<compile_context>
chip_gen: v5e
topology: v5e:2x2
jax: 0.10.0
libtpu: 0.0.40
codegen_flags: <defaults>
</compile_context>

<pallas_src>
import functools
import math

import jax
import jax.numpy as jnp
from jax.experimental import pallas as pl
from jax.experimental.pallas import tpu as pltpu

LANE = 128                      # channel axes padded to a multiple of the lane width
BN_EPS = 1e-3
DW_VMEM_LIMIT = 48 * 1024 * 1024   # scoped-VMEM headroom for the depthwise call
                                   # (fits under v7x's 64 MiB physical VMEM)


# ----------------------------- small helpers -----------------------------

def _round_up(n, m):
    return (n + m - 1) // m * m


def _pad_axis(x, axis, new_size):
    if x.shape[axis] == new_size:
        return x
    pad = [(0, 0)] * x.ndim
    pad[axis] = (0, new_size - x.shape[axis])
    return jnp.pad(x, pad)


# ----------------------- 1x1 expand conv (+BN+SiLU) -----------------------

def _mm_shift_silu_kernel(a_ref, w_ref, shift_ref, o_ref):
    # bf16 operands -> MXU with f32 accumulation; f32 epilogue; bf16 store.
    acc = jnp.dot(a_ref[...], w_ref[...], preferred_element_type=jnp.float32)
    y = acc + shift_ref[...]
    o_ref[...] = (y * jax.nn.sigmoid(y)).astype(o_ref.dtype)


def matmul_shift_silu(a, w_bf16, shift, tile_m=512):
    """SiLU((a @ w) + shift), row-tiled (tile_m=512) so DMA overlaps MXU work
    and the M axis can shard across TensorCores. a is bf16; output is bf16."""
    M, K = a.shape
    N = w_bf16.shape[1]
    tm = min(tile_m, _round_up(M, 8))
    Mp = _round_up(M, tm)
    a_p = _pad_axis(a, 0, Mp)
    out = pl.pallas_call(
        _mm_shift_silu_kernel,
        out_shape=jax.ShapeDtypeStruct((Mp, N), jnp.bfloat16),
        grid=(Mp // tm,),
        in_specs=[
            pl.BlockSpec((tm, K), lambda i: (i, 0)),
            pl.BlockSpec((K, N), lambda i: (0, 0)),
            pl.BlockSpec((1, N), lambda i: (0, 0)),
        ],
        out_specs=pl.BlockSpec((tm, N), lambda i: (i, 0)),
        compiler_params=pltpu.CompilerParams(dimension_semantics=("parallel",)),
    )(a_p, w_bf16, shift.reshape(1, N))
    return out if Mp == M else out[:M]


# --------------------- depthwise conv (+BN+SiLU) + fused GAP ---------------------

def _dw_row_chunk(ho, wo, c):
    # Keep the f32 accumulator (<= ~32 vregs = 128 KiB) in registers.
    budget = 128 * 1024
    return max(1, min(ho, budget // max(1, wo * c * 4)))


def _dw_s1_kernel(x_ref, w_ref, shift_ref, o_ref, gap_ref, xp_ref, *, k, row_chunk):
    """Stride-1 depthwise conv + folded-BN shift + SiLU + fused GAP, one batch.

    x_ref : (1, H, W, C) bf16;  w_ref : (k, k, C) f32;  shift_ref : (1, 1, C) f32
    o_ref : (1, H, W, C) bf16;  gap_ref : (1, 1, C) f32 (spatial mean of SiLU out)
    xp_ref: VMEM (H+2p, W+2p, C) bf16 scratch — in-kernel 'same' padding
            (replaces the old XLA pad pass over the largest tensor).
    """
    H, W, C = o_ref.shape[1], o_ref.shape[2], o_ref.shape[3]
    p = (k - 1) // 2
    xp_ref[...] = jnp.zeros(xp_ref.shape, xp_ref.dtype)
    xp_ref[p:p + H, p:p + W, :] = x_ref[0]

    w = w_ref[...]                                   # hoisted single weight load
    shift = shift_ref[...]                           # (1, 1, C)
    taps = [[w[kh, kw].reshape(1, 1, C) for kw in range(k)] for kh in range(k)]

    gap = jnp.zeros((1, C), jnp.float32)
    for r0 in range(0, H, row_chunk):                # static unroll over row chunks
        rh = min(row_chunk, H - r0)
        acc = jnp.zeros((rh, W, C), jnp.float32)     # fits in vregs by construction
        for kw in range(k):
            # One sliced (W-shifted) load per kw, reused by every kh.
            xw = xp_ref[r0:r0 + rh + k - 1, kw:kw + W, :].astype(jnp.float32)
            for kh in range(k):
                acc = acc + xw[kh:kh + rh] * taps[kh][kw]
        y = acc + shift
        y = y * jax.nn.sigmoid(y)
        o_ref[0, r0:r0 + rh, :, :] = y.astype(o_ref.dtype)
        gap = gap + jnp.sum(y, axis=(0, 1)).reshape(1, C)
    gap_ref[...] = (gap * (1.0 / (H * W))).reshape(1, 1, C)


def _dw_s2_kernel(x_ref, w_ref, shift_ref, o_ref, gap_ref, *, k, stride):
    """Strided depthwise conv + BN shift + SiLU + fused GAP for one batch element.
    x_ref: (stride*stride, 1, Hh, Wh, C) phase-decomposed padded input (bf16);
           phase p = (kh % stride)*stride + (kw % stride).
    """
    Ho, Wo, C = o_ref.shape[1], o_ref.shape[2], o_ref.shape[3]
    w = w_ref[...]
    shift = shift_ref[...]
    taps = [[w[kh, kw].reshape(1, 1, C) for kw in range(k)] for kh in range(k)]

    acc = jnp.zeros((Ho, Wo, C), jnp.float32)
    for kw in range(k):
        pw, cw = kw % stride, kw // stride
        for ph in range(stride):
            # One load per (kw, row-phase), reused by every kh of that phase.
            xw = x_ref[ph * stride + pw, 0, :, cw:cw + Wo, :].astype(jnp.float32)
            for kh in range(ph, k, stride):
                rh = kh // stride
                acc = acc + xw[rh:rh + Ho] * taps[kh][kw]
    y = acc + shift
    y = y * jax.nn.sigmoid(y)
    o_ref[0] = y.astype(o_ref.dtype)
    gap_ref[...] = (jnp.sum(y, axis=(0, 1)) * (1.0 / (Ho * Wo))).reshape(1, 1, C)


def depthwise_bn_silu(x, w_folded, shift, stride):
    """x: (B, H, W, C) bf16 NHWC (C lane-padded). 'same' padding, given stride.
    Returns (out bf16 (B,Ho,Wo,C), gap_mean f32 (B,C))."""
    B, H, W, C = x.shape
    k = w_folded.shape[0]
    p = (k - 1) // 2
    shift3 = shift.reshape(1, 1, C)
    cparams = pltpu.CompilerParams(dimension_semantics=("parallel",),
                                   vmem_limit_bytes=DW_VMEM_LIMIT)

    if stride == 1:
        Ho, Wo = H, W
        out, gap = pl.pallas_call(
            functools.partial(_dw_s1_kernel, k=k,
                              row_chunk=_dw_row_chunk(Ho, Wo, C)),
            out_shape=(jax.ShapeDtypeStruct((B, Ho, Wo, C), jnp.bfloat16),
                       jax.ShapeDtypeStruct((B, 1, C), jnp.float32)),
            grid=(B,),
            in_specs=[
                pl.BlockSpec((1, H, W, C), lambda b: (b, 0, 0, 0)),
                pl.BlockSpec((k, k, C), lambda b: (0, 0, 0)),
                pl.BlockSpec((1, 1, C), lambda b: (0, 0, 0)),
            ],
            out_specs=(pl.BlockSpec((1, Ho, Wo, C), lambda b: (b, 0, 0, 0)),
                       pl.BlockSpec((1, 1, C), lambda b: (b, 0, 0))),
            scratch_shapes=[pltpu.VMEM((H + 2 * p, W + 2 * p, C), x.dtype)],
            compiler_params=cparams,
        )(x, w_folded, shift3)
    else:
        # TODO(synk): stride>1 still uses one XLA pad + space-to-depth prep pass;
        # doing the phase split in-kernel needs strided sublane loads and is left out.
        xp = jnp.pad(x, ((0, 0), (p, p), (p, p), (0, 0)))
        Ho = (H + 2 * p - k) // stride + 1
        Wo = (W + 2 * p - k) // stride + 1
        Hp = _round_up(H + 2 * p, stride)
        Wp = _round_up(W + 2 * p, stride)
        xp = _pad_axis(_pad_axis(xp, 1, Hp), 2, Wp)
        Hh, Wh = Hp // stride, Wp // stride
        xph = xp.reshape(B, Hh, stride, Wh, stride, C)
        xph = xph.transpose(2, 4, 0, 1, 3, 5).reshape(stride * stride, B, Hh, Wh, C)
        out, gap = pl.pallas_call(
            functools.partial(_dw_s2_kernel, k=k, stride=stride),
            out_shape=(jax.ShapeDtypeStruct((B, Ho, Wo, C), jnp.bfloat16),
                       jax.ShapeDtypeStruct((B, 1, C), jnp.float32)),
            grid=(B,),
            in_specs=[
                pl.BlockSpec((stride * stride, 1, Hh, Wh, C),
                             lambda b: (0, b, 0, 0, 0)),
                pl.BlockSpec((k, k, C), lambda b: (0, 0, 0)),
                pl.BlockSpec((1, 1, C), lambda b: (0, 0, 0)),
            ],
            out_specs=(pl.BlockSpec((1, Ho, Wo, C), lambda b: (b, 0, 0, 0)),
                       pl.BlockSpec((1, 1, C), lambda b: (b, 0, 0))),
            compiler_params=cparams,
        )(xph, w_folded, shift3)
    return out, gap.reshape(B, C)


# --------------------- Squeeze-Excitation (FCs only; GAP fused upstream) ---------------------

def _se_kernel(g_ref, w1_ref, b1_ref, w2_ref, b2_ref, o_ref):
    h = jnp.dot(g_ref[...].astype(jnp.bfloat16), w1_ref[...],
                preferred_element_type=jnp.float32) + b1_ref[...]
    h = h * jax.nn.sigmoid(h)                                   # SiLU
    s = jnp.dot(h.astype(jnp.bfloat16), w2_ref[...],
                preferred_element_type=jnp.float32) + b2_ref[...]
    o_ref[...] = jax.nn.sigmoid(s)


def squeeze_excitation(gap_mean, w1_bf16, b1, w2_bf16, b2):
    """gap_mean: (B, Cexp) f32, produced by the depthwise kernel (no second pass
    over the expanded activation). Returns the SE gate of shape (B, Cexp)."""
    B, C = gap_mean.shape
    sq = w1_bf16.shape[1]
    Bp = _round_up(B, 8)
    g = _pad_axis(gap_mean, 0, Bp)
    gate = pl.pallas_call(
        _se_kernel,
        out_shape=jax.ShapeDtypeStruct((Bp, C), jnp.float32),
        grid=(1,),
        in_specs=[
            pl.BlockSpec((Bp, C), lambda i: (0, 0)),
            pl.BlockSpec((C, sq), lambda i: (0, 0)),
            pl.BlockSpec((1, sq), lambda i: (0, 0)),
            pl.BlockSpec((sq, C), lambda i: (0, 0)),
            pl.BlockSpec((1, C), lambda i: (0, 0)),
        ],
        out_specs=pl.BlockSpec((Bp, C), lambda i: (0, 0)),
    )(g, w1_bf16, b1.reshape(1, sq), w2_bf16, b2.reshape(1, C))
    return gate[:B]


# ----------- projection 1x1 conv with fused SE scale (+ residual) -----------

def _proj_kernel(x_ref, s_ref, w_ref, shift_ref, o_ref):
    a = (x_ref[0].astype(jnp.float32) * s_ref[0]).astype(jnp.bfloat16)
    acc = jnp.dot(a, w_ref[...], preferred_element_type=jnp.float32)
    o_ref[0] = (acc + shift_ref[...]).astype(o_ref.dtype)


def _proj_res_kernel(x_ref, s_ref, w_ref, shift_ref, res_ref, o_ref):
    a = (x_ref[0].astype(jnp.float32) * s_ref[0]).astype(jnp.bfloat16)
    acc = jnp.dot(a, w_ref[...], preferred_element_type=jnp.float32)
    # fused residual add (DropPath is identity in eval mode)
    o_ref[0] = (acc + shift_ref[...] + res_ref[0].astype(jnp.float32)).astype(o_ref.dtype)


def project_se_residual(x, s, w_bf16, shift, residual=None, tile_m=1024):
    """(SE gate * x) @ W_proj + BN shift (+ residual), one fused kernel.
    x / residual are bf16; output is bf16."""
    B, Ho, Wo, Cexp = x.shape
    Cout = w_bf16.shape[1]
    hw = Ho * Wo
    t = min(tile_m, _round_up(hw, 8))
    hw_p = _round_up(hw, t)
    x3 = _pad_axis(x.reshape(B, hw, Cexp), 1, hw_p)
    if s is None:
        s = jnp.ones((B, Cexp), jnp.float32)
    s3 = s.reshape(B, 1, Cexp)

    in_specs = [
        pl.BlockSpec((1, t, Cexp), lambda b, i: (b, i, 0)),
        pl.BlockSpec((1, 1, Cexp), lambda b, i: (b, 0, 0)),
        pl.BlockSpec((Cexp, Cout), lambda b, i: (0, 0)),
        pl.BlockSpec((1, Cout), lambda b, i: (0, 0)),
    ]
    args = [x3, s3, w_bf16, shift.reshape(1, Cout)]
    kernel = _proj_kernel
    if residual is not None:
        in_specs.append(pl.BlockSpec((1, t, Cout), lambda b, i: (b, i, 0)))
        args.append(_pad_axis(residual.reshape(B, hw, Cout), 1, hw_p))
        kernel = _proj_res_kernel

    out = pl.pallas_call(
        kernel,
        out_shape=jax.ShapeDtypeStruct((B, hw_p, Cout), jnp.bfloat16),
        grid=(B, hw_p // t),
        in_specs=in_specs,
        out_specs=pl.BlockSpec((1, t, Cout), lambda b, i: (b, i, 0)),
        compiler_params=pltpu.CompilerParams(
            dimension_semantics=("parallel", "parallel")),
    )(*args)
    return out[:, :hw].reshape(B, Ho, Wo, Cout)


# ----------------------------- parameters -----------------------------

def _kaiming(key, shape, fan_out):
    return jax.random.normal(key, shape, jnp.float32) * math.sqrt(2.0 / fan_out)


def make_block_params(key, *, in_c, out_c, kernel_size, stride, expand_ratio,
                      use_se=True, drop_rate=0.2):
    """One InvertedResidual block; channel axes zero-padded to LANE multiples.
    Eval-mode BN (mean=0, var=1, gamma=1, beta=0) is folded into the weights,
    so all pad channels stay exactly zero through the block."""
    exp_c = in_c * expand_ratio
    sq_c = in_c // 4                       # SqueezeExcitation uses block in_channels
    in_p, exp_p, out_p, sq_p = (_round_up(c, LANE)
                                for c in (in_c, exp_c, out_c, sq_c))
    bn_scale, bn_shift = 1.0 / math.sqrt(1.0 + BN_EPS), 0.0
    keys = jax.random.split(key, 5)

    prm = {"cfg": dict(in_c=in_c, out_c=out_c, exp_c=exp_c, k=kernel_size,
                       stride=stride, use_se=use_se, drop_rate=drop_rate,
                       in_p=in_p, exp_p=exp_p, out_p=out_p)}

    if exp_c != in_c:
        w = _kaiming(keys[0], (in_c, exp_c), fan_out=exp_c) * bn_scale
        prm["expand_w"] = _pad_axis(_pad_axis(w, 0, in_p), 1, exp_p).astype(jnp.bfloat16)
        prm["expand_shift"] = jnp.full((exp_p,), bn_shift, jnp.float32)

    wd = _kaiming(keys[1], (kernel_size, kernel_size, exp_c),
                  fan_out=kernel_size * kernel_size) * bn_scale
    prm["dw_w"] = _pad_axis(wd, 2, exp_p)            # f32: depthwise runs on the VPU
    prm["dw_shift"] = jnp.full((exp_p,), bn_shift, jnp.float32)

    if use_se:
        w1 = _kaiming(keys[2], (exp_c, sq_c), fan_out=sq_c)
        w2 = _kaiming(keys[3], (sq_c, exp_c), fan_out=exp_c)
        prm["se_w1"] = _pad_axis(_pad_axis(w1, 0, exp_p), 1, sq_p).astype(jnp.bfloat16)
        prm["se_b1"] = jnp.zeros((sq_p,), jnp.float32)
        prm["se_w2"] = _pad_axis(_pad_axis(w2, 0, sq_p), 1, exp_p).astype(jnp.bfloat16)
        prm["se_b2"] = jnp.zeros((exp_p,), jnp.float32)

    wp = _kaiming(keys[4], (exp_c, out_c), fan_out=out_c) * bn_scale
    prm["proj_w"] = _pad_axis(_pad_axis(wp, 0, exp_p), 1, out_p).astype(jnp.bfloat16)
    prm["proj_shift"] = jnp.full((out_p,), bn_shift, jnp.float32)
    return prm


# ----------------------------- forward pass -----------------------------

def inverted_residual(params, x):
    """One InvertedResidual (MBConv) block.
    x: (B, H, W, in_p) bf16 NHWC with lane-padded channels (pad channels zero).
    Returns (B, Ho, Wo, out_p) bf16."""
    cfg = params["cfg"]
    use_res = cfg["stride"] == 1 and cfg["in_c"] == cfg["out_c"]
    B, H, W, _ = x.shape

    h = x
    if "expand_w" in params:                               # 1x1 expand conv + BN + SiLU
        h = matmul_shift_silu(h.reshape(B * H * W, cfg["in_p"]),
                              params["expand_w"], params["expand_shift"])
        h = h.reshape(B, H, W, cfg["exp_p"])

    h, gap = depthwise_bn_silu(h, params["dw_w"], params["dw_shift"], cfg["stride"])

    s = None
    if cfg["use_se"]:
        s = squeeze_excitation(gap, params["se_w1"], params["se_b1"],
                               params["se_w2"], params["se_b2"])

    res = x if use_res else None
    # TODO(synk): DropPath (stochastic depth) / Dropout are identity in eval mode;
    # the training-mode per-sample drop is not implemented.
    return project_se_residual(h, s, params["proj_w"], params["proj_shift"],
                               residual=res)


if __name__ == "__main__":
    key = jax.random.PRNGKey(0)
    kb1, kb2, kx = jax.random.split(key, 3)

    B, C_IN, H, W = 2, 16, 16, 16
    # Two representative InvertedResidualConfig settings:
    #   block 1: k=3, stride=1, expand=6, in==out -> exercises the residual path
    #   block 2: k=5, stride=2, expand=6, 16->24  -> exercises the strided path
    blk1 = make_block_params(kb1, in_c=C_IN, out_c=C_IN, kernel_size=3,
                             stride=1, expand_ratio=6)
    blk2 = make_block_params(kb2, in_c=C_IN, out_c=24, kernel_size=5,
                             stride=2, expand_ratio=6)

    x_nchw = jax.random.normal(kx, (B, C_IN, H, W), jnp.float32)   # PyTorch-style NCHW

    @jax.jit
    def forward(x_nchw):
        x = jnp.transpose(x_nchw, (0, 2, 3, 1))                    # NCHW -> NHWC
        x = _pad_axis(x, 3, _round_up(C_IN, LANE)).astype(jnp.bfloat16)
        y = inverted_residual(blk1, x)
        y = inverted_residual(blk2, y)
        return y[..., :blk2["cfg"]["out_c"]].astype(jnp.float32)   # strip lane padding

    out = jax.block_until_ready(forward(x_nchw))
    assert out.shape == (B, 8, 8, 24), out.shape
    assert bool(jnp.all(jnp.isfinite(out)))
    print("KERNEL_OK")
</pallas_src>

<mosaic_0001>
module attributes {stable_mosaic.version = 11 : i64} {
  func.func @_mm_shift_silu_kernel(%arg0: i32, %arg1: memref<512x128xbf16, #tpu.memory_space<vmem>>, %arg2: memref<128x128xbf16, #tpu.memory_space<vmem>>, %arg3: memref<1x128xf32, #tpu.memory_space<vmem>>, %arg4: memref<512x128xbf16, #tpu.memory_space<vmem>>) attributes {dimension_semantics = [#tpu.dimension_semantics<parallel>], iteration_bounds = array<i64: 1>, scalar_prefetch = 0 : i64, scratch_operands = 0 : i64, tpu.core_type = #tpu.core_type<tc>, window_params = [{transform_indices = @transform_0, window_bounds = array<i64: 512, 128>}, {pipeline_mode = #tpu.pipeline_mode<synchronous>, transform_indices = @transform_1, window_bounds = array<i64: 128, 128>}, {pipeline_mode = #tpu.pipeline_mode<synchronous>, transform_indices = @transform_2, window_bounds = array<i64: 1, 128>}, {transform_indices = @transform_3, window_bounds = array<i64: 512, 128>}]} {
    %c0 = arith.constant 0 : index
    %c0_0 = arith.constant 0 : index
    %0 = vector.load %arg1[%c0, %c0_0] : memref<512x128xbf16, #tpu.memory_space<vmem>>, vector<512x128xbf16>
    %c0_1 = arith.constant 0 : index
    %c0_2 = arith.constant 0 : index
    %1 = vector.load %arg2[%c0_1, %c0_2] : memref<128x128xbf16, #tpu.memory_space<vmem>>, vector<128x128xbf16>
    %cst = arith.constant dense<0.000000e+00> : vector<512x128xf32>
    %2 = tpu.matmul %0, %1, %cst {dimension_numbers = #tpu.dot_dimension_numbers<[1], [0], [0], [1], [0, 0, 1, 1], [], []>} : vector<512x128xbf16>, vector<128x128xbf16>, vector<512x128xf32> -> vector<512x128xf32>
    %c0_3 = arith.constant 0 : index
    %c0_4 = arith.constant 0 : index
    %3 = vector.load %arg3[%c0_3, %c0_4] : memref<1x128xf32, #tpu.memory_space<vmem>>, vector<1x128xf32>
    %4 = vector.broadcast %3 : vector<1x128xf32> to vector<512x128xf32>
    %5 = arith.addf %2, %4 : vector<512x128xf32>
    %6 = arith.negf %5 : vector<512x128xf32>
    %7 = math.exp %6 : vector<512x128xf32>
    %cst_5 = arith.constant 1.000000e+00 : f32
    %8 = vector.broadcast %cst_5 : f32 to vector<512x128xf32>
    %9 = arith.addf %8, %7 : vector<512x128xf32>
    %10 = arith.divf %8, %9 : vector<512x128xf32>
    %11 = arith.mulf %5, %10 : vector<512x128xf32>
    %12 = arith.truncf %11 : vector<512x128xf32> to vector<512x128xbf16>
    %c0_6 = arith.constant 0 : index
    %c0_7 = arith.constant 0 : index
    %13 = vector.load %arg4[%c0_6, %c0_7] : memref<512x128xbf16, #tpu.memory_space<vmem>>, vector<512x128xbf16>
    tpu.vector_store %arg4[%c0_6, %c0_7], %12 {strides = array<i32>} : memref<512x128xbf16, #tpu.memory_space<vmem>>, vector<512x128xbf16>,
    return
  }
  func.func @transform_0(%arg0: i32) -> (i32, i32) {
    %c0_i32 = arith.constant 0 : i32
    %c0_i32_0 = arith.constant 0 : i32
    return %arg0, %c0_i32 : i32, i32
  }
  func.func @transform_1(%arg0: i32) -> (i32, i32) {
    %c0_i32 = arith.constant 0 : i32
    %c0_i32_0 = arith.constant 0 : i32
    %c0_i32_1 = arith.constant 0 : i32
    return %c0_i32, %c0_i32_0 : i32, i32
  }
  func.func @transform_2(%arg0: i32) -> (i32, i32) {
    %c0_i32 = arith.constant 0 : i32
    %c0_i32_0 = arith.constant 0 : i32
    %c0_i32_1 = arith.constant 0 : i32
    return %c0_i32, %c0_i32_0 : i32, i32
  }
  func.func @transform_3(%arg0: i32) -> (i32, i32) {
    %c0_i32 = arith.constant 0 : i32
    %c0_i32_0 = arith.constant 0 : i32
    return %arg0, %c0_i32 : i32, i32
  }
}

module attributes {stable_mosaic.version = 11 : i64} {
  func.func @_se_kernel(%arg0: i32, %arg1: memref<8x128xf32, #tpu.memory_space<vmem>>, %arg2: memref<128x128xbf16, #tpu.memory_space<vmem>>, %arg3: memref<1x128xf32, #tpu.memory_space<vmem>>, %arg4: memref<128x128xbf16, #tpu.memory_space<vmem>>, %arg5: memref<1x128xf32, #tpu.memory_space<vmem>>, %arg6: memref<8x128xf32, #tpu.memory_space<vmem>>) attributes {dimension_semantics = [#tpu.dimension_semantics<arbitrary>], iteration_bounds = array<i64: 1>, scalar_prefetch = 0 : i64, scratch_operands = 0 : i64, tpu.core_type = #tpu.core_type<tc>, window_params = [{pipeline_mode = #tpu.pipeline_mode<synchronous>, transform_indices = @transform_0, window_bounds = array<i64: 8, 128>}, {pipeline_mode = #tpu.pipeline_mode<synchronous>, transform_indices = @transform_1, window_bounds = array<i64: 128, 128>}, {pipeline_mode = #tpu.pipeline_mode<synchronous>, transform_indices = @transform_2, window_bounds = array<i64: 1, 128>}, {pipeline_mode = #tpu.pipeline_mode<synchronous>, transform_indices = @transform_3, window_bounds = array<i64: 128, 128>}, {pipeline_mode = #tpu.pipeline_mode<synchronous>, transform_indices = @transform_4, window_bounds = array<i64: 1, 128>}, {pipeline_mode = #tpu.pipeline_mode<synchronous>, transform_indices = @transform_5, window_bounds = array<i64: 8, 128>}]} {
    %c0 = arith.constant 0 : index
    %c0_0 = arith.constant 0 : index
    %0 = vector.load %arg1[%c0, %c0_0] : memref<8x128xf32, #tpu.memory_space<vmem>>, vector<8x128xf32>
    %1 = arith.truncf %0 : vector<8x128xf32> to vector<8x128xbf16>
    %c0_1 = arith.constant 0 : index
    %c0_2 = arith.constant 0 : index
    %2 = vector.load %arg2[%c0_1, %c0_2] : memref<128x128xbf16, #tpu.memory_space<vmem>>, vector<128x128xbf16>
    %cst = arith.constant dense<0.000000e+00> : vector<8x128xf32>
    %3 = tpu.matmul %1, %2, %cst {dimension_numbers = #tpu.dot_dimension_numbers<[1], [0], [0], [1], [0, 0, 1, 1], [], []>} : vector<8x128xbf16>, vector<128x128xbf16>, vector<8x128xf32> -> vector<8x128xf32>
    %c0_3 = arith.constant 0 : index
    %c0_4 = arith.constant 0 : index
    %4 = vector.load %arg3[%c0_3, %c0_4] : memref<1x128xf32, #tpu.memory_space<vmem>>, vector<1x128xf32>
    %5 = vector.broadcast %4 : vector<1x128xf32> to vector<8x128xf32>
    %6 = arith.addf %3, %5 : vector<8x128xf32>
    %7 = arith.negf %6 : vector<8x128xf32>
    %8 = math.exp %7 : vector<8x128xf32>
    %cst_5 = arith.constant 1.000000e+00 : f32
    %9 = vector.broadcast %cst_5 : f32 to vector<8x128xf32>
    %10 = arith.addf %9, %8 : vector<8x128xf32>
    %11 = arith.divf %9, %10 : vector<8x128xf32>
    %12 = arith.mulf %6, %11 : vector<8x128xf32>
    %13 = arith.truncf %12 : vector<8x128xf32> to vector<8x128xbf16>
    %c0_6 = arith.constant 0 : index
    %c0_7 = arith.constant 0 : index
    %14 = vector.load %arg4[%c0_6, %c0_7] : memref<128x128xbf16, #tpu.memory_space<vmem>>, vector<128x128xbf16>
    %cst_8 = arith.constant dense<0.000000e+00> : vector<8x128xf32>
    %15 = tpu.matmul %13, %14, %cst_8 {dimension_numbers = #tpu.dot_dimension_numbers<[1], [0], [0], [1], [0, 0, 1, 1], [], []>} : vector<8x128xbf16>, vector<128x128xbf16>, vector<8x128xf32> -> vector<8x128xf32>
    %c0_9 = arith.constant 0 : index
    %c0_10 = arith.constant 0 : index
    %16 = vector.load %arg5[%c0_9, %c0_10] : memref<1x128xf32, #tpu.memory_space<vmem>>, vector<1x128xf32>
    %17 = vector.broadcast %16 : vector<1x128xf32> to vector<8x128xf32>
    %18 = arith.addf %15, %17 : vector<8x128xf32>
    %19 = arith.negf %18 : vector<8x128xf32>
    %20 = math.exp %19 : vector<8x128xf32>
    %cst_11 = arith.constant 1.000000e+00 : f32
    %21 = vector.broadcast %cst_11 : f32 to vector<8x128xf32>
    %22 = arith.addf %21, %20 : vector<8x128xf32>
    %23 = arith.divf %21, %22 : vector<8x128xf32>
    %c0_12 = arith.constant 0 : index
    %c0_13 = arith.constant 0 : index
    %24 = vector.load %arg6[%c0_12, %c0_13] : memref<8x128xf32, #tpu.memory_space<vmem>>, vector<8x128xf32>
    tpu.vector_store %arg6[%c0_12, %c0_13], %23 {strides = array<i32>} : memref<8x128xf32, #tpu.memory_space<vmem>>, vector<8x128xf32>,
    return
  }
  func.func @transform_0(%arg0: i32) -> (i32, i32) {
    %c0_i32 = arith.constant 0 : i32
    %c0_i32_0 = arith.constant 0 : i32
    %c0_i32_1 = arith.constant 0 : i32
    return %c0_i32, %c0_i32_0 : i32, i32
  }
  func.func @transform_1(%arg0: i32) -> (i32, i32) {
    %c0_i32 = arith.constant 0 : i32
    %c0_i32_0 = arith.constant 0 : i32
    %c0_i32_1 = arith.constant 0 : i32
    return %c0_i32, %c0_i32_0 : i32, i32
  }
  func.func @transform_2(%arg0: i32) -> (i32, i32) {
    %c0_i32 = arith.constant 0 : i32
    %c0_i32_0 = arith.constant 0 : i32
    %c0_i32_1 = arith.constant 0 : i32
    return %c0_i32, %c0_i32_0 : i32, i32
  }
  func.func @transform_3(%arg0: i32) -> (i32, i32) {
    %c0_i32 = arith.constant 0 : i32
    %c0_i32_0 = arith.constant 0 : i32
    %c0_i32_1 = arith.constant 0 : i32
    return %c0_i32, %c0_i32_0 : i32, i32
  }
  func.func @transform_4(%arg0: i32) -> (i32, i32) {
    %c0_i32 = arith.constant 0 : i32
    %c0_i32_0 = arith.constant 0 : i32
    %c0_i32_1 = arith.constant 0 : i32
    return %c0_i32, %c0_i32_0 : i32, i32
  }
  func.func @transform_5(%arg0: i32) -> (i32, i32) {
    %c0_i32 = arith.constant 0 : i32
    %c0_i32_0 = arith.constant 0 : i32
    %c0_i32_1 = arith.constant 0 : i32
    return %c0_i32, %c0_i32_0 : i32, i32
  }
}

module attributes {stable_mosaic.version = 11 : i64} {
  func.func @_dw_s1_kernel(%arg0: i32, %arg1: memref<1x16x16x128xbf16, #tpu.memory_space<vmem>>, %arg2: memref<3x3x128xf32, #tpu.memory_space<vmem>>, %arg3: memref<1x1x128xf32, #tpu.memory_space<vmem>>, %arg4: memref<1x16x16x128xbf16, #tpu.memory_space<vmem>>, %arg5: memref<1x1x128xf32, #tpu.memory_space<vmem>>, %arg6: memref<18x18x128xbf16, #tpu.memory_space<vmem>>) attributes {dimension_semantics = [#tpu.dimension_semantics<parallel>], iteration_bounds = array<i64: 2>, scalar_prefetch = 0 : i64, scratch_operands = 1 : i64, tpu.core_type = #tpu.core_type<tc>, window_params = [{transform_indices = @transform_0, window_bounds = array<i64: 1, 16, 16, 128>}, {pipeline_mode = #tpu.pipeline_mode<synchronous>, transform_indices = @transform_1, window_bounds = array<i64: 3, 3, 128>}, {pipeline_mode = #tpu.pipeline_mode<synchronous>, transform_indices = @transform_2, window_bounds = array<i64: 1, 1, 128>}, {transform_indices = @transform_3, window_bounds = array<i64: 1, 16, 16, 128>}, {transform_indices = @transform_4, window_bounds = array<i64: 1, 1, 128>}]} {
    %cst = arith.constant 0.000000e+00 : bf16
    %0 = vector.broadcast %cst : bf16 to vector<18x18x128xbf16>
    %c0 = arith.constant 0 : index
    %c0_0 = arith.constant 0 : index
    %c0_1 = arith.constant 0 : index
    %1 = vector.load %arg6[%c0, %c0_0, %c0_1] : memref<18x18x128xbf16, #tpu.memory_space<vmem>>, vector<18x18x128xbf16>
    tpu.vector_store %arg6[%c0, %c0_0, %c0_1], %0 {strides = array<i32>} : memref<18x18x128xbf16, #tpu.memory_space<vmem>>, vector<18x18x128xbf16>,
    %c0_2 = arith.constant 0 : index
    %c0_3 = arith.constant 0 : index
    %c0_4 = arith.constant 0 : index
    %c0_5 = arith.constant 0 : index
    %2 = vector.load %arg1[%c0_2, %c0_3, %c0_4, %c0_5] : memref<1x16x16x128xbf16, #tpu.memory_space<vmem>>, vector<1x16x16x128xbf16>
    %3 = vector.shape_cast %2 : vector<1x16x16x128xbf16> to vector<16x16x128xbf16>
    %c1 = arith.constant 1 : index
    %c1_6 = arith.constant 1 : index
    %c0_7 = arith.constant 0 : index
    %4 = vector.load %arg6[%c1, %c1_6, %c0_7] : memref<18x18x128xbf16, #tpu.memory_space<vmem>>, vector<16x16x128xbf16>
    tpu.vector_store %arg6[%c1, %c1_6, %c0_7], %3 {strides = array<i32>} : memref<18x18x128xbf16, #tpu.memory_space<vmem>>, vector<16x16x128xbf16>,
    %c0_8 = arith.constant 0 : index
    %c0_9 = arith.constant 0 : index
    %c0_10 = arith.constant 0 : index
    %5 = vector.load %arg2[%c0_8, %c0_9, %c0_10] : memref<3x3x128xf32, #tpu.memory_space<vmem>>, vector<3x3x128xf32>
    %c0_11 = arith.constant 0 : index
    %c0_12 = arith.constant 0 : index
    %c0_13 = arith.constant 0 : index
    %6 = vector.load %arg3[%c0_11, %c0_12, %c0_13] : memref<1x1x128xf32, #tpu.memory_space<vmem>>, vector<1x1x128xf32>
    %7 = vector.extract_strided_slice %5 {offsets = [0, 0, 0], sizes = [1, 1, 128], strides = [1, 1, 1]} : vector<3x3x128xf32> to vector<1x1x128xf32>
    %8 = vector.shape_cast %7 : vector<1x1x128xf32> to vector<128xf32>
    %9 = vector.shape_cast %8 : vector<128xf32> to vector<1x1x128xf32>
    %10 = vector.extract_strided_slice %5 {offsets = [0, 1, 0], sizes = [1, 1, 128], strides = [1, 1, 1]} : vector<3x3x128xf32> to vector<1x1x128xf32>
    %11 = vector.shape_cast %10 : vector<1x1x128xf32> to vector<128xf32>
    %12 = vector.shape_cast %11 : vector<128xf32> to vector<1x1x128xf32>
    %13 = vector.extract_strided_slice %5 {offsets = [0, 2, 0], sizes = [1, 1, 128], strides = [1, 1, 1]} : vector<3x3x128xf32> to vector<1x1x128xf32>
    %14 = vector.shape_cast %13 : vector<1x1x128xf32> to vector<128xf32>
    %15 = vector.shape_cast %14 : vector<128xf32> to vector<1x1x128xf32>
    %16 = vector.extract_strided_slice %5 {offsets = [1, 0, 0], sizes = [1, 1, 128], strides = [1, 1, 1]} : vector<3x3x128xf32> to vector<1x1x128xf32>
    %17 = vector.shape_cast %16 : vector<1x1x128xf32> to vector<128xf32>
    %18 = vector.shape_cast %17 : vector<128xf32> to vector<1x1x128xf32>
    %19 = vector.extract_strided_slice %5 {offsets = [1, 1, 0], sizes = [1, 1, 128], strides = [1, 1, 1]} : vector<3x3x128xf32> to vector<1x1x128xf32>
    %20 = vector.shape_cast %19 : vector<1x1x128xf32> to vector<128xf32>
    %21 = vector.shape_cast %20 : vector<128xf32> to vector<1x1x128xf32>
    %22 = vector.extract_strided_slice %5 {offsets = [1, 2, 0], sizes = [1, 1, 128], strides = [1, 1, 1]} : vector<3x3x128xf32> to vector<1x1x128xf32>
    %23 = vector.shape_cast %22 : vector<1x1x128xf32> to vector<128xf32>
    %24 = vector.shape_cast %23 : vector<128xf32> to vector<1x1x128xf32>
    %25 = vector.extract_strided_slice %5 {offsets = [2, 0, 0], sizes = [1, 1, 128], strides = [1, 1, 1]} : vector<3x3x128xf32> to vector<1x1x128xf32>
    %26 = vector.shape_cast %25 : vector<1x1x128xf32> to vector<128xf32>
    %27 = vector.shape_cast %26 : vector<128xf32> to vector<1x1x128xf32>
    %28 = vector.extract_strided_slice %5 {offsets = [2, 1, 0], sizes = [1, 1, 128], strides = [1, 1, 1]} : vector<3x3x128xf32> to vector<1x1x128xf32>
    %29 = vector.shape_cast %28 : vector<1x1x128xf32> to vector<128xf32>
    %30 = vector.shape_cast %29 : vector<128xf32> to vector<1x1x128xf32>
    %31 = vector.extract_strided_slice %5 {offsets = [2, 2, 0], sizes = [1, 1, 128], strides = [1, 1, 1]} : vector<3x3x128xf32> to vector<1x1x128xf32>
    %32 = vector.shape_cast %31 : vector<1x1x128xf32> to vector<128xf32>
    %33 = vector.shape_cast %32 : vector<128xf32> to vector<1x1x128xf32>
    %cst_14 = arith.constant 0.000000e+00 : f32
    %34 = vector.broadcast %cst_14 : f32 to vector<1x128xf32>
    %cst_15 = arith.constant 0.000000e+00 : f32
    %35 = vector.broadcast %cst_15 : f32 to vector<16x16x128xf32>
    %c0_16 = arith.constant 0 : index
    %c0_17 = arith.constant 0 : index
    %c0_18 = arith.constant 0 : index
    %36 = vector.load %arg6[%c0_16, %c0_17, %c0_18] : memref<18x18x128xbf16, #tpu.memory_space<vmem>>, vector<18x16x128xbf16>
    %37 = arith.extf %36 : vector<18x16x128xbf16> to vector<18x16x128xf32>
    %38 = vector.extract_strided_slice %37 {offsets = [0, 0, 0], sizes = [16, 16, 128], strides = [1, 1, 1]} : vector<18x16x128xf32> to vector<16x16x128xf32>
    %39 = vector.broadcast %9 : vector<1x1x128xf32> to vector<16x16x128xf32>
    %40 = arith.mulf %38, %39 : vector<16x16x128xf32>
    %41 = arith.addf %35, %40 : vector<16x16x128xf32>
    %42 = vector.extract_strided_slice %37 {offsets = [1, 0, 0], sizes = [16, 16, 128], strides = [1, 1, 1]} : vector<18x16x128xf32> to vector<16x16x128xf32>
    %43 = vector.broadcast %18 : vector<1x1x128xf32> to vector<16x16x128xf32>
    %44 = arith.mulf %42, %43 : vector<16x16x128xf32>
    %45 = arith.addf %41, %44 : vector<16x16x128xf32>
    %46 = vector.extract_strided_slice %37 {offsets = [2, 0, 0], sizes = [16, 16, 128], strides = [1, 1, 1]} : vector<18x16x128xf32> to vector<16x16x128xf32>
    %47 = vector.broadcast %27 : vector<1x1x128xf32> to vector<16x16x128xf32>
    %48 = arith.mulf %46, %47 : vector<16x16x128xf32>
    %49 = arith.addf %45, %48 : vector<16x16x128xf32>
    %c0_19 = arith.constant 0 : index
    %c1_20 = arith.constant 1 : index
    %c0_21 = arith.constant 0 : index
    %50 = vector.load %arg6[%c0_19, %c1_20, %c0_21] : memref<18x18x128xbf16, #tpu.memory_space<vmem>>, vector<18x16x128xbf16>
    %51 = arith.extf %50 : vector<18x16x128xbf16> to vector<18x16x128xf32>
    %52 = vector.extract_strided_slice %51 {offsets = [0, 0, 0], sizes = [16, 16, 128], strides = [1, 1, 1]} : vector<18x16x128xf32> to vector<16x16x128xf32>
    %53 = vector.broadcast %12 : vector<1x1x128xf32> to vector<16x16x128xf32>
    %54 = arith.mulf %52, %53 : vector<16x16x128xf32>
    %55 = arith.addf %49, %54 : vector<16x16x128xf32>
    %56 = vector.extract_strided_slice %51 {offsets = [1, 0, 0], sizes = [16, 16, 128], strides = [1, 1, 1]} : vector<18x16x128xf32> to vector<16x16x128xf32>
    %57 = vector.broadcast %21 : vector<1x1x128xf32> to vector<16x16x128xf32>
    %58 = arith.mulf %56, %57 : vector<16x16x128xf32>
    %59 = arith.addf %55, %58 : vector<16x16x128xf32>
    %60 = vector.extract_strided_slice %51 {offsets = [2, 0, 0], sizes = [16, 16, 128], strides = [1, 1, 1]} : vector<18x16x128xf32> to vector<16x16x128xf32>
    %61 = vector.broadcast %30 : vector<1x1x128xf32> to vector<16x16x128xf32>
    %62 = arith.mulf %60, %61 : vector<16x16x128xf32>
    %63 = arith.addf %59, %62 : vector<16x16x128xf32>
    %c0_22 = arith.constant 0 : index
    %c2 = arith.constant 2 : index
    %c0_23 = arith.constant 0 : index
    %64 = vector.load %arg6[%c0_22, %c2, %c0_23] : memref<18x18x128xbf16, #tpu.memory_space<vmem>>, vector<18x16x128xbf16>
    %65 = arith.extf %64 : vector<18x16x128xbf16> to vector<18x16x128xf32>
    %66 = vector.extract_strided_slice %65 {offsets = [0, 0, 0], sizes = [16, 16, 128], strides = [1, 1, 1]} : vector<18x16x128xf32> to vector<16x16x128xf32>
    %67 = vector.broadcast %15 : vector<1x1x128xf32> to vector<16x16x128xf32>
    %68 = arith.mulf %66, %67 : vector<16x16x128xf32>
    %69 = arith.addf %63, %68 : vector<16x16x128xf32>
    %70 = vector.extract_strided_slice %65 {offsets = [1, 0, 0], sizes = [16, 16, 128], strides = [1, 1, 1]} : vector<18x16x128xf32> to vector<16x16x128xf32>
    %71 = vector.broadcast %24 : vector<1x1x128xf32> to vector<16x16x128xf32>
    %72 = arith.mulf %70, %71 : vector<16x16x128xf32>
    %73 = arith.addf %69, %72 : vector<16x16x128xf32>
    %74 = vector.extract_strided_slice %65 {offsets = [2, 0, 0], sizes = [16, 16, 128], strides = [1, 1, 1]} : vector<18x16x128xf32> to vector<16x16x128xf32>
    %75 = vector.broadcast %33 : vector<1x1x128xf32> to vector<16x16x128xf32>
    %76 = arith.mulf %74, %75 : vector<16x16x128xf32>
    %77 = arith.addf %73, %76 : vector<16x16x128xf32>
    %78 = vector.broadcast %6 : vector<1x1x128xf32> to vector<16x16x128xf32>
    %79 = arith.addf %77, %78 : vector<16x16x128xf32>
    %80 = arith.negf %79 : vector<16x16x128xf32>
    %81 = math.exp %80 : vector<16x16x128xf32>
    %cst_24 = arith.constant 1.000000e+00 : f32
    %82 = vector.broadcast %cst_24 : f32 to vector<16x16x128xf32>
    %83 = arith.addf %82, %81 : vector<16x16x128xf32>
    %84 = arith.divf %82, %83 : vector<16x16x128xf32>
    %85 = arith.mulf %79, %84 : vector<16x16x128xf32>
    %86 = arith.truncf %85 : vector<16x16x128xf32> to vector<16x16x128xbf16>
    %c0_25 = arith.constant 0 : index
    %c0_26 = arith.constant 0 : index
    %c0_27 = arith.constant 0 : index
    %c0_28 = arith.constant 0 : index
    %87 = vector.load %arg4[%c0_25, %c0_26, %c0_27, %c0_28] : memref<1x16x16x128xbf16, #tpu.memory_space<vmem>>, vector<1x16x16x128xbf16>
    %88 = vector.shape_cast %87 : vector<1x16x16x128xbf16> to vector<16x16x128xbf16>
    %89 = vector.shape_cast %86 : vector<16x16x128xbf16> to vector<1x16x16x128xbf16>
    tpu.vector_store %arg4[%c0_25, %c0_26, %c0_27, %c0_28], %89 {strides = array<i32>} : memref<1x16x16x128xbf16, #tpu.memory_space<vmem>>, vector<1x16x16x128xbf16>,
    %cst_29 = arith.constant dense<0.000000e+00> : vector<128xf32>
    %90 = vector.multi_reduction <add>, %85, %cst_29 [0, 1] : vector<16x16x128xf32> to vector<128xf32>
    %91 = vector.shape_cast %90 : vector<128xf32> to vector<1x128xf32>
    %92 = arith.addf %34, %91 : vector<1x128xf32>
    %cst_30 = arith.constant 3.906250e-03 : f32
    %93 = vector.broadcast %cst_30 : f32 to vector<1x128xf32>
    %94 = arith.mulf %92, %93 : vector<1x128xf32>
    %95 = vector.shape_cast %94 : vector<1x128xf32> to vector<1x1x128xf32>
    %c0_31 = arith.constant 0 : index
    %c0_32 = arith.constant 0 : index
    %c0_33 = arith.constant 0 : index
    %96 = vector.load %arg5[%c0_31, %c0_32, %c0_33] : memref<1x1x128xf32, #tpu.memory_space<vmem>>, vector<1x1x128xf32>
    tpu.vector_store %arg5[%c0_31, %c0_32, %c0_33], %95 {strides = array<i32>} : memref<1x1x128xf32, #tpu.memory_space<vmem>>, vector<1x1x128xf32>,
    return
  }
  func.func @transform_0(%arg0: i32) -> (i32, i32, i32, i32) {
    %c0_i32 = arith.constant 0 : i32
    %c0_i32_0 = arith.constant 0 : i32
    %c0_i32_1 = arith.constant 0 : i32
    %c0_i32_2 = arith.constant 0 : i32
    return %arg0, %c0_i32, %c0_i32_0, %c0_i32_1 : i32, i32, i32, i32
  }
  func.func @transform_1(%arg0: i32) -> (i32, i32, i32) {
    %c0_i32 = arith.constant 0 : i32
    %c0_i32_0 = arith.constant 0 : i32
    %c0_i32_1 = arith.constant 0 : i32
    %c0_i32_2 = arith.constant 0 : i32
    return %c0_i32, %c0_i32_0, %c0_i32_1 : i32, i32, i32
  }
  func.func @transform_2(%arg0: i32) -> (i32, i32, i32) {
    %c0_i32 = arith.constant 0 : i32
    %c0_i32_0 = arith.constant 0 : i32
    %c0_i32_1 = arith.constant 0 : i32
    %c0_i32_2 = arith.constant 0 : i32
    return %c0_i32, %c0_i32_0, %c0_i32_1 : i32, i32, i32
  }
  func.func @transform_3(%arg0: i32) -> (i32, i32, i32, i32) {
    %c0_i32 = arith.constant 0 : i32
    %c0_i32_0 = arith.constant 0 : i32
    %c0_i32_1 = arith.constant 0 : i32
    %c0_i32_2 = arith.constant 0 : i32
    return %arg0, %c0_i32, %c0_i32_0, %c0_i32_1 : i32, i32, i32, i32
  }
  func.func @transform_4(%arg0: i32) -> (i32, i32, i32) {
    %c0_i32 = arith.constant 0 : i32
    %c0_i32_0 = arith.constant 0 : i32
    %c0_i32_1 = arith.constant 0 : i32
    return %arg0, %c0_i32, %c0_i32_0 : i32, i32, i32
  }
}

module attributes {stable_mosaic.version = 11 : i64} {
  func.func @_proj_res_kernel(%arg0: i32, %arg1: i32, %arg2: memref<1x256x128xbf16, #tpu.memory_space<vmem>>, %arg3: memref<1x1x128xf32, #tpu.memory_space<vmem>>, %arg4: memref<128x128xbf16, #tpu.memory_space<vmem>>, %arg5: memref<1x128xf32, #tpu.memory_space<vmem>>, %arg6: memref<1x256x128xbf16, #tpu.memory_space<vmem>>, %arg7: memref<1x256x128xbf16, #tpu.memory_space<vmem>>) attributes {dimension_semantics = [#tpu.dimension_semantics<parallel>, #tpu.dimension_semantics<parallel>], iteration_bounds = array<i64: 2, 1>, scalar_prefetch = 0 : i64, scratch_operands = 0 : i64, tpu.core_type = #tpu.core_type<tc>, window_params = [{transform_indices = @transform_0, window_bounds = array<i64: 1, 256, 128>}, {transform_indices = @transform_1, window_bounds = array<i64: 1, 1, 128>}, {pipeline_mode = #tpu.pipeline_mode<synchronous>, transform_indices = @transform_2, window_bounds = array<i64: 128, 128>}, {pipeline_mode = #tpu.pipeline_mode<synchronous>, transform_indices = @transform_3, window_bounds = array<i64: 1, 128>}, {transform_indices = @transform_4, window_bounds = array<i64: 1, 256, 128>}, {transform_indices = @transform_5, window_bounds = array<i64: 1, 256, 128>}]} {
    %c0 = arith.constant 0 : index
    %c0_0 = arith.constant 0 : index
    %c0_1 = arith.constant 0 : index
    %0 = vector.load %arg2[%c0, %c0_0, %c0_1] : memref<1x256x128xbf16, #tpu.memory_space<vmem>>, vector<1x256x128xbf16>
    %1 = vector.shape_cast %0 : vector<1x256x128xbf16> to vector<256x128xbf16>
    %2 = arith.extf %1 : vector<256x128xbf16> to vector<256x128xf32>
    %c0_2 = arith.constant 0 : index
    %c0_3 = arith.constant 0 : index
    %c0_4 = arith.constant 0 : index
    %3 = vector.load %arg3[%c0_2, %c0_3, %c0_4] : memref<1x1x128xf32, #tpu.memory_space<vmem>>, vector<1x1x128xf32>
    %4 = vector.shape_cast %3 : vector<1x1x128xf32> to vector<1x128xf32>
    %5 = vector.broadcast %4 : vector<1x128xf32> to vector<256x128xf32>
    %6 = arith.mulf %2, %5 : vector<256x128xf32>
    %7 = arith.truncf %6 : vector<256x128xf32> to vector<256x128xbf16>
    %c0_5 = arith.constant 0 : index
    %c0_6 = arith.constant 0 : index
    %8 = vector.load %arg4[%c0_5, %c0_6] : memref<128x128xbf16, #tpu.memory_space<vmem>>, vector<128x128xbf16>
    %cst = arith.constant dense<0.000000e+00> : vector<256x128xf32>
    %9 = tpu.matmul %7, %8, %cst {dimension_numbers = #tpu.dot_dimension_numbers<[1], [0], [0], [1], [0, 0, 1, 1], [], []>} : vector<256x128xbf16>, vector<128x128xbf16>, vector<256x128xf32> -> vector<256x128xf32>
    %c0_7 = arith.constant 0 : index
    %c0_8 = arith.constant 0 : index
    %10 = vector.load %arg5[%c0_7, %c0_8] : memref<1x128xf32, #tpu.memory_space<vmem>>, vector<1x128xf32>
    %11 = vector.broadcast %10 : vector<1x128xf32> to vector<256x128xf32>
    %12 = arith.addf %9, %11 : vector<256x128xf32>
    %c0_9 = arith.constant 0 : index
    %c0_10 = arith.constant 0 : index
    %c0_11 = arith.constant 0 : index
    %13 = vector.load %arg6[%c0_9, %c0_10, %c0_11] : memref<1x256x128xbf16, #tpu.memory_space<vmem>>, vector<1x256x128xbf16>
    %14 = vector.shape_cast %13 : vector<1x256x128xbf16> to vector<256x128xbf16>
    %15 = arith.extf %14 : vector<256x128xbf16> to vector<256x128xf32>
    %16 = arith.addf %12, %15 : vector<256x128xf32>
    %17 = arith.truncf %16 : vector<256x128xf32> to vector<256x128xbf16>
    %c0_12 = arith.constant 0 : index
    %c0_13 = arith.constant 0 : index
    %c0_14 = arith.constant 0 : index
    %18 = vector.load %arg7[%c0_12, %c0_13, %c0_14] : memref<1x256x128xbf16, #tpu.memory_space<vmem>>, vector<1x256x128xbf16>
    %19 = vector.shape_cast %18 : vector<1x256x128xbf16> to vector<256x128xbf16>
    %20 = vector.shape_cast %17 : vector<256x128xbf16> to vector<1x256x128xbf16>
    tpu.vector_store %arg7[%c0_12, %c0_13, %c0_14], %20 {strides = array<i32>} : memref<1x256x128xbf16, #tpu.memory_space<vmem>>, vector<1x256x128xbf16>,
    return
  }
  func.func @transform_0(%arg0: i32, %arg1: i32) -> (i32, i32, i32) {
    %c0_i32 = arith.constant 0 : i32
    %c0_i32_0 = arith.constant 0 : i32
    return %arg0, %arg1, %c0_i32 : i32, i32, i32
  }
  func.func @transform_1(%arg0: i32, %arg1: i32) -> (i32, i32, i32) {
    %c0_i32 = arith.constant 0 : i32
    %c0_i32_0 = arith.constant 0 : i32
    %c0_i32_1 = arith.constant 0 : i32
    return %arg0, %c0_i32, %c0_i32_0 : i32, i32, i32
  }
  func.func @transform_2(%arg0: i32, %arg1: i32) -> (i32, i32) {
    %c0_i32 = arith.constant 0 : i32
    %c0_i32_0 = arith.constant 0 : i32
    %c0_i32_1 = arith.constant 0 : i32
    return %c0_i32, %c0_i32_0 : i32, i32
  }
  func.func @transform_3(%arg0: i32, %arg1: i32) -> (i32, i32) {
    %c0_i32 = arith.constant 0 : i32
    %c0_i32_0 = arith.constant 0 : i32
    %c0_i32_1 = arith.constant 0 : i32
    return %c0_i32, %c0_i32_0 : i32, i32
  }
  func.func @transform_4(%arg0: i32, %arg1: i32) -> (i32, i32, i32) {
    %c0_i32 = arith.constant 0 : i32
    %c0_i32_0 = arith.constant 0 : i32
    return %arg0, %arg1, %c0_i32 : i32, i32, i32
  }
  func.func @transform_5(%arg0: i32, %arg1: i32) -> (i32, i32, i32) {
    %c0_i32 = arith.constant 0 : i32
    %c0_i32_0 = arith.constant 0 : i32
    return %arg0, %arg1, %c0_i32 : i32, i32, i32
  }
}

module attributes {stable_mosaic.version = 11 : i64} {
  func.func @_dw_s2_kernel(%arg0: i32, %arg1: memref<4x1x10x10x128xbf16, #tpu.memory_space<vmem>>, %arg2: memref<5x5x128xf32, #tpu.memory_space<vmem>>, %arg3: memref<1x1x128xf32, #tpu.memory_space<vmem>>, %arg4: memref<1x8x8x128xbf16, #tpu.memory_space<vmem>>, %arg5: memref<1x1x128xf32, #tpu.memory_space<vmem>>) attributes {dimension_semantics = [#tpu.dimension_semantics<parallel>], iteration_bounds = array<i64: 2>, scalar_prefetch = 0 : i64, scratch_operands = 0 : i64, tpu.core_type = #tpu.core_type<tc>, window_params = [{transform_indices = @transform_0, window_bounds = array<i64: 4, 1, 10, 10, 128>}, {pipeline_mode = #tpu.pipeline_mode<synchronous>, transform_indices = @transform_1, window_bounds = array<i64: 5, 5, 128>}, {pipeline_mode = #tpu.pipeline_mode<synchronous>, transform_indices = @transform_2, window_bounds = array<i64: 1, 1, 128>}, {transform_indices = @transform_3, window_bounds = array<i64: 1, 8, 8, 128>}, {transform_indices = @transform_4, window_bounds = array<i64: 1, 1, 128>}]} {
    %c0 = arith.constant 0 : index
    %c0_0 = arith.constant 0 : index
    %c0_1 = arith.constant 0 : index
    %0 = vector.load %arg2[%c0, %c0_0, %c0_1] : memref<5x5x128xf32, #tpu.memory_space<vmem>>, vector<5x5x128xf32>
    %c0_2 = arith.constant 0 : index
    %c0_3 = arith.constant 0 : index
    %c0_4 = arith.constant 0 : index
    %1 = vector.load %arg3[%c0_2, %c0_3, %c0_4] : memref<1x1x128xf32, #tpu.memory_space<vmem>>, vector<1x1x128xf32>
    %2 = vector.extract_strided_slice %0 {offsets = [0, 0, 0], sizes = [1, 1, 128], strides = [1, 1, 1]} : vector<5x5x128xf32> to vector<1x1x128xf32>
    %3 = vector.shape_cast %2 : vector<1x1x128xf32> to vector<128xf32>
    %4 = vector.shape_cast %3 : vector<128xf32> to vector<1x1x128xf32>
    %5 = vector.extract_strided_slice %0 {offsets = [0, 1, 0], sizes = [1, 1, 128], strides = [1, 1, 1]} : vector<5x5x128xf32> to vector<1x1x128xf32>
    %6 = vector.shape_cast %5 : vector<1x1x128xf32> to vector<128xf32>
    %7 = vector.shape_cast %6 : vector<128xf32> to vector<1x1x128xf32>
    %8 = vector.extract_strided_slice %0 {offsets = [0, 2, 0], sizes = [1, 1, 128], strides = [1, 1, 1]} : vector<5x5x128xf32> to vector<1x1x128xf32>
    %9 = vector.shape_cast %8 : vector<1x1x128xf32> to vector<128xf32>
    %10 = vector.shape_cast %9 : vector<128xf32> to vector<1x1x128xf32>
    %11 = vector.extract_strided_slice %0 {offsets = [0, 3, 0], sizes = [1, 1, 128], strides = [1, 1, 1]} : vector<5x5x128xf32> to vector<1x1x128xf32>
    %12 = vector.shape_cast %11 : vector<1x1x128xf32> to vector<128xf32>
    %13 = vector.shape_cast %12 : vector<128xf32> to vector<1x1x128xf32>
    %14 = vector.extract_strided_slice %0 {offsets = [0, 4, 0], sizes = [1, 1, 128], strides = [1, 1, 1]} : vector<5x5x128xf32> to vector<1x1x128xf32>
    %15 = vector.shape_cast %14 : vector<1x1x128xf32> to vector<128xf32>
    %16 = vector.shape_cast %15 : vector<128xf32> to vector<1x1x128xf32>
    %17 = vector.extract_strided_slice %0 {offsets = [1, 0, 0], sizes = [1, 1, 128], strides = [1, 1, 1]} : vector<5x5x128xf32> to vector<1x1x128xf32>
    %18 = vector.shape_cast %17 : vector<1x1x128xf32> to vector<128xf32>
    %19 = vector.shape_cast %18 : vector<128xf32> to vector<1x1x128xf32>
    %20 = vector.extract_strided_slice %0 {offsets = [1, 1, 0], sizes = [1, 1, 128], strides = [1, 1, 1]} : vector<5x5x128xf32> to vector<1x1x128xf32>
    %21 = vector.shape_cast %20 : vector<1x1x128xf32> to vector<128xf32>
    %22 = vector.shape_cast %21 : vector<128xf32> to vector<1x1x128xf32>
    %23 = vector.extract_strided_slice %0 {offsets = [1, 2, 0], sizes = [1, 1, 128], strides = [1, 1, 1]} : vector<5x5x128xf32> to vector<1x1x128xf32>
    %24 = vector.shape_cast %23 : vector<1x1x128xf32> to vector<128xf32>
    %25 = vector.shape_cast %24 : vector<128xf32> to vector<1x1x128xf32>
    %26 = vector.extract_strided_slice %0 {offsets = [1, 3, 0], sizes = [1, 1, 128], strides = [1, 1, 1]} : vector<5x5x128xf32> to vector<1x1x128xf32>
    %27 = vector.shape_cast %26 : vector<1x1x128xf32> to vector<128xf32>
    %28 = vector.shape_cast %27 : vector<128xf32> to vector<1x1x128xf32>
    %29 = vector.extract_strided_slice %0 {offsets = [1, 4, 0], sizes = [1, 1, 128], strides = [1, 1, 1]} : vector<5x5x128xf32> to vector<1x1x128xf32>
    %30 = vector.shape_cast %29 : vector<1x1x128xf32> to vector<128xf32>
    %31 = vector.shape_cast %30 : vector<128xf32> to vector<1x1x128xf32>
    %32 = vector.extract_strided_slice %0 {offsets = [2, 0, 0], sizes = [1, 1, 128], strides = [1, 1, 1]} : vector<5x5x128xf32> to vector<1x1x128xf32>
    %33 = vector.shape_cast %32 : vector<1x1x128xf32> to vector<128xf32>
    %34 = vector.shape_cast %33 : vector<128xf32> to vector<1x1x128xf32>
    %35 = vector.extract_strided_slice %0 {offsets = [2, 1, 0], sizes = [1, 1, 128], strides = [1, 1, 1]} : vector<5x5x128xf32> to vector<1x1x128xf32>
    %36 = vector.shape_cast %35 : vector<1x1x128xf32> to vector<128xf32>
    %37 = vector.shape_cast %36 : vector<128xf32> to vector<1x1x128xf32>
    %38 = vector.extract_strided_slice %0 {offsets = [2, 2, 0], sizes = [1, 1, 128], strides = [1, 1, 1]} : vector<5x5x128xf32> to vector<1x1x128xf32>
    %39 = vector.shape_cast %38 : vector<1x1x128xf32> to vector<128xf32>
    %40 = vector.shape_cast %39 : vector<128xf32> to vector<1x1x128xf32>
    %41 = vector.extract_strided_slice %0 {offsets = [2, 3, 0], sizes = [1, 1, 128], strides = [1, 1, 1]} : vector<5x5x128xf32> to vector<1x1x128xf32>
    %42 = vector.shape_cast %41 : vector<1x1x128xf32> to vector<128xf32>
    %43 = vector.shape_cast %42 : vector<128xf32> to vector<1x1x128xf32>
    %44 = vector.extract_strided_slice %0 {offsets = [2, 4, 0], sizes = [1, 1, 128], strides = [1, 1, 1]} : vector<5x5x128xf32> to vector<1x1x128xf32>
    %45 = vector.shape_cast %44 : vector<1x1x128xf32> to vector<128xf32>
    %46 = vector.shape_cast %45 : vector<128xf32> to vector<1x1x128xf32>
    %47 = vector.extract_strided_slice %0 {offsets = [3, 0, 0], sizes = [1, 1, 128], strides = [1, 1, 1]} : vector<5x5x128xf32> to vector<1x1x128xf32>
    %48 = vector.shape_cast %47 : vector<1x1x128xf32> to vector<128xf32>
    %49 = vector.shape_cast %48 : vector<128xf32> to vector<1x1x128xf32>
    %50 = vector.extract_strided_slice %0 {offsets = [3, 1, 0], sizes = [1, 1, 128], strides = [1, 1, 1]} : vector<5x5x128xf32> to vector<1x1x128xf32>
    %51 = vector.shape_cast %50 : vector<1x1x128xf32> to vector<128xf32>
    %52 = vector.shape_cast %51 : vector<128xf32> to vector<1x1x128xf32>
    %53 = vector.extract_strided_slice %0 {offsets = [3, 2, 0], sizes = [1, 1, 128], strides = [1, 1, 1]} : vector<5x5x128xf32> to vector<1x1x128xf32>
    %54 = vector.shape_cast %53 : vector<1x1x128xf32> to vector<128xf32>
    %55 = vector.shape_cast %54 : vector<128xf32> to vector<1x1x128xf32>
    %56 = vector.extract_strided_slice %0 {offsets = [3, 3, 0], sizes = [1, 1, 128], strides = [1, 1, 1]} : vector<5x5x128xf32> to vector<1x1x128xf32>
    %57 = vector.shape_cast %56 : vector<1x1x128xf32> to vector<128xf32>
    %58 = vector.shape_cast %57 : vector<128xf32> to vector<1x1x128xf32>
    %59 = vector.extract_strided_slice %0 {offsets = [3, 4, 0], sizes = [1, 1, 128], strides = [1, 1, 1]} : vector<5x5x128xf32> to vector<1x1x128xf32>
    %60 = vector.shape_cast %59 : vector<1x1x128xf32> to vector<128xf32>
    %61 = vector.shape_cast %60 : vector<128xf32> to vector<1x1x128xf32>
    %62 = vector.extract_strided_slice %0 {offsets = [4, 0, 0], sizes = [1, 1, 128], strides = [1, 1, 1]} : vector<5x5x128xf32> to vector<1x1x128xf32>
    %63 = vector.shape_cast %62 : vector<1x1x128xf32> to vector<128xf32>
    %64 = vector.shape_cast %63 : vector<128xf32> to vector<1x1x128xf32>
    %65 = vector.extract_strided_slice %0 {offsets = [4, 1, 0], sizes = [1, 1, 128], strides = [1, 1, 1]} : vector<5x5x128xf32> to vector<1x1x128xf32>
    %66 = vector.shape_cast %65 : vector<1x1x128xf32> to vector<128xf32>
    %67 = vector.shape_cast %66 : vector<128xf32> to vector<1x1x128xf32>
    %68 = vector.extract_strided_slice %0 {offsets = [4, 2, 0], sizes = [1, 1, 128], strides = [1, 1, 1]} : vector<5x5x128xf32> to vector<1x1x128xf32>
    %69 = vector.shape_cast %68 : vector<1x1x128xf32> to vector<128xf32>
    %70 = vector.shape_cast %69 : vector<128xf32> to vector<1x1x128xf32>
    %71 = vector.extract_strided_slice %0 {offsets = [4, 3, 0], sizes = [1, 1, 128], strides = [1, 1, 1]} : vector<5x5x128xf32> to vector<1x1x128xf32>
    %72 = vector.shape_cast %71 : vector<1x1x128xf32> to vector<128xf32>
    %73 = vector.shape_cast %72 : vector<128xf32> to vector<1x1x128xf32>
    %74 = vector.extract_strided_slice %0 {offsets = [4, 4, 0], sizes = [1, 1, 128], strides = [1, 1, 1]} : vector<5x5x128xf32> to vector<1x1x128xf32>
    %75 = vector.shape_cast %74 : vector<1x1x128xf32> to vector<128xf32>
    %76 = vector.shape_cast %75 : vector<128xf32> to vector<1x1x128xf32>
    %cst = arith.constant 0.000000e+00 : f32
    %77 = vector.broadcast %cst : f32 to vector<8x8x128xf32>
    %c0_5 = arith.constant 0 : index
    %c0_6 = arith.constant 0 : index
    %c0_7 = arith.constant 0 : index
    %c0_8 = arith.constant 0 : index
    %c0_9 = arith.constant 0 : index
    %78 = vector.load %arg1[%c0_5, %c0_6, %c0_7, %c0_8, %c0_9] : memref<4x1x10x10x128xbf16, #tpu.memory_space<vmem>>, vector<1x1x10x8x128xbf16>
    %79 = vector.shape_cast %78 : vector<1x1x10x8x128xbf16> to vector<10x8x128xbf16>
    %80 = arith.extf %79 : vector<10x8x128xbf16> to vector<10x8x128xf32>
    %81 = vector.extract_strided_slice %80 {offsets = [0, 0, 0], sizes = [8, 8, 128], strides = [1, 1, 1]} : vector<10x8x128xf32> to vector<8x8x128xf32>
    %82 = vector.broadcast %4 : vector<1x1x128xf32> to vector<8x8x128xf32>
    %83 = arith.mulf %81, %82 : vector<8x8x128xf32>
    %84 = arith.addf %77, %83 : vector<8x8x128xf32>
    %85 = vector.extract_strided_slice %80 {offsets = [1, 0, 0], sizes = [8, 8, 128], strides = [1, 1, 1]} : vector<10x8x128xf32> to vector<8x8x128xf32>
    %86 = vector.broadcast %34 : vector<1x1x128xf32> to vector<8x8x128xf32>
    %87 = arith.mulf %85, %86 : vector<8x8x128xf32>
    %88 = arith.addf %84, %87 : vector<8x8x128xf32>
    %89 = vector.extract_strided_slice %80 {offsets = [2, 0, 0], sizes = [8, 8, 128], strides = [1, 1, 1]} : vector<10x8x128xf32> to vector<8x8x128xf32>
    %90 = vector.broadcast %64 : vector<1x1x128xf32> to vector<8x8x128xf32>
    %91 = arith.mulf %89, %90 : vector<8x8x128xf32>
    %92 = arith.addf %88, %91 : vector<8x8x128xf32>
    %c2 = arith.constant 2 : index
    %c0_10 = arith.constant 0 : index
    %c0_11 = arith.constant 0 : index
    %c0_12 = arith.constant 0 : index
    %c0_13 = arith.constant 0 : index
    %93 = vector.load %arg1[%c2, %c0_10, %c0_11, %c0_12, %c0_13] : memref<4x1x10x10x128xbf16, #tpu.memory_space<vmem>>, vector<1x1x10x8x128xbf16>
    %94 = vector.shape_cast %93 : vector<1x1x10x8x128xbf16> to vector<10x8x128xbf16>
    %95 = arith.extf %94 : vector<10x8x128xbf16> to vector<10x8x128xf32>
    %96 = vector.extract_strided_slice %95 {offsets = [0, 0, 0], sizes = [8, 8, 128], strides = [1, 1, 1]} : vector<10x8x128xf32> to vector<8x8x128xf32>
    %97 = vector.broadcast %19 : vector<1x1x128xf32> to vector<8x8x128xf32>
    %98 = arith.mulf %96, %97 : vector<8x8x128xf32>
    %99 = arith.addf %92, %98 : vector<8x8x128xf32>
    %100 = vector.extract_strided_slice %95 {offsets = [1, 0, 0], sizes = [8, 8, 128], strides = [1, 1, 1]} : vector<10x8x128xf32> to vector<8x8x128xf32>
    %101 = vector.broadcast %49 : vector<1x1x128xf32> to vector<8x8x128xf32>
    %102 = arith.mulf %100, %101 : vector<8x8x128xf32>
    %103 = arith.addf %99, %102 : vector<8x8x128xf32>
    %c1 = arith.constant 1 : index
    %c0_14 = arith.constant 0 : index
    %c0_15 = arith.constant 0 : index
    %c0_16 = arith.constant 0 : index
    %c0_17 = arith.constant 0 : index
    %104 = vector.load %arg1[%c1, %c0_14, %c0_15, %c0_16, %c0_17] : memref<4x1x10x10x128xbf16, #tpu.memory_space<vmem>>, vector<1x1x10x8x128xbf16>
    %105 = vector.shape_cast %104 : vector<1x1x10x8x128xbf16> to vector<10x8x128xbf16>
    %106 = arith.extf %105 : vector<10x8x128xbf16> to vector<10x8x128xf32>
    %107 = vector.extract_strided_slice %106 {offsets = [0, 0, 0], sizes = [8, 8, 128], strides = [1, 1, 1]} : vector<10x8x128xf32> to vector<8x8x128xf32>
    %108 = vector.broadcast %7 : vector<1x1x128xf32> to vector<8x8x128xf32>
    %109 = arith.mulf %107, %108 : vector<8x8x128xf32>
    %110 = arith.addf %103, %109 : vector<8x8x128xf32>
    %111 = vector.extract_strided_slice %106 {offsets = [1, 0, 0], sizes = [8, 8, 128], strides = [1, 1, 1]} : vector<10x8x128xf32> to vector<8x8x128xf32>
    %112 = vector.broadcast %37 : vector<1x1x128xf32> to vector<8x8x128xf32>
    %113 = arith.mulf %111, %112 : vector<8x8x128xf32>
    %114 = arith.addf %110, %113 : vector<8x8x128xf32>
    %115 = vector.extract_strided_slice %106 {offsets = [2, 0, 0], sizes = [8, 8, 128], strides = [1, 1, 1]} : vector<10x8x128xf32> to vector<8x8x128xf32>
    %116 = vector.broadcast %67 : vector<1x1x128xf32> to vector<8x8x128xf32>
    %117 = arith.mulf %115, %116 : vector<8x8x128xf32>
    %118 = arith.addf %114, %117 : vector<8x8x128xf32>
    %c3 = arith.constant 3 : index
    %c0_18 = arith.constant 0 : index
    %c0_19 = arith.constant 0 : index
    %c0_20 = arith.constant 0 : index
    %c0_21 = arith.constant 0 : index
    %119 = vector.load %arg1[%c3, %c0_18, %c0_19, %c0_20, %c0_21] : memref<4x1x10x10x128xbf16, #tpu.memory_space<vmem>>, vector<1x1x10x8x128xbf16>
    %120 = vector.shape_cast %119 : vector<1x1x10x8x128xbf16> to vector<10x8x128xbf16>
    %121 = arith.extf %120 : vector<10x8x128xbf16> to vector<10x8x128xf32>
    %122 = vector.extract_strided_slice %121 {offsets = [0, 0, 0], sizes = [8, 8, 128], strides = [1, 1, 1]} : vector<10x8x128xf32> to vector<8x8x128xf32>
    %123 = vector.broadcast %22 : vector<1x1x128xf32> to vector<8x8x128xf32>
    %124 = arith.mulf %122, %123 : vector<8x8x128xf32>
    %125 = arith.addf %118, %124 : vector<8x8x128xf32>
    %126 = vector.extract_strided_slice %121 {offsets = [1, 0, 0], sizes = [8, 8, 128], strides = [1, 1, 1]} : vector<10x8x128xf32> to vector<8x8x128xf32>
    %127 = vector.broadcast %52 : vector<1x1x128xf32> to vector<8x8x128xf32>
    %128 = arith.mulf %126, %127 : vector<8x8x128xf32>
    %129 = arith.addf %125, %128 : vector<8x8x128xf32>
    %c0_22 = arith.constant 0 : index
    %c0_23 = arith.constant 0 : index
    %c0_24 = arith.constant 0 : index
    %c1_25 = arith.constant 1 : index
    %c0_26 = arith.constant 0 : index
    %130 = vector.load %arg1[%c0_22, %c0_23, %c0_24, %c1_25, %c0_26] : memref<4x1x10x10x128xbf16, #tpu.memory_space<vmem>>, vector<1x1x10x8x128xbf16>
    %131 = vector.shape_cast %130 : vector<1x1x10x8x128xbf16> to vector<10x8x128xbf16>
    %132 = arith.extf %131 : vector<10x8x128xbf16> to vector<10x8x128xf32>
    %133 = vector.extract_strided_slice %132 {offsets = [0, 0, 0], sizes = [8, 8, 128], strides = [1, 1, 1]} : vector<10x8x128xf32> to vector<8x8x128xf32>
    %134 = vector.broadcast %10 : vector<1x1x128xf32> to vector<8x8x128xf32>
    %135 = arith.mulf %133, %134 : vector<8x8x128xf32>
    %136 = arith.addf %129, %135 : vector<8x8x128xf32>
    %137 = vector.extract_strided_slice %132 {offsets = [1, 0, 0], sizes = [8, 8, 128], strides = [1, 1, 1]} : vector<10x8x128xf32> to vector<8x8x128xf32>
    %138 = vector.broadcast %40 : vector<1x1x128xf32> to vector<8x8x128xf32>
    %139 = arith.mulf %137, %138 : vector<8x8x128xf32>
    %140 = arith.addf %136, %139 : vector<8x8x128xf32>
    %141 = vector.extract_strided_slice %132 {offsets = [2, 0, 0], sizes = [8, 8, 128], strides = [1, 1, 1]} : vector<10x8x128xf32> to vector<8x8x128xf32>
    %142 = vector.broadcast %70 : vector<1x1x128xf32> to vector<8x8x128xf32>
    %143 = arith.mulf %141, %142 : vector<8x8x128xf32>
    %144 = arith.addf %140, %143 : vector<8x8x128xf32>
    %c2_27 = arith.constant 2 : index
    %c0_28 = arith.constant 0 : index
    %c0_29 = arith.constant 0 : index
    %c1_30 = arith.constant 1 : index
    %c0_31 = arith.constant 0 : index
    %145 = vector.load %arg1[%c2_27, %c0_28, %c0_29, %c1_30, %c0_31] : memref<4x1x10x10x128xbf16, #tpu.memory_space<vmem>>, vector<1x1x10x8x128xbf16>
    %146 = vector.shape_cast %145 : vector<1x1x10x8x128xbf16> to vector<10x8x128xbf16>
    %147 = arith.extf %146 : vector<10x8x128xbf16> to vector<10x8x128xf32>
    %148 = vector.extract_strided_slice %147 {offsets = [0, 0, 0], sizes = [8, 8, 128], strides = [1, 1, 1]} : vector<10x8x128xf32> to vector<8x8x128xf32>
    %149 = vector.broadcast %25 : vector<1x1x128xf32> to vector<8x8x128xf32>
    %150 = arith.mulf %148, %149 : vector<8x8x128xf32>
    %151 = arith.addf %144, %150 : vector<8x8x128xf32>
    %152 = vector.extract_strided_slice %147 {offsets = [1, 0, 0], sizes = [8, 8, 128], strides = [1, 1, 1]} : vector<10x8x128xf32> to vector<8x8x128xf32>
    %153 = vector.broadcast %55 : vector<1x1x128xf32> to vector<8x8x128xf32>
    %154 = arith.mulf %152, %153 : vector<8x8x128xf32>
    %155 = arith.addf %151, %154 : vector<8x8x128xf32>
    %c1_32 = arith.constant 1 : index
    %c0_33 = arith.constant 0 : index
    %c0_34 = arith.constant 0 : index
    %c1_35 = arith.constant 1 : index
    %c0_36 = arith.constant 0 : index
    %156 = vector.load %arg1[%c1_32, %c0_33, %c0_34, %c1_35, %c0_36] : memref<4x1x10x10x128xbf16, #tpu.memory_space<vmem>>, vector<1x1x10x8x128xbf16>
    %157 = vector.shape_cast %156 : vector<1x1x10x8x128xbf16> to vector<10x8x128xbf16>
    %158 = arith.extf %157 : vector<10x8x128xbf16> to vector<10x8x128xf32>
    %159 = vector.extract_strided_slice %158 {offsets = [0, 0, 0], sizes = [8, 8, 128], strides = [1, 1, 1]} : vector<10x8x128xf32> to vector<8x8x128xf32>
    %160 = vector.broadcast %13 : vector<1x1x128xf32> to vector<8x8x128xf32>
    %161 = arith.mulf %159, %160 : vector<8x8x128xf32>
    %162 = arith.addf %155, %161 : vector<8x8x128xf32>
    %163 = vector.extract_strided_slice %158 {offsets = [1, 0, 0], sizes = [8, 8, 128], strides = [1, 1, 1]} : vector<10x8x128xf32> to vector<8x8x128xf32>
    %164 = vector.broadcast %43 : vector<1x1x128xf32> to vector<8x8x128xf32>
    %165 = arith.mulf %163, %164 : vector<8x8x128xf32>
    %166 = arith.addf %162, %165 : vector<8x8x128xf32>
    %167 = vector.extract_strided_slice %158 {offsets = [2, 0, 0], sizes = [8, 8, 128], strides = [1, 1, 1]} : vector<10x8x128xf32> to vector<8x8x128xf32>
    %168 = vector.broadcast %73 : vector<1x1x128xf32> to vector<8x8x128xf32>
    %169 = arith.mulf %167, %168 : vector<8x8x128xf32>
    %170 = arith.addf %166, %169 : vector<8x8x128xf32>
    %c3_37 = arith.constant 3 : index
    %c0_38 = arith.constant 0 : index
    %c0_39 = arith.constant 0 : index
    %c1_40 = arith.constant 1 : index
    %c0_41 = arith.constant 0 : index
    %171 = vector.load %arg1[%c3_37, %c0_38, %c0_39, %c1_40, %c0_41] : memref<4x1x10x10x128xbf16, #tpu.memory_space<vmem>>, vector<1x1x10x8x128xbf16>
    %172 = vector.shape_cast %171 : vector<1x1x10x8x128xbf16> to vector<10x8x128xbf16>
    %173 = arith.extf %172 : vector<10x8x128xbf16> to vector<10x8x128xf32>
    %174 = vector.extract_strided_slice %173 {offsets = [0, 0, 0], sizes = [8, 8, 128], strides = [1, 1, 1]} : vector<10x8x128xf32> to vector<8x8x128xf32>
    %175 = vector.broadcast %28 : vector<1x1x128xf32> to vector<8x8x128xf32>
    %176 = arith.mulf %174, %175 : vector<8x8x128xf32>
    %177 = arith.addf %170, %176 : vector<8x8x128xf32>
    %178 = vector.extract_strided_slice %173 {offsets = [1, 0, 0], sizes = [8, 8, 128], strides = [1, 1, 1]} : vector<10x8x128xf32> to vector<8x8x128xf32>
    %179 = vector.broadcast %58 : vector<1x1x128xf32> to vector<8x8x128xf32>
    %180 = arith.mulf %178, %179 : vector<8x8x128xf32>
    %181 = arith.addf %177, %180 : vector<8x8x128xf32>
    %c0_42 = arith.constant 0 : index
    %c0_43 = arith.constant 0 : index
    %c0_44 = arith.constant 0 : index
    %c2_45 = arith.constant 2 : index
    %c0_46 = arith.constant 0 : index
    %182 = vector.load %arg1[%c0_42, %c0_43, %c0_44, %c2_45, %c0_46] : memref<4x1x10x10x128xbf16, #tpu.memory_space<vmem>>, vector<1x1x10x8x128xbf16>
    %183 = vector.shape_cast %182 : vector<1x1x10x8x128xbf16> to vector<10x8x128xbf16>
    %184 = arith.extf %183 : vector<10x8x128xbf16> to vector<10x8x128xf32>
    %185 = vector.extract_strided_slice %184 {offsets = [0, 0, 0], sizes = [8, 8, 128], strides = [1, 1, 1]} : vector<10x8x128xf32> to vector<8x8x128xf32>
    %186 = vector.broadcast %16 : vector<1x1x128xf32> to vector<8x8x128xf32>
    %187 = arith.mulf %185, %186 : vector<8x8x128xf32>
    %188 = arith.addf %181, %187 : vector<8x8x128xf32>
    %189 = vector.extract_strided_slice %184 {offsets = [1, 0, 0], sizes = [8, 8, 128], strides = [1, 1, 1]} : vector<10x8x128xf32> to vector<8x8x128xf32>
    %190 = vector.broadcast %46 : vector<1x1x128xf32> to vector<8x8x128xf32>
    %191 = arith.mulf %189, %190 : vector<8x8x128xf32>
    %192 = arith.addf %188, %191 : vector<8x8x128xf32>
    %193 = vector.extract_strided_slice %184 {offsets = [2, 0, 0], sizes = [8, 8, 128], strides = [1, 1, 1]} : vector<10x8x128xf32> to vector<8x8x128xf32>
    %194 = vector.broadcast %76 : vector<1x1x128xf32> to vector<8x8x128xf32>
    %195 = arith.mulf %193, %194 : vector<8x8x128xf32>
    %196 = arith.addf %192, %195 : vector<8x8x128xf32>
    %c2_47 = arith.constant 2 : index
    %c0_48 = arith.constant 0 : index
    %c0_49 = arith.constant 0 : index
    %c2_50 = arith.constant 2 : index
    %c0_51 = arith.constant 0 : index
    %197 = vector.load %arg1[%c2_47, %c0_48, %c0_49, %c2_50, %c0_51] : memref<4x1x10x10x128xbf16, #tpu.memory_space<vmem>>, vector<1x1x10x8x128xbf16>
    %198 = vector.shape_cast %197 : vector<1x1x10x8x128xbf16> to vector<10x8x128xbf16>
    %199 = arith.extf %198 : vector<10x8x128xbf16> to vector<10x8x128xf32>
    %200 = vector.extract_strided_slice %199 {offsets = [0, 0, 0], sizes = [8, 8, 128], strides = [1, 1, 1]} : vector<10x8x128xf32> to vector<8x8x128xf32>
    %201 = vector.broadcast %31 : vector<1x1x128xf32> to vector<8x8x128xf32>
    %202 = arith.mulf %200, %201 : vector<8x8x128xf32>
    %203 = arith.addf %196, %202 : vector<8x8x128xf32>
    %204 = vector.extract_strided_slice %199 {offsets = [1, 0, 0], sizes = [8, 8, 128], strides = [1, 1, 1]} : vector<10x8x128xf32> to vector<8x8x128xf32>
    %205 = vector.broadcast %61 : vector<1x1x128xf32> to vector<8x8x128xf32>
    %206 = arith.mulf %204, %205 : vector<8x8x128xf32>
    %207 = arith.addf %203, %206 : vector<8x8x128xf32>
    %208 = vector.broadcast %1 : vector<1x1x128xf32> to vector<8x8x128xf32>
    %209 = arith.addf %207, %208 : vector<8x8x128xf32>
    %210 = arith.negf %209 : vector<8x8x128xf32>
    %211 = math.exp %210 : vector<8x8x128xf32>
    %cst_52 = arith.constant 1.000000e+00 : f32
    %212 = vector.broadcast %cst_52 : f32 to vector<8x8x128xf32>
    %213 = arith.addf %212, %211 : vector<8x8x128xf32>
    %214 = arith.divf %212, %213 : vector<8x8x128xf32>
    %215 = arith.mulf %209, %214 : vector<8x8x128xf32>
    %216 = arith.truncf %215 : vector<8x8x128xf32> to vector<8x8x128xbf16>
    %c0_53 = arith.constant 0 : index
    %c0_54 = arith.constant 0 : index
    %c0_55 = arith.constant 0 : index
    %c0_56 = arith.constant 0 : index
    %217 = vector.load %arg4[%c0_53, %c0_54, %c0_55, %c0_56] : memref<1x8x8x128xbf16, #tpu.memory_space<vmem>>, vector<1x8x8x128xbf16>
    %218 = vector.shape_cast %217 : vector<1x8x8x128xbf16> to vector<8x8x128xbf16>
    %219 = vector.shape_cast %216 : vector<8x8x128xbf16> to vector<1x8x8x128xbf16>
    tpu.vector_store %arg4[%c0_53, %c0_54, %c0_55, %c0_56], %219 {strides = array<i32>} : memref<1x8x8x128xbf16, #tpu.memory_space<vmem>>, vector<1x8x8x128xbf16>,
    %cst_57 = arith.constant dense<0.000000e+00> : vector<128xf32>
    %220 = vector.multi_reduction <add>, %215, %cst_57 [0, 1] : vector<8x8x128xf32> to vector<128xf32>
    %cst_58 = arith.constant 1.562500e-02 : f32
    %221 = vector.broadcast %cst_58 : f32 to vector<128xf32>
    %222 = arith.mulf %220, %221 : vector<128xf32>
    %223 = vector.shape_cast %222 : vector<128xf32> to vector<1x1x128xf32>
    %c0_59 = arith.constant 0 : index
    %c0_60 = arith.constant 0 : index
    %c0_61 = arith.constant 0 : index
    %224 = vector.load %arg5[%c0_59, %c0_60, %c0_61] : memref<1x1x128xf32, #tpu.memory_space<vmem>>, vector<1x1x128xf32>
    tpu.vector_store %arg5[%c0_59, %c0_60, %c0_61], %223 {strides = array<i32>} : memref<1x1x128xf32, #tpu.memory_space<vmem>>, vector<1x1x128xf32>,
    return
  }
  func.func @transform_0(%arg0: i32) -> (i32, i32, i32, i32, i32) {
    %c0_i32 = arith.constant 0 : i32
    %c0_i32_0 = arith.constant 0 : i32
    %c0_i32_1 = arith.constant 0 : i32
    %c0_i32_2 = arith.constant 0 : i32
    %c0_i32_3 = arith.constant 0 : i32
    return %c0_i32, %arg0, %c0_i32_0, %c0_i32_1, %c0_i32_2 : i32, i32, i32, i32, i32
  }
  func.func @transform_1(%arg0: i32) -> (i32, i32, i32) {
    %c0_i32 = arith.constant 0 : i32
    %c0_i32_0 = arith.constant 0 : i32
    %c0_i32_1 = arith.constant 0 : i32
    %c0_i32_2 = arith.constant 0 : i32
    return %c0_i32, %c0_i32_0, %c0_i32_1 : i32, i32, i32
  }
  func.func @transform_2(%arg0: i32) -> (i32, i32, i32) {
    %c0_i32 = arith.constant 0 : i32
    %c0_i32_0 = arith.constant 0 : i32
    %c0_i32_1 = arith.constant 0 : i32
    %c0_i32_2 = arith.constant 0 : i32
    return %c0_i32, %c0_i32_0, %c0_i32_1 : i32, i32, i32
  }
  func.func @transform_3(%arg0: i32) -> (i32, i32, i32, i32) {
    %c0_i32 = arith.constant 0 : i32
    %c0_i32_0 = arith.constant 0 : i32
    %c0_i32_1 = arith.constant 0 : i32
    %c0_i32_2 = arith.constant 0 : i32
    return %arg0, %c0_i32, %c0_i32_0, %c0_i32_1 : i32, i32, i32, i32
  }
  func.func @transform_4(%arg0: i32) -> (i32, i32, i32) {
    %c0_i32 = arith.constant 0 : i32
    %c0_i32_0 = arith.constant 0 : i32
    %c0_i32_1 = arith.constant 0 : i32
    return %arg0, %c0_i32, %c0_i32_0 : i32, i32, i32
  }
}

module attributes {stable_mosaic.version = 11 : i64} {
  func.func @_proj_kernel(%arg0: i32, %arg1: i32, %arg2: memref<1x64x128xbf16, #tpu.memory_space<vmem>>, %arg3: memref<1x1x128xf32, #tpu.memory_space<vmem>>, %arg4: memref<128x128xbf16, #tpu.memory_space<vmem>>, %arg5: memref<1x128xf32, #tpu.memory_space<vmem>>, %arg6: memref<1x64x128xbf16, #tpu.memory_space<vmem>>) attributes {dimension_semantics = [#tpu.dimension_semantics<parallel>, #tpu.dimension_semantics<parallel>], iteration_bounds = array<i64: 2, 1>, scalar_prefetch = 0 : i64, scratch_operands = 0 : i64, tpu.core_type = #tpu.core_type<tc>, window_params = [{transform_indices = @transform_0, window_bounds = array<i64: 1, 64, 128>}, {transform_indices = @transform_1, window_bounds = array<i64: 1, 1, 128>}, {pipeline_mode = #tpu.pipeline_mode<synchronous>, transform_indices = @transform_2, window_bounds = array<i64: 128, 128>}, {pipeline_mode = #tpu.pipeline_mode<synchronous>, transform_indices = @transform_3, window_bounds = array<i64: 1, 128>}, {transform_indices = @transform_4, window_bounds = array<i64: 1, 64, 128>}]} {
    %c0 = arith.constant 0 : index
    %c0_0 = arith.constant 0 : index
    %c0_1 = arith.constant 0 : index
    %0 = vector.load %arg2[%c0, %c0_0, %c0_1] : memref<1x64x128xbf16, #tpu.memory_space<vmem>>, vector<1x64x128xbf16>
    %1 = vector.shape_cast %0 : vector<1x64x128xbf16> to vector<64x128xbf16>
    %2 = arith.extf %1 : vector<64x128xbf16> to vector<64x128xf32>
    %c0_2 = arith.constant 0 : index
    %c0_3 = arith.constant 0 : index
    %c0_4 = arith.constant 0 : index
    %3 = vector.load %arg3[%c0_2, %c0_3, %c0_4] : memref<1x1x128xf32, #tpu.memory_space<vmem>>, vector<1x1x128xf32>
    %4 = vector.shape_cast %3 : vector<1x1x128xf32> to vector<1x128xf32>
    %5 = vector.broadcast %4 : vector<1x128xf32> to vector<64x128xf32>
    %6 = arith.mulf %2, %5 : vector<64x128xf32>
    %7 = arith.truncf %6 : vector<64x128xf32> to vector<64x128xbf16>
    %c0_5 = arith.constant 0 : index
    %c0_6 = arith.constant 0 : index
    %8 = vector.load %arg4[%c0_5, %c0_6] : memref<128x128xbf16, #tpu.memory_space<vmem>>, vector<128x128xbf16>
    %cst = arith.constant dense<0.000000e+00> : vector<64x128xf32>
    %9 = tpu.matmul %7, %8, %cst {dimension_numbers = #tpu.dot_dimension_numbers<[1], [0], [0], [1], [0, 0, 1, 1], [], []>} : vector<64x128xbf16>, vector<128x128xbf16>, vector<64x128xf32> -> vector<64x128xf32>
    %c0_7 = arith.constant 0 : index
    %c0_8 = arith.constant 0 : index
    %10 = vector.load %arg5[%c0_7, %c0_8] : memref<1x128xf32, #tpu.memory_space<vmem>>, vector<1x128xf32>
    %11 = vector.broadcast %10 : vector<1x128xf32> to vector<64x128xf32>
    %12 = arith.addf %9, %11 : vector<64x128xf32>
    %13 = arith.truncf %12 : vector<64x128xf32> to vector<64x128xbf16>
    %c0_9 = arith.constant 0 : index
    %c0_10 = arith.constant 0 : index
    %c0_11 = arith.constant 0 : index
    %14 = vector.load %arg6[%c0_9, %c0_10, %c0_11] : memref<1x64x128xbf16, #tpu.memory_space<vmem>>, vector<1x64x128xbf16>
    %15 = vector.shape_cast %14 : vector<1x64x128xbf16> to vector<64x128xbf16>
    %16 = vector.shape_cast %13 : vector<64x128xbf16> to vector<1x64x128xbf16>
    tpu.vector_store %arg6[%c0_9, %c0_10, %c0_11], %16 {strides = array<i32>} : memref<1x64x128xbf16, #tpu.memory_space<vmem>>, vector<1x64x128xbf16>,
    return
  }
  func.func @transform_0(%arg0: i32, %arg1: i32) -> (i32, i32, i32) {
    %c0_i32 = arith.constant 0 : i32
    %c0_i32_0 = arith.constant 0 : i32
    return %arg0, %arg1, %c0_i32 : i32, i32, i32
  }
  func.func @transform_1(%arg0: i32, %arg1: i32) -> (i32, i32, i32) {
    %c0_i32 = arith.constant 0 : i32
    %c0_i32_0 = arith.constant 0 : i32
    %c0_i32_1 = arith.constant 0 : i32
    return %arg0, %c0_i32, %c0_i32_0 : i32, i32, i32
  }
  func.func @transform_2(%arg0: i32, %arg1: i32) -> (i32, i32) {
    %c0_i32 = arith.constant 0 : i32
    %c0_i32_0 = arith.constant 0 : i32
    %c0_i32_1 = arith.constant 0 : i32
    return %c0_i32, %c0_i32_0 : i32, i32
  }
  func.func @transform_3(%arg0: i32, %arg1: i32) -> (i32, i32) {
    %c0_i32 = arith.constant 0 : i32
    %c0_i32_0 = arith.constant 0 : i32
    %c0_i32_1 = arith.constant 0 : i32
    return %c0_i32, %c0_i32_0 : i32, i32
  }
  func.func @transform_4(%arg0: i32, %arg1: i32) -> (i32, i32, i32) {
    %c0_i32 = arith.constant 0 : i32
    %c0_i32_0 = arith.constant 0 : i32
    return %arg0, %arg1, %c0_i32 : i32, i32, i32
  }
}

</mosaic_0001>

<bundles_post_ra>
// kernel: forward.10
= control target key start
LH: loop header
LB: loop body
LE: loop exit
PB: predicated region body
PF: predicated region fallthrough
CT: control target
= control target key end

     0   :  { %s411_s1 = inlined_call_operand.vmem [shape: bf16[128,128], index: 1, kind: input, shape index: {}]   ;;  %s412_s2 = inlined_call_operand.vmem [shape: f32[1,128], index: 2, kind: input, shape index: {}, may-alias: {2,4}]   ;;  %s413_s0 = inlined_call_operand.vmem [shape: f32[8,128], index: 0, kind: input, shape index: {}]   ;;  %s414_s4 = inlined_call_operand.vmem [shape: f32[1,128], index: 4, kind: input, shape index: {}, may-alias: {2,4}]   ;;  %s415_s3 = inlined_call_operand.vmem [shape: bf16[128,128], index: 3, kind: input, shape index: {}]   ;;  %s416_s5 = inlined_call_operand.vmem [shape: f32[8,128], index: 5, kind: output, shape index: {}]  }
   0x1   :  { %v302_v0 = vld [vmem:[%s411_s1 + $0x38] sm:$0xff]  ;;  %v301_v1 = vld [vmem:[%s411_s1 + $0x30] sm:$0xff]  ;;  %v300_v2 = vld [vmem:[%s411_s1 + $0x28] sm:$0xff] }
   0x2   :  { %90 = vmatpush.bf16.msra.mxu0 %v302_v0  ;;  %v299_v3 = vld [vmem:[%s411_s1 + $0x20] sm:$0xff]  ;;  %v298_v4 = vld [vmem:[%s411_s1 + $0x18] sm:$0xff]  ;;  %v297_v5 = vld [vmem:[%s411_s1 + $0x10] sm:$0xff] }
   0x3   :  { %v296_v6 = vld [vmem:[%s411_s1 + $0x8] sm:$0xff]  ;;  %v295_v7 = vld [vmem:[%s411_s1] sm:$0xff]  ;;  %v310_v10 = vld [vmem:[%s415_s3 + $0x38] sm:$0xff] }
   0x4   :  { %v20_v8 = vld [vmem:[%s413_s0] sm:$0xff]  ;;  %192 = vmatpush.bf16.msra.mxu1 %v310_v10  ;;  %v309_v11 = vld [vmem:[%s415_s3 + $0x30] sm:$0xff]  ;;  %v308_v12 = vld [vmem:[%s415_s3 + $0x28] sm:$0xff] }
   0x5   :  { %v21_v9 = vpack.c.bf16 %v20_v8, %v20_v8  ;;  %v307_v13 = vld [vmem:[%s415_s3 + $0x20] sm:$0xff]  ;;  %v306_v14 = vld [vmem:[%s415_s3 + $0x18] sm:$0xff]  ;;  %v305_v15 = vld [vmem:[%s415_s3 + $0x10] sm:$0xff] }
   0x6   :  { %91 = vmatpush.bf16.msra.mxu0 %v301_v1  ;;  %v304_v16 = vld [vmem:[%s415_s3 + $0x8] sm:$0xff]  ;;  %v303_v17 = vld [vmem:[%s415_s3] sm:$0xff] }
   0x7   :  { %v311_v18 = vld [vmem:[%s412_s2] ss:$0 sm:$0xff] }
   0x8   :  { %193 = vmatpush.bf16.msra.mxu1 %v309_v11  ;;  %v312_v37 = vld [vmem:[%s414_s4] ss:$0 sm:$0xff] }
   0xa   :  { %92 = vmatpush.bf16.msra.mxu0 %v300_v2 }
   0xc   :  { %194 = vmatpush.bf16.msra.mxu1 %v308_v12 }
   0xe   :  { %93 = vmatpush.bf16.msra.mxu0 %v299_v3 }
  0x10   :  { %195 = vmatpush.bf16.msra.mxu1 %v307_v13 }
  0x12   :  { %94 = vmatpush.bf16.msra.mxu0 %v298_v4 }
  0x14   :  { %196 = vmatpush.bf16.msra.mxu1 %v306_v14 }
  0x16   :  { %95 = vmatpush.bf16.msra.mxu0 %v297_v5 }
  0x18   :  { %197 = vmatpush.bf16.msra.mxu1 %v305_v15 }
  0x1a   :  { %96 = vmatpush.bf16.msra.mxu0 %v296_v6 }
  0x1c   :  { %198 = vmatpush.bf16.msra.mxu1 %v304_v16 }
  0x1e   :  { %97 = vmatpush.bf16.msra.mxu0 %v295_v7 }
  0x20   :  { %199 = vmatpush.bf16.msra.mxu1 %v303_v17 }
  0x21   :  { %98 = vmatmul.bf16.vlgmr.msra.gmra.mxu0 %v21_v9 }
  0x9e   :  { %v99_v19 = vpop.f32.mrf.mxu0 }
  0x9f   :  { %v100_v20 = vadd.f32 %v311_v18, %v99_v19 }
  0xa1   :  { %v261_v21 = vmul.f32 -1.442695, %v100_v20 }
  0xa3   :  { %313 = vpow2.f32 %v261_v21 }
  0xa6   :  { %v101_v22 = vpop.f32.mrf.mxu0 }
  0xa9   :  { %v314_v23 = vpop.eup %313 }
  0xaa   :  { %v106_v24 = vadd.f32 1.0, %v314_v23 }
  0xac   :  { %315 = vrcp.f32 %v106_v24  ;;  %v118_v28 = vand.u32 2147483648, %v106_v24  ;;  %v116_v30 = vand.u32 2147483647, %v106_v24  ;;  %vm112_vm1 = vweird.f32 %v106_v24 }
  0xae   :  { %v119_v32 = vor.u32 1.1754944e-38, %v118_v28  ;;  %vm117_vm3 = vcmp.eq.f32.partialorder %v116_v30, 8.507059e+37 }
  0xb2   :  { %v316_v25 = vpop.eup %315 }
  0xb3   :  { %v108_v26 = vmul.f32 %v316_v25, %v106_v24  ;;  %vm113_vm0 = vweird.f32 %v316_v25 }
  0xb4   :  { %vm114_vm2 = vmor %vm112_vm1, %vm113_vm0 }
  0xb5   :  { %v109_v27 = vsub.f32 1.0, %v108_v26 }
  0xb7   :  { %v110_v29 = vmul.f32 %v316_v25, %v109_v27 }
  0xb9   :  { %v111_v31 = vadd.f32 %v316_v25, %v110_v29 }
  0xbb   :  { %v115_v33 = vsel %vm114_vm2, %v316_v25, %v111_v31 }
  0xbc   :  { %v120_v34 = vsel %vm117_vm3, %v119_v32, %v115_v33 }
  0xbd   :  { %v122_v35 = vmul.f32 %v120_v34, %v100_v20 }
  0xbf   :  { %v123_v36 = vpack.c.bf16 %v122_v35, %v122_v35 }
  0xc1   :  { %200 = vmatmul.bf16.vlgmr.msra.gmra.mxu1 %v123_v36 }
 0x13e   :  { %v201_v38 = vpop.f32.mrf.mxu1 }
 0x13f   :  { %v202_v39 = vadd.f32 %v312_v37, %v201_v38 }
 0x141   :  { %v294_v40 = vmul.f32 -1.442695, %v202_v39 }
 0x143   :  { %317 = vpow2.f32 %v294_v40 }
 0x146   :  { %v203_v41 = vpop.f32.mrf.mxu1 }
 0x149   :  { %v318_v42 = vpop.eup %317 }
 0x14a   :  { %v208_v43 = vadd.f32 1.0, %v318_v42 }
 0x14c   :  { %319 = vrcp.f32 %v208_v43  ;;  %v220_v47 = vand.u32 2147483648, %v208_v43  ;;  %v218_v49 = vand.u32 2147483647, %v208_v43  ;;  %vm214_vm5 = vweird.f32 %v208_v43 }
 0x14e   :  { %v221_v51 = vor.u32 1.1754944e-38, %v220_v47  ;;  %vm219_vm7 = vcmp.eq.f32.partialorder %v218_v49, 8.507059e+37 }
 0x152   :  { %v320_v44 = vpop.eup %319 }
 0x153   :  { %v210_v45 = vmul.f32 %v320_v44, %v208_v43  ;;  %vm215_vm4 = vweird.f32 %v320_v44 }
 0x154   :  { %vm216_vm6 = vmor %vm214_vm5, %vm215_vm4 }
 0x155   :  { %v211_v46 = vsub.f32 1.0, %v210_v45 }
 0x157   :  { %v212_v48 = vmul.f32 %v320_v44, %v211_v46 }
 0x159   :  { %v213_v50 = vadd.f32 %v320_v44, %v212_v48 }
 0x15b   :  { %v217_v52 = vsel %vm216_vm6, %v320_v44, %v213_v50 }
 0x15c   :  { %v222_v53 = vsel %vm219_vm7, %v221_v51, %v217_v52 }
 0x15d   :  { %224 = vst [vmem:[%s416_s5] sm:$0xff] %v222_v53 }

// kernel: forward.8
= control target key start
LH: loop header
LB: loop body
LE: loop exit
PB: predicated region body
PF: predicated region fallthrough
CT: control target
= control target key end

     0   :  { %s4591_s1 = inlined_call_operand.vmem [shape: bf16[128,128], index: 1, kind: input, shape index: {}]   ;;  %s4592_s2 = inlined_call_operand.vmem [shape: f32[1,128], index: 2, kind: input, shape index: {}]   ;;  %s4593_s0 = inlined_call_operand.vmem [shape: bf16[512,128], index: 0, kind: input, shape index: {}]   ;;  %s4594_s3 = inlined_call_operand.vmem [shape: bf16[512,128], index: 3, kind: output, shape index: {}]  }
   0x1   :  { %v2182_v0 = vld [vmem:[%s4591_s1 + $0x38] sm:$0xff]  ;;  %v2181_v1 = vld [vmem:[%s4591_s1 + $0x30] sm:$0xff]  ;;  %v2180_v2 = vld [vmem:[%s4591_s1 + $0x28] sm:$0xff] }
   0x2   :  { %338 = vmatpush.bf16.msra.mxu0 %v2182_v0  ;;  %2374 = vmatpush.bf16.msra.mxu1 %v2182_v0  ;;  %v2179_v3 = vld [vmem:[%s4591_s1 + $0x20] sm:$0xff]  ;;  %v2178_v4 = vld [vmem:[%s4591_s1 + $0x18] sm:$0xff]  ;;  %v2177_v5 = vld [vmem:[%s4591_s1 + $0x10] sm:$0xff] }
   0x3   :  { %2375 = vmatpush.bf16.msra.mxu2 %v2182_v0  ;;  %2376 = vmatpush.bf16.msra.mxu3 %v2182_v0  ;;  %v2176_v6 = vld [vmem:[%s4591_s1 + $0x8] sm:$0xff]  ;;  %v2175_v7 = vld [vmem:[%s4591_s1] sm:$0xff]  ;;  %v2145_v16 = vld [vmem:[%s4593_s0 + $0x10] sm:$0xff] }
   0x4   :  { %v2143_v8 = vld [vmem:[%s4593_s0] sm:$0xff]  ;;  %v2144_v12 = vld [vmem:[%s4593_s0 + $0x8] sm:$0xff]  ;;  %v2153_v17 = vld [vmem:[%s4593_s0 + $0x50] sm:$0xff] }
   0x5   :  { %v2151_v9 = vld [vmem:[%s4593_s0 + $0x40] sm:$0xff]  ;;  %v2152_v13 = vld [vmem:[%s4593_s0 + $0x48] sm:$0xff]  ;;  %v2161_v18 = vld [vmem:[%s4593_s0 + $0x90] sm:$0xff] }
   0x6   :  { %339 = vmatpush.bf16.msra.mxu0 %v2181_v1  ;;  %2377 = vmatpush.bf16.msra.mxu1 %v2181_v1  ;;  %v2159_v10 = vld [vmem:[%s4593_s0 + $0x80] sm:$0xff]  ;;  %v2160_v14 = vld [vmem:[%s4593_s0 + $0x88] sm:$0xff]  ;;  %v2169_v19 = vld [vmem:[%s4593_s0 + $0xd0] sm:$0xff] }
   0x7   :  { %2378 = vmatpush.bf16.msra.mxu2 %v2181_v1  ;;  %2379 = vmatpush.bf16.msra.mxu3 %v2181_v1  ;;  %v2167_v11 = vld [vmem:[%s4593_s0 + $0xc0] sm:$0xff]  ;;  %v2168_v15 = vld [vmem:[%s4593_s0 + $0xc8] sm:$0xff]  ;;  %v2146_v20 = vld [vmem:[%s4593_s0 + $0x18] sm:$0xff] }
   0x8   :  { %v2154_v21 = vld [vmem:[%s4593_s0 + $0x58] sm:$0xff]  ;;  %v2147_v24 = vld [vmem:[%s4593_s0 + $0x20] sm:$0xff]  ;;  %v2148_v28 = vld [vmem:[%s4593_s0 + $0x28] sm:$0xff] }
   0x9   :  { %v2162_v22 = vld [vmem:[%s4593_s0 + $0x98] sm:$0xff]  ;;  %v2155_v25 = vld [vmem:[%s4593_s0 + $0x60] sm:$0xff]  ;;  %v2156_v29 = vld [vmem:[%s4593_s0 + $0x68] sm:$0xff] }
   0xa   :  { %340 = vmatpush.bf16.msra.mxu0 %v2180_v2  ;;  %2380 = vmatpush.bf16.msra.mxu1 %v2180_v2  ;;  %v2170_v23 = vld [vmem:[%s4593_s0 + $0xd8] sm:$0xff]  ;;  %v2163_v26 = vld [vmem:[%s4593_s0 + $0xa0] sm:$0xff]  ;;  %v2164_v30 = vld [vmem:[%s4593_s0 + $0xa8] sm:$0xff] }
   0xb   :  { %2381 = vmatpush.bf16.msra.mxu2 %v2180_v2  ;;  %2382 = vmatpush.bf16.msra.mxu3 %v2180_v2  ;;  %v2171_v27 = vld [vmem:[%s4593_s0 + $0xe0] sm:$0xff]  ;;  %v2172_v31 = vld [vmem:[%s4593_s0 + $0xe8] sm:$0xff]  ;;  %v2149_v32 = vld [vmem:[%s4593_s0 + $0x30] sm:$0xff] }
   0xc   :  { %v2157_v33 = vld [vmem:[%s4593_s0 + $0x70] sm:$0xff]  ;;  %v2150_v36 = vld [vmem:[%s4593_s0 + $0x38] sm:$0xff]  ;;  %v2800_v40 = vld [vmem:[%s4592_s2] ss:$0 sm:$0xff] }
   0xd   :  { %v2165_v34 = vld [vmem:[%s4593_s0 + $0xb0] sm:$0xff]  ;;  %v2158_v37 = vld [vmem:[%s4593_s0 + $0x78] sm:$0xff] }
   0xe   :  { %341 = vmatpush.bf16.msra.mxu0 %v2179_v3  ;;  %2383 = vmatpush.bf16.msra.mxu1 %v2179_v3  ;;  %v2173_v35 = vld [vmem:[%s4593_s0 + $0xf0] sm:$0xff]  ;;  %v2166_v38 = vld [vmem:[%s4593_s0 + $0xb8] sm:$0xff] }
   0xf   :  { %2384 = vmatpush.bf16.msra.mxu2 %v2179_v3  ;;  %2385 = vmatpush.bf16.msra.mxu3 %v2179_v3  ;;  %v2174_v39 = vld [vmem:[%s4593_s0 + $0xf8] sm:$0xff] }
  0x12   :  { %342 = vmatpush.bf16.msra.mxu0 %v2178_v4  ;;  %2386 = vmatpush.bf16.msra.mxu1 %v2178_v4 }
  0x13   :  { %2387 = vmatpush.bf16.msra.mxu2 %v2178_v4  ;;  %2388 = vmatpush.bf16.msra.mxu3 %v2178_v4 }
  0x16   :  { %343 = vmatpush.bf16.msra.mxu0 %v2177_v5  ;;  %2389 = vmatpush.bf16.msra.mxu1 %v2177_v5 }
  0x17   :  { %2390 = vmatpush.bf16.msra.mxu2 %v2177_v5  ;;  %2391 = vmatpush.bf16.msra.mxu3 %v2177_v5 }
  0x1a   :  { %344 = vmatpush.bf16.msra.mxu0 %v2176_v6  ;;  %2392 = vmatpush.bf16.msra.mxu1 %v2176_v6 }
  0x1b   :  { %2393 = vmatpush.bf16.msra.mxu2 %v2176_v6  ;;  %2394 = vmatpush.bf16.msra.mxu3 %v2176_v6 }
  0x1e   :  { %345 = vmatpush.bf16.msra.mxu0 %v2175_v7  ;;  %2395 = vmatpush.bf16.msra.mxu1 %v2175_v7 }
  0x1f   :  { %2396 = vmatpush.bf16.msra.mxu2 %v2175_v7  ;;  %2397 = vmatpush.bf16.msra.mxu3 %v2175_v7 }
  0x21   :  { %346 = vmatmul.bf16.vlgmr.msra.gmra.mxu0 %v2143_v8  ;;  %386 = vmatmul.bf16.vlgmr.msra.gmra.mxu1 %v2151_v9 }
  0x22   :  { %426 = vmatmul.bf16.vlgmr.msra.gmra.mxu2 %v2159_v10  ;;  %466 = vmatmul.bf16.vlgmr.msra.gmra.mxu3 %v2167_v11 }
  0x31   :  { %351 = vmatmul.bf16.gmra.mxu0 %v2144_v12  ;;  %391 = vmatmul.bf16.gmra.mxu1 %v2152_v13 }
  0x32   :  { %431 = vmatmul.bf16.gmra.mxu2 %v2160_v14  ;;  %471 = vmatmul.bf16.gmra.mxu3 %v2168_v15 }
  0x41   :  { %356 = vmatmul.bf16.gmra.mxu0 %v2145_v16  ;;  %396 = vmatmul.bf16.gmra.mxu1 %v2153_v17 }
  0x42   :  { %436 = vmatmul.bf16.gmra.mxu2 %v2161_v18  ;;  %476 = vmatmul.bf16.gmra.mxu3 %v2169_v19 }
  0x51   :  { %361 = vmatmul.bf16.gmra.mxu0 %v2146_v20  ;;  %401 = vmatmul.bf16.gmra.mxu1 %v2154_v21 }
  0x52   :  { %441 = vmatmul.bf16.gmra.mxu2 %v2162_v22  ;;  %481 = vmatmul.bf16.gmra.mxu3 %v2170_v23 }
  0x61   :  { %366 = vmatmul.bf16.gmra.mxu0 %v2147_v24  ;;  %406 = vmatmul.bf16.gmra.mxu1 %v2155_v25 }
  0x62   :  { %446 = vmatmul.bf16.gmra.mxu2 %v2163_v26  ;;  %486 = vmatmul.bf16.gmra.mxu3 %v2171_v27 }
  0x71   :  { %371 = vmatmul.bf16.gmra.mxu0 %v2148_v28  ;;  %411 = vmatmul.bf16.gmra.mxu1 %v2156_v29 }
  0x72   :  { %451 = vmatmul.bf16.gmra.mxu2 %v2164_v30  ;;  %491 = vmatmul.bf16.gmra.mxu3 %v2172_v31 }
  0x81   :  { %376 = vmatmul.bf16.gmra.mxu0 %v2149_v32  ;;  %416 = vmatmul.bf16.gmra.mxu1 %v2157_v33 }
  0x82   :  { %456 = vmatmul.bf16.gmra.mxu2 %v2165_v34  ;;  %496 = vmatmul.bf16.gmra.mxu3 %v2173_v35 }
  0x91   :  { %381 = vmatmul.bf16.gmra.mxu0 %v2150_v36  ;;  %421 = vmatmul.bf16.gmra.mxu1 %v2158_v37 }
  0x92   :  { %461 = vmatmul.bf16.gmra.mxu2 %v2166_v38  ;;  %501 = vmatmul.bf16.gmra.mxu3 %v2174_v39 }
  0x9e   :  { %v347_v41 = vpop.f32.mrf.mxu0  ;;  %v387_v42 = vpop.f32.mrf.mxu1 }
  0x9f   :  { %v2803_v43 = vadd.f32 %v2800_v40, %v347_v41  ;;  %v2806_v44 = vadd.f32 %v2800_v40, %v387_v42 }
  0xa1   :  { %v2079_v45 = vmul.f32 -1.442695, %v2803_v43  ;;  %v2095_v46 = vmul.f32 -1.442695, %v2806_v44 }
  0xa3   :  { %2399 = vpow2.f32 %v2079_v45 }
  0xa4   :  { %2401 = vpow2.f32 %v2095_v46 }
  0xa5   :  { %v427_v47 = vpop.f32.mrf.mxu2  ;;  %v467_v48 = vpop.f32.mrf.mxu3 }
  0xa6   :  { %v2811_v49 = vadd.f32 %v2800_v40, %v427_v47  ;;  %v2814_v50 = vadd.f32 %v2800_v40, %v467_v48  ;;  %v349_v51 = vpop.f32.mrf.mxu0  ;;  %v389_v52 = vpop.f32.mrf.mxu1 }
  0xa7   :  { %v2817_v53 = vadd.f32 %v2800_v40, %v349_v51  ;;  %v2820_v54 = vadd.f32 %v2800_v40, %v389_v52 }
  0xa8   :  { %v2111_v55 = vmul.f32 -1.442695, %v2811_v49  ;;  %v2127_v56 = vmul.f32 -1.442695, %v2814_v50 }
  0xa9   :  { %v2400_v57 = vpop.eup %2399  ;;  %v2080_v60 = vmul.f32 -1.442695, %v2817_v53  ;;  %v2096_v62 = vmul.f32 -1.442695, %v2820_v54 }
  0xaa   :  { %v2402_v58 = vpop.eup %2401  ;;  %v2824_v59 = vadd.f32 1.0, %v2400_v57  ;;  %2403 = vpow2.f32 %v2111_v55 }
  0xab   :  { %v2827_v61 = vadd.f32 1.0, %v2402_v58  ;;  %2405 = vpow2.f32 %v2127_v56 }
  0xac   :  { %2407 = vrcp.f32 %v2824_v59  ;;  %v772_v11 = vand.u32 2147483647, %v2824_v59  ;;  %v774_v12 = vand.u32 2147483648, %v2824_v59  ;;  %vm768_vm0 = vweird.f32 %v2824_v59 }
  0xad   :  { %2409 = vrcp.f32 %v2827_v61  ;;  %v429_v63 = vpop.f32.mrf.mxu2  ;;  %v469_v0 = vpop.f32.mrf.mxu3  ;;  %vm1008_vm1 = vweird.f32 %v2827_v61  ;;  %v1012_v20 = vand.u32 2147483647, %v2827_v61  ;;  %v1014_v21 = vand.u32 2147483648, %v2827_v61 }
  0xae   :  { %2411 = vpow2.f32 %v2080_v60  ;;  %v2833_v1 = vadd.f32 %v2800_v40, %v429_v63  ;;  %v2836_v3 = vadd.f32 %v2800_v40, %v469_v0  ;;  %v352_v13 = vpop.f32.mrf.mxu0  ;;  %v392_v14 = vpop.f32.mrf.mxu1  ;;  %vm2867_vm2 = vcmp.eq.f32.partialorder %v772_v11, 8.507059e+37 }
  0xaf   :  { %2413 = vpow2.f32 %v2096_v62  ;;  %v2861_v23 = vadd.f32 %v2800_v40, %v352_v13  ;;  %v2864_v24 = vadd.f32 %v2800_v40, %v392_v14  ;;  %v775_v27 = vor.u32 1.1754944e-38, %v774_v12 }
  0xb0   :  { %v2404_v2 = vpop.eup %2403  ;;  %v2112_v8 = vmul.f32 -1.442695, %v2833_v1  ;;  %v2128_v17 = vmul.f32 -1.442695, %v2836_v3  ;;  %vm2881_vm4 = vcmp.eq.f32.partialorder %v1012_v20, 8.507059e+37  ;;  %v1015_v37 = vor.u32 1.1754944e-38, %v1014_v21 }
  0xb1   :  { %v2406_v4 = vpop.eup %2405  ;;  %v2838_v5 = vadd.f32 1.0, %v2404_v2  ;;  %v2081_v39 = vmul.f32 -1.442695, %v2861_v23  ;;  %v2892_v41 = vmul.f32 -1.442695, %v2864_v24 }
  0xb2   :  { %v2840_v6 = vpop.eup %2407  ;;  %v2842_v7 = vadd.f32 1.0, %v2406_v4 }
  0xb3   :  { %v2845_v9 = vpop.eup %2409  ;;  %v764_v10 = vmul.f32 %v2840_v6, %v2824_v59  ;;  %2415 = vrcp.f32 %v2838_v5  ;;  %vm769_vm3 = vweird.f32 %v2840_v6  ;;  %v1252_v31 = vand.u32 2147483647, %v2838_v5 }
  0xb4   :  { %v2412_v15 = vpop.eup %2411  ;;  %v1004_v16 = vmul.f32 %v2845_v9, %v2827_v61  ;;  %2417 = vrcp.f32 %v2842_v7  ;;  %v1254_v35 = vand.u32 2147483648, %v2838_v5  ;;  %v1494_v36 = vand.u32 2147483648, %v2842_v7  ;;  %vm2904_vm7 = vmor %vm768_vm0, %vm769_vm3 }
  0xb5   :  { %v2414_v18 = vpop.eup %2413  ;;  %v765_v19 = vsub.f32 1.0, %v764_v10  ;;  %2419 = vpow2.f32 %v2112_v8  ;;  %v2871_v28 = vadd.f32 1.0, %v2412_v15  ;;  %v432_v42 = vpop.f32.mrf.mxu2  ;;  %vm1009_vm5 = vweird.f32 %v2845_v9 }
  0xb6   :  { %v1005_v22 = vsub.f32 1.0, %v1004_v16  ;;  %v2873_v29 = vadd.f32 1.0, %v2414_v18  ;;  %2421 = vpow2.f32 %v2128_v17  ;;  %vm1248_vm6 = vweird.f32 %v2838_v5  ;;  %vm2929_vm10 = vmor %vm1008_vm1, %vm1009_vm5  ;;  %v354_v0 = vpop.f32.mrf.mxu0  ;;  %v394_v15 = vpop.f32.mrf.mxu1 }
  0xb7   :  { %v766_v25 = vmul.f32 %v2840_v6, %v765_v19  ;;  %2423 = vrcp.f32 %v2871_v28  ;;  %v1492_v55 = vand.u32 2147483647, %v2842_v7  ;;  %v787_v56 = vand.u32 2147483647, %v2871_v28 }
  0xb8   :  { %v1006_v30 = vmul.f32 %v2845_v9, %v1005_v22  ;;  %2425 = vrcp.f32 %v2873_v29  ;;  %vm2915_vm8 = vcmp.eq.f32.partialorder %v1252_v31, 8.507059e+37  ;;  %v1255_v59 = vor.u32 1.1754944e-38, %v1254_v35 }
  0xb9   :  { %v2878_v32 = vpop.eup %2415  ;;  %v767_v33 = vadd.f32 %v2840_v6, %v766_v25  ;;  %vm1488_vm9 = vweird.f32 %v2842_v7  ;;  %v2920_v60 = vor.u32 1.1754944e-38, %v1494_v36  ;;  %v2923_v62 = vadd.f32 %v2800_v40, %v432_v42 }
  0xba   :  { %v1244_v38 = vmul.f32 %v2878_v32, %v2838_v5  ;;  %v2894_v45 = vpop.eup %2417  ;;  %v1007_v46 = vadd.f32 %v2845_v9, %v1006_v30  ;;  %vm1249_vm11 = vweird.f32 %v2878_v32  ;;  %vm783_vm12 = vweird.f32 %v2871_v28 }
  0xbb   :  { %v2420_v47 = vpop.eup %2419  ;;  %v1484_v52 = vmul.f32 %v2894_v45, %v2842_v7  ;;  %v771_v57 = vsel %vm2904_vm7, %v2840_v6, %v767_v33  ;;  %v789_v10 = vand.u32 2147483648, %v2871_v28  ;;  %2427 = vpow2.f32 %v2081_v39  ;;  %vm2966_vm15 = vmor %vm1248_vm6, %vm1249_vm11 }
  0xbc   :  { %v1245_v51 = vsub.f32 1.0, %v1244_v38  ;;  %v2422_v63 = vpop.eup %2421  ;;  %v1011_v8 = vsel %vm2929_vm10, %v2845_v9, %v1007_v46  ;;  %v2940_v11 = vadd.f32 1.0, %v2420_v47  ;;  %v776_v61 = vsel %vm2867_vm2, %v775_v27, %v771_v57 }
  0xbd   :  { %v1485_v4 = vsub.f32 1.0, %v1484_v52  ;;  %v2424_v6 = vpop.eup %2423  ;;  %vm2947_vm13 = vcmp.eq.f32.partialorder %v787_v56, 8.507059e+37  ;;  %vm2951_vm14 = vcmp.eq.f32.partialorder %v1492_v55, 8.507059e+37  ;;  %v1027_v17 = vand.u32 2147483647, %v2873_v29 }
  0xbe   :  { %v1246_v2 = vmul.f32 %v2878_v32, %v1245_v51  ;;  %v779_v14 = vmul.f32 %v2424_v6, %v2871_v28  ;;  %v2426_v16 = vpop.eup %2425  ;;  %v1029_v18 = vand.u32 2147483648, %v2873_v29  ;;  %2429 = vrcp.f32 %v2940_v11 }
  0xbf   :  { %v1486_v13 = vmul.f32 %v2894_v45, %v1485_v4  ;;  %v2958_v19 = vadd.f32 1.0, %v2422_v63  ;;  %v1016_v20 = vsel %vm2881_vm4, %v1015_v37, %v1011_v8  ;;  %v1019_v25 = vmul.f32 %v2426_v16, %v2873_v29 }
  0xc0   :  { %v1247_v12 = vadd.f32 %v2878_v32, %v1246_v2  ;;  %v780_v22 = vsub.f32 1.0, %v779_v14  ;;  %vm1023_vm0 = vweird.f32 %v2873_v29  ;;  %v1723_v26 = vmul.f32 %v776_v61, %v2803_v43 }
  0xc1   :  { %v1487_v30 = vadd.f32 %v2894_v45, %v1486_v13  ;;  %vm1489_vm1 = vweird.f32 %v2894_v45  ;;  %vm784_vm2 = vweird.f32 %v2424_v6  ;;  %v790_v31 = vor.u32 1.1754944e-38, %v789_v10  ;;  %v2428_v34 = vpop.eup %2427 }
  0xc2   :  { %v1251_v27 = vsel %vm2966_vm15, %v2878_v32, %v1247_v12  ;;  %v781_v5 = vmul.f32 %v2424_v6, %v780_v22  ;;  %v1020_v33 = vsub.f32 1.0, %v1019_v25  ;;  %v1739_v35 = vmul.f32 %v1016_v20, %v2806_v44  ;;  %vm2988_vm4 = vmor %vm1488_vm9, %vm1489_vm1  ;;  %v434_v20 = vpop.f32.mrf.mxu2 }
  0xc3   :  { %vm2979_vm3 = vcmp.eq.f32.partialorder %v1027_v17, 8.507059e+37  ;;  %v1030_v43 = vor.u32 1.1754944e-38, %v1029_v18  ;;  %2431 = vrcp.f32 %v2958_v19  ;;  %v1256_v32 = vsel %vm2915_vm8, %v1255_v59, %v1251_v27  ;;  %vm785_vm6 = vmor %vm783_vm12, %vm784_vm2 }
  0xc4   :  { %v782_v38 = vadd.f32 %v2424_v6, %v781_v5  ;;  %v1021_v39 = vmul.f32 %v2426_v16, %v1020_v33  ;;  %vm1024_vm5 = vweird.f32 %v2426_v16  ;;  %v2430_v44 = vpop.eup %2429  ;;  %v1491_v42 = vsel %vm2988_vm4, %v2894_v45, %v1487_v30 }
  0xc5   :  { %vm1263_vm7 = vweird.f32 %v2940_v11  ;;  %v2999_v46 = vadd.f32 1.0, %v2428_v34  ;;  %2433 = vpow2.f32 %v2892_v41  ;;  %v1259_v48 = vmul.f32 %v2430_v44, %v2940_v11  ;;  %vm1025_vm8 = vmor %vm1023_vm0, %vm1024_vm5  ;;  %v472_v41 = vpop.f32.mrf.mxu3 }
  0xc6   :  { %v786_v7 = vsel %vm785_vm6, %v2424_v6, %v782_v38  ;;  %v1022_v47 = vadd.f32 %v2426_v16, %v1021_v39  ;;  %v1267_v51 = vand.u32 2147483647, %v2940_v11  ;;  %v3005_v52 = vmul.f32 %v1256_v32, %v2811_v49 }
  0xc7   :  { %v791_v45 = vsel %vm2947_vm13, %v790_v31, %v786_v7  ;;  %v1269_v28 = vand.u32 2147483648, %v2940_v11  ;;  %2435 = vrcp.f32 %v2999_v46  ;;  %v1496_v55 = vsel %vm2951_vm14, %v2920_v60, %v1491_v42  ;;  %v357_v7 = vpop.f32.mrf.mxu0 }
  0xc8   :  { %v1724_v56 = vmul.f32 %v791_v45, %v2817_v53  ;;  %v1026_v57 = vsel %vm1025_vm8, %v2426_v16, %v1022_v47  ;;  %v1260_v49 = vsub.f32 1.0, %v1259_v48  ;;  %vm1264_vm9 = vweird.f32 %v2430_v44 }
  0xc9   :  { %v2432_v58 = vpop.eup %2431  ;;  %v1031_v59 = vsel %vm2979_vm3, %v1030_v43, %v1026_v57  ;;  %v1507_v29 = vand.u32 2147483647, %v2958_v19  ;;  %v2113_v63 = vmul.f32 -1.442695, %v2923_v62  ;;  %vm3023_vm10 = vcmp.eq.f32.partialorder %v1267_v51, 8.507059e+37  ;;  %vm1265_vm11 = vmor %vm1263_vm7, %vm1264_vm9 }
  0xca   :  { %v2186_v2 = vpack.c.bf16 %v1724_v56, %v1723_v26  ;;  %v1740_v4 = vmul.f32 %v1031_v59, %v2820_v54  ;;  %v1261_v6 = vmul.f32 %v2430_v44, %v1260_v49  ;;  %v1499_v60 = vmul.f32 %v2432_v58, %v2958_v19  ;;  %v397_v56 = vpop.f32.mrf.mxu1 }
  0xcb   :  { %v2434_v8 = vpop.eup %2433  ;;  %v1270_v10 = vor.u32 1.1754944e-38, %v1269_v28  ;;  %v1509_v61 = vand.u32 2147483648, %v2958_v19  ;;  %2437 = vpow2.f32 %v2113_v63  ;;  %vm1503_vm12 = vweird.f32 %v2958_v19 }
  0xcc   :  { %2187 = vst [vmem:[%s4594_s3] sm:$0xff] %v2186_v2   ;;  %v2226_v12 = vpack.c.bf16 %v1740_v4, %v1739_v35  ;;  %v1262_v13 = vadd.f32 %v2430_v44, %v1261_v6  ;;  %v1500_v14 = vsub.f32 1.0, %v1499_v60  ;;  %v3031_v54 = vadd.f32 1.0, %v2434_v8 }
  0xcd   :  { %v3033_v16 = vpop.eup %2435  ;;  %vm3039_vm13 = vcmp.eq.f32.partialorder %v1507_v29, 8.507059e+37  ;;  %v3044_v17 = vadd.f32 %v2800_v40, %v472_v41  ;;  %v3047_v18 = vadd.f32 %v2800_v40, %v354_v0  ;;  %vm1504_vm14 = vweird.f32 %v2432_v58  ;;  %v474_v37 = vpop.f32.mrf.mxu3 }
  0xce   :  { %2350 = vst [vmem:[%s4594_s3 + $0x40] sm:$0xff] %v2226_v12   ;;  %v1266_v21 = vsel %vm1265_vm11, %v2430_v44, %v1262_v13  ;;  %v1501_v11 = vmul.f32 %v2432_v58, %v1500_v14  ;;  %v794_v22 = vmul.f32 %v3033_v16, %v2999_v46  ;;  %v1510_v26 = vor.u32 1.1754944e-38, %v1509_v61  ;;  %vm1505_vm15 = vmor %vm1503_vm12, %vm1504_vm14 }
  0xcf   :  { %v1271_v25 = vsel %vm3023_vm10, %v1270_v10, %v1266_v21  ;;  %2439 = vrcp.f32 %v3031_v54  ;;  %v3058_v27 = vadd.f32 %v2800_v40, %v394_v15  ;;  %v3062_v33 = vadd.f32 %v2800_v40, %v434_v20  ;;  %v437_v15 = vpop.f32.mrf.mxu2 }
  0xd0   :  { %v1756_v30 = vmul.f32 %v1271_v25, %v2833_v1  ;;  %v1502_v5 = vadd.f32 %v2432_v58, %v1501_v11  ;;  %v795_v31 = vsub.f32 1.0, %v794_v22  ;;  %v1771_v35 = vmul.f32 %v1496_v55, %v2814_v50  ;;  %v359_v22 = vpop.f32.mrf.mxu0 }
  0xd1   :  { %v2438_v34 = vpop.eup %2437  ;;  %v802_v36 = vand.u32 2147483647, %v2999_v46  ;;  %v2129_v43 = vmul.f32 -1.442695, %v3044_v17  ;;  %v2082_v32 = vmul.f32 -1.442695, %v3047_v18  ;;  %v3084_v51 = vadd.f32 %v2800_v40, %v474_v37 }
  0xd2   :  { %v2266_v1 = vpack.c.bf16 %v1756_v30, %v3005_v52  ;;  %v1506_v38 = vsel %vm1505_vm15, %v2432_v58, %v1502_v5  ;;  %v796_v39 = vmul.f32 %v3033_v16, %v795_v31  ;;  %v804_v44 = vand.u32 2147483648, %v2999_v46 }
  0xd3   :  { %v1511_v50 = vsel %vm3039_vm13, %v1510_v26, %v1506_v38  ;;  %v3075_v42 = vadd.f32 1.0, %v2438_v34  ;;  %2441 = vpow2.f32 %v2129_v43  ;;  %v2098_v19 = vmul.f32 -1.442695, %v3058_v27 }
  0xd4   :  { %2358 = vst [vmem:[%s4594_s3 + $0x80] sm:$0xff] %v2266_v1   ;;  %v1772_v47 = vmul.f32 %v1511_v50, %v2836_v3  ;;  %2443 = vpow2.f32 %v2082_v32  ;;  %v2114_v48 = vmul.f32 -1.442695, %v3062_v33  ;;  %v797_v45 = vadd.f32 %v3033_v16, %v796_v39 }
  0xd5   :  { %v3086_v52 = vpop.eup %2439  ;;  %vm798_vm0 = vweird.f32 %v2999_v46  ;;  %vm799_vm1 = vweird.f32 %v3033_v16  ;;  %2445 = vrcp.f32 %v3075_v42  ;;  %vm3094_vm2 = vcmp.eq.f32.partialorder %v802_v36, 8.507059e+37 }
  0xd6   :  { %v2306_v28 = vpack.c.bf16 %v1772_v47, %v1771_v35  ;;  %v1034_v3 = vmul.f32 %v3086_v52, %v3031_v54  ;;  %v1042_v55 = vand.u32 2147483647, %v3031_v54  ;;  %2447 = vpow2.f32 %v2098_v19  ;;  %vm3102_vm3 = vmor %vm798_vm0, %vm799_vm1 }
  0xd7   :  { %v805_v57 = vor.u32 1.1754944e-38, %v804_v44  ;;  %2449 = vpow2.f32 %v2114_v48  ;;  %v2130_v58 = vmul.f32 -1.442695, %v3084_v51  ;;  %v801_v29 = vsel %vm3102_vm3, %v3033_v16, %v797_v45  ;;  %v477_v16 = vpop.f32.mrf.mxu3  ;;  %v399_v44 = vpop.f32.mrf.mxu1 }
  0xd8   :  { %2366 = vst [vmem:[%s4594_s3 + $0xc0] sm:$0xff] %v2306_v28   ;;  %v1035_v49 = vsub.f32 1.0, %v1034_v3  ;;  %v1044_v63 = vand.u32 2147483648, %v3031_v54  ;;  %v1282_v0 = vand.u32 2147483647, %v3075_v42  ;;  %v3113_v2 = vadd.f32 %v2800_v40, %v357_v7 }
  0xd9   :  { %v2442_v59 = vpop.eup %2441  ;;  %v1284_v60 = vand.u32 2147483648, %v3075_v42  ;;  %2451 = vpow2.f32 %v2130_v58  ;;  %vm1038_vm4 = vweird.f32 %v3031_v54  ;;  %vm1039_vm5 = vweird.f32 %v3086_v52 }
  0xda   :  { %v2444_v4 = vpop.eup %2443  ;;  %v1036_v6 = vmul.f32 %v3086_v52, %v1035_v49  ;;  %v3117_v8 = vadd.f32 1.0, %v2442_v59  ;;  %vm3121_vm6 = vcmp.eq.f32.partialorder %v1042_v55, 8.507059e+37  ;;  %v806_v12 = vsel %vm3094_vm2, %v805_v57, %v801_v29  ;;  %vm3141_vm7 = vmor %vm1038_vm4, %vm1039_vm5 }
  0xdb   :  { %v2446_v53 = vpop.eup %2445  ;;  %v3125_v61 = vadd.f32 1.0, %v2444_v4  ;;  %v1045_v20 = vor.u32 1.1754944e-38, %v1044_v63  ;;  %v2083_v21 = vmul.f32 -1.442695, %v3113_v2  ;;  %v3135_v11 = vadd.f32 %v2800_v40, %v397_v56 }
  0xdc   :  { %v1037_v13 = vadd.f32 %v3086_v52, %v1036_v6  ;;  %v1274_v14 = vmul.f32 %v2446_v53, %v3075_v42  ;;  %2453 = vrcp.f32 %v3117_v8  ;;  %v2448_v9 = vpop.eup %2447  ;;  %vm1278_vm8 = vweird.f32 %v3075_v42 }
  0xdd   :  { %2455 = vrcp.f32 %v3125_v61  ;;  %v2450_v25 = vpop.eup %2449  ;;  %vm3146_vm9 = vcmp.eq.f32.partialorder %v1282_v0, 8.507059e+37  ;;  %v1285_v31 = vor.u32 1.1754944e-38, %v1284_v60  ;;  %v3151_v34 = vmul.f32 %v806_v12, %v2861_v23 }
  0xde   :  { %v1275_v30 = vsub.f32 1.0, %v1274_v14  ;;  %v1041_v35 = vsel %vm3141_vm7, %v3086_v52, %v1037_v13  ;;  %v3157_v54 = vadd.f32 %v2800_v40, %v437_v15  ;;  %v3160_v36 = vadd.f32 %v2800_v40, %v477_v16  ;;  %v439_v13 = vpop.f32.mrf.mxu2 }
  0xdf   :  { %v2452_v43 = vpop.eup %2451  ;;  %vm1279_vm10 = vweird.f32 %v2446_v53  ;;  %v3162_v37 = vadd.f32 1.0, %v2448_v9  ;;  %v3165_v1 = vadd.f32 %v2800_v40, %v359_v22  ;;  %v1524_v23 = vand.u32 2147483648, %v3117_v8 }
  0xe0   :  { %v1276_v32 = vmul.f32 %v2446_v53, %v1275_v30  ;;  %v3168_v38 = vadd.f32 1.0, %v2450_v25  ;;  %2457 = vpow2.f32 %v2083_v21  ;;  %v2099_v39 = vmul.f32 -1.442695, %v3135_v11  ;;  %vm1280_vm11 = vmor %vm1278_vm8, %vm1279_vm10 }
  0xe1   :  { %v1046_v19 = vsel %vm3121_vm6, %v1045_v20, %v1041_v35  ;;  %v817_v47 = vand.u32 2147483647, %v3125_v61  ;;  %2459 = vrcp.f32 %v3162_v37  ;;  %v819_v45 = vand.u32 2147483648, %v3125_v61 }
  0xe2   :  { %v3171_v50 = vpop.eup %2453  ;;  %v1277_v7 = vadd.f32 %v2446_v53, %v1276_v32  ;;  %2461 = vrcp.f32 %v3168_v38  ;;  %v3183_v28 = vadd.f32 1.0, %v2452_v43  ;;  %v1522_v41 = vand.u32 2147483647, %v3117_v8 }
  0xe3   :  { %v2456_v48 = vpop.eup %2455  ;;  %v1514_v52 = vmul.f32 %v3171_v50, %v3117_v8  ;;  %v3188_v56 = vadd.f32 %v2800_v40, %v399_v44  ;;  %vm813_vm12 = vweird.f32 %v3125_v61  ;;  %v1057_v42 = vand.u32 2147483647, %v3162_v37 }
  0xe4   :  { %v1281_v3 = vsel %vm1280_vm11, %v2446_v53, %v1277_v7  ;;  %v809_v55 = vmul.f32 %v2456_v48, %v3125_v61  ;;  %v1059_v57 = vand.u32 2147483648, %v3162_v37  ;;  %v3194_v49 = vmul.f32 %v1046_v19, %v2864_v24 }
  0xe5   :  { %v1515_v46 = vsub.f32 1.0, %v1514_v52  ;;  %v1286_v58 = vsel %vm3146_vm9, %v1285_v31, %v1281_v3  ;;  %vm1518_vm13 = vweird.f32 %v3117_v8  ;;  %v3199_v59 = vor.u32 1.1754944e-38, %v1524_v23 }
  0xe6   :  { %v810_v29 = vsub.f32 1.0, %v809_v55  ;;  %v2458_v63 = vpop.eup %2457  ;;  %vm3201_vm14 = vcmp.eq.f32.partialorder %v817_v47, 8.507059e+37  ;;  %v820_v4 = vor.u32 1.1754944e-38, %v819_v45  ;;  %vm1053_vm15 = vweird.f32 %v3162_v37 }
  0xe7   :  { %2463 = vrcp.f32 %v3183_v28  ;;  %v2460_v24 = vpop.eup %2459  ;;  %v1516_v6 = vmul.f32 %v3171_v50, %v1515_v46  ;;  %vm1519_vm0 = vweird.f32 %v3171_v50  ;;  %vm814_vm1 = vweird.f32 %v2456_v48 }
  0xe8   :  { %v811_v60 = vmul.f32 %v2456_v48, %v810_v29  ;;  %v2462_v53 = vpop.eup %2461  ;;  %v3210_v10 = vmul.f32 %v1286_v58, %v2923_v62  ;;  %v1049_v12 = vmul.f32 %v2460_v24, %v3162_v37  ;;  %vm3213_vm2 = vcmp.eq.f32.partialorder %v1057_v42, 8.507059e+37  ;;  %vm815_vm4 = vmor %vm813_vm12, %vm814_vm1 }
  0xe9   :  { %v1060_v14 = vor.u32 1.1754944e-38, %v1059_v57  ;;  %vm1293_vm3 = vweird.f32 %v3168_v38  ;;  %v1289_v16 = vmul.f32 %v2462_v53, %v3168_v38  ;;  %v1297_v9 = vand.u32 2147483647, %v3168_v38  ;;  %vm3241_vm8 = vmor %vm1518_vm13, %vm1519_vm0 }
  0xea   :  { %v812_v15 = vadd.f32 %v2456_v48, %v811_v60  ;;  %v1299_v20 = vand.u32 2147483648, %v3168_v38  ;;  %v1050_v62 = vsub.f32 1.0, %v1049_v12  ;;  %v1537_v21 = vand.u32 2147483647, %v3183_v28 }
  0xeb   :  { %v3224_v22 = vadd.f32 1.0, %v2458_v63  ;;  %2465 = vpow2.f32 %v2099_v39  ;;  %v1517_v25 = vadd.f32 %v3171_v50, %v1516_v6  ;;  %vm3227_vm5 = vcmp.eq.f32.partialorder %v1522_v41, 8.507059e+37 }
  0xec   :  { %v816_v30 = vsel %vm815_vm4, %v2456_v48, %v812_v15  ;;  %v1290_v5 = vsub.f32 1.0, %v1289_v16  ;;  %v2115_v31 = vmul.f32 -1.442695, %v3157_v54  ;;  %v1051_v43 = vmul.f32 %v2460_v24, %v1050_v62 }
  0xed   :  { %v2464_v35 = vpop.eup %2463  ;;  %v821_v61 = vsel %vm3201_vm14, %v820_v4, %v816_v30  ;;  %vm1054_vm6 = vweird.f32 %v2460_v24  ;;  %2467 = vrcp.f32 %v3224_v22  ;;  %vm1294_vm7 = vweird.f32 %v2462_v53 }
  0xee   :  { %v1726_v32 = vmul.f32 %v821_v61, %v3047_v18  ;;  %v1291_v23 = vmul.f32 %v2462_v53, %v1290_v5  ;;  %v1529_v39 = vmul.f32 %v2464_v35, %v3183_v28  ;;  %v1052_v19 = vadd.f32 %v2460_v24, %v1051_v43  ;;  %vm1055_vm10 = vmor %vm1053_vm15, %vm1054_vm6 }
  0xef   :  { %vm3245_vm9 = vcmp.eq.f32.partialorder %v1297_v9, 8.507059e+37  ;;  %v1300_v47 = vor.u32 1.1754944e-38, %v1299_v20  ;;  %v1539_v18 = vand.u32 2147483648, %v3183_v28  ;;  %2469 = vpow2.f32 %v2115_v31  ;;  %vm1295_vm11 = vmor %vm1293_vm3, %vm1294_vm7 }
  0xf0   :  { %v2191_v48 = vpack.c.bf16 %v1726_v32, %v3151_v34  ;;  %v1292_v52 = vadd.f32 %v2462_v53, %v1291_v23  ;;  %v1530_v45 = vsub.f32 1.0, %v1529_v39  ;;  %v1521_v3 = vsel %vm3241_vm8, %v3171_v50, %v1517_v25 }
  0xf1   :  { %v2466_v8 = vpop.eup %2465  ;;  %v1056_v41 = vsel %vm1055_vm10, %v2460_v24, %v1052_v19  ;;  %vm1534_vm12 = vweird.f32 %v2464_v35  ;;  %v2131_v55 = vmul.f32 -1.442695, %v3160_v36  ;;  %v2084_v58 = vmul.f32 -1.442695, %v3165_v1 }
  0xf2   :  { %2343 = vst [vmem:[%s4594_s3 + $0x8] sm:$0xff] %v2191_v48   ;;  %v1061_v34 = vsel %vm3213_vm2, %v1060_v14, %v1056_v41  ;;  %v1296_v37 = vsel %vm1295_vm11, %v2462_v53, %v1292_v52  ;;  %v1531_v46 = vmul.f32 %v2464_v35, %v1530_v45  ;;  %v3265_v42 = vadd.f32 1.0, %v2466_v8 }
  0xf3   :  { %v3267_v50 = vpop.eup %2467  ;;  %v1742_v57 = vmul.f32 %v1061_v34, %v3058_v27  ;;  %v1301_v38 = vsel %vm3245_vm9, %v1300_v47, %v1296_v37  ;;  %2471 = vpow2.f32 %v2131_v55  ;;  %vm1533_vm13 = vweird.f32 %v3183_v28 }
  0xf4   :  { %v1758_v29 = vmul.f32 %v1301_v38, %v3062_v33  ;;  %v1532_v63 = vadd.f32 %v2464_v35, %v1531_v46  ;;  %v824_v0 = vmul.f32 %v3267_v50, %v3224_v22  ;;  %v1526_v4 = vsel %vm3227_vm5, %v3199_v59, %v1521_v3  ;;  %vm1535_vm14 = vmor %vm1533_vm13, %vm1534_vm12 }
  0xf5   :  { %v2231_v27 = vpack.c.bf16 %v1742_v57, %v3194_v49  ;;  %v1540_v24 = vor.u32 1.1754944e-38, %v1539_v18  ;;  %2473 = vrcp.f32 %v3265_v42  ;;  %v2470_v6 = vpop.eup %2469  ;;  %vm1538_vm15 = vcmp.eq.f32.partialorder %v1537_v21, 8.507059e+37  ;;  %v479_v21 = vpop.f32.mrf.mxu3 }
  0xf6   :  { %v2271_v33 = vpack.c.bf16 %v1758_v29, %v3210_v10  ;;  %v1536_v60 = vsel %vm1535_vm14, %v2464_v35, %v1532_v63  ;;  %v825_v28 = vsub.f32 1.0, %v824_v0  ;;  %v3287_v12 = vadd.f32 1.0, %v2470_v6  ;;  %v362_v35 = vpop.f32.mrf.mxu0 }
  0xf7   :  { %2351 = vst [vmem:[%s4594_s3 + $0x48] sm:$0xff] %v2231_v27   ;;  %v1541_v53 = vsel %vm1538_vm15, %v1540_v24, %v1536_v60  ;;  %2475 = vpow2.f32 %v2084_v58  ;;  %v1773_v49 = vmul.f32 %v1526_v4, %v3044_v17  ;;  %v2100_v10 = vmul.f32 -1.442695, %v3188_v56  ;;  %v402_v58 = vpop.f32.mrf.mxu1 }
  0xf8   :  { %2359 = vst [vmem:[%s4594_s3 + $0x88] sm:$0xff] %v2271_v33   ;;  %v1774_v59 = vmul.f32 %v1541_v53, %v3084_v51  ;;  %v826_v15 = vmul.f32 %v3267_v50, %v825_v28  ;;  %2477 = vrcp.f32 %v3287_v12  ;;  %v832_v17 = vand.u32 2147483647, %v3224_v22 }
  0xf9   :  { %v2472_v14 = vpop.eup %2471  ;;  %2479 = vpow2.f32 %v2100_v10  ;;  %v834_v62 = vand.u32 2147483648, %v3224_v22  ;;  %v3304_v51 = vadd.f32 %v2800_v40, %v439_v13  ;;  %vm828_vm0 = vweird.f32 %v3224_v22 }
  0xfa   :  { %v2311_v16 = vpack.c.bf16 %v1774_v59, %v1773_v49  ;;  %v3297_v9 = vadd.f32 1.0, %v2472_v14  ;;  %v827_v30 = vadd.f32 %v3267_v50, %v826_v15  ;;  %vm829_vm1 = vweird.f32 %v3267_v50 }
  0xfb   :  { %v3299_v20 = vpop.eup %2473  ;;  %v1072_v5 = vand.u32 2147483647, %v3265_v42  ;;  %v1074_v31 = vand.u32 2147483648, %v3265_v42  ;;  %v2116_v32 = vmul.f32 -1.442695, %v3304_v51  ;;  %v3321_v23 = vadd.f32 %v2800_v40, %v479_v21  ;;  %vm3332_vm4 = vmor %vm828_vm0, %vm829_vm1 }
  0xfc   :  { %2367 = vst [vmem:[%s4594_s3 + $0xc8] sm:$0xff] %v2311_v16   ;;  %v1064_v25 = vmul.f32 %v3299_v20, %v3265_v42  ;;  %2481 = vrcp.f32 %v3297_v9  ;;  %vm3325_vm2 = vcmp.eq.f32.partialorder %v832_v17, 8.507059e+37  ;;  %v835_v19 = vor.u32 1.1754944e-38, %v834_v62 }
  0xfd   :  { %v2476_v26 = vpop.eup %2475  ;;  %vm1068_vm3 = vweird.f32 %v3265_v42  ;;  %v3341_v52 = vadd.f32 %v2800_v40, %v362_v35  ;;  %v831_v45 = vsel %vm3332_vm4, %v3267_v50, %v827_v30  ;;  %vm3346_vm5 = vcmp.eq.f32.partialorder %v1072_v5, 8.507059e+37  ;;  %v442_v30 = vpop.f32.mrf.mxu2 }
  0xfe   :  { %v1065_v61 = vsub.f32 1.0, %v1064_v25  ;;  %v3317_v43 = vadd.f32 1.0, %v2476_v26  ;;  %v3323_v39 = vpop.eup %2477  ;;  %v1075_v8 = vor.u32 1.1754944e-38, %v1074_v31  ;;  %v1314_v3 = vand.u32 2147483648, %v3287_v12 }
  0xff   :  { %v2480_v7 = vpop.eup %2479  ;;  %v1304_v48 = vmul.f32 %v3323_v39, %v3287_v12  ;;  %v1312_v37 = vand.u32 2147483647, %v3287_v12  ;;  %v2132_v46 = vmul.f32 -1.442695, %v3321_v23  ;;  %vm1069_vm6 = vweird.f32 %v3299_v20  ;;  %v404_v33 = vpop.f32.mrf.mxu1 }
 0x100   :  { %v1066_v18 = vmul.f32 %v3299_v20, %v1065_v61  ;;  %2483 = vrcp.f32 %v3317_v43  ;;  %v3351_v41 = vadd.f32 1.0, %v2480_v7  ;;  %v1554_v38 = vand.u32 2147483648, %v3297_v9  ;;  %vm3371_vm8 = vmor %vm1068_vm3, %vm1069_vm6  ;;  %v482_v61 = vpop.f32.mrf.mxu3 }
 0x101   :  { %v1305_v34 = vsub.f32 1.0, %v1304_v48  ;;  %2485 = vpow2.f32 %v2116_v32  ;;  %v836_v29 = vsel %vm3325_vm2, %v835_v19, %v831_v45  ;;  %vm1308_vm7 = vweird.f32 %v3287_v12 }
 0x102   :  { %v3353_v55 = vpop.eup %2481  ;;  %v1067_v57 = vadd.f32 %v3299_v20, %v1066_v18  ;;  %2487 = vrcp.f32 %v3351_v41  ;;  %v2085_v63 = vmul.f32 -1.442695, %v3341_v52  ;;  %v1315_v4 = vor.u32 1.1754944e-38, %v1314_v3 }
 0x103   :  { %v1544_v50 = vmul.f32 %v3353_v55, %v3297_v9  ;;  %v1306_v0 = vmul.f32 %v3323_v39, %v1305_v34  ;;  %v1552_v24 = vand.u32 2147483647, %v3297_v9  ;;  %vm1548_vm9 = vweird.f32 %v3297_v9 }
 0x104   :  { %v847_v60 = vand.u32 2147483647, %v3317_v43  ;;  %v849_v28 = vand.u32 2147483648, %v3317_v43  ;;  %2489 = vpow2.f32 %v2132_v46  ;;  %v3379_v53 = vadd.f32 %v2800_v40, %v402_v58 }
 0x105   :  { %v1545_v27 = vsub.f32 1.0, %v1544_v50  ;;  %v3382_v49 = vmul.f32 %v836_v29, %v3113_v2  ;;  %v1071_v42 = vsel %vm3371_vm8, %v3299_v20, %v1067_v57  ;;  %vm3387_vm10 = vcmp.eq.f32.partialorder %v1312_v37, 8.507059e+37 }
 0x106   :  { %v2484_v6 = vpop.eup %2483  ;;  %v3391_v10 = vor.u32 1.1754944e-38, %v1554_v38  ;;  %vm1309_vm11 = vweird.f32 %v3323_v39  ;;  %2491 = vpow2.f32 %v2085_v63  ;;  %v2101_v2 = vmul.f32 -1.442695, %v3379_v53 }
 0x107   :  { %v839_v13 = vmul.f32 %v2484_v6, %v3317_v43  ;;  %v2486_v14 = vpop.eup %2485  ;;  %v1546_v15 = vmul.f32 %v3353_v55, %v1545_v27  ;;  %v1307_v16 = vadd.f32 %v3323_v39, %v1306_v0  ;;  %vm843_vm12 = vweird.f32 %v3317_v43  ;;  %vm3417_vm1 = vmor %vm1308_vm7, %vm1309_vm11 }
 0x108   :  { %v3399_v20 = vadd.f32 1.0, %v2486_v14  ;;  %v2488_v62 = vpop.eup %2487  ;;  %v1076_v21 = vsel %vm3346_vm5, %v1075_v8, %v1071_v42  ;;  %vm1549_vm13 = vweird.f32 %v3353_v55  ;;  %vm3404_vm14 = vcmp.eq.f32.partialorder %v847_v60, 8.507059e+37 }
 0x109   :  { %v840_v17 = vsub.f32 1.0, %v839_v13  ;;  %v850_v26 = vor.u32 1.1754944e-38, %v849_v28  ;;  %vm3408_vm15 = vcmp.eq.f32.partialorder %v1552_v24, 8.507059e+37  ;;  %vm844_vm0 = vweird.f32 %v2484_v6  ;;  %vm3445_vm4 = vmor %vm1548_vm9, %vm1549_vm13 }
 0x10a   :  { %v1079_v35 = vmul.f32 %v2488_v62, %v3351_v41  ;;  %2493 = vpow2.f32 %v2101_v2  ;;  %v2490_v32 = vpop.eup %2489  ;;  %v1547_v19 = vadd.f32 %v3353_v55, %v1546_v15  ;;  %vm1083_vm2 = vweird.f32 %v3351_v41  ;;  %vm845_vm3 = vmor %vm843_vm12, %vm844_vm0 }
 0x10b   :  { %v841_v31 = vmul.f32 %v2484_v6, %v840_v17  ;;  %v1087_v7 = vand.u32 2147483647, %v3351_v41  ;;  %2495 = vrcp.f32 %v3399_v20  ;;  %v1311_v47 = vsel %vm3417_vm1, %v3323_v39, %v1307_v16 }
 0x10c   :  { %v1080_v48 = vsub.f32 1.0, %v1079_v35  ;;  %v3429_v12 = vadd.f32 %v2800_v40, %v442_v30  ;;  %v2492_v45 = vpop.eup %2491  ;;  %v1743_v22 = vmul.f32 %v1076_v21, %v3135_v11  ;;  %v1089_v8 = vand.u32 2147483648, %v3351_v41 }
 0x10d   :  { %v842_v18 = vadd.f32 %v2484_v6, %v841_v31  ;;  %v3436_v3 = vadd.f32 1.0, %v2490_v32  ;;  %v3439_v34 = vadd.f32 %v2800_v40, %v482_v61  ;;  %vm1084_vm5 = vweird.f32 %v2488_v62 }
 0x10e   :  { %v1081_v37 = vmul.f32 %v2488_v62, %v1080_v48  ;;  %v3449_v43 = vadd.f32 1.0, %v2492_v45  ;;  %v1316_v46 = vsel %vm3387_vm10, %v1315_v4, %v1311_v47  ;;  %v1551_v40 = vsel %vm3445_vm4, %v3353_v55, %v1547_v19  ;;  %vm1085_vm6 = vmor %vm1083_vm2, %vm1084_vm5 }
 0x10f   :  { %v846_v11 = vsel %vm845_vm3, %v2484_v6, %v842_v18  ;;  %2497 = vrcp.f32 %v3436_v3  ;;  %v2117_v58 = vmul.f32 -1.442695, %v3429_v12  ;;  %vm1088_vm7 = vcmp.eq.f32.partialorder %v1087_v7, 8.507059e+37  ;;  %v364_v6 = vpop.f32.mrf.mxu0 }
 0x110   :  { %v851_v57 = vsel %vm3404_vm14, %v850_v26, %v846_v11  ;;  %v2494_v9 = vpop.eup %2493  ;;  %v1082_v38 = vadd.f32 %v2488_v62, %v1081_v37  ;;  %2499 = vrcp.f32 %v3449_v43  ;;  %v1090_v63 = vor.u32 1.1754944e-38, %v1089_v8 }
 0x111   :  { %v1728_v50 = vmul.f32 %v851_v57, %v3165_v1  ;;  %v2496_v29 = vpop.eup %2495  ;;  %v1327_v55 = vand.u32 2147483647, %v3399_v20  ;;  %v2133_v0 = vmul.f32 -1.442695, %v3439_v34  ;;  %v3467_v4 = vmul.f32 %v1316_v46, %v3157_v54  ;;  %v444_v57 = vpop.f32.mrf.mxu2 }
 0x112   :  { %v1086_v27 = vsel %vm1085_vm6, %v2488_v62, %v1082_v38  ;;  %v1319_v24 = vmul.f32 %v2496_v29, %v3399_v20  ;;  %v1556_v41 = vsel %vm3408_vm15, %v3391_v10, %v1551_v40  ;;  %vm1323_vm8 = vweird.f32 %v3399_v20  ;;  %v3489_v10 = vld [vmem:[%s4592_s2] ss:$0 sm:$0xff]  ;;  %v484_v38 = vpop.f32.mrf.mxu3 }
 0x113   :  { %v2196_v1 = vpack.c.bf16 %v1728_v50, %v3382_v49  ;;  %v1091_v60 = vsel %vm1088_vm7, %v1090_v63, %v1086_v27  ;;  %v1329_v28 = vand.u32 2147483648, %v3399_v20  ;;  %v3480_v42 = vadd.f32 1.0, %v2494_v9 }
 0x114   :  { %v1744_v54 = vmul.f32 %v1091_v60, %v3188_v56  ;;  %v1320_v49 = vsub.f32 1.0, %v1319_v24  ;;  %2501 = vpow2.f32 %v2117_v58  ;;  %vm3482_vm9 = vcmp.eq.f32.partialorder %v1327_v55, 8.507059e+37 }
 0x115   :  { %2344 = vst [vmem:[%s4594_s3 + $0x10] sm:$0xff] %v2196_v1   ;;  %v2498_v59 = vpop.eup %2497  ;;  %2503 = vpow2.f32 %v2133_v0  ;;  %v3492_v14 = vadd.f32 %v3489_v10, %v364_v6  ;;  %v3495_v56 = vadd.f32 %v3489_v10, %v404_v33  ;;  %vm1324_vm10 = vweird.f32 %v2496_v29 }
 0x116   :  { %v3497_v15 = vpop.eup %2499  ;;  %v2236_v2 = vpack.c.bf16 %v1744_v54, %v1743_v22  ;;  %v1321_v16 = vmul.f32 %v2496_v29, %v1320_v49  ;;  %v1559_v17 = vmul.f32 %v2498_v59, %v3436_v3  ;;  %v1330_v62 = vor.u32 1.1754944e-38, %v1329_v28  ;;  %vm1325_vm12 = vmor %vm1323_vm8, %vm1324_vm10 }
 0x117   :  { %vm1563_vm11 = vweird.f32 %v3436_v3  ;;  %v854_v21 = vmul.f32 %v3497_v15, %v3449_v43  ;;  %2505 = vrcp.f32 %v3480_v42  ;;  %v1567_v30 = vand.u32 2147483647, %v3436_v3 }
 0x118   :  { %2352 = vst [vmem:[%s4594_s3 + $0x50] sm:$0xff] %v2236_v2   ;;  %v1322_v25 = vadd.f32 %v2496_v29, %v1321_v16  ;;  %v1560_v26 = vsub.f32 1.0, %v1559_v17  ;;  %v1569_v5 = vand.u32 2147483648, %v3436_v3  ;;  %vm858_vm13 = vweird.f32 %v3449_v43 }
 0x119   :  { %v855_v31 = vsub.f32 1.0, %v854_v21  ;;  %v2086_v35 = vmul.f32 -1.442695, %v3492_v14  ;;  %v2102_v61 = vmul.f32 -1.442695, %v3495_v56  ;;  %vm1564_vm14 = vweird.f32 %v2498_v59 }
 0x11a   :  { %v2502_v32 = vpop.eup %2501  ;;  %v1326_v44 = vsel %vm1325_vm12, %v2496_v29, %v1322_v25  ;;  %v1561_v19 = vmul.f32 %v2498_v59, %v1560_v26  ;;  %v864_v7 = vand.u32 2147483648, %v3449_v43  ;;  %vm1565_vm15 = vmor %vm1563_vm11, %vm1564_vm14  ;;  %v1570_v11 = vor.u32 1.1754944e-38, %v1569_v5  ;;  %v367_v25 = vpop.f32.mrf.mxu0 }
 0x11b   :  { %v2504_v47 = vpop.eup %2503  ;;  %v1331_v18 = vsel %vm3482_vm9, %v1330_v62, %v1326_v44  ;;  %v856_v20 = vmul.f32 %v3497_v15, %v855_v31  ;;  %v3518_v48 = vadd.f32 1.0, %v2502_v32  ;;  %2507 = vpow2.f32 %v2086_v35  ;;  %v407_v31 = vpop.f32.mrf.mxu1 }
 0x11c   :  { %v1760_v45 = vmul.f32 %v1331_v18, %v3304_v51  ;;  %v1562_v22 = vadd.f32 %v2498_v59, %v1561_v19  ;;  %v3521_v8 = vadd.f32 1.0, %v2504_v47  ;;  %2509 = vpow2.f32 %v2102_v61  ;;  %v447_v44 = vpop.f32.mrf.mxu2 }
 0x11d   :  { %v3523_v39 = vpop.eup %2505  ;;  %v857_v37 = vadd.f32 %v3497_v15, %v856_v20  ;;  %vm859_vm0 = vweird.f32 %v3497_v15  ;;  %2511 = vrcp.f32 %v3518_v48  ;;  %vm1568_vm1 = vcmp.eq.f32.partialorder %v1567_v30, 8.507059e+37 }
 0x11e   :  { %v2276_v46 = vpack.c.bf16 %v1760_v45, %v3467_v4  ;;  %v1566_v40 = vsel %vm1565_vm15, %v2498_v59, %v1562_v22  ;;  %v1094_v51 = vmul.f32 %v3523_v39, %v3480_v42  ;;  %v1775_v9 = vmul.f32 %v1556_v41, %v3160_v36  ;;  %vm3541_vm2 = vmor %vm858_vm13, %vm859_vm0 }
 0x11f   :  { %v1571_v50 = vsel %vm1568_vm1, %v1570_v11, %v1566_v40  ;;  %v862_v3 = vand.u32 2147483647, %v3449_v43  ;;  %v1102_v55 = vand.u32 2147483647, %v3480_v42  ;;  %2513 = vrcp.f32 %v3521_v8 }
 0x120   :  { %2360 = vst [vmem:[%s4594_s3 + $0x90] sm:$0xff] %v2276_v46   ;;  %v1776_v58 = vmul.f32 %v1571_v50, %v3321_v23  ;;  %v1095_v63 = vsub.f32 1.0, %v1094_v51  ;;  %v861_v0 = vsel %vm3541_vm2, %v3497_v15, %v857_v37  ;;  %v865_v4 = vor.u32 1.1754944e-38, %v864_v7 }
 0x121   :  { %v2508_v36 = vpop.eup %2507  ;;  %v1104_v1 = vand.u32 2147483648, %v3480_v42  ;;  %v3552_v23 = vadd.f32 %v3489_v10, %v444_v57  ;;  %v3558_v33 = vadd.f32 %v3489_v10, %v484_v38  ;;  %vm863_vm3 = vcmp.eq.f32.partialorder %v862_v3, 8.507059e+37 }
 0x122   :  { %v2510_v43 = vpop.eup %2509  ;;  %v2316_v27 = vpack.c.bf16 %v1776_v58, %v1775_v9  ;;  %v1096_v24 = vmul.f32 %v3523_v39, %v1095_v63  ;;  %v3555_v6 = vadd.f32 1.0, %v2508_v36  ;;  %vm1098_vm4 = vweird.f32 %v3480_v42  ;;  %v369_v3 = vpop.f32.mrf.mxu0 }
 0x123   :  { %v3560_v41 = vpop.eup %2511  ;;  %v3563_v60 = vadd.f32 1.0, %v2510_v43  ;;  %v866_v28 = vsel %vm863_vm3, %v865_v4, %v861_v0  ;;  %vm3568_vm5 = vcmp.eq.f32.partialorder %v1102_v55, 8.507059e+37  ;;  %v1344_v59 = vand.u32 2147483648, %v3518_v48 }
 0x124   :  { %2368 = vst [vmem:[%s4594_s3 + $0xd0] sm:$0xff] %v2316_v27   ;;  %v1334_v49 = vmul.f32 %v3560_v41, %v3518_v48  ;;  %v1584_v13 = vand.u32 2147483648, %v3521_v8  ;;  %vm1099_vm6 = vweird.f32 %v3523_v39  ;;  %v1105_v15 = vor.u32 1.1754944e-38, %v1104_v1 }
 0x125   :  { %2515 = vrcp.f32 %v3555_v6  ;;  %v2118_v2 = vmul.f32 -1.442695, %v3552_v23  ;;  %v3579_v16 = vpop.eup %2513  ;;  %v1097_v17 = vadd.f32 %v3523_v39, %v1096_v24  ;;  %v2134_v21 = vmul.f32 -1.442695, %v3558_v33  ;;  %vm3599_vm9 = vmor %vm1098_vm4, %vm1099_vm6 }
 0x126   :  { %v1335_v62 = vsub.f32 1.0, %v1334_v49  ;;  %2517 = vrcp.f32 %v3563_v60  ;;  %v3585_v26 = vmul.f32 %v866_v28, %v3341_v52  ;;  %vm1338_vm7 = vweird.f32 %v3518_v48 }
 0x127   :  { %v1342_v30 = vand.u32 2147483647, %v3518_v48  ;;  %v1574_v5 = vmul.f32 %v3579_v16, %v3521_v8  ;;  %vm1339_vm8 = vweird.f32 %v3560_v41  ;;  %v1345_v35 = vor.u32 1.1754944e-38, %v1344_v59 }
 0x128   :  { %v1582_v61 = vand.u32 2147483647, %v3521_v8  ;;  %v3593_v32 = vor.u32 1.1754944e-38, %v1584_v13  ;;  %v1336_v19 = vmul.f32 %v3560_v41, %v1335_v62  ;;  %vm1578_vm10 = vweird.f32 %v3521_v8  ;;  %vm3646_vm0 = vmor %vm1338_vm7, %vm1339_vm8 }
 0x129   :  { %v1575_v7 = vsub.f32 1.0, %v1574_v5  ;;  %2519 = vpow2.f32 %v2118_v2  ;;  %v3606_v47 = vadd.f32 %v3489_v10, %v367_v25  ;;  %v1101_v18 = vsel %vm3599_vm9, %v3523_v39, %v1097_v17 }
 0x12a   :  { %vm873_vm11 = vweird.f32 %v3555_v6  ;;  %2521 = vpow2.f32 %v2134_v21  ;;  %v3613_v42 = vadd.f32 %v3489_v10, %v407_v31  ;;  %vm3615_vm12 = vcmp.eq.f32.partialorder %v1342_v30, 8.507059e+37 }
 0x12b   :  { %v2516_v20 = vpop.eup %2515  ;;  %v1576_v22 = vmul.f32 %v3579_v16, %v1575_v7  ;;  %v877_v11 = vand.u32 2147483647, %v3555_v6  ;;  %v2087_v37 = vmul.f32 -1.442695, %v3606_v47  ;;  %v3623_v46 = vadd.f32 %v3489_v10, %v447_v44 }
 0x12c   :  { %v2518_v39 = vpop.eup %2517  ;;  %v869_v40 = vmul.f32 %v2516_v20, %v3555_v6  ;;  %v879_v51 = vand.u32 2147483648, %v3555_v6  ;;  %vm1113_vm13 = vweird.f32 %v3563_v60  ;;  %v2103_v57 = vmul.f32 -1.442695, %v3613_v42 }
 0x12d   :  { %v1106_v9 = vsel %vm3568_vm5, %v1105_v15, %v1101_v18  ;;  %v1337_v50 = vadd.f32 %v3560_v41, %v1336_v19  ;;  %vm1579_vm14 = vweird.f32 %v3579_v16  ;;  %vm3633_vm15 = vcmp.eq.f32.partialorder %v1582_v61, 8.507059e+37  ;;  %v487_v15 = vpop.f32.mrf.mxu3 }
 0x12e   :  { %v1109_v38 = vmul.f32 %v2518_v39, %v3563_v60  ;;  %v870_v58 = vsub.f32 1.0, %v869_v40  ;;  %v1117_v29 = vand.u32 2147483647, %v3563_v60  ;;  %2523 = vpow2.f32 %v2087_v37  ;;  %vm3662_vm3 = vmor %vm1578_vm10, %vm1579_vm14 }
 0x12f   :  { %v2119_v63 = vmul.f32 -1.442695, %v3623_v46  ;;  %v2520_v55 = vpop.eup %2519  ;;  %v1577_v36 = vadd.f32 %v3579_v16, %v1576_v22  ;;  %v1119_v4 = vand.u32 2147483648, %v3563_v60  ;;  %2525 = vpow2.f32 %v2103_v57 }
 0x130   :  { %v1110_v0 = vsub.f32 1.0, %v1109_v38  ;;  %v2522_v1 = vpop.eup %2521  ;;  %v871_v27 = vmul.f32 %v2516_v20, %v870_v58  ;;  %vm874_vm1 = vweird.f32 %v2516_v20  ;;  %v3650_v24 = vadd.f32 1.0, %v2520_v55 }
 0x131   :  { %2527 = vpow2.f32 %v2119_v63  ;;  %v1341_v28 = vsel %vm3646_vm0, %v3560_v41, %v1337_v50  ;;  %vm1114_vm2 = vweird.f32 %v2518_v39  ;;  %v3655_v49 = vadd.f32 1.0, %v2522_v1  ;;  %vm875_vm5 = vmor %vm873_vm11, %vm874_vm1  ;;  %v409_v63 = vpop.f32.mrf.mxu1 }
 0x132   :  { %v1111_v54 = vmul.f32 %v2518_v39, %v1110_v0  ;;  %v1745_v59 = vmul.f32 %v1106_v9, %v3379_v53  ;;  %v872_v13 = vadd.f32 %v2516_v20, %v871_v27  ;;  %vm878_vm4 = vcmp.eq.f32.partialorder %v877_v11, 8.507059e+37  ;;  %vm1115_vm6 = vmor %vm1113_vm13, %vm1114_vm2 }
 0x133   :  { %2529 = vrcp.f32 %v3650_v24  ;;  %v1581_v41 = vsel %vm3662_vm3, %v3579_v16, %v1577_v36  ;;  %v880_v53 = vor.u32 1.1754944e-38, %v879_v51  ;;  %v1346_v17 = vsel %vm3615_vm12, %v1345_v35, %v1341_v28 }
 0x134   :  { %v1112_v2 = vadd.f32 %v2518_v39, %v1111_v54  ;;  %2531 = vrcp.f32 %v3655_v49  ;;  %v2524_v8 = vpop.eup %2523  ;;  %v876_v62 = vsel %vm875_vm5, %v2516_v20, %v872_v13  ;;  %vm1118_vm7 = vcmp.eq.f32.partialorder %v1117_v29, 8.507059e+37 }
 0x135   :  { %v1120_v21 = vor.u32 1.1754944e-38, %v1119_v4  ;;  %v2526_v25 = vpop.eup %2525  ;;  %v881_v16 = vsel %vm878_vm4, %v880_v53, %v876_v62  ;;  %v3678_v6 = vadd.f32 1.0, %v2524_v8  ;;  %v3681_v5 = vadd.f32 %v3489_v10, %v487_v15  ;;  %v449_v4 = vpop.f32.mrf.mxu2 }
 0x136   :  { %v1116_v30 = vsel %vm1115_vm6, %v2518_v39, %v1112_v2  ;;  %v1586_v35 = vsel %vm3633_vm15, %v3593_v32, %v1581_v41  ;;  %v1730_v61 = vmul.f32 %v881_v16, %v3492_v14  ;;  %v1357_v60 = vand.u32 2147483647, %v3650_v24 }
 0x137   :  { %v2528_v31 = vpop.eup %2527  ;;  %v1121_v44 = vsel %vm1118_vm7, %v1120_v21, %v1116_v30  ;;  %v1359_v19 = vand.u32 2147483648, %v3650_v24  ;;  %v1597_v7 = vand.u32 2147483647, %v3655_v49  ;;  %2533 = vrcp.f32 %v3678_v6 }
 0x138   :  { %v1746_v52 = vmul.f32 %v1121_v44, %v3495_v56  ;;  %v2201_v20 = vpack.c.bf16 %v1730_v61, %v3585_v26  ;;  %v1599_v45 = vand.u32 2147483648, %v3655_v49  ;;  %v3694_v22 = vadd.f32 1.0, %v2526_v25  ;;  %v489_v61 = vpop.f32.mrf.mxu3 }
 0x139   :  { %v2530_v18 = vpop.eup %2529  ;;  %v3696_v32 = vadd.f32 1.0, %v2528_v31  ;;  %v3699_v11 = vmul.f32 %v1346_v17, %v3429_v12  ;;  %v3702_v56 = vmul.f32 %v1586_v35, %v3439_v34  ;;  %vm1353_vm8 = vweird.f32 %v3650_v24 }
 0x13a   :  { %v2532_v14 = vpop.eup %2531  ;;  %v2241_v37 = vpack.c.bf16 %v1746_v52, %v1745_v59  ;;  %v1349_v39 = vmul.f32 %v2530_v18, %v3650_v24  ;;  %2345 = vst [vmem:[%s4594_s3 + $0x18] sm:$0xff] %v2201_v20   ;;  %2535 = vrcp.f32 %v3694_v22  ;;  %v2135_v40 = vmul.f32 -1.442695, %v3681_v5 }
 0x13b   :  { %v1589_v26 = vmul.f32 %v2532_v14, %v3655_v49  ;;  %vm3715_vm9 = vcmp.eq.f32.partialorder %v1357_v60, 8.507059e+37  ;;  %v1360_v51 = vor.u32 1.1754944e-38, %v1359_v19  ;;  %vm1593_vm10 = vweird.f32 %v3655_v49 }
 0x13c   :  { %2353 = vst [vmem:[%s4594_s3 + $0x58] sm:$0xff] %v2241_v37   ;;  %v1350_v12 = vsub.f32 1.0, %v1349_v39  ;;  %vm3720_vm11 = vcmp.eq.f32.partialorder %v1597_v7, 8.507059e+37  ;;  %v1600_v50 = vor.u32 1.1754944e-38, %v1599_v45  ;;  %2537 = vrcp.f32 %v3696_v32 }
 0x13d   :  { %v1590_v57 = vsub.f32 1.0, %v1589_v26  ;;  %v3725_v38 = vpop.eup %2533  ;;  %vm1354_vm12 = vweird.f32 %v2530_v18  ;;  %vm888_vm13 = vweird.f32 %v3678_v6  ;;  %v892_v29 = vand.u32 2147483647, %v3678_v6 }
 0x13e   :  { %v1351_v58 = vmul.f32 %v2530_v18, %v1350_v12  ;;  %vm1594_vm14 = vweird.f32 %v2532_v14  ;;  %v884_v36 = vmul.f32 %v3725_v38, %v3678_v6  ;;  %v894_v0 = vand.u32 2147483648, %v3678_v6  ;;  %vm1355_vm0 = vmor %vm1353_vm8, %vm1354_vm12 }
 0x13f   :  { %v1591_v55 = vmul.f32 %v2532_v14, %v1590_v57  ;;  %vm1128_vm15 = vweird.f32 %v3694_v22  ;;  %2539 = vpow2.f32 %v2135_v40  ;;  %v3734_v43 = vadd.f32 %v3489_v10, %v369_v3  ;;  %vm1595_vm1 = vmor %vm1593_vm10, %vm1594_vm14 }
 0x140   :  { %v1352_v1 = vadd.f32 %v2530_v18, %v1351_v58  ;;  %v3736_v27 = vpop.eup %2535  ;;  %v885_v54 = vsub.f32 1.0, %v884_v36  ;;  %v1132_v59 = vand.u32 2147483647, %v3694_v22  ;;  %v3742_v48 = vadd.f32 %v3489_v10, %v409_v63 }
 0x141   :  { %v1592_v28 = vadd.f32 %v2532_v14, %v1591_v55  ;;  %v1124_v15 = vmul.f32 %v3736_v27, %v3694_v22  ;;  %v2088_v41 = vmul.f32 -1.442695, %v3734_v43  ;;  %v3751_v24 = vadd.f32 %v3489_v10, %v449_v4 }
 0x142   :  { %v1356_v13 = vsel %vm1355_vm0, %v2530_v18, %v1352_v1  ;;  %v3753_v53 = vpop.eup %2537  ;;  %v886_v17 = vmul.f32 %v3725_v38, %v885_v54  ;;  %vm3758_vm2 = vcmp.eq.f32.partialorder %v892_v29, 8.507059e+37  ;;  %v2104_v49 = vmul.f32 -1.442695, %v3742_v48  ;;  %v412_v1 = vpop.f32.mrf.mxu1 }
 0x143   :  { %v1361_v2 = vsel %vm3715_vm9, %v1360_v51, %v1356_v13  ;;  %v1596_v8 = vsel %vm1595_vm1, %v2532_v14, %v1592_v28  ;;  %v1125_v16 = vsub.f32 1.0, %v1124_v15  ;;  %v1364_v30 = vmul.f32 %v3753_v53, %v3696_v32 }
 0x144   :  { %v1762_v21 = vmul.f32 %v1361_v2, %v3552_v23  ;;  %v1601_v25 = vsel %vm3720_vm11, %v1600_v50, %v1596_v8  ;;  %v887_v35 = vadd.f32 %v3725_v38, %v886_v17  ;;  %vm889_vm3 = vweird.f32 %v3725_v38 }
 0x145   :  { %v1778_v31 = vmul.f32 %v1601_v25, %v3558_v33  ;;  %2541 = vpow2.f32 %v2088_v41  ;;  %v2540_v44 = vpop.eup %2539  ;;  %v1126_v23 = vmul.f32 %v3736_v27, %v1125_v16  ;;  %v1365_v52 = vsub.f32 1.0, %v1364_v30  ;;  %vm3783_vm5 = vmor %vm888_vm13, %vm889_vm3 }
 0x146   :  { %v2281_v60 = vpack.c.bf16 %v1762_v21, %v3699_v11  ;;  %2543 = vpow2.f32 %v2104_v49  ;;  %vm1129_vm4 = vweird.f32 %v3736_v27  ;;  %v3775_v7 = vadd.f32 1.0, %v2540_v44 }
 0x147   :  { %v2321_v19 = vpack.c.bf16 %v1778_v31, %v3702_v56  ;;  %v2120_v33 = vmul.f32 -1.442695, %v3751_v24  ;;  %v1127_v20 = vadd.f32 %v3736_v27, %v1126_v23  ;;  %v1134_v45 = vand.u32 2147483648, %v3694_v22  ;;  %v372_v56 = vpop.f32.mrf.mxu0  ;;  %vm3805_vm7 = vmor %vm1128_vm15, %vm1129_vm4 }
 0x148   :  { %2361 = vst [vmem:[%s4594_s3 + $0x98] sm:$0xff] %v2281_v60   ;;  %v1366_v14 = vmul.f32 %v3753_v53, %v1365_v52  ;;  %v3791_v11 = vadd.f32 %v3489_v10, %v489_v61  ;;  %v891_v6 = vsel %vm3783_vm5, %v3725_v38, %v887_v35  ;;  %v895_v37 = vor.u32 1.1754944e-38, %v894_v0 }
 0x149   :  { %2369 = vst [vmem:[%s4594_s3 + $0xd8] sm:$0xff] %v2321_v19   ;;  %vm1369_vm6 = vweird.f32 %v3753_v53  ;;  %2545 = vrcp.f32 %v3775_v7  ;;  %vm1368_vm8 = vweird.f32 %v3696_v32  ;;  %v1374_v40 = vand.u32 2147483648, %v3696_v32 }
 0x14a   :  { %v1367_v26 = vadd.f32 %v3753_v53, %v1366_v14  ;;  %2547 = vpow2.f32 %v2120_v33  ;;  %v1131_v34 = vsel %vm3805_vm7, %v3736_v27, %v1127_v20  ;;  %v1372_v51 = vand.u32 2147483647, %v3696_v32  ;;  %vm3824_vm10 = vmor %vm1368_vm8, %vm1369_vm6  ;;  %v414_v18 = vpop.f32.mrf.mxu1 }
 0x14b   :  { %v2542_v12 = vpop.eup %2541  ;;  %v2136_v22 = vmul.f32 -1.442695, %v3791_v11  ;;  %v3818_v57 = vadd.f32 %v3489_v10, %v372_v56  ;;  %v896_v50 = vsel %vm3758_vm2, %v895_v37, %v891_v6  ;;  %vm1133_vm9 = vcmp.eq.f32.partialorder %v1132_v59, 8.507059e+37 }
 0x14c   :  { %v2544_v9 = vpop.eup %2543  ;;  %v1135_v3 = vor.u32 1.1754944e-38, %v1134_v45  ;;  %v3828_v58 = vadd.f32 1.0, %v2542_v12  ;;  %v1371_v32 = vsel %vm3824_vm10, %v3753_v53, %v1367_v26  ;;  %v1375_v36 = vor.u32 1.1754944e-38, %v1374_v40  ;;  %v452_v53 = vpop.f32.mrf.mxu2 }
 0x14d   :  { %v3833_v29 = vadd.f32 1.0, %v2544_v9  ;;  %2549 = vpow2.f32 %v2136_v22  ;;  %v2089_v63 = vmul.f32 -1.442695, %v3818_v57  ;;  %v1614_v0 = vand.u32 2147483648, %v3775_v7 }
 0x14e   :  { %v1136_v55 = vsel %vm1133_vm9, %v1135_v3, %v1131_v34  ;;  %2551 = vrcp.f32 %v3828_v58  ;;  %vm1373_vm11 = vcmp.eq.f32.partialorder %v1372_v51, 8.507059e+37  ;;  %v3842_v28 = vmul.f32 %v896_v50, %v3606_v47 }
 0x14f   :  { %v3838_v4 = vpop.eup %2545  ;;  %2553 = vrcp.f32 %v3833_v29  ;;  %v1376_v54 = vsel %vm1373_vm11, %v1375_v36, %v1371_v32  ;;  %v3847_v13 = vmul.f32 %v1136_v55, %v3613_v42  ;;  %v1612_v15 = vand.u32 2147483647, %v3775_v7 }
 0x150   :  { %v2548_v27 = vpop.eup %2547  ;;  %v1604_v59 = vmul.f32 %v3838_v4, %v3775_v7  ;;  %2555 = vpow2.f32 %v2089_v63  ;;  %vm1608_vm12 = vweird.f32 %v3775_v7  ;;  %v3853_v8 = vor.u32 1.1754944e-38, %v1614_v0 }
 0x151   :  { %v3850_v41 = vadd.f32 1.0, %v2548_v27  ;;  %v907_v47 = vand.u32 2147483647, %v3828_v58  ;;  %v3857_v17 = vadd.f32 %v3489_v10, %v412_v1  ;;  %v3860_v42 = vmul.f32 %v1376_v54, %v3623_v46 }
 0x152   :  { %v1605_v2 = vsub.f32 1.0, %v1604_v59  ;;  %v909_v49 = vand.u32 2147483648, %v3828_v58  ;;  %v1147_v21 = vand.u32 2147483647, %v3833_v29  ;;  %vm903_vm13 = vweird.f32 %v3828_v58 }
 0x153   :  { %v2550_v62 = vpop.eup %2549  ;;  %2557 = vrcp.f32 %v3850_v41  ;;  %v2105_v30 = vmul.f32 -1.442695, %v3857_v17  ;;  %v3870_v31 = vadd.f32 %v3489_v10, %v452_v53  ;;  %vm1143_vm14 = vweird.f32 %v3833_v29 }
 0x154   :  { %v2552_v25 = vpop.eup %2551  ;;  %v3866_v16 = vadd.f32 1.0, %v2550_v62  ;;  %v1606_v46 = vmul.f32 %v3838_v4, %v1605_v2  ;;  %v1149_v44 = vand.u32 2147483648, %v3833_v29  ;;  %vm1609_vm15 = vweird.f32 %v3838_v4 }
 0x155   :  { %v2554_v35 = vpop.eup %2553  ;;  %v899_v61 = vmul.f32 %v2552_v25, %v3828_v58  ;;  %vm3877_vm0 = vcmp.eq.f32.partialorder %v907_v47, 8.507059e+37  ;;  %v910_v33 = vor.u32 1.1754944e-38, %v909_v49  ;;  %vm3883_vm1 = vcmp.eq.f32.partialorder %v1147_v21, 8.507059e+37  ;;  %vm3902_vm6 = vmor %vm1608_vm12, %vm1609_vm15  ;;  %v492_v58 = vpop.f32.mrf.mxu3 }
 0x156   :  { %v1139_v23 = vmul.f32 %v2554_v35, %v3833_v29  ;;  %2559 = vrcp.f32 %v3866_v16  ;;  %v2556_v52 = vpop.eup %2555  ;;  %v1389_v20 = vand.u32 2147483648, %v3850_v41  ;;  %v2121_v56 = vmul.f32 -1.442695, %v3870_v31 }
 0x157   :  { %v900_v19 = vsub.f32 1.0, %v899_v61  ;;  %v3888_v14 = vadd.f32 1.0, %v2556_v52  ;;  %2561 = vpow2.f32 %v2105_v30  ;;  %v1607_v37 = vadd.f32 %v3838_v4, %v1606_v46 }
 0x158   :  { %v1140_v45 = vsub.f32 1.0, %v1139_v23  ;;  %vm904_vm2 = vweird.f32 %v2552_v25  ;;  %v1150_v26 = vor.u32 1.1754944e-38, %v1149_v44  ;;  %vm3892_vm3 = vcmp.eq.f32.partialorder %v1612_v15, 8.507059e+37  ;;  %v374_v15 = vpop.f32.mrf.mxu0 }
 0x159   :  { %v2558_v6 = vpop.eup %2557  ;;  %v901_v39 = vmul.f32 %v2552_v25, %v900_v19  ;;  %vm1144_vm4 = vweird.f32 %v2554_v35  ;;  %vm1383_vm5 = vweird.f32 %v3850_v41  ;;  %v1387_v9 = vand.u32 2147483647, %v3850_v41  ;;  %vm905_vm7 = vmor %vm903_vm13, %vm904_vm2 }
 0x15a   :  { %v1141_v12 = vmul.f32 %v2554_v35, %v1140_v45  ;;  %v1379_v34 = vmul.f32 %v2558_v6, %v3850_v41  ;;  %v1390_v50 = vor.u32 1.1754944e-38, %v1389_v20  ;;  %2563 = vrcp.f32 %v3888_v14  ;;  %vm1145_vm8 = vmor %vm1143_vm14, %vm1144_vm4  ;;  %v454_v45 = vpop.f32.mrf.mxu2 }
 0x15b   :  { %v902_v22 = vadd.f32 %v2552_v25, %v901_v39  ;;  %v1627_v63 = vand.u32 2147483647, %v3866_v16  ;;  %2565 = vpow2.f32 %v2121_v56  ;;  %v1611_v7 = vsel %vm3902_vm6, %v3838_v4, %v1607_v37 }
 0x15c   :  { %v2560_v3 = vpop.eup %2559  ;;  %v1142_v38 = vadd.f32 %v2554_v35, %v1141_v12  ;;  %v1380_v32 = vsub.f32 1.0, %v1379_v34  ;;  %v1629_v0 = vand.u32 2147483648, %v3866_v16  ;;  %vm1384_vm9 = vweird.f32 %v2558_v6 }
 0x15d   :  { %v906_v55 = vsel %vm905_vm7, %v2552_v25, %v902_v22  ;;  %v1619_v36 = vmul.f32 %v2560_v3, %v3866_v16  ;;  %v2562_v1 = vpop.eup %2561  ;;  %vm1624_vm10 = vweird.f32 %v2560_v3  ;;  %v3928_v49 = vadd.f32 %v3489_v10, %v492_v58  ;;  %vm1385_vm11 = vmor %vm1383_vm5, %vm1384_vm9  ;;  %v494_v39 = vpop.f32.mrf.mxu3 }
 0x15e   :  { %v911_v27 = vsel %vm3877_vm0, %v910_v33, %v906_v55  ;;  %v1146_v54 = vsel %vm1145_vm8, %v2554_v35, %v1142_v38  ;;  %v1381_v59 = vmul.f32 %v2558_v6, %v1380_v32  ;;  %v3924_v2 = vadd.f32 1.0, %v2562_v1 }
 0x15f   :  { %v1732_v4 = vmul.f32 %v911_v27, %v3734_v43  ;;  %v1151_v53 = vsel %vm3883_vm1, %v1150_v26, %v1146_v54  ;;  %v1620_v29 = vsub.f32 1.0, %v1619_v36  ;;  %v3937_v30 = vadd.f32 %v3489_v10, %v374_v15 }
 0x160   :  { %v1748_v47 = vmul.f32 %v1151_v53, %v3742_v48  ;;  %v1382_v62 = vadd.f32 %v2558_v6, %v1381_v59  ;;  %v3930_v21 = vpop.eup %2563  ;;  %2567 = vrcp.f32 %v3924_v2  ;;  %vm1388_vm12 = vcmp.eq.f32.partialorder %v1387_v9, 8.507059e+37  ;;  %v377_v40 = vpop.f32.mrf.mxu0 }
 0x161   :  { %v2206_v25 = vpack.c.bf16 %v1732_v4, %v3842_v28  ;;  %v1621_v43 = vmul.f32 %v2560_v3, %v1620_v29  ;;  %v2566_v35 = vpop.eup %2565  ;;  %v914_v61 = vmul.f32 %v3930_v21, %v3888_v14  ;;  %v1616_v28 = vsel %vm3892_vm3, %v3853_v8, %v1611_v7  ;;  %v417_v4 = vpop.f32.mrf.mxu1 }
 0x162   :  { %v2246_v48 = vpack.c.bf16 %v1748_v47, %v3847_v13  ;;  %v1386_v46 = vsel %vm1385_vm11, %v2558_v6, %v1382_v62  ;;  %vm1623_vm13 = vweird.f32 %v3866_v16  ;;  %v1630_v60 = vor.u32 1.1754944e-38, %v1629_v0 }
 0x163   :  { %2346 = vst [vmem:[%s4594_s3 + $0x20] sm:$0xff] %v2206_v25   ;;  %v1391_v41 = vsel %vm1388_vm12, %v1390_v50, %v1386_v46  ;;  %v1622_v44 = vadd.f32 %v2560_v3, %v1621_v43  ;;  %vm1625_vm14 = vmor %vm1623_vm13, %vm1624_vm10  ;;  %v3954_v23 = vadd.f32 1.0, %v2566_v35  ;;  %v2137_v8 = vmul.f32 -1.442695, %v3928_v49  ;;  %v457_v25 = vpop.f32.mrf.mxu2 }
 0x164   :  { %2354 = vst [vmem:[%s4594_s3 + $0x60] sm:$0xff] %v2246_v48   ;;  %v1764_v13 = vmul.f32 %v1391_v41, %v3751_v24  ;;  %vm1628_vm15 = vcmp.eq.f32.partialorder %v1627_v63, 8.507059e+37  ;;  %v915_v19 = vsub.f32 1.0, %v914_v61  ;;  %v2090_v33 = vmul.f32 -1.442695, %v3937_v30 }
 0x165   :  { %v1626_v52 = vsel %vm1625_vm14, %v2560_v3, %v1622_v44  ;;  %2569 = vrcp.f32 %v3954_v23  ;;  %v1779_v56 = vmul.f32 %v1616_v28, %v3681_v5  ;;  %vm918_vm0 = vweird.f32 %v3888_v14  ;;  %v497_v28 = vpop.f32.mrf.mxu3 }
 0x166   :  { %v2286_v16 = vpack.c.bf16 %v1764_v13, %v3860_v42  ;;  %v1631_v20 = vsel %vm1628_vm15, %v1630_v60, %v1626_v52  ;;  %v3960_v24 = vpop.eup %2567  ;;  %2571 = vpow2.f32 %v2137_v8  ;;  %v916_v26 = vmul.f32 %v3930_v21, %v915_v19 }
 0x167   :  { %v1780_v6 = vmul.f32 %v1631_v20, %v3791_v11  ;;  %v1154_v37 = vmul.f32 %v3960_v24, %v3924_v2  ;;  %2573 = vpow2.f32 %v2090_v33  ;;  %v922_v5 = vand.u32 2147483647, %v3888_v14 }
 0x168   :  { %2362 = vst [vmem:[%s4594_s3 + $0xa0] sm:$0xff] %v2286_v16   ;;  %v3973_v11 = vadd.f32 %v3489_v10, %v414_v18  ;;  %v3976_v34 = vadd.f32 %v3489_v10, %v454_v45  ;;  %vm919_vm1 = vweird.f32 %v3930_v21  ;;  %v924_v51 = vand.u32 2147483648, %v3888_v14 }
 0x169   :  { %v2326_v42 = vpack.c.bf16 %v1780_v6, %v1779_v56  ;;  %v1155_v12 = vsub.f32 1.0, %v1154_v37  ;;  %vm1158_vm2 = vweird.f32 %v3924_v2  ;;  %v3985_v22 = vadd.f32 %v3489_v10, %v494_v39  ;;  %vm4010_vm4 = vmor %vm918_vm0, %vm919_vm1 }
 0x16a   :  { %v2106_v3 = vmul.f32 -1.442695, %v3973_v11  ;;  %v2122_v38 = vmul.f32 -1.442695, %v3976_v34  ;;  %v3993_v32 = vadd.f32 %v3489_v10, %v377_v40  ;;  %v917_v63 = vadd.f32 %v3930_v21, %v916_v26 }
 0x16b   :  { %2370 = vst [vmem:[%s4594_s3 + $0xe0] sm:$0xff] %v2326_v42   ;;  %v3987_v9 = vpop.eup %2569  ;;  %v1156_v50 = vmul.f32 %v3960_v24, %v1155_v12  ;;  %v1162_v7 = vand.u32 2147483647, %v3924_v2  ;;  %v2138_v36 = vmul.f32 -1.442695, %v3985_v22  ;;  %vm1159_vm3 = vweird.f32 %v3960_v24 }
 0x16c   :  { %v1394_v55 = vmul.f32 %v3987_v9, %v3954_v23  ;;  %v2572_v0 = vpop.eup %2571  ;;  %v1164_v1 = vand.u32 2147483648, %v3924_v2  ;;  %2575 = vpow2.f32 %v2106_v3  ;;  %v1402_v59 = vand.u32 2147483647, %v3954_v23  ;;  %vm4025_vm6 = vmor %vm1158_vm2, %vm1159_vm3 }
 0x16d   :  { %v1157_v58 = vadd.f32 %v3960_v24, %v1156_v50  ;;  %v2574_v27 = vpop.eup %2573  ;;  %v4004_v15 = vadd.f32 1.0, %v2572_v0  ;;  %2577 = vpow2.f32 %v2122_v38  ;;  %v1404_v29 = vand.u32 2147483648, %v3954_v23 }
 0x16e   :  { %v1395_v54 = vsub.f32 1.0, %v1394_v55  ;;  %v4015_v47 = vadd.f32 1.0, %v2574_v27  ;;  %2579 = vpow2.f32 %v2138_v36  ;;  %v2091_v62 = vmul.f32 -1.442695, %v3993_v32 }
 0x16f   :  { %v921_v43 = vsel %vm4010_vm4, %v3930_v21, %v917_v63  ;;  %vm923_vm5 = vcmp.eq.f32.partialorder %v922_v5, 8.507059e+37  ;;  %2581 = vrcp.f32 %v4004_v15  ;;  %v925_v48 = vor.u32 1.1754944e-38, %v924_v51 }
 0x170   :  { %v1396_v35 = vmul.f32 %v3987_v9, %v1395_v54  ;;  %v1161_v46 = vsel %vm4025_vm6, %v3960_v24, %v1157_v58  ;;  %2583 = vrcp.f32 %v4015_v47  ;;  %v4036_v21 = vadd.f32 %v3489_v10, %v417_v4 }
 0x171   :  { %vm1163_vm7 = vcmp.eq.f32.partialorder %v1162_v7, 8.507059e+37  ;;  %v1165_v2 = vor.u32 1.1754944e-38, %v1164_v1  ;;  %vm1398_vm8 = vweird.f32 %v3954_v23  ;;  %v4040_v61 = vadd.f32 %v3489_v10, %v457_v25  ;;  %v379_v23 = vpop.f32.mrf.mxu0 }
 0x172   :  { %v2576_v41 = vpop.eup %2575  ;;  %v926_v44 = vsel %vm923_vm5, %v925_v48, %v921_v43  ;;  %vm4042_vm9 = vcmp.eq.f32.partialorder %v1402_v59, 8.507059e+37  ;;  %v1405_v60 = vor.u32 1.1754944e-38, %v1404_v29  ;;  %2585 = vpow2.f32 %v2091_v62 }
 0x173   :  { %v2578_v8 = vpop.eup %2577  ;;  %v1166_v52 = vsel %vm1163_vm7, %v1165_v2, %v1161_v46  ;;  %v1397_v19 = vadd.f32 %v3987_v9, %v1396_v35  ;;  %vm1399_vm10 = vweird.f32 %v3987_v9  ;;  %v4048_v33 = vadd.f32 1.0, %v2576_v41 }
 0x174   :  { %v2580_v18 = vpop.eup %2579  ;;  %v1644_v16 = vand.u32 2147483648, %v4004_v15  ;;  %v4051_v20 = vadd.f32 1.0, %v2578_v8  ;;  %v2107_v45 = vmul.f32 -1.442695, %v4036_v21  ;;  %v4055_v24 = vadd.f32 %v3489_v10, %v497_v28  ;;  %vm4070_vm11 = vmor %vm1398_vm8, %vm1399_vm10 }
 0x175   :  { %v4057_v56 = vpop.eup %2581  ;;  %v4060_v6 = vmul.f32 %v926_v44, %v3818_v57  ;;  %v937_v37 = vand.u32 2147483647, %v4015_v47  ;;  %2587 = vrcp.f32 %v4048_v33  ;;  %v2123_v39 = vmul.f32 -1.442695, %v4040_v61 }
 0x176   :  { %v2584_v42 = vpop.eup %2583  ;;  %v4066_v26 = vmul.f32 %v1166_v52, %v3857_v17  ;;  %v1634_v57 = vmul.f32 %v4057_v56, %v4004_v15  ;;  %v939_v5 = vand.u32 2147483648, %v4015_v47  ;;  %2589 = vrcp.f32 %v4051_v20 }
 0x177   :  { %v1401_v12 = vsel %vm4070_vm11, %v3987_v9, %v1397_v19  ;;  %v1642_v17 = vand.u32 2147483647, %v4004_v15  ;;  %v929_v51 = vmul.f32 %v2584_v42, %v4015_v47  ;;  %vm933_vm12 = vweird.f32 %v4015_v47 }
 0x178   :  { %v2586_v50 = vpop.eup %2585  ;;  %v1635_v3 = vsub.f32 1.0, %v1634_v57  ;;  %v4084_v38 = vor.u32 1.1754944e-38, %v1644_v16  ;;  %2591 = vpow2.f32 %v2107_v45  ;;  %v2139_v63 = vmul.f32 -1.442695, %v4055_v24 }
 0x179   :  { %vm1638_vm13 = vweird.f32 %v4004_v15  ;;  %v930_v7 = vsub.f32 1.0, %v929_v51  ;;  %vm4088_vm14 = vcmp.eq.f32.partialorder %v937_v37, 8.507059e+37  ;;  %v1177_v9 = vand.u32 2147483647, %v4048_v33 }
 0x17a   :  { %v4093_v36 = vadd.f32 1.0, %v2580_v18  ;;  %v4097_v0 = vsel %vm4042_vm9, %v1405_v60, %v1401_v12  ;;  %v940_v58 = vor.u32 1.1754944e-38, %v939_v5  ;;  %v4099_v1 = vadd.f32 1.0, %v2586_v50 }
 0x17b   :  { %v4102_v27 = vadd.f32 %v3489_v10, %v379_v23  ;;  %v2588_v54 = vpop.eup %2587  ;;  %v931_v59 = vmul.f32 %v2584_v42, %v930_v7  ;;  %vm934_vm15 = vweird.f32 %v2584_v42  ;;  %vm1173_vm0 = vweird.f32 %v4048_v33 }
 0x17c   :  { %2593 = vrcp.f32 %v4093_v36  ;;  %v2590_v4 = vpop.eup %2589  ;;  %v1636_v53 = vmul.f32 %v4057_v56, %v1635_v3  ;;  %vm1639_vm1 = vweird.f32 %v4057_v56  ;;  %v1169_v29 = vmul.f32 %v2588_v54, %v4048_v33  ;;  %vm935_vm3 = vmor %vm933_vm12, %vm934_vm15 }
 0x17d   :  { %v1179_v62 = vand.u32 2147483648, %v4048_v33  ;;  %v932_v25 = vadd.f32 %v2584_v42, %v931_v59  ;;  %vm4110_vm2 = vcmp.eq.f32.partialorder %v1177_v9, 8.507059e+37  ;;  %v1409_v43 = vmul.f32 %v2590_v4, %v4051_v20  ;;  %vm4135_vm8 = vmor %vm1638_vm13, %vm1639_vm1 }
 0x17e   :  { %2595 = vpow2.f32 %v2123_v39  ;;  %v2592_v14 = vpop.eup %2591  ;;  %v1170_v35 = vsub.f32 1.0, %v1169_v29  ;;  %vm1413_vm4 = vweird.f32 %v4051_v20  ;;  %v1417_v48 = vand.u32 2147483647, %v4051_v20 }
 0x17f   :  { %2597 = vrcp.f32 %v4099_v1  ;;  %v936_v46 = vsel %vm935_vm3, %v2584_v42, %v932_v25  ;;  %v1410_v2 = vsub.f32 1.0, %v1409_v43  ;;  %v1419_v28 = vand.u32 2147483648, %v4051_v20 }
 0x180   :  { %2599 = vpow2.f32 %v2139_v63  ;;  %v1637_v41 = vadd.f32 %v4057_v56, %v1636_v53  ;;  %vm4122_vm5 = vcmp.eq.f32.partialorder %v1642_v17, 8.507059e+37  ;;  %v941_v47 = vsel %vm4088_vm14, %v940_v58, %v936_v46  ;;  %v459_v46 = vpop.f32.mrf.mxu2 }
 0x181   :  { %v1171_v13 = vmul.f32 %v2588_v54, %v1170_v35  ;;  %vm1174_vm6 = vweird.f32 %v2588_v54  ;;  %v1734_v8 = vmul.f32 %v941_v47, %v3937_v30  ;;  %v1411_v52 = vmul.f32 %v2590_v4, %v1410_v2  ;;  %v499_v2 = vpop.f32.mrf.mxu3  ;;  %v382_v47 = vpop.f32.mrf.mxu0 }
 0x182   :  { %v2594_v60 = vpop.eup %2593  ;;  %vm1414_vm7 = vweird.f32 %v2590_v4  ;;  %v4129_v19 = vadd.f32 1.0, %v2592_v14  ;;  %v1180_v45 = vor.u32 1.1754944e-38, %v1179_v62  ;;  %vm4139_vm9 = vcmp.eq.f32.partialorder %v1417_v48, 8.507059e+37  ;;  %vm1175_vm10 = vmor %vm1173_vm0, %vm1174_vm6 }
 0x183   :  { %v1172_v16 = vadd.f32 %v2588_v54, %v1171_v13  ;;  %v1649_v30 = vmul.f32 %v2594_v60, %v4093_v36  ;;  %v2211_v42 = vpack.c.bf16 %v1734_v8, %v4060_v6  ;;  %v1412_v40 = vadd.f32 %v2590_v4, %v1411_v52  ;;  %vm1415_vm11 = vmor %vm1413_vm4, %vm1414_vm7 }
 0x184   :  { %v2596_v39 = vpop.eup %2595  ;;  %v1420_v15 = vor.u32 1.1754944e-38, %v1419_v28  ;;  %2601 = vrcp.f32 %v4129_v19  ;;  %v1657_v17 = vand.u32 2147483647, %v4093_v36  ;;  %v1659_v51 = vand.u32 2147483648, %v4093_v36 }
 0x185   :  { %v4148_v57 = vpop.eup %2597  ;;  %v1176_v5 = vsel %vm1175_vm10, %v2588_v54, %v1172_v16  ;;  %v1650_v12 = vsub.f32 1.0, %v1649_v30  ;;  %v1641_v33 = vsel %vm4135_vm8, %v4057_v56, %v1637_v41  ;;  %2347 = vst [vmem:[%s4594_s3 + $0x28] sm:$0xff] %v2211_v42   ;;  %v1416_v50 = vsel %vm1415_vm11, %v2590_v4, %v1412_v40 }
 0x186   :  { %v2600_v6 = vpop.eup %2599  ;;  %v1181_v23 = vsel %vm4110_vm2, %v1180_v45, %v1176_v5  ;;  %v944_v20 = vmul.f32 %v4148_v57, %v4099_v1  ;;  %v1421_v63 = vsel %vm4139_vm9, %v1420_v15, %v1416_v50  ;;  %vm1654_vm12 = vweird.f32 %v2594_v60 }
 0x187   :  { %v1750_v3 = vmul.f32 %v1181_v23, %v3973_v11  ;;  %v1651_v7 = vmul.f32 %v2594_v60, %v1650_v12  ;;  %v1765_v56 = vmul.f32 %v4097_v0, %v3870_v31  ;;  %v1766_v55 = vmul.f32 %v1421_v63, %v3976_v34  ;;  %v419_v11 = vpop.f32.mrf.mxu1 }
 0x188   :  { %vm1653_vm13 = vweird.f32 %v4093_v36  ;;  %v4172_v9 = vadd.f32 1.0, %v2596_v39  ;;  %v1660_v59 = vor.u32 1.1754944e-38, %v1659_v51  ;;  %v4175_v4 = vadd.f32 1.0, %v2600_v6 }
 0x189   :  { %v2251_v58 = vpack.c.bf16 %v1750_v3, %v4066_v26  ;;  %v1652_v54 = vadd.f32 %v2594_v60, %v1651_v7  ;;  %v1646_v29 = vsel %vm4122_vm5, %v4084_v38, %v1641_v33  ;;  %v2291_v31 = vpack.c.bf16 %v1766_v55, %v1765_v56  ;;  %vm1655_vm14 = vmor %vm1653_vm13, %vm1654_vm12 }
 0x18a   :  { %v4177_v53 = vpop.eup %2601  ;;  %v945_v34 = vsub.f32 1.0, %v944_v20  ;;  %2603 = vrcp.f32 %v4172_v9  ;;  %vm1658_vm15 = vcmp.eq.f32.partialorder %v1657_v17, 8.507059e+37  ;;  %v2092_v38 = vmul.f32 -1.442695, %v4102_v27 }
 0x18b   :  { %2355 = vst [vmem:[%s4594_s3 + $0x68] sm:$0xff] %v2251_v58   ;;  %v1656_v26 = vsel %vm1655_vm14, %v2594_v60, %v1652_v54  ;;  %v1184_v36 = vmul.f32 %v4177_v53, %v4129_v19  ;;  %v1781_v62 = vmul.f32 %v1646_v29, %v3928_v49  ;;  %v952_v10 = vand.u32 2147483647, %v4099_v1  ;;  %v4203_v49 = vld [vmem:[%s4592_s2] ss:$0 sm:$0xff] }
 0x18c   :  { %2363 = vst [vmem:[%s4594_s3 + $0xa8] sm:$0xff] %v2291_v31   ;;  %v1661_v0 = vsel %vm1658_vm15, %v1660_v59, %v1656_v26  ;;  %2605 = vrcp.f32 %v4175_v4  ;;  %v946_v43 = vmul.f32 %v4148_v57, %v945_v34  ;;  %v954_v35 = vand.u32 2147483648, %v4099_v1  ;;  %v462_v31 = vpop.f32.mrf.mxu2 }
 0x18d   :  { %v1782_v25 = vmul.f32 %v1661_v0, %v3985_v22  ;;  %v1185_v48 = vsub.f32 1.0, %v1184_v36  ;;  %2607 = vpow2.f32 %v2092_v38  ;;  %v4206_v22 = vadd.f32 %v4203_v49, %v419_v11  ;;  %v502_v0 = vpop.f32.mrf.mxu3 }
 0x18e   :  { %vm948_vm0 = vweird.f32 %v4099_v1  ;;  %vm949_vm1 = vweird.f32 %v4148_v57  ;;  %vm4213_vm2 = vcmp.eq.f32.partialorder %v952_v10, 8.507059e+37  ;;  %v947_v13 = vadd.f32 %v4148_v57, %v946_v43 }
 0x18f   :  { %v2331_v14 = vpack.c.bf16 %v1782_v25, %v1781_v62  ;;  %v2108_v60 = vmul.f32 -1.442695, %v4206_v22  ;;  %v4222_v8 = vadd.f32 %v4203_v49, %v459_v46  ;;  %v4225_v52 = vadd.f32 %v4203_v49, %v499_v2  ;;  %v422_v30 = vpop.f32.mrf.mxu1  ;;  %vm4241_vm4 = vmor %vm948_vm0, %vm949_vm1  ;;  %v384_v2 = vpop.f32.mrf.mxu0 }
 0x190   :  { %v4198_v28 = vpop.eup %2603  ;;  %v955_v16 = vor.u32 1.1754944e-38, %v954_v35  ;;  %v1186_v45 = vmul.f32 %v4177_v53, %v1185_v48  ;;  %vm1188_vm3 = vweird.f32 %v4129_v19  ;;  %v1192_v37 = vand.u32 2147483647, %v4129_v19 }
 0x191   :  { %2371 = vst [vmem:[%s4594_s3 + $0xe8] sm:$0xff] %v2331_v14   ;;  %v1424_v44 = vmul.f32 %v4198_v28, %v4172_v9  ;;  %2609 = vpow2.f32 %v2108_v60  ;;  %v4235_v40 = vadd.f32 %v4203_v49, %v382_v47  ;;  %vm1189_vm5 = vweird.f32 %v4177_v53 }
 0x192   :  { %v4227_v18 = vpop.eup %2605  ;;  %v1194_v5 = vand.u32 2147483648, %v4129_v19  ;;  %v2124_v12 = vmul.f32 -1.442695, %v4222_v8  ;;  %v2140_v17 = vmul.f32 -1.442695, %v4225_v52  ;;  %v951_v6 = vsel %vm4241_vm4, %v4148_v57, %v947_v13  ;;  %vm4275_vm8 = vmor %vm1188_vm3, %vm1189_vm5 }
 0x193   :  { %v1425_v39 = vsub.f32 1.0, %v1424_v44  ;;  %v1664_v42 = vmul.f32 %v4227_v18, %v4175_v4  ;;  %v2608_v51 = vpop.eup %2607  ;;  %v1432_v33 = vand.u32 2147483647, %v4172_v9  ;;  %v1434_v1 = vand.u32 2147483648, %v4172_v9 }
 0x194   :  { %v4255_v23 = vadd.f32 %v4203_v49, %v422_v30  ;;  %v1187_v50 = vadd.f32 %v4177_v53, %v1186_v45  ;;  %v4258_v3 = vadd.f32 1.0, %v2608_v51  ;;  %2611 = vpow2.f32 %v2124_v12 }
 0x195   :  { %v1665_v20 = vsub.f32 1.0, %v1664_v42  ;;  %vm4260_vm6 = vcmp.eq.f32.partialorder %v1192_v37, 8.507059e+37  ;;  %v1426_v7 = vmul.f32 %v4198_v28, %v1425_v39  ;;  %2613 = vpow2.f32 %v2140_v17 }
 0x196   :  { %v2093_v57 = vmul.f32 -1.442695, %v4235_v40  ;;  %v1195_v56 = vor.u32 1.1754944e-38, %v1194_v5  ;;  %vm1428_vm7 = vweird.f32 %v4172_v9  ;;  %v1674_v55 = vand.u32 2147483648, %v4175_v4 }
 0x197   :  { %2615 = vrcp.f32 %v4258_v3  ;;  %v2610_v58 = vpop.eup %2609  ;;  %v956_v54 = vsel %vm4213_vm2, %v955_v16, %v951_v6  ;;  %vm4279_vm9 = vcmp.eq.f32.partialorder %v1432_v33, 8.507059e+37  ;;  %vm1668_vm10 = vweird.f32 %v4175_v4 }
 0x198   :  { %v2109_v29 = vmul.f32 -1.442695, %v4255_v23  ;;  %v1191_v34 = vsel %vm4275_vm8, %v4177_v53, %v1187_v50  ;;  %v1435_v26 = vor.u32 1.1754944e-38, %v1434_v1  ;;  %v1666_v19 = vmul.f32 %v4227_v18, %v1665_v20 }
 0x199   :  { %v4289_v36 = vadd.f32 1.0, %v2610_v58  ;;  %v1427_v38 = vadd.f32 %v4198_v28, %v1426_v7  ;;  %vm1429_vm11 = vweird.f32 %v4198_v28  ;;  %v1672_v62 = vand.u32 2147483647, %v4175_v4 }
 0x19a   :  { %2617 = vpow2.f32 %v2093_v57  ;;  %v2612_v25 = vpop.eup %2611  ;;  %v4295_v10 = vmul.f32 %v956_v54, %v3993_v32  ;;  %v4297_v43 = vor.u32 1.1754944e-38, %v1674_v55  ;;  %v4301_v53 = vadd.f32 %v4203_v49, %v462_v31  ;;  %vm4314_vm12 = vmor %vm1428_vm7, %vm1429_vm11 }
 0x19b   :  { %2619 = vrcp.f32 %v4289_v36  ;;  %v2614_v14 = vpop.eup %2613  ;;  %v1196_v35 = vsel %vm4260_vm6, %v1195_v56, %v1191_v34  ;;  %v4305_v48 = vadd.f32 1.0, %v2612_v25  ;;  %v4308_v46 = vadd.f32 %v4203_v49, %v502_v0 }
 0x19c   :  { %2621 = vpow2.f32 %v2109_v29  ;;  %v4319_v44 = vadd.f32 %v4227_v18, %v1666_v19  ;;  %vm1669_vm13 = vweird.f32 %v4227_v18  ;;  %v967_v47 = vand.u32 2147483647, %v4258_v3 }
 0x19d   :  { %v2616_v32 = vpop.eup %2615  ;;  %v4323_v13 = vadd.f32 1.0, %v2614_v14  ;;  %v1431_v60 = vsel %vm4314_vm12, %v4198_v28, %v1427_v38  ;;  %v969_v9 = vand.u32 2147483648, %v4258_v3  ;;  %2623 = vrcp.f32 %v4305_v48  ;;  %vm4341_vm14 = vmor %vm1668_vm10, %vm1669_vm13 }
 0x19e   :  { %v959_v16 = vmul.f32 %v2616_v32, %v4258_v3  ;;  %v4332_v45 = vmul.f32 %v1196_v35, %v4036_v21  ;;  %v2125_v37 = vmul.f32 -1.442695, %v4301_v53  ;;  %v4337_v30 = vadd.f32 %v4203_v49, %v384_v2 }
 0x19f   :  { %2625 = vrcp.f32 %v4323_v13  ;;  %vm963_vm15 = vweird.f32 %v4258_v3  ;;  %v1207_v21 = vand.u32 2147483647, %v4289_v36  ;;  %v2141_v15 = vmul.f32 -1.442695, %v4308_v46 }
 0x1a0   :  { %v2618_v39 = vpop.eup %2617  ;;  %v960_v42 = vsub.f32 1.0, %v959_v16  ;;  %v4350_v12 = vsel %vm4279_vm9, %v1435_v26, %v1431_v60  ;;  %v1671_v4 = vsel %vm4341_vm14, %v4227_v18, %v4319_v44  ;;  %vm4356_vm0 = vcmp.eq.f32.partialorder %v967_v47, 8.507059e+37 }
 0x1a1   :  { %v2620_v5 = vpop.eup %2619  ;;  %v1209_v51 = vand.u32 2147483648, %v4289_v36  ;;  %vm964_vm1 = vweird.f32 %v2616_v32  ;;  %v970_v1 = vor.u32 1.1754944e-38, %v969_v9  ;;  %vm1203_vm2 = vweird.f32 %v4289_v36 }
 0x1a2   :  { %v2622_v6 = vpop.eup %2621  ;;  %v961_v33 = vmul.f32 %v2616_v32, %v960_v42  ;;  %v1199_v50 = vmul.f32 %v2620_v5, %v4289_v36  ;;  %v4363_v20 = vadd.f32 1.0, %v2618_v39  ;;  %2627 = vpow2.f32 %v2125_v37  ;;  %vm965_vm5 = vmor %vm963_vm15, %vm964_vm1 }
 0x1a3   :  { %v2094_v63 = vmul.f32 -1.442695, %v4337_v30  ;;  %v2624_v18 = vpop.eup %2623  ;;  %vm4366_vm3 = vcmp.eq.f32.partialorder %v1672_v62, 8.507059e+37  ;;  %vm4370_vm4 = vcmp.eq.f32.partialorder %v1207_v21, 8.507059e+37  ;;  %2629 = vpow2.f32 %v2141_v15 }
 0x1a4   :  { %v962_v57 = vadd.f32 %v2616_v32, %v961_v33  ;;  %v1200_v56 = vsub.f32 1.0, %v1199_v50  ;;  %v1210_v54 = vor.u32 1.1754944e-38, %v1209_v51  ;;  %v1439_v59 = vmul.f32 %v2624_v18, %v4305_v48  ;;  %v504_v50 = vpop.f32.mrf.mxu3 }
 0x1a5   :  { %v2626_v58 = vpop.eup %2625  ;;  %v1447_v11 = vand.u32 2147483647, %v4305_v48  ;;  %v4378_v29 = vadd.f32 1.0, %v2622_v6  ;;  %vm1204_vm6 = vweird.f32 %v2620_v5  ;;  %v1449_v38 = vand.u32 2147483648, %v4305_v48 }
 0x1a6   :  { %v966_v31 = vsel %vm965_vm5, %v2616_v32, %v962_v57  ;;  %v1201_v34 = vmul.f32 %v2620_v5, %v1200_v56  ;;  %v1679_v26 = vmul.f32 %v2626_v58, %v4323_v13  ;;  %v1440_v0 = vsub.f32 1.0, %v1439_v59  ;;  %vm1205_vm7 = vmor %vm1203_vm2, %vm1204_vm6 }
 0x1a7   :  { %v971_v19 = vsel %vm4356_vm0, %v970_v1, %v966_v31  ;;  %2631 = vrcp.f32 %v4363_v20  ;;  %v1687_v14 = vand.u32 2147483647, %v4323_v13  ;;  %vm1444_vm8 = vweird.f32 %v2624_v18 }
 0x1a8   :  { %v1736_v3 = vmul.f32 %v971_v19, %v4102_v27  ;;  %v1202_v62 = vadd.f32 %v2620_v5, %v1201_v34  ;;  %v1680_v25 = vsub.f32 1.0, %v1679_v26  ;;  %v2628_v35 = vpop.eup %2627  ;;  %v1441_v2 = vmul.f32 %v2624_v18, %v1440_v0 }
 0x1a9   :  { %v1689_v32 = vand.u32 2147483648, %v4323_v13  ;;  %2633 = vrcp.f32 %v4378_v29  ;;  %v2630_v41 = vpop.eup %2629  ;;  %vm1684_vm9 = vweird.f32 %v2626_v58  ;;  %vm1443_vm10 = vweird.f32 %v4305_v48 }
 0x1aa   :  { %v2216_v44 = vpack.c.bf16 %v1736_v3, %v4295_v10  ;;  %v1206_v47 = vsel %vm1205_vm7, %v2620_v5, %v1202_v62  ;;  %v1681_v60 = vmul.f32 %v2626_v58, %v1680_v25  ;;  %v1442_v16 = vadd.f32 %v2624_v18, %v1441_v2  ;;  %vm1445_vm11 = vmor %vm1443_vm10, %vm1444_vm8 }
 0x1ab   :  { %v1211_v27 = vsel %vm4370_vm4, %v1210_v54, %v1206_v47  ;;  %2635 = vpow2.f32 %v2094_v63  ;;  %v1450_v9 = vor.u32 1.1754944e-38, %v1449_v38  ;;  %vm1683_vm12 = vweird.f32 %v4323_v13 }
 0x1ac   :  { %2348 = vst [vmem:[%s4594_s3 + $0x30] sm:$0xff] %v2216_v44   ;;  %v1752_v36 = vmul.f32 %v1211_v27, %v4206_v22  ;;  %v1682_v37 = vadd.f32 %v2626_v58, %v1681_v60  ;;  %v1676_v39 = vsel %vm4366_vm3, %v4297_v43, %v1671_v4  ;;  %v1446_v28 = vsel %vm1445_vm11, %v2624_v18, %v1442_v16  ;;  %vm1685_vm14 = vmor %vm1683_vm12, %vm1684_vm9  ;;  %v424_v43 = vpop.f32.mrf.mxu1 }
 0x1ad   :  { %v4400_v10 = vpop.eup %2631  ;;  %vm1448_vm13 = vcmp.eq.f32.partialorder %v1447_v11, 8.507059e+37  ;;  %v1690_v48 = vor.u32 1.1754944e-38, %v1689_v32  ;;  %vm1688_vm15 = vcmp.eq.f32.partialorder %v1687_v14, 8.507059e+37  ;;  %v1767_v13 = vmul.f32 %v4350_v12, %v4040_v61 }
 0x1ae   :  { %v2256_v42 = vpack.c.bf16 %v1752_v36, %v4332_v45  ;;  %v1451_v21 = vsel %vm1448_vm13, %v1450_v9, %v1446_v28  ;;  %v1686_v22 = vsel %vm1685_vm14, %v2626_v58, %v1682_v37  ;;  %v4412_v51 = vadd.f32 1.0, %v2628_v35 }
 0x1af   :  { %v4407_v15 = vpop.eup %2633  ;;  %v1768_v5 = vmul.f32 %v1451_v21, %v4222_v8  ;;  %v1691_v17 = vsel %vm1688_vm15, %v1690_v48, %v1686_v22  ;;  %v1783_v4 = vmul.f32 %v1676_v39, %v4055_v24  ;;  %v974_v6 = vmul.f32 %v4400_v10, %v4363_v20 }
 0x1b0   :  { %2356 = vst [vmem:[%s4594_s3 + $0x70] sm:$0xff] %v2256_v42   ;;  %v1784_v45 = vmul.f32 %v1691_v17, %v4225_v52  ;;  %v4421_v33 = vadd.f32 1.0, %v2630_v41  ;;  %v4424_v1 = vadd.f32 %v4203_v49, %v424_v43  ;;  %v1214_v24 = vmul.f32 %v4407_v15, %v4378_v29  ;;  %v464_v52 = vpop.f32.mrf.mxu2 }
 0x1b1   :  { %v2636_v61 = vpop.eup %2635  ;;  %v2296_v12 = vpack.c.bf16 %v1768_v5, %v1767_v13  ;;  %2637 = vrcp.f32 %v4412_v51  ;;  %v975_v63 = vsub.f32 1.0, %v974_v6  ;;  %v4440_v57 = vadd.f32 %v4203_v49, %v464_v52 }
 0x1b2   :  { %v2336_v8 = vpack.c.bf16 %v1784_v45, %v1783_v4  ;;  %2639 = vrcp.f32 %v4421_v33  ;;  %v4436_v18 = vadd.f32 1.0, %v2636_v61  ;;  %v2110_v7 = vmul.f32 -1.442695, %v4424_v1 }
 0x1b3   :  { %2364 = vst [vmem:[%s4594_s3 + $0xb0] sm:$0xff] %v2296_v12   ;;  %v4443_v56 = vadd.f32 %v4203_v49, %v504_v50  ;;  %v1215_v55 = vsub.f32 1.0, %v1214_v24  ;;  %v976_v58 = vmul.f32 %v4400_v10, %v975_v63  ;;  %v2126_v59 = vmul.f32 -1.442695, %v4440_v57 }
 0x1b4   :  { %2372 = vst [vmem:[%s4594_s3 + $0xf0] sm:$0xff] %v2336_v8   ;;  %2641 = vrcp.f32 %v4436_v18  ;;  %vm978_vm0 = vweird.f32 %v4363_v20  ;;  %v982_v34 = vand.u32 2147483647, %v4363_v20  ;;  %v984_v49 = vand.u32 2147483648, %v4363_v20 }
 0x1b5   :  { %2643 = vpow2.f32 %v2110_v7  ;;  %v2142_v11 = vmul.f32 -1.442695, %v4443_v56  ;;  %v1216_v26 = vmul.f32 %v4407_v15, %v1215_v55  ;;  %v1222_v19 = vand.u32 2147483647, %v4378_v29 }
 0x1b6   :  { %2645 = vpow2.f32 %v2126_v59  ;;  %v977_v0 = vadd.f32 %v4400_v10, %v976_v58  ;;  %vm979_vm1 = vweird.f32 %v4400_v10  ;;  %v1224_v62 = vand.u32 2147483648, %v4378_v29 }
 0x1b7   :  { %v4447_v54 = vpop.eup %2637  ;;  %2647 = vpow2.f32 %v2142_v11  ;;  %vm4465_vm2 = vcmp.eq.f32.partialorder %v982_v34, 8.507059e+37  ;;  %vm1218_vm3 = vweird.f32 %v4378_v29  ;;  %vm4473_vm4 = vmor %vm978_vm0, %vm979_vm1  ;;  %v985_v41 = vor.u32 1.1754944e-38, %v984_v49 }
 0x1b8   :  { %v4451_v31 = vpop.eup %2639  ;;  %v1454_v38 = vmul.f32 %v4447_v54, %v4412_v51  ;;  %v1217_v44 = vadd.f32 %v4407_v15, %v1216_v26  ;;  %vm1219_vm5 = vweird.f32 %v4407_v15  ;;  %v981_v60 = vsel %vm4473_vm4, %v4400_v10, %v977_v0 }
 0x1b9   :  { %v1694_v25 = vmul.f32 %v4451_v31, %v4421_v33  ;;  %vm4484_vm6 = vcmp.eq.f32.partialorder %v1222_v19, 8.507059e+37  ;;  %v1225_v9 = vor.u32 1.1754944e-38, %v1224_v62  ;;  %v999_v39 = vand.u32 2147483648, %v4436_v18  ;;  %vm4492_vm7 = vmor %vm1218_vm3, %vm1219_vm5 }
 0x1ba   :  { %v2642_v3 = vpop.eup %2641  ;;  %v1455_v20 = vsub.f32 1.0, %v1454_v38  ;;  %vm1458_vm8 = vweird.f32 %v4412_v51  ;;  %v997_v42 = vand.u32 2147483647, %v4436_v18  ;;  %v986_v22 = vsel %vm4465_vm2, %v985_v41, %v981_v60 }
 0x1bb   :  { %v2644_v14 = vpop.eup %2643  ;;  %v989_v2 = vmul.f32 %v2642_v3, %v4436_v18  ;;  %v1695_v37 = vsub.f32 1.0, %v1694_v25  ;;  %vm994_vm9 = vweird.f32 %v2642_v3  ;;  %v1221_v13 = vsel %vm4492_vm7, %v4407_v15, %v1217_v44 }
 0x1bc   :  { %v4479_v47 = vadd.f32 1.0, %v2644_v14  ;;  %v2646_v36 = vpop.eup %2645  ;;  %v1462_v29 = vand.u32 2147483647, %v4412_v51  ;;  %v1456_v17 = vmul.f32 %v4447_v54, %v1455_v20  ;;  %vm993_vm10 = vweird.f32 %v4436_v18 }
 0x1bd   :  { %v990_v16 = vsub.f32 1.0, %v989_v2  ;;  %v2648_v28 = vpop.eup %2647  ;;  %v4498_v21 = vadd.f32 1.0, %v2646_v36  ;;  %v1464_v4 = vand.u32 2147483648, %v4412_v51  ;;  %v1696_v45 = vmul.f32 %v4451_v31, %v1695_v37  ;;  %vm995_vm11 = vmor %vm993_vm10, %vm994_vm9 }
 0x1be   :  { %2649 = vrcp.f32 %v4479_v47  ;;  %v4506_v5 = vadd.f32 1.0, %v2648_v28  ;;  %v1000_v6 = vor.u32 1.1754944e-38, %v999_v39  ;;  %vm1698_vm12 = vweird.f32 %v4421_v33 }
 0x1bf   :  { %v991_v10 = vmul.f32 %v2642_v3, %v990_v16  ;;  %2651 = vrcp.f32 %v4498_v21  ;;  %v1702_v15 = vand.u32 2147483647, %v4421_v33  ;;  %vm998_vm13 = vcmp.eq.f32.partialorder %v997_v42, 8.507059e+37 }
 0x1c0   :  { %2653 = vrcp.f32 %v4506_v5  ;;  %v1737_v8 = vmul.f32 %v986_v22, %v4235_v40  ;;  %v1226_v24 = vsel %vm4484_vm6, %v1225_v9, %v1221_v13  ;;  %v1704_v52 = vand.u32 2147483648, %v4421_v33 }
 0x1c1   :  { %v992_v43 = vadd.f32 %v2642_v3, %v991_v10  ;;  %v1457_v63 = vadd.f32 %v4447_v54, %v1456_v17  ;;  %vm1459_vm14 = vweird.f32 %v4447_v54  ;;  %vm4524_vm15 = vcmp.eq.f32.partialorder %v1462_v29, 8.507059e+37 }
 0x1c2   :  { %v1697_v40 = vadd.f32 %v4451_v31, %v1696_v45  ;;  %vm1699_vm0 = vweird.f32 %v4451_v31  ;;  %v1237_v58 = vand.u32 2147483647, %v4479_v47  ;;  %v1465_v11 = vor.u32 1.1754944e-38, %v1464_v4  ;;  %vm4535_vm1 = vmor %vm1458_vm8, %vm1459_vm14 }
 0x1c3   :  { %v996_v61 = vsel %vm995_vm11, %v2642_v3, %v992_v43  ;;  %v1239_v26 = vand.u32 2147483648, %v4479_v47  ;;  %vm4539_vm2 = vcmp.eq.f32.partialorder %v1702_v15, 8.507059e+37  ;;  %v1705_v3 = vor.u32 1.1754944e-38, %v1704_v52  ;;  %vm4549_vm3 = vmor %vm1698_vm12, %vm1699_vm0 }
 0x1c4   :  { %v2650_v12 = vpop.eup %2649  ;;  %v1001_v50 = vsel %vm998_vm13, %v1000_v6, %v996_v61  ;;  %v1461_v25 = vsel %vm4535_vm1, %v4447_v54, %v1457_v63  ;;  %v1701_v35 = vsel %vm4549_vm3, %v4451_v31, %v1697_v40  ;;  %vm1233_vm5 = vweird.f32 %v4479_v47 }
 0x1c5   :  { %v1738_v18 = vmul.f32 %v1001_v50, %v4337_v30  ;;  %v1229_v7 = vmul.f32 %v2650_v12, %v4479_v47  ;;  %v2652_v59 = vpop.eup %2651  ;;  %v1753_v30 = vmul.f32 %v1226_v24, %v4255_v23  ;;  %vm1234_vm4 = vweird.f32 %v2650_v12 }
 0x1c6   :  { %v2654_v19 = vpop.eup %2653  ;;  %v1469_v62 = vmul.f32 %v2652_v59, %v4498_v21  ;;  %vm4561_vm6 = vcmp.eq.f32.partialorder %v1237_v58, 8.507059e+37  ;;  %v1240_v32 = vor.u32 1.1754944e-38, %v1239_v26  ;;  %v1479_v41 = vand.u32 2147483648, %v4498_v21  ;;  %vm1235_vm7 = vmor %vm1233_vm5, %vm1234_vm4 }
 0x1c7   :  { %v2221_v34 = vpack.c.bf16 %v1738_v18, %v1737_v8  ;;  %v1230_v49 = vsub.f32 1.0, %v1229_v7  ;;  %v1709_v14 = vmul.f32 %v2654_v19, %v4506_v5  ;;  %vm1474_vm8 = vweird.f32 %v2652_v59 }
 0x1c8   :  { %v1470_v54 = vsub.f32 1.0, %v1469_v62  ;;  %v1477_v27 = vand.u32 2147483647, %v4498_v21  ;;  %v1719_v20 = vand.u32 2147483648, %v4506_v5  ;;  %vm1714_vm9 = vweird.f32 %v2654_v19 }
 0x1c9   :  { %2349 = vst [vmem:[%s4594_s3 + $0x38] sm:$0xff] %v2221_v34   ;;  %v1231_v51 = vmul.f32 %v2650_v12, %v1230_v49  ;;  %v1710_v44 = vsub.f32 1.0, %v1709_v14  ;;  %v1717_v47 = vand.u32 2147483647, %v4506_v5  ;;  %v1466_v36 = vsel %vm4524_vm15, %v1465_v11, %v1461_v25 }
 0x1ca   :  { %v1471_v60 = vmul.f32 %v2652_v59, %v1470_v54  ;;  %vm1473_vm10 = vweird.f32 %v4498_v21  ;;  %v1480_v28 = vor.u32 1.1754944e-38, %v1479_v41  ;;  %vm1713_vm12 = vweird.f32 %v4506_v5 }
 0x1cb   :  { %v1232_v2 = vadd.f32 %v2650_v12, %v1231_v51  ;;  %v1711_v16 = vmul.f32 %v2654_v19, %v1710_v44  ;;  %vm1475_vm11 = vmor %vm1473_vm10, %vm1474_vm8  ;;  %v1706_v10 = vsel %vm4539_vm2, %v1705_v3, %v1701_v35  ;;  %vm1478_vm13 = vcmp.eq.f32.partialorder %v1477_v27, 8.507059e+37 }
 0x1cc   :  { %v1472_v37 = vadd.f32 %v2652_v59, %v1471_v60  ;;  %vm1715_vm14 = vmor %vm1713_vm12, %vm1714_vm9  ;;  %v1720_v22 = vor.u32 1.1754944e-38, %v1719_v20  ;;  %vm1718_vm15 = vcmp.eq.f32.partialorder %v1717_v47, 8.507059e+37  ;;  %v1769_v21 = vmul.f32 %v1466_v36, %v4301_v53 }
 0x1cd   :  { %v1236_v31 = vsel %vm1235_vm7, %v2650_v12, %v1232_v2  ;;  %v1712_v48 = vadd.f32 %v2654_v19, %v1711_v16  ;;  %v1785_v4 = vmul.f32 %v1706_v10, %v4308_v46 }
 0x1ce   :  { %v1241_v9 = vsel %vm4561_vm6, %v1240_v32, %v1236_v31  ;;  %v1476_v42 = vsel %vm1475_vm11, %v2652_v59, %v1472_v37 }
 0x1cf   :  { %v1754_v39 = vmul.f32 %v1241_v9, %v4424_v1  ;;  %v1481_v29 = vsel %vm1478_vm13, %v1480_v28, %v1476_v42  ;;  %v1716_v17 = vsel %vm1715_vm14, %v2654_v19, %v1712_v48 }
 0x1d0   :  { %v1770_v1 = vmul.f32 %v1481_v29, %v4440_v57  ;;  %v1721_v43 = vsel %vm1718_vm15, %v1720_v22, %v1716_v17 }
 0x1d1   :  { %v2261_v13 = vpack.c.bf16 %v1754_v39, %v1753_v30  ;;  %v1786_v5 = vmul.f32 %v1721_v43, %v4443_v56 }
 0x1d2   :  { %v2301_v45 = vpack.c.bf16 %v1770_v1, %v1769_v21 }
 0x1d3   :  { %2357 = vst [vmem:[%s4594_s3 + $0x78] sm:$0xff] %v2261_v13   ;;  %v2341_v6 = vpack.c.bf16 %v1786_v5, %v1785_v4 }
 0x1d4   :  { %2365 = vst [vmem:[%s4594_s3 + $0xb8] sm:$0xff] %v2301_v45  }
 0x1d5   :  { %2373 = vst [vmem:[%s4594_s3 + $0xf8] sm:$0xff] %v2341_v6  }

// kernel: forward.11
= control target key start
LH: loop header
LB: loop body
LE: loop exit
PB: predicated region body
PF: predicated region fallthrough
CT: control target
= control target key end

     0   :  { %s1274_s18 = smov 0   ;;  %s1276_s19 = smov 0   ;;  %s1471_s0 = inlined_call_operand.vmem [shape: bf16[2,256,128], index: 0, kind: input, shape index: {}]   ;;  %s1472_s1 = inlined_call_operand.vmem [shape: f32[2,1,128], index: 1, kind: input, shape index: {}]   ;;  %s1473_s2 = inlined_call_operand.vmem [shape: bf16[128,128], index: 2, kind: input, shape index: {}]   ;;  %s1474_s3 = inlined_call_operand.vmem [shape: f32[1,128], index: 3, kind: input, shape index: {}]   ;;  %s1475_s4 = inlined_call_operand.vmem [shape: bf16[2,256,128], index: 4, kind: input, shape index: {}]   ;;  %s1476_s5 = inlined_call_operand.vmem [shape: bf16[2,256,128], index: 5, kind: output, shape index: {}]  }
   0x1   :  { %s1278_s20 = smov 0  }
   0x2 LB: > { %s27_s21 = sadd.s32 1, %s1238_s19  ;;  %p865_p0 = scmp.ge.s32.totalorder %s1242_s20, 1  ;;  %s1242_s20 = sphi %s1278_s20, %s15_s20   ;;  %s1238_s19 = sphi %s1276_s19, %s1478_s19   ;;  %s1234_s18 = sphi %s1274_s18, %s1477_s18  }
   0x3   : > { %p29_p1 = scmp.ge.s32.totalorder %s27_s21, 2  ;;  %p233_p2 = scmp.lt.s32.totalorder %s1242_s20, 3 }
   0x5   : > { %s1480_s21 = smov (%p29_p1, %s27_s21), 0  ;;  %p234_p3 = pnand %p865_p0, %p233_p2 }
   0x6   : > { %p282_p4 = scmp.lt.s32.totalorder (!%p234_p3), %s1234_s18, 1 }
   0x7   : > { %237 = sbr.rel (%p234_p3) target bundleno = 241 (0xf1), region = 40 }
   0xc   : > { %v916_v0 = vld [vmem:[%s1473_s2 + $0x38] sm:$0xff]  ;;  %v915_v1 = vld [vmem:[%s1473_s2 + $0x30] sm:$0xff]  ;;  %s1482_s18 = smov (!%p282_p4, %s1234_s18), 1  ;;  %v914_v2 = vld [vmem:[%s1473_s2 + $0x28] sm:$0xff] }
   0xd   : > { %498 = vmatpush.bf16.msra.mxu0 %v916_v0  ;;  %1170 = vmatpush.bf16.msra.mxu1 %v916_v0  ;;  %s293_s28 = scalar_lea.vmem %s1472_s1, %s1482_s18  ;;  %v913_v3 = vld [vmem:[%s1473_s2 + $0x20] sm:$0xff]  ;;  %s1311_s8 = sshll.u32 %s1482_s18, 7  ;;  %v912_v4 = vld [vmem:[%s1473_s2 + $0x18] sm:$0xff]  ;;  %v911_v6 = vld [vmem:[%s1473_s2 + $0x10] sm:$0xff] }
   0xe   : > { %1171 = vmatpush.bf16.msra.mxu2 %v916_v0  ;;  %1172 = vmatpush.bf16.msra.mxu3 %v916_v0  ;;  %s1320_s13 = scalar_lea.vmem %s1471_s0, %s1311_s8  ;;  %v1329_v11 = vld [vmem:[%s293_s28] ss:$0 sm:$0xff]  ;;  %v910_v16 = vld [vmem:[%s1473_s2 + $0x8] sm:$0xff]  ;;  %s1385_s25 = scalar_lea.vmem %s1475_s4, %s1311_s8 }
   0xf   : > { %v918_v5 = vld [vmem:[%s1320_s13] sm:$0xff]   ;;  %v1125_v33 = vld [vmem:[%s1320_s13 + $0x8] sm:$0xff]   ;;  %v1126_v57 = vld [vmem:[%s1320_s13 + $0x10] sm:$0xff]   ;;  %s1404_s30 = scalar_lea.vmem %s1476_s5, %s1311_s8 }
  0x10   : > { %v1128_v7 = vld [vmem:[%s1320_s13 + $0x20] sm:$0xff]   ;;  %v919_v10 = vunpack.c.l.bf16 %v918_v5  ;;  %v920_v12 = vunpack.c.h.bf16 %v918_v5  ;;  %v1129_v34 = vld [vmem:[%s1320_s13 + $0x28] sm:$0xff]   ;;  %v923_v37 = vunpack.c.l.bf16 %v1125_v33  ;;  %v924_v38 = vunpack.c.h.bf16 %v1125_v33  ;;  %v1130_v58 = vld [vmem:[%s1320_s13 + $0x30] sm:$0xff]  }
  0x11   : > { %499 = vmatpush.bf16.msra.mxu0 %v915_v1  ;;  %1173 = vmatpush.bf16.msra.mxu1 %v915_v1  ;;  %v1132_v8 = vld [vmem:[%s1320_s13 + $0x40] sm:$0xff]   ;;  %v935_v13 = vunpack.c.l.bf16 %v1128_v7  ;;  %v936_v14 = vunpack.c.h.bf16 %v1128_v7  ;;  %v1133_v35 = vld [vmem:[%s1320_s13 + $0x48] sm:$0xff]   ;;  %v939_v39 = vunpack.c.l.bf16 %v1129_v34  ;;  %v940_v40 = vunpack.c.h.bf16 %v1129_v34  ;;  %v1134_v59 = vld [vmem:[%s1320_s13 + $0x50] sm:$0xff]  }
  0x12   : > { %1174 = vmatpush.bf16.msra.mxu2 %v915_v1  ;;  %1175 = vmatpush.bf16.msra.mxu3 %v915_v1  ;;  %v1136_v9 = vld [vmem:[%s1320_s13 + $0x60] sm:$0xff]   ;;  %v951_v15 = vunpack.c.l.bf16 %v1132_v8  ;;  %v952_v17 = vunpack.c.h.bf16 %v1132_v8  ;;  %v382_v20 = vmul.f32 %v1329_v11, %v919_v10  ;;  %v383_v21 = vmul.f32 %v1329_v11, %v920_v12  ;;  %v1137_v36 = vld [vmem:[%s1320_s13 + $0x68] sm:$0xff]   ;;  %v1138_v60 = vld [vmem:[%s1320_s13 + $0x70] sm:$0xff]  }
  0x13   : > { %v967_v18 = vunpack.c.l.bf16 %v1136_v9  ;;  %v968_v19 = vunpack.c.h.bf16 %v1136_v9  ;;  %v390_v22 = vmul.f32 %v1329_v11, %v935_v13  ;;  %v391_v23 = vmul.f32 %v1329_v11, %v936_v14  ;;  %v909_v25 = vld [vmem:[%s1473_s2] sm:$0xff] }
  0x14   : > { %v398_v24 = vmul.f32 %v1329_v11, %v951_v15  ;;  %v399_v26 = vmul.f32 %v1329_v11, %v952_v17  ;;  %v414_v29 = vpack.c.bf16 %v383_v21, %v382_v20  ;;  %v955_v41 = vunpack.c.l.bf16 %v1133_v35  ;;  %v1135_v20 = vld [vmem:[%s1320_s13 + $0x58] sm:$0xff]  }
  0x15   : > { %500 = vmatpush.bf16.msra.mxu0 %v914_v2  ;;  %1176 = vmatpush.bf16.msra.mxu1 %v914_v2  ;;  %v406_v27 = vmul.f32 %v1329_v11, %v967_v18  ;;  %v407_v28 = vmul.f32 %v1329_v11, %v968_v19  ;;  %v418_v30 = vpack.c.bf16 %v391_v23, %v390_v22  ;;  %v956_v42 = vunpack.c.h.bf16 %v1133_v35  ;;  %v1127_v18 = vld [vmem:[%s1320_s13 + $0x18] sm:$0xff]  }
  0x16   : > { %1177 = vmatpush.bf16.msra.mxu2 %v914_v2  ;;  %1178 = vmatpush.bf16.msra.mxu3 %v914_v2  ;;  %v422_v31 = vpack.c.bf16 %v399_v26, %v398_v24  ;;  %v971_v43 = vunpack.c.l.bf16 %v1137_v36  ;;  %v972_v44 = vunpack.c.h.bf16 %v1137_v36  ;;  %v384_v45 = vmul.f32 %v1329_v11, %v923_v37  ;;  %v1131_v19 = vld [vmem:[%s1320_s13 + $0x38] sm:$0xff]  }
  0x17   : > { %v426_v32 = vpack.c.bf16 %v407_v28, %v406_v27  ;;  %v385_v46 = vmul.f32 %v1329_v11, %v924_v38  ;;  %v392_v47 = vmul.f32 %v1329_v11, %v939_v39  ;;  %v393_v48 = vmul.f32 %v1329_v11, %v940_v40  ;;  %v1139_v21 = vld [vmem:[%s1320_s13 + $0x78] sm:$0xff]  }
  0x18   : > { %v400_v49 = vmul.f32 %v1329_v11, %v955_v41  ;;  %v401_v50 = vmul.f32 %v1329_v11, %v956_v42  ;;  %v408_v51 = vmul.f32 %v1329_v11, %v971_v43  ;;  %v409_v52 = vmul.f32 %v1329_v11, %v972_v44  ;;  %v982_v44 = vld [vmem:[%s1385_s25] sm:$0xff]  }
  0x19   : > { %501 = vmatpush.bf16.msra.mxu0 %v913_v3  ;;  %1179 = vmatpush.bf16.msra.mxu1 %v913_v3  ;;  %v415_v53 = vpack.c.bf16 %v385_v46, %v384_v45  ;;  %v419_v54 = vpack.c.bf16 %v393_v48, %v392_v47  ;;  %v927_v61 = vunpack.c.l.bf16 %v1126_v57  ;;  %v928_v62 = vunpack.c.h.bf16 %v1126_v57  ;;  %v1143_v45 = vld [vmem:[%s1385_s25 + $0x20] sm:$0xff]  }
  0x1a   : > { %1180 = vmatpush.bf16.msra.mxu2 %v913_v3  ;;  %1181 = vmatpush.bf16.msra.mxu3 %v913_v3  ;;  %v423_v55 = vpack.c.bf16 %v401_v50, %v400_v49  ;;  %v427_v56 = vpack.c.bf16 %v409_v52, %v408_v51  ;;  %v943_v63 = vunpack.c.l.bf16 %v1130_v58  ;;  %v944_v0 = vunpack.c.h.bf16 %v1130_v58  ;;  %v1147_v58 = vld [vmem:[%s1385_s25 + $0x40] sm:$0xff]  }
  0x1b   : > { %v959_v1 = vunpack.c.l.bf16 %v1134_v59  ;;  %v960_v2 = vunpack.c.h.bf16 %v1134_v59  ;;  %v975_v3 = vunpack.c.l.bf16 %v1138_v60  ;;  %v386_v5 = vmul.f32 %v1329_v11, %v927_v61  ;;  %v1151_v59 = vld [vmem:[%s1385_s25 + $0x60] sm:$0xff]  }
  0x1c   : > { %v394_v7 = vmul.f32 %v1329_v11, %v943_v63  ;;  %v395_v8 = vmul.f32 %v1329_v11, %v944_v0  ;;  %v931_v22 = vunpack.c.l.bf16 %v1127_v18  ;;  %v932_v23 = vunpack.c.h.bf16 %v1127_v18 }
  0x1d   : > { %502 = vmatpush.bf16.msra.mxu0 %v912_v4  ;;  %1182 = vmatpush.bf16.msra.mxu1 %v912_v4  ;;  %v402_v9 = vmul.f32 %v1329_v11, %v959_v1  ;;  %v403_v10 = vmul.f32 %v1329_v11, %v960_v2  ;;  %v410_v12 = vmul.f32 %v1329_v11, %v975_v3  ;;  %v947_v24 = vunpack.c.l.bf16 %v1131_v19 }
  0x1e   : > { %1183 = vmatpush.bf16.msra.mxu2 %v912_v4  ;;  %1184 = vmatpush.bf16.msra.mxu3 %v912_v4  ;;  %v976_v4 = vunpack.c.h.bf16 %v1138_v60  ;;  %v420_v15 = vpack.c.bf16 %v395_v8, %v394_v7  ;;  %v963_v26 = vunpack.c.l.bf16 %v1135_v20  ;;  %v964_v27 = vunpack.c.h.bf16 %v1135_v20  ;;  %v1144_v20 = vld [vmem:[%s1385_s25 + $0x28] sm:$0xff]  }
  0x1f   : > { %v979_v28 = vunpack.c.l.bf16 %v1139_v21  ;;  %v983_v46 = vunpack.c.l.bf16 %v982_v44  ;;  %v999_v47 = vunpack.c.l.bf16 %v1143_v45  ;;  %v984_v52 = vunpack.c.h.bf16 %v982_v44 }
  0x20   : > { %v411_v13 = vmul.f32 %v1329_v11, %v976_v4  ;;  %v404_v34 = vmul.f32 %v1329_v11, %v963_v26  ;;  %v405_v35 = vmul.f32 %v1329_v11, %v964_v27  ;;  %v1015_v0 = vunpack.c.l.bf16 %v1147_v58 }
  0x21   : > { %503 = vmatpush.bf16.msra.mxu0 %v911_v6  ;;  %1185 = vmatpush.bf16.msra.mxu1 %v911_v6  ;;  %v412_v36 = vmul.f32 %v1329_v11, %v979_v28  ;;  %v1031_v1 = vunpack.c.l.bf16 %v1151_v59  ;;  %v1032_v7 = vunpack.c.h.bf16 %v1151_v59  ;;  %v1141_v59 = vld [vmem:[%s1385_s25 + $0x10] sm:$0xff]  }
  0x22   : > { %1186 = vmatpush.bf16.msra.mxu2 %v911_v6  ;;  %1187 = vmatpush.bf16.msra.mxu3 %v911_v6  ;;  %v387_v6 = vmul.f32 %v1329_v11, %v928_v62  ;;  %v428_v17 = vpack.c.bf16 %v411_v13, %v410_v12  ;;  %v425_v40 = vpack.c.bf16 %v405_v35, %v404_v34  ;;  %v1148_v35 = vld [vmem:[%s1385_s25 + $0x48] sm:$0xff]  }
  0x24   : > { %v416_v14 = vpack.c.bf16 %v387_v6, %v386_v5  ;;  %v1016_v6 = vunpack.c.h.bf16 %v1147_v58 }
  0x25   : > { %504 = vmatpush.bf16.msra.mxu0 %v910_v16  ;;  %1188 = vmatpush.bf16.msra.mxu1 %v910_v16 }
  0x26   : > { %1189 = vmatpush.bf16.msra.mxu2 %v910_v16  ;;  %1190 = vmatpush.bf16.msra.mxu3 %v910_v16  ;;  %v424_v16 = vpack.c.bf16 %v403_v10, %v402_v9 }
  0x29   : > { %505 = vmatpush.bf16.msra.mxu0 %v909_v25  ;;  %1191 = vmatpush.bf16.msra.mxu1 %v909_v25 }
  0x2a   : > { %1192 = vmatpush.bf16.msra.mxu2 %v909_v25  ;;  %1193 = vmatpush.bf16.msra.mxu3 %v909_v25  ;;  %v948_v25 = vunpack.c.h.bf16 %v1131_v19  ;;  %v1140_v19 = vld [vmem:[%s1385_s25 + $0x8] sm:$0xff]  }
  0x2c   : > { %506 = vmatmul.bf16.vlgmr.msra.gmra.mxu0 %v414_v29  ;;  %526 = vmatmul.bf16.vlgmr.msra.gmra.mxu1 %v418_v30  ;;  %v980_v29 = vunpack.c.h.bf16 %v1139_v21  ;;  %v388_v30 = vmul.f32 %v1329_v11, %v931_v22  ;;  %v397_v33 = vmul.f32 %v1329_v11, %v948_v25 }
  0x2d   : > { %546 = vmatmul.bf16.vlgmr.msra.gmra.mxu2 %v422_v31  ;;  %566 = vmatmul.bf16.vlgmr.msra.gmra.mxu3 %v426_v32  ;;  %v389_v31 = vmul.f32 %v1329_v11, %v932_v23  ;;  %v396_v32 = vmul.f32 %v1329_v11, %v947_v24  ;;  %v987_v23 = vunpack.c.l.bf16 %v1140_v19  ;;  %v1003_v24 = vunpack.c.l.bf16 %v1144_v20 }
  0x2e   : > { %v413_v37 = vmul.f32 %v1329_v11, %v980_v29  ;;  %v1390_v11 = vld [vmem:[%s1474_s3] ss:$0 sm:$0xff]  ;;  %v988_v29 = vunpack.c.h.bf16 %v1140_v19 }
  0x2f   : > { %v417_v38 = vpack.c.bf16 %v389_v31, %v388_v30  ;;  %v421_v39 = vpack.c.bf16 %v397_v33, %v396_v32  ;;  %v1004_v30 = vunpack.c.h.bf16 %v1144_v20 }
  0x30   : > { %v429_v41 = vpack.c.bf16 %v413_v37, %v412_v36  ;;  %v1152_v36 = vld [vmem:[%s1385_s25 + $0x68] sm:$0xff]  }
  0x3c   : > { %511 = vmatmul.bf16.gmra.mxu0 %v415_v53  ;;  %531 = vmatmul.bf16.gmra.mxu1 %v419_v54  ;;  %v1000_v53 = vunpack.c.h.bf16 %v1143_v45 }
  0x3d   : > { %551 = vmatmul.bf16.gmra.mxu2 %v423_v55  ;;  %571 = vmatmul.bf16.gmra.mxu3 %v427_v56 }
  0x4c   : > { %516 = vmatmul.bf16.gmra.mxu0 %v416_v14  ;;  %536 = vmatmul.bf16.gmra.mxu1 %v420_v15 }
  0x4d   : > { %556 = vmatmul.bf16.gmra.mxu2 %v424_v16  ;;  %576 = vmatmul.bf16.gmra.mxu3 %v428_v17 }
  0x5c   : > { %521 = vmatmul.bf16.gmra.mxu0 %v417_v38  ;;  %541 = vmatmul.bf16.gmra.mxu1 %v421_v39 }
  0x5d   : > { %561 = vmatmul.bf16.gmra.mxu2 %v425_v40  ;;  %581 = vmatmul.bf16.gmra.mxu3 %v429_v41  ;;  %v1019_v41 = vunpack.c.l.bf16 %v1148_v35 }
  0xa9   : > { %v507_v42 = vpop.f32.mrf.mxu0  ;;  %v527_v43 = vpop.f32.mrf.mxu1 }
  0xaa   : > { %v508_v48 = vadd.f32 %v1390_v11, %v507_v42  ;;  %v528_v49 = vadd.f32 %v1390_v11, %v527_v43  ;;  %v1035_v42 = vunpack.c.l.bf16 %v1152_v36 }
  0xac   : > { %v651_v60 = vadd.f32 %v983_v46, %v508_v48  ;;  %v659_v61 = vadd.f32 %v999_v47, %v528_v49  ;;  %v1020_v47 = vunpack.c.h.bf16 %v1148_v35  ;;  %v1036_v48 = vunpack.c.h.bf16 %v1152_v36  ;;  %v1142_v36 = vld [vmem:[%s1385_s25 + $0x18] sm:$0xff]  }
  0xb0   : > { %v547_v50 = vpop.f32.mrf.mxu2  ;;  %v567_v51 = vpop.f32.mrf.mxu3 }
  0xb1   : > { %v509_v54 = vpop.f32.mrf.mxu0  ;;  %v529_v55 = vpop.f32.mrf.mxu1  ;;  %v548_v4 = vadd.f32 %v1390_v11, %v547_v50  ;;  %v568_v5 = vadd.f32 %v1390_v11, %v567_v51 }
  0xb2   : > { %v510_v56 = vadd.f32 %v1390_v11, %v509_v54  ;;  %v530_v57 = vadd.f32 %v1390_v11, %v529_v55 }
  0xb3   : > { %v667_v15 = vadd.f32 %v1015_v0, %v548_v4  ;;  %v675_v16 = vadd.f32 %v1031_v1, %v568_v5  ;;  %v992_v5 = vunpack.c.h.bf16 %v1141_v59 }
  0xb4   : > { %v652_v62 = vadd.f32 %v984_v52, %v510_v56  ;;  %v660_v63 = vadd.f32 %v1000_v53, %v530_v57 }
  0xb6   : > { %v1048_v2 = vpack.c.bf16 %v652_v62, %v651_v60  ;;  %v1068_v3 = vpack.c.bf16 %v660_v63, %v659_v61  ;;  %v1145_v60 = vld [vmem:[%s1385_s25 + $0x30] sm:$0xff]   ;;  %v991_v63 = vunpack.c.l.bf16 %v1141_v59 }
  0xb7   : > { %v1007_v0 = vunpack.c.l.bf16 %v1145_v60 }
  0xb8   : > { %1049 = vst [vmem:[%s1404_s30] sm:$0xff] %v1048_v2   ;;  %v549_v8 = vpop.f32.mrf.mxu2  ;;  %v569_v9 = vpop.f32.mrf.mxu3 }
  0xb9   : > { %1158 = vst [vmem:[%s1404_s30 + $0x20] sm:$0xff] %v1068_v3   ;;  %v550_v10 = vadd.f32 %v1390_v11, %v549_v8  ;;  %v570_v12 = vadd.f32 %v1390_v11, %v569_v9  ;;  %v512_v13 = vpop.f32.mrf.mxu0  ;;  %v532_v14 = vpop.f32.mrf.mxu1 }
  0xba   : > { %v513_v25 = vadd.f32 %v1390_v11, %v512_v13  ;;  %v533_v26 = vadd.f32 %v1390_v11, %v532_v14  ;;  %v1153_v13 = vld [vmem:[%s1385_s25 + $0x70] sm:$0xff]  }
  0xbb   : > { %v668_v17 = vadd.f32 %v1016_v6, %v550_v10  ;;  %v676_v18 = vadd.f32 %v1032_v7, %v570_v12  ;;  %v1008_v6 = vunpack.c.h.bf16 %v1145_v60  ;;  %v1149_v12 = vld [vmem:[%s1385_s25 + $0x50] sm:$0xff]   ;;  %v1039_v19 = vunpack.c.l.bf16 %v1153_v13 }
  0xbc   : > { %v653_v37 = vadd.f32 %v987_v23, %v513_v25  ;;  %v661_v38 = vadd.f32 %v1003_v24, %v533_v26  ;;  %v1024_v24 = vunpack.c.h.bf16 %v1149_v12  ;;  %v1040_v25 = vunpack.c.h.bf16 %v1153_v13 }
  0xbd   : > { %v1088_v21 = vpack.c.bf16 %v668_v17, %v667_v15  ;;  %v1108_v22 = vpack.c.bf16 %v676_v18, %v675_v16  ;;  %v1023_v18 = vunpack.c.l.bf16 %v1149_v12 }
  0xbf   : > { %1162 = vst [vmem:[%s1404_s30 + $0x40] sm:$0xff] %v1088_v21  }
  0xc0   : > { %1166 = vst [vmem:[%s1404_s30 + $0x60] sm:$0xff] %v1108_v22   ;;  %v552_v27 = vpop.f32.mrf.mxu2  ;;  %v572_v28 = vpop.f32.mrf.mxu3 }
  0xc1   : > { %v514_v31 = vpop.f32.mrf.mxu0  ;;  %v534_v32 = vpop.f32.mrf.mxu1  ;;  %v553_v45 = vadd.f32 %v1390_v11, %v552_v27  ;;  %v573_v46 = vadd.f32 %v1390_v11, %v572_v28 }
  0xc2   : > { %v515_v33 = vadd.f32 %v1390_v11, %v514_v31  ;;  %v535_v34 = vadd.f32 %v1390_v11, %v534_v32 }
  0xc3   : > { %v669_v55 = vadd.f32 %v1019_v41, %v553_v45  ;;  %v677_v56 = vadd.f32 %v1035_v42, %v573_v46  ;;  %v996_v46 = vunpack.c.h.bf16 %v1142_v36 }
  0xc4   : > { %v654_v39 = vadd.f32 %v988_v29, %v515_v33  ;;  %v662_v40 = vadd.f32 %v1004_v30, %v535_v34 }
  0xc6   : > { %v1053_v43 = vpack.c.bf16 %v654_v39, %v653_v37  ;;  %v1073_v44 = vpack.c.bf16 %v662_v40, %v661_v38  ;;  %v1146_v37 = vld [vmem:[%s1385_s25 + $0x38] sm:$0xff]   ;;  %v995_v40 = vunpack.c.l.bf16 %v1142_v36 }
  0xc7   : > { %v1011_v41 = vunpack.c.l.bf16 %v1146_v37 }
  0xc8   : > { %1155 = vst [vmem:[%s1404_s30 + $0x8] sm:$0xff] %v1053_v43   ;;  %v554_v49 = vpop.f32.mrf.mxu2  ;;  %v574_v50 = vpop.f32.mrf.mxu3 }
  0xc9   : > { %1159 = vst [vmem:[%s1404_s30 + $0x28] sm:$0xff] %v1073_v44   ;;  %v555_v51 = vadd.f32 %v1390_v11, %v554_v49  ;;  %v575_v52 = vadd.f32 %v1390_v11, %v574_v50  ;;  %v517_v53 = vpop.f32.mrf.mxu0  ;;  %v537_v54 = vpop.f32.mrf.mxu1 }
  0xca   : > { %v518_v1 = vadd.f32 %v1390_v11, %v517_v53  ;;  %v538_v2 = vadd.f32 %v1390_v11, %v537_v54  ;;  %v1154_v53 = vld [vmem:[%s1385_s25 + $0x78] sm:$0xff]  }
  0xcb   : > { %v670_v57 = vadd.f32 %v1020_v47, %v555_v51  ;;  %v678_v58 = vadd.f32 %v1036_v48, %v575_v52  ;;  %v1012_v47 = vunpack.c.h.bf16 %v1146_v37  ;;  %v1150_v52 = vld [vmem:[%s1385_s25 + $0x58] sm:$0xff]   ;;  %v1043_v59 = vunpack.c.l.bf16 %v1154_v53 }
  0xcc   : > { %v655_v14 = vadd.f32 %v991_v63, %v518_v1  ;;  %v663_v15 = vadd.f32 %v1007_v0, %v538_v2  ;;  %v1028_v0 = vunpack.c.h.bf16 %v1150_v52  ;;  %v1044_v1 = vunpack.c.h.bf16 %v1154_v53 }
  0xcd   : > { %v1093_v61 = vpack.c.bf16 %v670_v57, %v669_v55  ;;  %v1113_v62 = vpack.c.bf16 %v678_v58, %v677_v56  ;;  %v1027_v58 = vunpack.c.l.bf16 %v1150_v52 }
  0xcf   : > { %1163 = vst [vmem:[%s1404_s30 + $0x48] sm:$0xff] %v1093_v61  }
  0xd0   : > { %1167 = vst [vmem:[%s1404_s30 + $0x68] sm:$0xff] %v1113_v62   ;;  %v557_v3 = vpop.f32.mrf.mxu2  ;;  %v577_v4 = vpop.f32.mrf.mxu3 }
  0xd1   : > { %v519_v7 = vpop.f32.mrf.mxu0  ;;  %v539_v8 = vpop.f32.mrf.mxu1  ;;  %v558_v22 = vadd.f32 %v1390_v11, %v557_v3  ;;  %v578_v23 = vadd.f32 %v1390_v11, %v577_v4 }
  0xd2   : > { %v520_v9 = vadd.f32 %v1390_v11, %v519_v7  ;;  %v540_v10 = vadd.f32 %v1390_v11, %v539_v8 }
  0xd3   : > { %v671_v32 = vadd.f32 %v1023_v18, %v558_v22  ;;  %v679_v33 = vadd.f32 %v1039_v19, %v578_v23 }
  0xd4   : > { %v656_v16 = vadd.f32 %v992_v5, %v520_v9  ;;  %v664_v17 = vadd.f32 %v1008_v6, %v540_v10 }
  0xd6   : > { %v1058_v20 = vpack.c.bf16 %v656_v16, %v655_v14  ;;  %v1078_v21 = vpack.c.bf16 %v664_v17, %v663_v15 }
  0xd8   : > { %1156 = vst [vmem:[%s1404_s30 + $0x10] sm:$0xff] %v1058_v20   ;;  %v559_v26 = vpop.f32.mrf.mxu2  ;;  %v579_v27 = vpop.f32.mrf.mxu3 }
  0xd9   : > { %1160 = vst [vmem:[%s1404_s30 + $0x30] sm:$0xff] %v1078_v21   ;;  %v560_v28 = vadd.f32 %v1390_v11, %v559_v26  ;;  %v580_v29 = vadd.f32 %v1390_v11, %v579_v27  ;;  %v522_v30 = vpop.f32.mrf.mxu0  ;;  %v542_v31 = vpop.f32.mrf.mxu1 }
  0xda   : > { %v523_v42 = vadd.f32 %v1390_v11, %v522_v30  ;;  %v543_v43 = vadd.f32 %v1390_v11, %v542_v31 }
  0xdb   : > { %v672_v34 = vadd.f32 %v1024_v24, %v560_v28  ;;  %v680_v35 = vadd.f32 %v1040_v25, %v580_v29 }
  0xdc   : > { %v657_v54 = vadd.f32 %v995_v40, %v523_v42  ;;  %v665_v55 = vadd.f32 %v1011_v41, %v543_v43 }
  0xdd   : > { %v1098_v38 = vpack.c.bf16 %v672_v34, %v671_v32  ;;  %v1118_v39 = vpack.c.bf16 %v680_v35, %v679_v33 }
  0xdf   : > { %1164 = vst [vmem:[%s1404_s30 + $0x50] sm:$0xff] %v1098_v38  }
  0xe0   : > { %1168 = vst [vmem:[%s1404_s30 + $0x70] sm:$0xff] %v1118_v39   ;;  %v562_v44 = vpop.f32.mrf.mxu2  ;;  %v582_v45 = vpop.f32.mrf.mxu3 }
  0xe1   : > { %v524_v48 = vpop.f32.mrf.mxu0  ;;  %v544_v49 = vpop.f32.mrf.mxu1  ;;  %v563_v62 = vadd.f32 %v1390_v11, %v562_v44  ;;  %v583_v63 = vadd.f32 %v1390_v11, %v582_v45 }
  0xe2   : > { %v525_v50 = vadd.f32 %v1390_v11, %v524_v48  ;;  %v545_v51 = vadd.f32 %v1390_v11, %v544_v49 }
  0xe3   : > { %v673_v6 = vadd.f32 %v1027_v58, %v563_v62  ;;  %v681_v7 = vadd.f32 %v1043_v59, %v583_v63 }
  0xe4   : > { %v658_v56 = vadd.f32 %v996_v46, %v525_v50  ;;  %v666_v57 = vadd.f32 %v1012_v47, %v545_v51 }
  0xe6   : > { %v1063_v60 = vpack.c.bf16 %v658_v56, %v657_v54  ;;  %v1083_v61 = vpack.c.bf16 %v666_v57, %v665_v55 }
  0xe8   : > { %1157 = vst [vmem:[%s1404_s30 + $0x18] sm:$0xff] %v1063_v60   ;;  %v564_v2 = vpop.f32.mrf.mxu2  ;;  %v584_v3 = vpop.f32.mrf.mxu3 }
  0xe9   : > { %1161 = vst [vmem:[%s1404_s30 + $0x38] sm:$0xff] %v1083_v61   ;;  %v565_v4 = vadd.f32 %v1390_v11, %v564_v2  ;;  %v585_v5 = vadd.f32 %v1390_v11, %v584_v3 }
  0xeb   : > { %v674_v8 = vadd.f32 %v1028_v0, %v565_v4  ;;  %v682_v9 = vadd.f32 %v1044_v1, %v585_v5 }
  0xed   : > { %v1103_v10 = vpack.c.bf16 %v674_v8, %v673_v6  ;;  %v1123_v12 = vpack.c.bf16 %v682_v9, %v681_v7 }
  0xef   : > { %1165 = vst [vmem:[%s1404_s30 + $0x58] sm:$0xff] %v1103_v10  }
  0xf0   : > { %1169 = vst [vmem:[%s1404_s30 + $0x78] sm:$0xff] %v1123_v12  }
  0xf1 PF: > { %s15_s20 = sadd.s32 1, %s1242_s20   ;;  %s1477_s18 = smov %s1238_s19 }
  0xf2   : > { %p12_p5 = scmp.ge.s32.totalorder %s15_s20, 4   ;;  %s1478_s19 = smov %s1480_s21 }
  0xf4   :  { %14 = sbr.rel (!%p12_p5) target bundleno = 2 (0x2), region = 76 }

// kernel: forward.9
= control target key start
LH: loop header
LB: loop body
LE: loop exit
PB: predicated region body
PF: predicated region fallthrough
CT: control target
= control target key end

     0   :  { %s3744_s15 = smov 0   ;;  %s6010_s0 = inlined_call_operand.vmem [shape: bf16[2,16,16,128], index: 0, kind: input, shape index: {}]   ;;  %s6011_s1 = inlined_call_operand.vmem [shape: f32[3,3,128], index: 1, kind: input, shape index: {}]   ;;  %s6012_s2 = inlined_call_operand.vmem [shape: f32[1,1,128], index: 2, kind: input, shape index: {}]   ;;  %s6013_s3 = inlined_call_operand.vmem [shape: bf16[2,16,16,128], index: 3, kind: output, shape index: {0}]   ;;  %s6014_s4 = inlined_call_operand.vmem [shape: f32[2,1,128], index: 4, kind: output, shape index: {1}]  }
   0x1 LB: > { %s3385_s16 = sadd.s32 4294967295, %s3716_s15   ;;  %p3389_p0 = scmp.ge.s32.totalorder %s3716_s15, 1  ;;  %s3716_s15 = sphi %s3744_s15, %s15_s15  }
   0x2   : > { %p165_p1 = scmp.lt.s32.totalorder %s3716_s15, 3 }
   0x4   : > { %p166_p2 = pnand %p3389_p0, %p165_p1 }
   0x5   : > { %p194_p3 = scmp.lt.s32.totalorder (!%p166_p2), %s3385_s16, 1 }
   0x6   : > { %169 = sbr.rel (%p166_p2) target bundleno = 593 (0x251), region = 32 }
   0xb   : > { %v3718_v0 = vmov 0   ;;  %s6108_s16 = smov (!%p194_p3, %s3385_s16), 1  ;;  %vm618_vm0 = vcmask 1043456   ;;  %vm619_vm1 = vsmask.f32 7938  ;;  %vm625_vm4 = vcmask 1040384  }
   0xc   : > { %211 = vst [vmem:[#allocation2 + $0xc] sm:$0xf] %v3718_v0  ;;  %s3428_s17 = sshll.u32 %s6108_s16, 7  ;;  %vm294_vm2 = vsmask.f32 256  ;;  %vm3842_vm5 = vmand %vm618_vm0, %vm619_vm1  ;;  %vm1139_vm8 = vcmask 1046528   ;;  %s206_s14 = scalar_lea.vmem %s6014_s4, %s6108_s16 }
   0xd   : > { %208 = vst [vmem:[#allocation2] sm:$0xf] %v3718_v0  ;;  %s3784_s20 = scalar_lea.vmem %s6010_s0, %s3428_s17  ;;  %vm295_vm3 = vsmask.f32 4368  ;;  %vm3870_vm7 = vmand %vm625_vm4, %vm294_vm2  ;;  %v4117_v26 = vld [vmem:[%s6011_s1 + $0x8] sm:$0x7]  ;;  %s4379_s5 = scalar_lea.vmem %s6013_s3, %s3428_s17 }
   0xe   : > { %209 = vst [vmem:[#allocation2 + $0x4] sm:$0xf] %v3718_v0  ;;  %v262_v1 = vld [vmem:[%s3784_s20] sm:$0xf]  ;;  %v263_v2 = vld [vmem:[%s3784_s20 + $0x4] sm:$0xf]  ;;  %vm3857_vm6 = vmor %vm294_vm2, %vm295_vm3 }
   0xf   : > { %210 = vst [vmem:[#allocation2 + $0x8] sm:$0x1] %v3718_v0  ;;  %v298_v3 = vshrl.u32 %v262_v1, 16  ;;  %v306_v4 = vshrl.u32 %v263_v2, 16  ;;  %v264_v5 = vld [vmem:[%s3784_s20 + $0x8] sm:$0xf] }
  0x10   : > { %212 = vst [vmem:[#allocation2 + $0x10] sm:$0xf] %v3718_v0  ;;  %v301_v7 = vshll.u32 %v262_v1, 16  ;;  %v315_v9 = vshrl.u32 %v264_v5, 16  ;;  %v3804_v10 = vld [vmem:[%s3784_s20 + $0xc] sm:$0xf] }
  0x11   : > { %213 = vst [vmem:[#allocation2 + $0x14] sm:$0x1] %v3718_v0  ;;  %v300_v6 = vrot.slane %v298_v3, 7  ;;  %v3800_v8 = vrot.slane %v306_v4, 7  ;;  %v3808_v11 = vld [vmem:[%s3784_s20 + $0x10] sm:$0xf] }
  0x12   : > { %214 = vst [vmem:[#allocation2 + $0x18] sm:$0xf] %v3718_v0  ;;  %v309_v13 = vshll.u32 %v263_v2, 16  ;;  %v3813_v15 = vrot.slane %v315_v9, 7  ;;  %v318_v16 = vshll.u32 %v264_v5, 16  ;;  %v323_v19 = vshrl.u32 %v3804_v10, 16 }
  0x13   : > { %215 = vst [vmem:[#allocation2 + $0x1c] sm:$0xf] %v3718_v0  ;;  %v304_v12 = vrot.slane %v300_v6, 4  ;;  %v313_v14 = vrot.slane %v3800_v8, 4  ;;  %v3817_v17 = vld [vmem:[%s3784_s20 + $0x14] sm:$0xf]  ;;  %v3838_v25 = vor.u32 %v301_v7, %v300_v6 }
  0x14   : > { %216 = vst [vmem:[#allocation2 + $0x20] sm:$0x1] %v3718_v0  ;;  %v3820_v18 = vld [vmem:[%s3784_s20 + $0x18] sm:$0xf]  ;;  %v332_v20 = vshrl.u32 %v3808_v11, 16  ;;  %v311_v27 = vor.u32 %v309_v13, %v3800_v8  ;;  %v340_v30 = vshrl.u32 %v3817_v17, 16  ;;  %v3862_v34 = vor.u32 %v318_v16, %v3813_v15 }
  0x15   : > { %217 = vst [vmem:[#allocation2 + $0x24] sm:$0xf] %v3718_v0  ;;  %v3826_v21 = vld [vmem:[%s3784_s20 + $0x20] sm:$0xf]  ;;  %v3829_v22 = vld [vmem:[#allocation2 + $0xc] sm:$0xf] }
  0x16   : > { %218 = vst [vmem:[#allocation2 + $0x28] sm:$0xf] %v3718_v0  ;;  %v3832_v23 = vld [vmem:[%s3784_s20 + $0x1c] sm:$0xf]  ;;  %v3835_v24 = vld [vmem:[%s3784_s20 + $0x28] sm:$0xf]  ;;  %v622_v47 = vsel %vm3842_vm5, %v3838_v25, %v3829_v22  ;;  %v312_v48 = vsel %vm3857_vm6, %v304_v12, %v311_v27 }
  0x17   : > { %219 = vst [vmem:[#allocation2 + $0x2c] sm:$0x1] %v3718_v0  ;;  %v349_v31 = vshrl.u32 %v3820_v18, 16  ;;  %v3852_v32 = vld [vmem:[%s3784_s20 + $0x24] sm:$0xf]  ;;  %v321_v35 = vrot.slane %v3813_v15, 4 }
  0x18   : > { %220 = vst [vmem:[#allocation2 + $0x30] sm:$0xf] %v3718_v0  ;;  %v627_v28 = vld [vmem:[#allocation2 + $0x14] sm:$0x1]  ;;  %v326_v36 = vshll.u32 %v3804_v10, 16  ;;  %v366_v37 = vshrl.u32 %v3826_v21, 16 }
  0x19   : > { %221 = vst [vmem:[#allocation2 + $0x34] sm:$0xf] %v3718_v0  ;;  %v3847_v29 = vld [vmem:[#allocation2 + $0x18] sm:$0xf]  ;;  %v3874_v39 = vrot.slane %v323_v19, 7  ;;  %v335_v40 = vshll.u32 %v3808_v11, 16  ;;  %v628_v52 = vsel %vm3870_vm7, %v313_v14, %v627_v28 }
  0x1a   : > { %222 = vst [vmem:[#allocation2 + $0x38] sm:$0x1] %v3718_v0  ;;  %v357_v41 = vshrl.u32 %v3832_v23, 16  ;;  %v383_v42 = vshrl.u32 %v3835_v24, 16  ;;  %v3880_v43 = vrot.slane %v332_v20, 7  ;;  %v343_v44 = vshll.u32 %v3817_v17, 16 }
  0x1b   : > { %223 = vst [vmem:[#allocation2 + $0x3c] sm:$0xf] %v3718_v0  ;;  %v352_v45 = vshll.u32 %v3820_v18, 16  ;;  %v374_v46 = vshrl.u32 %v3852_v32, 16  ;;  %v3892_v49 = vrot.slane %v340_v30, 7  ;;  %v351_v50 = vrot.slane %v349_v31, 7 }
  0x1c   : > { %224 = vst [vmem:[#allocation2 + $0x40] sm:$0xf] %v3718_v0  ;;  %v3895_v51 = vld [vmem:[%s3784_s20 + $0x2c] sm:$0xf]  ;;  %v631_v53 = vsel %vm3842_vm5, %v3862_v34, %v3847_v29  ;;  %v360_v54 = vshll.u32 %v3832_v23, 16  ;;  %v368_v55 = vrot.slane %v366_v37, 7  ;;  %v328_v61 = vor.u32 %v326_v36, %v3874_v39 }
  0x1d   : > { %225 = vst [vmem:[#allocation2 + $0x44] sm:$0x1] %v3718_v0  ;;  %v3906_v56 = vld [vmem:[%s3784_s20 + $0x30] sm:$0xf]  ;;  %v3909_v57 = vrot.slane %v357_v41, 7  ;;  %v369_v58 = vshll.u32 %v3826_v21, 16  ;;  %v337_v62 = vor.u32 %v335_v40, %v3880_v43  ;;  %v345_v9 = vor.u32 %v343_v44, %v3892_v49 }
  0x1e   : > { %226 = vst [vmem:[#allocation2 + $0x48] sm:$0xf] %v3718_v0  ;;  %v377_v59 = vshll.u32 %v3852_v32, 16  ;;  %v3913_v60 = vrot.slane %v383_v42, 7  ;;  %v637_v63 = vld [vmem:[#allocation2 + $0x24] sm:$0xf]  ;;  %v354_v10 = vor.u32 %v352_v45, %v351_v50  ;;  %v329_v20 = vsel %vm3857_vm6, %v321_v35, %v328_v61 }
  0x1f   : > { %227 = vst [vmem:[#allocation2 + $0x4c] sm:$0xf] %v3718_v0  ;;  %v3918_v1 = vrot.slane %v374_v46, 7  ;;  %v391_v2 = vshrl.u32 %v3895_v51, 16  ;;  %v3922_v3 = vld [vmem:[%s3784_s20 + $0x34] sm:$0xf]  ;;  %v362_v15 = vor.u32 %v360_v54, %v3909_v57  ;;  %v3940_v16 = vor.u32 %v369_v58, %v368_v55 }
  0x20   : > { %228 = vst [vmem:[#allocation2 + $0x50] sm:$0x1] %v3718_v0  ;;  %v338_v4 = vrot.slane %v3880_v43, 4  ;;  %v3926_v5 = vld [vmem:[#allocation2 + $0x30] sm:$0xf]  ;;  %v355_v6 = vrot.slane %v351_v50, 4  ;;  %v638_v27 = vsel %vm3842_vm5, %v337_v62, %v637_v63 }
  0x21   : > { %229 = vst [vmem:[#allocation2 + $0x54] sm:$0xf] %v3718_v0  ;;  %v386_v7 = vshll.u32 %v3835_v24, 16  ;;  %v400_v8 = vshrl.u32 %v3906_v56, 16  ;;  %v372_v12 = vrot.slane %v368_v55, 4  ;;  %v394_v13 = vshll.u32 %v3895_v51, 16 }
  0x22   : > { %230 = vst [vmem:[#allocation2 + $0x58] sm:$0xf] %v3718_v0  ;;  %v3932_v11 = vld [vmem:[#allocation2 + $0x3c] sm:$0xf]  ;;  %v3936_v14 = vld [vmem:[%s3784_s20 + $0x38] sm:$0xf]  ;;  %v379_v21 = vor.u32 %v377_v59, %v3918_v1  ;;  %v346_v31 = vsel %vm3857_vm6, %v338_v4, %v345_v9  ;;  %v645_v32 = vsel %vm3842_vm5, %v354_v10, %v3926_v5  ;;  %v363_v37 = vsel %vm3857_vm6, %v355_v6, %v362_v15 }
  0x23   : > { %231 = vst [vmem:[#allocation2 + $0x5c] sm:$0x1] %v3718_v0  ;;  %v389_v17 = vrot.slane %v3913_v60, 4  ;;  %v408_v18 = vshrl.u32 %v3922_v3, 16  ;;  %v3945_v19 = vld [vmem:[%s3784_s20 + $0x3c] sm:$0xf]  ;;  %v652_v40 = vsel %vm3842_vm5, %v3940_v16, %v3932_v11 }
  0x24   : > { %232 = vst [vmem:[#allocation2 + $0x60] sm:$0xf] %v3718_v0  ;;  %v3953_v23 = vrot.slane %v391_v2, 7  ;;  %v403_v24 = vshll.u32 %v3906_v56, 16  ;;  %v278_v25 = vld [vmem:[%s3784_s20 + $0x40] sm:$0xf]  ;;  %v380_v44 = vsel %vm3857_vm6, %v372_v12, %v379_v21 }
  0x25   : > { %233 = vst [vmem:[#allocation2 + $0x64] sm:$0xf] %v3718_v0  ;;  %v3951_v22 = vld [vmem:[#allocation2 + $0x48] sm:$0xf]  ;;  %v402_v28 = vrot.slane %v400_v8, 7  ;;  %v417_v29 = vshrl.u32 %v3936_v14, 16 }
  0x26   : > { %234 = vst [vmem:[#allocation2 + $0x68] sm:$0x1] %v3718_v0  ;;  %v279_v30 = vld [vmem:[%s3784_s20 + $0x44] sm:$0xf]  ;;  %v411_v34 = vshll.u32 %v3922_v3, 16  ;;  %v425_v35 = vshrl.u32 %v3945_v19, 16  ;;  %v396_v45 = vor.u32 %v394_v13, %v3953_v23 }
  0x27   : > { %235 = vst [vmem:[#allocation2 + $0x6c] sm:$0xf] %v3718_v0  ;;  %v280_v36 = vld [vmem:[%s3784_s20 + $0x48] sm:$0xf]  ;;  %v3976_v41 = vrot.slane %v408_v18, 7  ;;  %v434_v42 = vshrl.u32 %v278_v25, 16 }
  0x28   : > { %236 = vst [vmem:[#allocation2 + $0x70] sm:$0xf] %v3718_v0  ;;  %v281_v43 = vld [vmem:[%s3784_s20 + $0x4c] sm:$0xf]  ;;  %v665_v46 = vld [vmem:[#allocation2 + $0x54] sm:$0xf]  ;;  %v397_v3 = vsel %vm3857_vm6, %v389_v17, %v396_v45 }
  0x29   : > { %237 = vst [vmem:[#allocation2 + $0x74] sm:$0x1] %v3718_v0  ;;  %v282_v50 = vld [vmem:[%s3784_s20 + $0x50] sm:$0xf]  ;;  %v419_v54 = vrot.slane %v417_v29, 7  ;;  %v451_v55 = vshrl.u32 %v280_v36, 16  ;;  %v413_v61 = vor.u32 %v411_v34, %v3976_v41 }
  0x2a   : > { %238 = vst [vmem:[#allocation2 + $0x78] sm:$0xf] %v3718_v0  ;;  %v283_v56 = vld [vmem:[%s3784_s20 + $0x54] sm:$0xf]  ;;  %v3988_v58 = vrot.slane %v425_v35, 7  ;;  %v428_v59 = vshll.u32 %v3945_v19, 16 }
  0x2b   : > { %239 = vst [vmem:[#allocation2 + $0x7c] sm:$0xf] %v3718_v0  ;;  %v436_v62 = vrot.slane %v434_v42, 7  ;;  %v437_v63 = vshll.u32 %v278_v25, 16  ;;  %v468_v2 = vshrl.u32 %v282_v50, 16  ;;  %v445_v5 = vshll.u32 %v279_v30, 16 }
  0x2c   : > { %240 = vst [vmem:[#allocation2 + $0x80] sm:$0x1] %v3718_v0  ;;  %v476_v6 = vshrl.u32 %v283_v56, 16  ;;  %v672_v9 = vld [vmem:[#allocation2 + $0x60] sm:$0xf]  ;;  %v453_v10 = vrot.slane %v451_v55, 7  ;;  %v430_v13 = vor.u32 %v428_v59, %v3988_v58 }
  0x2d   : > { %241 = vst [vmem:[#allocation2 + $0x84] sm:$0xf] %v3718_v0  ;;  %v454_v11 = vshll.u32 %v280_v36, 16  ;;  %v423_v12 = vrot.slane %v419_v54, 4  ;;  %v462_v15 = vshll.u32 %v281_v43, 16  ;;  %v439_v17 = vor.u32 %v437_v63, %v436_v62 }
  0x2e   : > { %242 = vst [vmem:[#allocation2 + $0x88] sm:$0xf] %v3718_v0  ;;  %v679_v18 = vld [vmem:[#allocation2 + $0x6c] sm:$0xf]  ;;  %v470_v19 = vrot.slane %v468_v2, 7  ;;  %v440_v21 = vrot.slane %v436_v62, 4 }
  0x2f   : > { %243 = vst [vmem:[#allocation2 + $0x8c] sm:$0x1] %v3718_v0  ;;  %v479_v25 = vshll.u32 %v283_v56, 16  ;;  %v330_v29 = vrot.slane %v3874_v39, 4  ;;  %v364_v35 = vrot.slane %v3909_v57, 4  ;;  %v381_v39 = vrot.slane %v3918_v1, 4 }
  0x30   : > { %244 = vst [vmem:[#allocation2 + $0x90] sm:$0xf] %v3718_v0  ;;  %v284_v36 = vld [vmem:[%s3784_s20 + $0x58] sm:$0xf]  ;;  %v634_v57 = vld [vmem:[#allocation2 + $0x20] sm:$0x1] }
  0x31   : > { %245 = vst [vmem:[#allocation2 + $0x94] sm:$0xf] %v3718_v0  ;;  %v641_v1 = vld [vmem:[#allocation2 + $0x2c] sm:$0x1]  ;;  %v669_v62 = vld [vmem:[#allocation2 + $0x5c] sm:$0x1] }
  0x32   : > { %246 = vst [vmem:[#allocation2 + $0x98] sm:$0x1] %v3718_v0  ;;  %v488_v2 = vshll.u32 %v284_v36, 16  ;;  %v1766_v33 = vld [vmem:[#allocation2] sm:$0xe]  ;;  %vm1899_vm9 = vcmask 1045504  }
  0x33   : > { %247 = vst [vmem:[#allocation2 + $0x9c] sm:$0xf] %v3718_v0 }
  0x34   : > { %248 = vst [vmem:[#allocation2 + $0xa0] sm:$0xf] %v3718_v0  ;;  %v693_v42 = vld [vmem:[#allocation2 + $0x84] sm:$0xf] }
  0x35   : > { %249 = vst [vmem:[#allocation2 + $0xa4] sm:$0x1] %v3718_v0 }
  0x36   : > { %250 = vst [vmem:[#allocation2 + $0xa8] sm:$0xf] %v3718_v0 }
  0x37   : > { %251 = vst [vmem:[#allocation2 + $0xac] sm:$0xf] %v3718_v0 }
  0x38   : > { %252 = vst [vmem:[#allocation2 + $0xb0] sm:$0x1] %v3718_v0 }
  0x39   : > { %253 = vst [vmem:[#allocation2 + $0xb4] sm:$0xf] %v3718_v0 }
  0x3a   : > { %254 = vst [vmem:[#allocation2 + $0xb8] sm:$0xf] %v3718_v0 }
  0x3b   : > { %255 = vst [vmem:[#allocation2 + $0xbc] sm:$0x1] %v3718_v0 }
  0x3c   : > { %256 = vst [vmem:[#allocation2 + $0xc0] sm:$0xf] %v3718_v0 }
  0x3d   : > { %257 = vst [vmem:[#allocation2 + $0xc4] sm:$0xf] %v3718_v0 }
  0x3e   : > { %258 = vst [vmem:[#allocation2 + $0xc8] sm:$0x1] %v3718_v0 }
  0x3f   : > { %259 = vst [vmem:[#allocation2 + $0xcc] sm:$0xf] %v3718_v0 }
  0x40   : > { %260 = vst [vmem:[#allocation2 + $0xd0] sm:$0xf] %v3718_v0 }
  0x41   : > { %261 = vst [vmem:[#allocation2 + $0xd4] sm:$0x1] %v3718_v0  ;;  %v388_v0 = vor.u32 %v386_v7, %v3913_v60  ;;  %v459_v60 = vshrl.u32 %v281_v43, 16 }
  0x42   : > { %623 = vst [vmem:[#allocation2 + $0xc] sm:$0xf] %v622_v47  ;;  %v420_v47 = vshll.u32 %v3936_v14, 16 }
  0x43   : > { %624 = vst [vmem:[#allocation2 + $0x10] sm:$0xf] %v312_v48  ;;  %v442_v48 = vshrl.u32 %v279_v30, 16  ;;  %v659_v51 = vsel %vm3842_vm5, %v388_v0, %v3951_v22  ;;  %v3999_v14 = vrot.slane %v459_v60, 7  ;;  %v456_v0 = vor.u32 %v454_v11, %v453_v10  ;;  %v662_v60 = vld [vmem:[#allocation2 + $0x50] sm:$0x1] }
  0x44   : > { %629 = vst [vmem:[#allocation2 + $0x14] sm:$0x1] %v628_v52  ;;  %v405_v52 = vor.u32 %v403_v24, %v402_v28  ;;  %v422_v8 = vor.u32 %v420_v47, %v419_v54  ;;  %v4004_v24 = vrot.slane %v476_v6, 7  ;;  %v347_v30 = vrot.slane %v3892_v49, 4  ;;  %v285_v47 = vld [vmem:[%s3784_s20 + $0x5c] sm:$0xf] }
  0x45   : > { %632 = vst [vmem:[#allocation2 + $0x18] sm:$0xf] %v631_v53  ;;  %v406_v53 = vrot.slane %v402_v28, 4  ;;  %v3994_v4 = vrot.slane %v442_v48, 7  ;;  %v686_v28 = vld [vmem:[#allocation2 + $0x78] sm:$0xf]  ;;  %v464_v34 = vor.u32 %v462_v15, %v3999_v14 }
  0x46   : > { %633 = vst [vmem:[#allocation2 + $0x1c] sm:$0xf] %v329_v20  ;;  %v666_v7 = vsel %vm3842_vm5, %v405_v52, %v665_v46  ;;  %v471_v20 = vshll.u32 %v282_v50, 16  ;;  %v398_v49 = vrot.slane %v3953_v23, 4  ;;  %v481_v45 = vor.u32 %v479_v25, %v4004_v24  ;;  %v648_v52 = vld [vmem:[#allocation2 + $0x38] sm:$0x1] }
  0x47   : > { %639 = vst [vmem:[#allocation2 + $0x24] sm:$0xf] %v638_v27  ;;  %v414_v16 = vsel %vm3857_vm6, %v406_v53, %v413_v61  ;;  %v447_v22 = vor.u32 %v445_v5, %v3994_v4  ;;  %v673_v27 = vsel %vm3842_vm5, %v422_v8, %v672_v9  ;;  %v415_v46 = vrot.slane %v3976_v41, 4  ;;  %v286_v54 = vld [vmem:[%s3784_s20 + $0x60] sm:$0xf] }
  0x48   : > { %640 = vst [vmem:[#allocation2 + $0x28] sm:$0xf] %v346_v31  ;;  %v431_v31 = vsel %vm3857_vm6, %v423_v12, %v430_v13  ;;  %v687_v48 = vsel %vm3842_vm5, %v456_v0, %v686_v28  ;;  %v432_v23 = vrot.slane %v3988_v58, 4  ;;  %v485_v50 = vshrl.u32 %v284_v36, 16  ;;  %v287_v53 = vld [vmem:[%s3784_s20 + $0x64] sm:$0xf] }
  0x49   : > { %646 = vst [vmem:[#allocation2 + $0x30] sm:$0xf] %v645_v32  ;;  %v457_v32 = vrot.slane %v453_v10, 4  ;;  %v448_v43 = vsel %vm3857_vm6, %v440_v21, %v447_v22  ;;  %v449_v41 = vrot.slane %v3994_v4, 4  ;;  %v493_v56 = vshrl.u32 %v285_v47, 16 }
  0x4a   : > { %647 = vst [vmem:[#allocation2 + $0x34] sm:$0xf] %v363_v37  ;;  %v680_v37 = vsel %vm3842_vm5, %v439_v17, %v679_v18  ;;  %v655_v58 = vld [vmem:[#allocation2 + $0x44] sm:$0x1]  ;;  %v635_v61 = vsel %vm3870_vm7, %v330_v29, %v634_v57  ;;  %v487_v63 = vrot.slane %v485_v50, 7  ;;  %v642_v4 = vsel %vm3870_vm7, %v347_v30, %v641_v1 }
  0x4b   : > { %653 = vst [vmem:[#allocation2 + $0x3c] sm:$0xf] %v652_v40  ;;  %v473_v40 = vor.u32 %v471_v20, %v470_v19  ;;  %v676_v5 = vld [vmem:[#allocation2 + $0x68] sm:$0x1]  ;;  %v466_v6 = vrot.slane %v3999_v14, 4  ;;  %v649_v8 = vsel %vm3870_vm7, %v364_v35, %v648_v52  ;;  %v4043_v9 = vrot.slane %v493_v56, 7 }
  0x4c   : > { %654 = vst [vmem:[#allocation2 + $0x40] sm:$0xf] %v380_v44  ;;  %v474_v44 = vrot.slane %v470_v19, 4  ;;  %v496_v10 = vshll.u32 %v285_v47, 16  ;;  %v288_v11 = vld [vmem:[%s3784_s20 + $0x68] sm:$0xf]  ;;  %v656_v12 = vsel %vm3870_vm7, %v381_v39, %v655_v58  ;;  %v663_v13 = vsel %vm3870_vm7, %v398_v49, %v662_v60 }
  0x4d   : > { %660 = vst [vmem:[#allocation2 + $0x48] sm:$0xf] %v659_v51  ;;  %v465_v51 = vsel %vm3857_vm6, %v457_v32, %v464_v34  ;;  %v694_v55 = vsel %vm3842_vm5, %v473_v40, %v693_v42  ;;  %v683_v15 = vld [vmem:[#allocation2 + $0x74] sm:$0x1]  ;;  %v490_v14 = vor.u32 %v488_v2, %v487_v63  ;;  %v505_v18 = vshll.u32 %v286_v54, 16 }
  0x4e   : > { %661 = vst [vmem:[#allocation2 + $0x4c] sm:$0xf] %v397_v3  ;;  %v482_v59 = vsel %vm3857_vm6, %v474_v44, %v481_v45  ;;  %v502_v3 = vshrl.u32 %v286_v54, 16  ;;  %v519_v19 = vshrl.u32 %v288_v11, 16  ;;  %v670_v20 = vsel %vm3870_vm7, %v415_v46, %v669_v62  ;;  %v700_v21 = vld [vmem:[#allocation2 + $0x90] sm:$0xf] }
  0x4f   : > { %667 = vst [vmem:[#allocation2 + $0x54] sm:$0xf] %v666_v7  ;;  %v510_v7 = vshrl.u32 %v287_v53, 16  ;;  %v513_v25 = vshll.u32 %v287_v53, 16  ;;  %v491_v0 = vrot.slane %v487_v63, 4  ;;  %v498_v28 = vor.u32 %v496_v10, %v4043_v9 }
  0x50   : > { %668 = vst [vmem:[#allocation2 + $0x58] sm:$0xf] %v414_v16  ;;  %v690_v16 = vld [vmem:[#allocation2 + $0x80] sm:$0x1]  ;;  %v504_v17 = vrot.slane %v502_v3, 7  ;;  %v684_v30 = vsel %vm3870_vm7, %v449_v41, %v683_v15  ;;  %v483_v32 = vrot.slane %v4004_v24, 4  ;;  %v701_v36 = vsel %vm3842_vm5, %v490_v14, %v700_v21 }
  0x51   : > { %674 = vst [vmem:[#allocation2 + $0x60] sm:$0xf] %v673_v27  ;;  %v512_v22 = vrot.slane %v510_v7, 7  ;;  %v677_v27 = vsel %vm3870_vm7, %v432_v23, %v676_v5  ;;  %v289_v29 = vld [vmem:[%s3784_s20 + $0x6c] sm:$0xf]  ;;  %v521_v42 = vrot.slane %v519_v19, 7  ;;  %v499_v24 = vsel %vm3857_vm6, %v491_v0, %v498_v28 }
  0x52   : > { %675 = vst [vmem:[#allocation2 + $0x64] sm:$0xf] %v431_v31  ;;  %v691_v31 = vsel %vm3870_vm7, %v466_v6, %v690_v16  ;;  %v697_v34 = vld [vmem:[#allocation2 + $0x8c] sm:$0x1]  ;;  %v527_v35 = vshrl.u32 %v289_v29, 16  ;;  %v522_v39 = vshll.u32 %v288_v11, 16 }
  0x53   : > { %681 = vst [vmem:[#allocation2 + $0x6c] sm:$0xf] %v680_v37  ;;  %v507_v37 = vor.u32 %v505_v18, %v504_v17  ;;  %v707_v40 = vld [vmem:[#allocation2 + $0x9c] sm:$0xf]  ;;  %v508_v49 = vrot.slane %v504_v17, 4  ;;  %v530_v45 = vshll.u32 %v289_v29, 16  ;;  %v698_v47 = vsel %vm3870_vm7, %v483_v32, %v697_v34 }
  0x54   : > { %682 = vst [vmem:[#allocation2 + $0x70] sm:$0xf] %v448_v43  ;;  %v515_v43 = vor.u32 %v513_v25, %v512_v22  ;;  %v529_v44 = vrot.slane %v527_v35, 7  ;;  %v500_v57 = vrot.slane %v4043_v9, 4  ;;  %v290_v46 = vld [vmem:[%s3784_s20 + $0x70] sm:$0xf]  ;;  %v524_v52 = vor.u32 %v522_v39, %v521_v42 }
  0x55   : > { %688 = vst [vmem:[#allocation2 + $0x78] sm:$0xf] %v687_v48  ;;  %v704_v48 = vld [vmem:[#allocation2 + $0x98] sm:$0x1]  ;;  %v517_v1 = vrot.slane %v512_v22, 4  ;;  %v536_v23 = vshrl.u32 %v290_v46, 16  ;;  %v708_v50 = vsel %vm3842_vm5, %v507_v37, %v707_v40 }
  0x56   : > { %689 = vst [vmem:[#allocation2 + $0x7c] sm:$0xf] %v465_v51  ;;  %v711_v51 = vld [vmem:[#allocation2 + $0xa4] sm:$0x1]  ;;  %v539_v54 = vshll.u32 %v290_v46, 16  ;;  %v525_v56 = vrot.slane %v521_v42, 4  ;;  %v532_v53 = vor.u32 %v530_v45, %v529_v44  ;;  %v705_v58 = vsel %vm3870_vm7, %v500_v57, %v704_v48 }
  0x57   : > { %695 = vst [vmem:[#allocation2 + $0x84] sm:$0xf] %v694_v55  ;;  %v516_v55 = vsel %vm3857_vm6, %v508_v49, %v515_v43  ;;  %v714_v41 = vld [vmem:[#allocation2 + $0xa8] sm:$0xf]  ;;  %v534_v60 = vrot.slane %v529_v44, 4  ;;  %v3431_v25 = vld [vmem:[#allocation2] sm:$0xff]  }
  0x58   : > { %696 = vst [vmem:[#allocation2 + $0x88] sm:$0xf] %v482_v59  ;;  %v538_v59 = vrot.slane %v536_v23, 7  ;;  %v718_v62 = vld [vmem:[#allocation2 + $0xb0] sm:$0x1]  ;;  %v715_v3 = vsel %vm3842_vm5, %v524_v52, %v714_v41  ;;  %v533_v6 = vsel %vm3857_vm6, %v525_v56, %v532_v53  ;;  %v3546_v28 = vld [vmem:[#allocation2 + $0x18] sm:$0xff]   ;;  %v4092_v37 = vunpack.c.h.bf16 %v3431_v25 }
  0x59   : > { %636 = vst [vmem:[#allocation2 + $0x20] sm:$0x1] %v635_v61  ;;  %v712_v61 = vsel %vm3870_vm7, %v517_v1, %v711_v51  ;;  %v291_v2 = vld [vmem:[%s3784_s20 + $0x74] sm:$0xf]  ;;  %v742_v18 = vld [vmem:[#allocation2 + $0x10] sm:$0xf]  ;;  %v4108_v45 = vunpack.c.l.bf16 %v3546_v28 }
  0x5a   : > { %643 = vst [vmem:[#allocation2 + $0x2c] sm:$0x1] %v642_v4  ;;  %v541_v63 = vor.u32 %v539_v54, %v538_v59  ;;  %v721_v4 = vld [vmem:[#allocation2 + $0xb4] sm:$0xf]  ;;  %v544_v5 = vshrl.u32 %v291_v2, 16  ;;  %v547_v7 = vshll.u32 %v291_v2, 16  ;;  %v4094_v40 = vunpack.c.l.bf16 %v742_v18 }
  0x5b   : > { %650 = vst [vmem:[#allocation2 + $0x38] sm:$0x1] %v649_v8  ;;  %v719_v8 = vsel %vm3870_vm7, %v534_v60, %v718_v62  ;;  %v542_v9 = vrot.slane %v538_v59, 4  ;;  %v745_v19 = vld [vmem:[#allocation2 + $0x24] sm:$0xf]  ;;  %v4139_v59 = vperm.slane %v4117_v26, 0 }
  0x5c   : > { %657 = vst [vmem:[#allocation2 + $0x44] sm:$0x1] %v656_v12  ;;  %v546_v10 = vrot.slane %v544_v5, 7  ;;  %v722_v11 = vsel %vm3842_vm5, %v541_v63, %v721_v4  ;;  %v725_v12 = vld [vmem:[#allocation2 + $0xbc] sm:$0x1]  ;;  %v4112_v57 = vunpack.c.l.bf16 %v745_v19 }
  0x5d   : > { %664 = vst [vmem:[#allocation2 + $0x50] sm:$0x1] %v663_v13  ;;  %v292_v13 = vld [vmem:[%s3784_s20 + $0x78] sm:$0xf]  ;;  %v293_v0 = vld [vmem:[%s3784_s20 + $0x7c] sm:$0xf]  ;;  %v942_v38 = vmul.f32 %v4108_v45, %v4139_v59 }
  0x5e   : > { %671 = vst [vmem:[#allocation2 + $0x5c] sm:$0x1] %v670_v20  ;;  %v549_v15 = vor.u32 %v547_v7, %v546_v10  ;;  %v551_v16 = vrot.slane %v546_v10, 4  ;;  %v553_v14 = vshrl.u32 %v292_v13, 16  ;;  %v556_v17 = vshll.u32 %v292_v13, 16 }
  0x5f   : > { %678 = vst [vmem:[#allocation2 + $0x68] sm:$0x1] %v677_v27  ;;  %v728_v27 = vld [vmem:[#allocation2 + $0xc0] sm:$0xf]  ;;  %v746_v29 = vld [vmem:[#allocation2 + $0x28] sm:$0xf]  ;;  %v1784_v13 = vunpack.c.l.bf16 %v1766_v33 }
  0x60   : > { %685 = vst [vmem:[#allocation2 + $0x74] sm:$0x1] %v684_v30  ;;  %v550_v20 = vsel %vm3857_vm6, %v542_v9, %v549_v15  ;;  %v726_v21 = vsel %vm3870_vm7, %v551_v16, %v725_v12  ;;  %v555_v22 = vrot.slane %v553_v14, 7  ;;  %v1008_v32 = vld [vmem:[#allocation2 + $0x20] sm:$0x1]  ;;  %v564_v34 = vshll.u32 %v293_v0, 16 }
  0x61   : > { %692 = vst [vmem:[#allocation2 + $0x80] sm:$0x1] %v691_v31  ;;  %v561_v31 = vshrl.u32 %v293_v0, 16  ;;  %v732_v35 = vld [vmem:[#allocation2 + $0xc8] sm:$0x1]  ;;  %v4141_v60 = vunpack.c.l.bf16 %v1008_v32  ;;  %v4163_v9 = vperm.slane %v4117_v26, 1 }
  0x62   : > { %702 = vst [vmem:[#allocation2 + $0x90] sm:$0xf] %v701_v36  ;;  %v558_v30 = vor.u32 %v556_v17, %v555_v22  ;;  %v3432_v36 = vunpack.c.l.bf16 %v3431_v25  ;;  %v559_v39 = vrot.slane %v555_v22, 4  ;;  %v4101_v43 = vld [vmem:[%s6011_s1] sm:$0x7] }
  0x63   : > { %703 = vst [vmem:[#allocation2 + $0x94] sm:$0xf] %v499_v24  ;;  %v563_v49 = vrot.slane %v561_v31, 7  ;;  %v4106_v44 = vld [vmem:[%s6011_s1 + $0x4] sm:$0x7]  ;;  %v4110_v24 = vunpack.c.h.bf16 %v3546_v28  ;;  %v4120_v46 = vperm.slane %v4101_v43, 0  ;;  %v1528_v32 = vmul.f32 %v4163_v9, %v4141_v60 }
  0x64   : > { %699 = vst [vmem:[#allocation2 + $0x8c] sm:$0x1] %v698_v47  ;;  %v729_v42 = vsel %vm3842_vm5, %v558_v30, %v728_v27  ;;  %v4122_v47 = vunpack.c.l.bf16 %v746_v29  ;;  %v1009_v48 = vld [vmem:[#allocation2 + $0x2c] sm:$0x1]  ;;  %v4132_v41 = vld [vmem:[#allocation2 + $0x8] sm:$0x1]  ;;  %v1526_v27 = vmul.f32 %v4108_v45, %v4163_v9 }
  0x65   : > { %709 = vst [vmem:[#allocation2 + $0x9c] sm:$0xf] %v708_v50  ;;  %v566_v1 = vor.u32 %v564_v34, %v563_v49  ;;  %v568_v23 = vrot.slane %v563_v49, 4  ;;  %v741_v50 = vld [vmem:[#allocation2 + $0xc] sm:$0xf]  ;;  %v812_v52 = vmul.f32 %v3432_v36, %v4120_v46  ;;  %v813_v54 = vmul.f32 %v4092_v37, %v4120_v46 }
  0x66   : > { %710 = vst [vmem:[#allocation2 + $0xa0] sm:$0xf] %v516_v55  ;;  %v4124_v51 = vunpack.c.l.bf16 %v741_v50  ;;  %v4130_v55 = vperm.slane %v4106_v44, 0  ;;  %v1024_v63 = vunpack.c.l.bf16 %v4132_v41  ;;  %v4148_v2 = vunpack.c.l.bf16 %v1009_v48  ;;  %v4179_v28 = vld [vmem:[#allocation2 + $0xc] sm:$0xe] }
  0x67   : > { %706 = vst [vmem:[#allocation2 + $0x98] sm:$0x1] %v705_v58  ;;  %v567_v56 = vsel %vm3857_vm6, %v559_v39, %v566_v1  ;;  %v733_v53 = vsel %vm3870_vm7, %v568_v23, %v732_v35  ;;  %v1007_v58 = vld [vmem:[#allocation2 + $0x14] sm:$0x1]  ;;  %v4157_v5 = vperm.slane %v4101_v43, 1  ;;  %v1527_v0 = vmul.f32 %v4110_v24, %v4163_v9 }
  0x68   : > { %713 = vst [vmem:[#allocation2 + $0xa4] sm:$0x1] %v712_v61  ;;  %v877_v61 = vmul.f32 %v4130_v55, %v4124_v51  ;;  %v878_v62 = vmul.f32 %v4130_v55, %v4094_v40  ;;  %v4154_v4 = vunpack.c.l.bf16 %v1007_v58  ;;  %v1768_v34 = vld [vmem:[#allocation2 + $0x18] sm:$0xe]  ;;  %v1622_v39 = vrot.slane %v1526_v27, 1 }
  0x69   : > { %716 = vst [vmem:[#allocation2 + $0xa8] sm:$0xf] %v715_v3  ;;  %v943_v3 = vmul.f32 %v4110_v24, %v4139_v59  ;;  %v1043_v10 = vmul.f32 %v3432_v36, %v4157_v5  ;;  %v1045_v12 = vmul.f32 %v4157_v5, %v1024_v63  ;;  %v1623_v48 = vrot.slane %v1527_v0, 1 }
  0x6a   : > { %717 = vst [vmem:[#allocation2 + $0xac] sm:$0xf] %v533_v6  ;;  %v909_v6 = vadd.f32 %v877_v61, %v812_v52  ;;  %v910_v7 = vadd.f32 %v878_v62, %v813_v54  ;;  %v1625_v1 = vrot.slane %v1528_v32, 1  ;;  %v1785_v23 = vunpack.c.l.bf16 %v4179_v28 }
  0x6b   : > { %720 = vst [vmem:[#allocation2 + $0xb0] sm:$0x1] %v719_v8  ;;  %v4160_v8 = vperm.slane %v4106_v44, 1  ;;  %v1140_v18 = vrot.slane %v1043_v10, 1  ;;  %v4188_v54 = vunpack.c.l.bf16 %v1768_v34  ;;  %v4191_v41 = vperm.slane %v4101_v43, 2 }
  0x6c   : > { %723 = vst [vmem:[#allocation2 + $0xb4] sm:$0xf] %v722_v11  ;;  %v1044_v11 = vmul.f32 %v4092_v37, %v4157_v5  ;;  %v974_v15 = vadd.f32 %v942_v38, %v909_v6  ;;  %v975_v16 = vadd.f32 %v943_v3, %v910_v7  ;;  %v4196_v58 = vperm.slane %v4106_v44, 2 }
  0x6d   : > { %724 = vst [vmem:[#allocation2 + $0xb8] sm:$0xf] %v550_v20  ;;  %v1285_v14 = vmul.f32 %v4160_v8, %v4124_v51  ;;  %v1286_v17 = vmul.f32 %v4160_v8, %v4094_v40  ;;  %v1143_v20 = vrot.slane %v1045_v12, 1  ;;  %v4199_v61 = vperm.slane %v4117_v26, 2 }
  0x6e   : > { %727 = vst [vmem:[#allocation2 + $0xbc] sm:$0x1] %v726_v21  ;;  %v1141_v19 = vrot.slane %v1044_v11, 1  ;;  %v1287_v21 = vmul.f32 %v4160_v8, %v4154_v4  ;;  %v1803_v38 = vmul.f32 %v4191_v41, %v1784_v13  ;;  %v1804_v3 = vmul.f32 %v4092_v37, %v4191_v41 }
  0x6f   : > { %730 = vst [vmem:[#allocation2 + $0xc0] sm:$0xf] %v729_v42  ;;  %v1381_v22 = vrot.slane %v1285_v14, 1  ;;  %v1382_v25 = vrot.slane %v1286_v17, 1  ;;  %v1805_v43 = vmul.f32 %v4191_v41, %v1024_v63  ;;  %v2045_v6 = vmul.f32 %v4196_v58, %v1785_v23 }
  0x70   : > { %731 = vst [vmem:[#allocation2 + $0xc4] sm:$0xf] %v567_v56  ;;  %v1142_v29 = vsel %vm1139_vm8, %v1140_v18, %v1141_v19  ;;  %v1144_v30 = vsel %vm1139_vm8, %v1141_v19, %v1143_v20  ;;  %v1384_v31 = vrot.slane %v1287_v21, 1  ;;  %v1624_v56 = vsel %vm1139_vm8, %v1622_v39, %v1623_v48 }
  0x71   : > { %734 = vst [vmem:[#allocation2 + $0xc8] sm:$0x1] %v733_v53  ;;  %v1252_v35 = vadd.f32 %v1142_v29, %v974_v15  ;;  %v1253_v36 = vadd.f32 %v1144_v30, %v975_v16  ;;  %v1383_v42 = vsel %vm1139_vm8, %v1381_v22, %v1382_v25  ;;  %v1626_v53 = vsel %vm1139_vm8, %v1623_v48, %v1625_v1 }
  0x72   : > { %v1385_v49 = vsel %vm1139_vm8, %v1382_v25, %v1384_v31  ;;  %v2046_v44 = vmul.f32 %v4196_v58, %v4094_v40  ;;  %v2047_v26 = vmul.f32 %v4196_v58, %v4154_v4  ;;  %v1900_v7 = vrot.slane %v1803_v38, 2  ;;  %v4228_v31 = vld [vmem:[%s6012_s2] ss:$0 sm:$0xff] }
  0x73   : > { %v1493_v50 = vadd.f32 %v1383_v42, %v1252_v35  ;;  %v1494_v52 = vadd.f32 %v1385_v49, %v1253_v36  ;;  %v1901_v10 = vrot.slane %v1804_v3, 2  ;;  %v2286_v11 = vmul.f32 %v4199_v61, %v4188_v54 }
  0x74   : > { %v2287_v37 = vmul.f32 %v4110_v24, %v4199_v61  ;;  %v1903_v12 = vrot.slane %v1805_v43, 2  ;;  %v2141_v63 = vrot.slane %v2045_v6, 2  ;;  %v2142_v13 = vrot.slane %v2046_v44, 2 }
  0x75   : > { %v1734_v62 = vadd.f32 %v1624_v56, %v1493_v50  ;;  %v1735_v33 = vadd.f32 %v1626_v53, %v1494_v52  ;;  %v2144_v15 = vrot.slane %v2047_v26, 2  ;;  %v1902_v16 = vsel %vm1899_vm9, %v1900_v7, %v1901_v10 }
  0x76   : > { %v2288_v14 = vmul.f32 %v4199_v61, %v4141_v60  ;;  %v2382_v17 = vrot.slane %v2286_v11, 2  ;;  %v2383_v18 = vrot.slane %v2287_v37, 2  ;;  %v1904_v19 = vsel %vm1899_vm9, %v1901_v10, %v1903_v12 }
  0x77   : > { %v2012_v20 = vadd.f32 %v1902_v16, %v1734_v62  ;;  %v2143_v21 = vsel %vm1899_vm9, %v2141_v63, %v2142_v13  ;;  %v2145_v22 = vsel %vm1899_vm9, %v2142_v13, %v2144_v15  ;;  %v2013_v25 = vadd.f32 %v1904_v19, %v1735_v33 }
  0x78   : > { %v2384_v27 = vsel %vm1899_vm9, %v2382_v17, %v2383_v18  ;;  %v2385_v0 = vrot.slane %v2288_v14, 2  ;;  %v814_v29 = vmul.f32 %v4120_v46, %v4124_v51  ;;  %v815_v32 = vmul.f32 %v4120_v46, %v4094_v40 }
  0x79   : > { %v2253_v30 = vadd.f32 %v2143_v21, %v2012_v20  ;;  %v879_v34 = vmul.f32 %v4108_v45, %v4130_v55  ;;  %v880_v35 = vmul.f32 %v4110_v24, %v4130_v55  ;;  %v2254_v36 = vadd.f32 %v2145_v22, %v2013_v25 }
  0x7a   : > { %v2386_v42 = vsel %vm1899_vm9, %v2383_v18, %v2385_v0  ;;  %v944_v39 = vmul.f32 %v4139_v59, %v4112_v57  ;;  %v945_v49 = vmul.f32 %v4139_v59, %v4122_v47  ;;  %v1046_v52 = vmul.f32 %v4157_v5, %v4124_v51 }
  0x7b   : > { %v2494_v48 = vadd.f32 %v2384_v27, %v2253_v30  ;;  %v911_v1 = vadd.f32 %v879_v34, %v814_v29  ;;  %v912_v50 = vadd.f32 %v880_v35, %v815_v32  ;;  %v2495_v56 = vadd.f32 %v2386_v42, %v2254_v36  ;;  %v1769_v32 = vld [vmem:[#allocation2 + $0x24] sm:$0xe] }
  0x7c   : > { %v1047_v53 = vmul.f32 %v4157_v5, %v4094_v40  ;;  %v1048_v62 = vmul.f32 %v4157_v5, %v4154_v4  ;;  %v1288_v33 = vmul.f32 %v4108_v45, %v4160_v8  ;;  %v1145_v6 = vrot.slane %v1046_v52, 1 }
  0x7d   : > { %v4250_v38 = vadd.f32 %v4228_v31, %v2494_v48  ;;  %v976_v3 = vadd.f32 %v944_v39, %v911_v1  ;;  %v977_v43 = vadd.f32 %v945_v49, %v912_v50  ;;  %v4253_v44 = vadd.f32 %v4228_v31, %v2495_v56  ;;  %v3547_v1 = vld [vmem:[#allocation2 + $0x30] sm:$0xff]  }
  0x7e   : > { %v1146_v51 = vrot.slane %v1047_v53, 1  ;;  %v1148_v26 = vrot.slane %v1048_v62, 1  ;;  %v1289_v7 = vmul.f32 %v4110_v24, %v4160_v8  ;;  %v1290_v11 = vmul.f32 %v4160_v8, %v4141_v60 }
  0x7f   : > { %v3394_v10 = vmul.f32 -1.442695, %v4250_v38  ;;  %v1386_v37 = vrot.slane %v1288_v33, 1  ;;  %v1529_v12 = vmul.f32 %v4163_v9, %v4112_v57  ;;  %v3395_v63 = vmul.f32 -1.442695, %v4253_v44 }
  0x80   : > { %v1147_v13 = vsel %vm1139_vm8, %v1145_v6, %v1146_v51  ;;  %v1149_v15 = vsel %vm1139_vm8, %v1146_v51, %v1148_v26  ;;  %v1387_v16 = vrot.slane %v1289_v7, 1  ;;  %v1389_v18 = vrot.slane %v1290_v11, 1 }
  0x81   : > { %3579 = vpow2.f32 %v3394_v10  ;;  %v1254_v14 = vadd.f32 %v1147_v13, %v976_v3  ;;  %v1255_v17 = vadd.f32 %v1149_v15, %v977_v43  ;;  %v1530_v20 = vmul.f32 %v4163_v9, %v4122_v47 }
  0x82   : > { %3581 = vpow2.f32 %v3395_v63  ;;  %v1388_v19 = vsel %vm1139_vm8, %v1386_v37, %v1387_v16  ;;  %v1531_v21 = vmul.f32 %v4163_v9, %v4148_v2  ;;  %v1390_v22 = vsel %vm1139_vm8, %v1387_v16, %v1389_v18 }
  0x83   : > { %v1495_v25 = vadd.f32 %v1388_v19, %v1254_v14  ;;  %v1627_v27 = vrot.slane %v1529_v12, 1  ;;  %v1496_v0 = vadd.f32 %v1390_v22, %v1255_v17  ;;  %v1628_v29 = vrot.slane %v1530_v20, 1 }
  0x84   : > { %v1630_v30 = vrot.slane %v1531_v21, 1  ;;  %v1806_v34 = vmul.f32 %v4191_v41, %v1785_v23  ;;  %v1807_v35 = vmul.f32 %v4191_v41, %v4094_v40  ;;  %v1808_v36 = vmul.f32 %v4191_v41, %v4154_v4 }
  0x85   : > { %v2048_v42 = vmul.f32 %v4196_v58, %v4188_v54  ;;  %v2049_v39 = vmul.f32 %v4110_v24, %v4196_v58  ;;  %v1629_v49 = vsel %vm1139_vm8, %v1627_v27, %v1628_v29  ;;  %v2050_v28 = vmul.f32 %v4196_v58, %v4141_v60 }
  0x86   : > { %v1631_v48 = vsel %vm1139_vm8, %v1628_v29, %v1630_v30  ;;  %v4286_v50 = vunpack.c.l.bf16 %v1769_v32  ;;  %v1905_v40 = vrot.slane %v1806_v34, 2  ;;  %v1906_v52 = vrot.slane %v1807_v35, 2 }
  0x87   : > { %v3580_v23 = vpop.eup %3579  ;;  %v1908_v4 = vrot.slane %v1808_v36, 2  ;;  %v1736_v62 = vadd.f32 %v1629_v49, %v1495_v25  ;;  %v1737_v33 = vadd.f32 %v1631_v48, %v1496_v0  ;;  %v2146_v43 = vrot.slane %v2048_v42, 2 }
  0x88   : > { %v3582_v56 = vpop.eup %3581  ;;  %v4288_v53 = vadd.f32 1.0, %v3580_v23  ;;  %v2147_v6 = vrot.slane %v2049_v39, 2  ;;  %v2149_v51 = vrot.slane %v2050_v28, 2  ;;  %v4292_v26 = vunpack.c.l.bf16 %v3547_v1 }
  0x89   : > { %v4290_v3 = vadd.f32 1.0, %v3582_v56  ;;  %v4294_v7 = vunpack.c.h.bf16 %v3547_v1  ;;  %v1907_v11 = vsel %vm1899_vm9, %v1905_v40, %v1906_v52  ;;  %v1909_v37 = vsel %vm1899_vm9, %v1906_v52, %v1908_v4 }
  0x8a   : > { %3583 = vrcp.f32 %v4288_v53  ;;  %v2700_v10 = vand.u32 2147483648, %v4288_v53  ;;  %v2289_v12 = vmul.f32 %v4199_v61, %v4286_v50  ;;  %v2698_v63 = vand.u32 2147483647, %v4288_v53 }
  0x8b   : > { %3585 = vrcp.f32 %v4290_v3  ;;  %v2713_v13 = vand.u32 2147483647, %v4290_v3  ;;  %v2014_v15 = vadd.f32 %v1907_v11, %v1736_v62  ;;  %v2015_v16 = vadd.f32 %v1909_v37, %v1737_v33 }
  0x8c   : > { %v2701_v14 = vor.u32 1.1754944e-38, %v2700_v10  ;;  %v2715_v17 = vand.u32 2147483648, %v4290_v3  ;;  %v2148_v18 = vsel %vm1899_vm9, %v2146_v43, %v2147_v6  ;;  %v2150_v19 = vsel %vm1899_vm9, %v2147_v6, %v2149_v51 }
  0x8d   : > { %v2255_v20 = vadd.f32 %v2148_v18, %v2014_v15  ;;  %v2256_v21 = vadd.f32 %v2150_v19, %v2015_v16  ;;  %v2290_v22 = vmul.f32 %v4199_v61, %v4122_v47  ;;  %v2291_v25 = vmul.f32 %v4199_v61, %v4148_v2 }
  0x8e   : > { %vm2694_vm10 = vweird.f32 %v4288_v53  ;;  %v2387_v27 = vrot.slane %v2289_v12, 2  ;;  %v816_v0 = vmul.f32 %v4108_v45, %v4120_v46  ;;  %v817_v29 = vmul.f32 %v4110_v24, %v4120_v46 }
  0x8f   : > { %v881_v30 = vmul.f32 %v4130_v55, %v4112_v57  ;;  %vm2709_vm11 = vweird.f32 %v4290_v3  ;;  %v2388_v34 = vrot.slane %v2290_v22, 2  ;;  %v2390_v35 = vrot.slane %v2291_v25, 2  ;;  %v1010_v22 = vld [vmem:[#allocation2 + $0x38] sm:$0x1] }
  0x90   : > { %v3584_v32 = vpop.eup %3583  ;;  %v882_v36 = vmul.f32 %v4130_v55, %v4122_v47  ;;  %v946_v42 = vmul.f32 %v4292_v26, %v4139_v59  ;;  %vm4325_vm12 = vcmp.eq.f32.partialorder %v2698_v63, 8.507059e+37  ;;  %v2716_v28 = vor.u32 1.1754944e-38, %v2715_v17 }
  0x91   : > { %v3586_v39 = vpop.eup %3585  ;;  %v2690_v49 = vmul.f32 %v3584_v32, %v4288_v53  ;;  %v913_v23 = vadd.f32 %v881_v30, %v816_v0  ;;  %v947_v1 = vmul.f32 %v4294_v7, %v4139_v59  ;;  %vm2695_vm13 = vweird.f32 %v3584_v32 }
  0x92   : > { %v2705_v40 = vmul.f32 %v3586_v39, %v4290_v3  ;;  %vm4332_vm14 = vcmp.eq.f32.partialorder %v2713_v13, 8.507059e+37  ;;  %v2389_v4 = vsel %vm1899_vm9, %v2387_v27, %v2388_v34  ;;  %v2391_v56 = vsel %vm1899_vm9, %v2388_v34, %v2390_v35  ;;  %vm2696_vm0 = vmor %vm2694_vm10, %vm2695_vm13 }
  0x93   : > { %v2691_v62 = vsub.f32 1.0, %v2690_v49  ;;  %v2496_v33 = vadd.f32 %v2389_v4, %v2255_v20  ;;  %v2497_v43 = vadd.f32 %v2391_v56, %v2256_v21  ;;  %v914_v6 = vadd.f32 %v882_v36, %v817_v29 }
  0x94   : > { %v2706_v51 = vsub.f32 1.0, %v2705_v40  ;;  %vm2710_vm15 = vweird.f32 %v3586_v39  ;;  %v978_v10 = vadd.f32 %v946_v42, %v913_v23  ;;  %v1049_v11 = vmul.f32 %v4108_v45, %v4157_v5 }
  0x95   : > { %v2692_v37 = vmul.f32 %v3584_v32, %v2691_v62  ;;  %v4341_v12 = vadd.f32 %v4228_v31, %v2496_v33  ;;  %v4344_v63 = vadd.f32 %v4228_v31, %v2497_v43  ;;  %v979_v13 = vadd.f32 %v947_v1, %v914_v6  ;;  %vm2711_vm1 = vmor %vm2709_vm11, %vm2710_vm15  ;;  %v749_v1 = vld [vmem:[#allocation2 + $0x3c] sm:$0xf] }
  0x96   : > { %v2707_v15 = vmul.f32 %v3586_v39, %v2706_v51  ;;  %v1050_v16 = vmul.f32 %v4110_v24, %v4157_v5  ;;  %v1051_v17 = vmul.f32 %v4157_v5, %v4141_v60  ;;  %v1150_v18 = vrot.slane %v1049_v11, 1 }
  0x97   : > { %v2693_v19 = vadd.f32 %v3584_v32, %v2692_v37  ;;  %v3396_v20 = vmul.f32 -1.442695, %v4341_v12  ;;  %v3397_v45 = vmul.f32 -1.442695, %v4344_v63  ;;  %v1291_v21 = vmul.f32 %v4160_v8, %v4112_v57 }
  0x98   : > { %v2708_v25 = vadd.f32 %v3586_v39, %v2707_v15  ;;  %v1151_v27 = vrot.slane %v1050_v16, 1  ;;  %v1153_v0 = vrot.slane %v1051_v17, 1  ;;  %v1292_v29 = vmul.f32 %v4160_v8, %v4122_v47 }
  0x99   : > { %v2697_v30 = vsel %vm2696_vm0, %v3584_v32, %v2693_v19  ;;  %3587 = vpow2.f32 %v3396_v20  ;;  %v1293_v34 = vmul.f32 %v4160_v8, %v4148_v2  ;;  %v1391_v35 = vrot.slane %v1291_v21, 1 }
  0x9a   : > { %v2702_v53 = vsel %vm4325_vm12, %v2701_v14, %v2697_v30  ;;  %v2712_v36 = vsel %vm2711_vm1, %v3586_v39, %v2708_v25  ;;  %3589 = vpow2.f32 %v3397_v45  ;;  %v1152_v42 = vsel %vm1139_vm8, %v1150_v18, %v1151_v27  ;;  %v750_v14 = vld [vmem:[#allocation2 + $0x40] sm:$0xf]  ;;  %v1770_v18 = vld [vmem:[#allocation2 + $0x30] sm:$0xe] }
  0x9b   : > { %v2717_v32 = vsel %vm4332_vm14, %v2716_v28, %v2712_v36  ;;  %v3169_v49 = vmul.f32 %v2702_v53, %v4250_v38  ;;  %v4370_v3 = vunpack.c.l.bf16 %v1010_v22  ;;  %v1154_v23 = vsel %vm1139_vm8, %v1151_v27, %v1153_v0 }
  0x9c   : > { %v3170_v40 = vmul.f32 %v2717_v32, %v4253_v44  ;;  %v1256_v4 = vadd.f32 %v1152_v42, %v978_v10  ;;  %v1392_v56 = vrot.slane %v1292_v29, 1  ;;  %v1394_v48 = vrot.slane %v1293_v34, 1 }
  0x9d   : > { %v1257_v39 = vadd.f32 %v1154_v23, %v979_v13  ;;  %v1532_v38 = vmul.f32 %v4292_v26, %v4163_v9  ;;  %v1533_v28 = vmul.f32 %v4294_v7, %v4163_v9  ;;  %v1534_v44 = vmul.f32 %v4163_v9, %v4370_v3 }
  0x9e   : > { %v3469_v52 = vpack.c.bf16 %v3170_v40, %v3169_v49  ;;  %v4387_v62 = vadd.f32 %v3170_v40, %v3169_v49  ;;  %v1393_v33 = vsel %vm1139_vm8, %v1391_v35, %v1392_v56  ;;  %v1395_v43 = vsel %vm1139_vm8, %v1392_v56, %v1394_v48 }
  0x9f   : > { %v3588_v6 = vpop.eup %3587  ;;  %v4391_v51 = vunpack.c.l.bf16 %v749_v1  ;;  %v1632_v10 = vrot.slane %v1532_v38, 1  ;;  %v1633_v11 = vrot.slane %v1533_v28, 1  ;;  %v4393_v13 = vunpack.c.l.bf16 %v750_v14 }
  0xa0   : > { %v3590_v37 = vpop.eup %3589  ;;  %3470 = vst [vmem:[%s4379_s5] sm:$0xff] %v3469_v52   ;;  %v4396_v15 = vadd.f32 1.0, %v3588_v6  ;;  %v1497_v16 = vadd.f32 %v1393_v33, %v1256_v4  ;;  %v1635_v17 = vrot.slane %v1534_v44, 1  ;;  %v1498_v20 = vadd.f32 %v1395_v43, %v1257_v39 }
  0xa1   : > { %v4398_v19 = vadd.f32 1.0, %v3590_v37  ;;  %v1809_v45 = vmul.f32 %v4191_v41, %v4188_v54  ;;  %v1810_v21 = vmul.f32 %v4110_v24, %v4191_v41  ;;  %v1634_v25 = vsel %vm1139_vm8, %v1632_v10, %v1633_v11 }
  0xa2   : > { %3591 = vrcp.f32 %v4396_v15  ;;  %v2730_v22 = vand.u32 2147483648, %v4396_v15  ;;  %v1811_v27 = vmul.f32 %v4191_v41, %v4141_v60  ;;  %v4411_v29 = vunpack.c.l.bf16 %v1770_v18 }
  0xa3   : > { %3593 = vrcp.f32 %v4398_v19  ;;  %v2745_v0 = vand.u32 2147483648, %v4398_v19  ;;  %v2051_v54 = vmul.f32 %v4196_v58, %v4286_v50  ;;  %v2728_v24 = vand.u32 2147483647, %v4396_v15 }
  0xa4   : > { %v4416_v30 = vor.u32 1.1754944e-38, %v2730_v22  ;;  %v2743_v34 = vand.u32 2147483647, %v4398_v19  ;;  %v1636_v35 = vsel %vm1139_vm8, %v1633_v11, %v1635_v17  ;;  %v1738_v60 = vadd.f32 %v1634_v25, %v1497_v16 }
  0xa5   : > { %v4420_v53 = vor.u32 1.1754944e-38, %v2745_v0  ;;  %v1739_v36 = vadd.f32 %v1636_v35, %v1498_v20  ;;  %v1910_v42 = vrot.slane %v1809_v45, 2  ;;  %v1911_v32 = vrot.slane %v1810_v21, 2 }
  0xa6   : > { %v1913_v49 = vrot.slane %v1811_v27, 2  ;;  %v2052_v23 = vmul.f32 %v4196_v58, %v4122_v47  ;;  %v2053_v1 = vmul.f32 %v4196_v58, %v4148_v2  ;;  %vm2724_vm2 = vweird.f32 %v4396_v15 }
  0xa7   : > { %v2151_v40 = vrot.slane %v2051_v54, 2  ;;  %v2292_v4 = vmul.f32 %v4199_v61, %v4411_v29  ;;  %v2293_v56 = vmul.f32 %v4294_v7, %v4199_v61  ;;  %v2294_v48 = vmul.f32 %v4199_v61, %v4370_v3  ;;  %v1011_v54 = vld [vmem:[#allocation2 + $0x44] sm:$0x1] }
  0xa8   : > { %v3592_v14 = vpop.eup %3591  ;;  %vm2739_vm3 = vweird.f32 %v4398_v19  ;;  %v1912_v39 = vsel %vm1899_vm9, %v1910_v42, %v1911_v32  ;;  %v1914_v38 = vsel %vm1899_vm9, %v1911_v32, %v1913_v49  ;;  %v2152_v28 = vrot.slane %v2052_v23, 2 }
  0xa9   : > { %v2154_v44 = vrot.slane %v2053_v1, 2  ;;  %v3594_v52 = vpop.eup %3593  ;;  %v2720_v33 = vmul.f32 %v3592_v14, %v4396_v15  ;;  %vm2725_vm4 = vweird.f32 %v3592_v14  ;;  %vm4437_vm5 = vcmp.eq.f32.partialorder %v2728_v24, 8.507059e+37 }
  0xaa   : > { %v2016_v6 = vadd.f32 %v1912_v39, %v1738_v60  ;;  %v2017_v10 = vadd.f32 %v1914_v38, %v1739_v36  ;;  %v2735_v11 = vmul.f32 %v3594_v52, %v4398_v19  ;;  %vm2740_vm6 = vweird.f32 %v3594_v52  ;;  %vm2726_vm10 = vmor %vm2724_vm2, %vm2725_vm4 }
  0xab   : > { %vm4442_vm7 = vcmp.eq.f32.partialorder %v2743_v34, 8.507059e+37  ;;  %v2153_v16 = vsel %vm1899_vm9, %v2151_v40, %v2152_v28  ;;  %v2155_v17 = vsel %vm1899_vm9, %v2152_v28, %v2154_v44  ;;  %v2721_v18 = vsub.f32 1.0, %v2720_v33  ;;  %vm2741_vm11 = vmor %vm2739_vm3, %vm2740_vm6 }
  0xac   : > { %v2257_v20 = vadd.f32 %v2153_v16, %v2016_v6  ;;  %v2258_v45 = vadd.f32 %v2155_v17, %v2017_v10  ;;  %v2392_v21 = vrot.slane %v2292_v4, 2  ;;  %v2736_v22 = vsub.f32 1.0, %v2735_v11 }
  0xad   : > { %v2393_v25 = vrot.slane %v2293_v56, 2  ;;  %v2395_v27 = vrot.slane %v2294_v48, 2  ;;  %v818_v0 = vmul.f32 %v4120_v46, %v4112_v57  ;;  %v2722_v24 = vmul.f32 %v3592_v14, %v2721_v18 }
  0xae   : > { %v819_v34 = vmul.f32 %v4120_v46, %v4122_v47  ;;  %v883_v35 = vmul.f32 %v4292_v26, %v4130_v55  ;;  %v884_v60 = vmul.f32 %v4294_v7, %v4130_v55  ;;  %v2737_v36 = vmul.f32 %v3594_v52, %v2736_v22 }
  0xaf   : > { %v2394_v42 = vsel %vm1899_vm9, %v2392_v21, %v2393_v25  ;;  %v2396_v32 = vsel %vm1899_vm9, %v2393_v25, %v2395_v27  ;;  %v948_v49 = vmul.f32 %v4139_v59, %v4391_v51  ;;  %v2723_v23 = vadd.f32 %v3592_v14, %v2722_v24 }
  0xb0   : > { %v2498_v1 = vadd.f32 %v2394_v42, %v2257_v20  ;;  %v2499_v40 = vadd.f32 %v2396_v32, %v2258_v45  ;;  %v915_v4 = vadd.f32 %v883_v35, %v818_v0  ;;  %v2738_v56 = vadd.f32 %v3594_v52, %v2737_v36  ;;  %v3548_v42 = vld [vmem:[#allocation2 + $0x48] sm:$0xff]  }
  0xb1   : > { %v916_v48 = vadd.f32 %v884_v60, %v819_v34  ;;  %v949_v39 = vmul.f32 %v4139_v59, %v4393_v13  ;;  %v4465_v38 = vunpack.c.l.bf16 %v1011_v54  ;;  %v2727_v28 = vsel %vm2726_vm10, %v3592_v14, %v2723_v23 }
  0xb2   : > { %v4471_v44 = vadd.f32 %v4228_v31, %v2498_v1  ;;  %v4474_v33 = vadd.f32 %v4228_v31, %v2499_v40  ;;  %v980_v15 = vadd.f32 %v948_v49, %v915_v4  ;;  %v2732_v6 = vsel %vm4437_vm5, %v4416_v30, %v2727_v28 }
  0xb3   : > { %v2742_v10 = vsel %vm2741_vm11, %v3594_v52, %v2738_v56  ;;  %v981_v11 = vadd.f32 %v949_v39, %v916_v48  ;;  %v1052_v14 = vmul.f32 %v4157_v5, %v4112_v57  ;;  %v3171_v16 = vmul.f32 %v2732_v6, %v4341_v12  ;;  %v1771_v6 = vld [vmem:[#allocation2 + $0x3c] sm:$0xe] }
  0xb4   : > { %v2747_v19 = vsel %vm4442_vm7, %v4420_v53, %v2742_v10  ;;  %v3398_v17 = vmul.f32 -1.442695, %v4471_v44  ;;  %v3399_v18 = vmul.f32 -1.442695, %v4474_v33  ;;  %v1053_v30 = vmul.f32 %v4157_v5, %v4122_v47 }
  0xb5   : > { %v3172_v20 = vmul.f32 %v2747_v19, %v4344_v63  ;;  %v1054_v52 = vmul.f32 %v4157_v5, %v4148_v2  ;;  %v1155_v57 = vrot.slane %v1052_v14, 1  ;;  %v3266_v43 = vadd.f32 %v4387_v62, %v3171_v16 }
  0xb6   : > { %3595 = vpow2.f32 %v3398_v17  ;;  %v1294_v12 = vmul.f32 %v4292_v26, %v4160_v8  ;;  %v1295_v53 = vmul.f32 %v4294_v7, %v4160_v8  ;;  %v1156_v63 = vrot.slane %v1053_v30, 1 }
  0xb7   : > { %v3474_v37 = vpack.c.bf16 %v3172_v20, %v3171_v16  ;;  %3597 = vpow2.f32 %v3399_v18  ;;  %v1158_v45 = vrot.slane %v1054_v52, 1  ;;  %v4497_v21 = vadd.f32 %v3266_v43, %v3172_v20 }
  0xb8   : > { %v1296_v22 = vmul.f32 %v4160_v8, %v4370_v3  ;;  %v1396_v25 = vrot.slane %v1294_v12, 1  ;;  %v1397_v27 = vrot.slane %v1295_v53, 1  ;;  %v1157_v62 = vsel %vm1139_vm8, %v1155_v57, %v1156_v63 }
  0xb9   : > { %3554 = vst [vmem:[%s4379_s5 + $0x8] sm:$0xff] %v3474_v37   ;;  %v1159_v0 = vsel %vm1139_vm8, %v1156_v63, %v1158_v45  ;;  %v1535_v54 = vmul.f32 %v4163_v9, %v4391_v51  ;;  %v1536_v24 = vmul.f32 %v4163_v9, %v4393_v13  ;;  %v1258_v34 = vadd.f32 %v1157_v62, %v980_v15 }
  0xba   : > { %v1259_v35 = vadd.f32 %v1159_v0, %v981_v11  ;;  %v1398_v60 = vsel %vm1139_vm8, %v1396_v25, %v1397_v27  ;;  %v1399_v36 = vrot.slane %v1296_v22, 1  ;;  %v1537_v32 = vmul.f32 %v4163_v9, %v4465_v38 }
  0xbb   : > { %v1637_v49 = vrot.slane %v1535_v54, 1  ;;  %v1638_v23 = vrot.slane %v1536_v24, 1  ;;  %v1499_v4 = vadd.f32 %v1398_v60, %v1258_v34  ;;  %v1812_v56 = vmul.f32 %v4191_v41, %v4286_v50 }
  0xbc   : > { %v3596_v1 = vpop.eup %3595  ;;  %v1400_v40 = vsel %vm1139_vm8, %v1397_v27, %v1399_v36  ;;  %v1640_v15 = vrot.slane %v1537_v32, 1  ;;  %v1813_v10 = vmul.f32 %v4191_v41, %v4122_v47  ;;  %v4519_v11 = vunpack.c.l.bf16 %v3548_v42 }
  0xbd   : > { %v3598_v48 = vpop.eup %3597  ;;  %v4514_v39 = vadd.f32 1.0, %v3596_v1  ;;  %v1639_v28 = vsel %vm1139_vm8, %v1637_v49, %v1638_v23  ;;  %v1500_v19 = vadd.f32 %v1400_v40, %v1259_v35  ;;  %v1814_v16 = vmul.f32 %v4191_v41, %v4148_v2 }
  0xbe   : > { %v4521_v14 = vadd.f32 1.0, %v3598_v48  ;;  %v4525_v17 = vunpack.c.h.bf16 %v3548_v42  ;;  %v1915_v18 = vrot.slane %v1812_v56, 2  ;;  %v1740_v47 = vadd.f32 %v1639_v28, %v1499_v4 }
  0xbf   : > { %3599 = vrcp.f32 %v4514_v39  ;;  %v2760_v50 = vand.u32 2147483648, %v4514_v39  ;;  %v4531_v30 = vunpack.c.l.bf16 %v1771_v6  ;;  %v2758_v52 = vand.u32 2147483647, %v4514_v39 }
  0xc0   : > { %3601 = vrcp.f32 %v4521_v14  ;;  %v2775_v20 = vand.u32 2147483648, %v4521_v14  ;;  %v2773_v57 = vand.u32 2147483647, %v4521_v14  ;;  %v1641_v2 = vsel %vm1139_vm8, %v1638_v23, %v1640_v15 }
  0xc1   : > { %v1916_v43 = vrot.slane %v1813_v10, 2  ;;  %v2761_v12 = vor.u32 1.1754944e-38, %v2760_v50  ;;  %v1741_v37 = vadd.f32 %v1641_v2, %v1500_v19  ;;  %v1918_v63 = vrot.slane %v1814_v16, 2 }
  0xc2   : > { %v4536_v53 = vor.u32 1.1754944e-38, %v2775_v20  ;;  %v2054_v22 = vmul.f32 %v4196_v58, %v4411_v29  ;;  %v2055_v25 = vmul.f32 %v4294_v7, %v4196_v58  ;;  %v2056_v27 = vmul.f32 %v4196_v58, %v4370_v3 }
  0xc3   : > { %v1917_v45 = vsel %vm1899_vm9, %v1915_v18, %v1916_v43  ;;  %vm2754_vm12 = vweird.f32 %v4514_v39  ;;  %v1919_v62 = vsel %vm1899_vm9, %v1916_v43, %v1918_v63  ;;  %v2295_v54 = vmul.f32 %v4199_v61, %v4531_v30 }
  0xc4   : > { %v2018_v0 = vadd.f32 %v1917_v45, %v1740_v47  ;;  %v2296_v24 = vmul.f32 %v4199_v61, %v4393_v13  ;;  %vm2769_vm13 = vweird.f32 %v4521_v14  ;;  %v2019_v35 = vadd.f32 %v1919_v62, %v1741_v37  ;;  %v1012_v47 = vld [vmem:[#allocation2 + $0x50] sm:$0x1] }
  0xc5   : > { %v3600_v34 = vpop.eup %3599  ;;  %v2156_v60 = vrot.slane %v2054_v22, 2  ;;  %v2157_v36 = vrot.slane %v2055_v25, 2  ;;  %v2159_v42 = vrot.slane %v2056_v27, 2  ;;  %vm4553_vm15 = vcmp.eq.f32.partialorder %v2758_v52, 8.507059e+37 }
  0xc6   : > { %v3602_v32 = vpop.eup %3601  ;;  %v2750_v49 = vmul.f32 %v3600_v34, %v4514_v39  ;;  %vm2755_vm14 = vweird.f32 %v3600_v34  ;;  %v2297_v1 = vmul.f32 %v4199_v61, %v4465_v38  ;;  %v2397_v40 = vrot.slane %v2295_v54, 2 }
  0xc7   : > { %v2765_v4 = vmul.f32 %v3602_v32, %v4521_v14  ;;  %vm2770_vm0 = vweird.f32 %v3602_v32  ;;  %vm4560_vm1 = vcmp.eq.f32.partialorder %v2773_v57, 8.507059e+37  ;;  %v2158_v48 = vsel %vm1899_vm9, %v2156_v60, %v2157_v36  ;;  %vm2756_vm2 = vmor %vm2754_vm12, %vm2755_vm14 }
  0xc8   : > { %v2160_v28 = vsel %vm1899_vm9, %v2157_v36, %v2159_v42  ;;  %v2751_v15 = vsub.f32 1.0, %v2750_v49  ;;  %v2259_v6 = vadd.f32 %v2158_v48, %v2018_v0  ;;  %v2398_v19 = vrot.slane %v2296_v24, 2  ;;  %vm2771_vm3 = vmor %vm2769_vm13, %vm2770_vm0 }
  0xc9   : > { %v2260_v10 = vadd.f32 %v2160_v28, %v2019_v35  ;;  %v2766_v16 = vsub.f32 1.0, %v2765_v4  ;;  %v2400_v50 = vrot.slane %v2297_v1, 2  ;;  %v820_v18 = vmul.f32 %v4292_v26, %v4120_v46 }
  0xca   : > { %v821_v20 = vmul.f32 %v4294_v7, %v4120_v46  ;;  %v2752_v52 = vmul.f32 %v3600_v34, %v2751_v15  ;;  %v2399_v57 = vsel %vm1899_vm9, %v2397_v40, %v2398_v19  ;;  %v885_v2 = vmul.f32 %v4130_v55, %v4391_v51 }
  0xcb   : > { %v886_v43 = vmul.f32 %v4130_v55, %v4393_v13  ;;  %v2767_v37 = vmul.f32 %v3602_v32, %v2766_v16  ;;  %v2401_v63 = vsel %vm1899_vm9, %v2398_v19, %v2400_v50  ;;  %v2500_v45 = vadd.f32 %v2399_v57, %v2259_v6  ;;  %v753_v19 = vld [vmem:[#allocation2 + $0x54] sm:$0xf] }
  0xcc   : > { %v950_v22 = vmul.f32 %v4519_v11, %v4139_v59  ;;  %v2753_v25 = vadd.f32 %v3600_v34, %v2752_v52  ;;  %v2501_v27 = vadd.f32 %v2401_v63, %v2260_v10  ;;  %v917_v62 = vadd.f32 %v885_v2, %v820_v18 }
  0xcd   : > { %v918_v0 = vadd.f32 %v886_v43, %v821_v20  ;;  %v2768_v54 = vadd.f32 %v3602_v32, %v2767_v37  ;;  %v4582_v24 = vadd.f32 %v4228_v31, %v2500_v45  ;;  %v951_v35 = vmul.f32 %v4525_v17, %v4139_v59 }
  0xce   : > { %v4586_v60 = vunpack.c.l.bf16 %v1012_v47  ;;  %v2757_v36 = vsel %vm2756_vm2, %v3600_v34, %v2753_v25  ;;  %v4592_v42 = vadd.f32 %v4228_v31, %v2501_v27  ;;  %v982_v49 = vadd.f32 %v950_v22, %v917_v62  ;;  %v754_v22 = vld [vmem:[#allocation2 + $0x58] sm:$0xf] }
  0xcf   : > { %v1055_v39 = vmul.f32 %v4292_v26, %v4157_v5  ;;  %v2762_v1 = vsel %vm4553_vm15, %v2761_v12, %v2757_v36  ;;  %v2772_v40 = vsel %vm2771_vm3, %v3602_v32, %v2768_v54  ;;  %v3400_v4 = vmul.f32 -1.442695, %v4582_v24  ;;  %v1772_v36 = vld [vmem:[#allocation2 + $0x48] sm:$0xe] }
  0xd0   : > { %v983_v48 = vadd.f32 %v951_v35, %v918_v0  ;;  %v2777_v34 = vsel %vm4560_vm1, %v4536_v53, %v2772_v40  ;;  %v3173_v14 = vmul.f32 %v2762_v1, %v4471_v44  ;;  %v3401_v28 = vmul.f32 -1.442695, %v4592_v42 }
  0xd1   : > { %v1056_v15 = vmul.f32 %v4294_v7, %v4157_v5  ;;  %v3174_v26 = vmul.f32 %v2777_v34, %v4474_v33  ;;  %3603 = vpow2.f32 %v3400_v4  ;;  %v1057_v12 = vmul.f32 %v4157_v5, %v4370_v3 }
  0xd2   : > { %v1160_v32 = vrot.slane %v1055_v39, 1  ;;  %v3268_v23 = vadd.f32 %v4497_v21, %v3173_v14  ;;  %3605 = vpow2.f32 %v3401_v28  ;;  %v1297_v44 = vmul.f32 %v4160_v8, %v4391_v51 }
  0xd3   : > { %v1161_v56 = vrot.slane %v1056_v15, 1  ;;  %v3479_v53 = vpack.c.bf16 %v3174_v26, %v3173_v14  ;;  %v1163_v6 = vrot.slane %v1057_v12, 1  ;;  %v1298_v10 = vmul.f32 %v4160_v8, %v4393_v13 }
  0xd4   : > { %v1299_v33 = vmul.f32 %v4160_v8, %v4465_v38  ;;  %v4616_v16 = vadd.f32 %v3268_v23, %v3174_v26  ;;  %v1401_v18 = vrot.slane %v1297_v44, 1  ;;  %v1538_v21 = vmul.f32 %v4519_v11, %v4163_v9 }
  0xd5   : > { %v1162_v50 = vsel %vm1139_vm8, %v1160_v32, %v1161_v56  ;;  %3555 = vst [vmem:[%s4379_s5 + $0x10] sm:$0xff] %v3479_v53   ;;  %v1164_v20 = vsel %vm1139_vm8, %v1161_v56, %v1163_v6  ;;  %v1402_v52 = vrot.slane %v1298_v10, 1  ;;  %v1539_v43 = vmul.f32 %v4525_v17, %v4163_v9 }
  0xd6   : > { %v1260_v47 = vadd.f32 %v1162_v50, %v982_v49  ;;  %v1404_v57 = vrot.slane %v1299_v33, 1  ;;  %v1261_v2 = vadd.f32 %v1164_v20, %v983_v48  ;;  %v1540_v37 = vmul.f32 %v4163_v9, %v4586_v60 }
  0xd7   : > { %v3604_v63 = vpop.eup %3603  ;;  %v4627_v45 = vunpack.c.l.bf16 %v753_v19  ;;  %v1403_v25 = vsel %vm1139_vm8, %v1401_v18, %v1402_v52  ;;  %v1642_v54 = vrot.slane %v1538_v21, 1  ;;  %v1643_v35 = vrot.slane %v1539_v43, 1 }
  0xd8   : > { %v1405_v27 = vsel %vm1139_vm8, %v1402_v52, %v1404_v57  ;;  %v3606_v62 = vpop.eup %3605  ;;  %v4631_v0 = vadd.f32 1.0, %v3604_v63  ;;  %v1815_v49 = vmul.f32 %v4191_v41, %v4411_v29  ;;  %v1501_v1 = vadd.f32 %v1403_v25, %v1260_v47 }
  0xd9   : > { %v4635_v39 = vadd.f32 1.0, %v3606_v62  ;;  %v1502_v40 = vadd.f32 %v1405_v27, %v1261_v2  ;;  %v1645_v4 = vrot.slane %v1540_v37, 1  ;;  %v1816_v34 = vmul.f32 %v4294_v7, %v4191_v41 }
  0xda   : > { %3607 = vrcp.f32 %v4631_v0  ;;  %v2790_v48 = vand.u32 2147483648, %v4631_v0  ;;  %v1817_v14 = vmul.f32 %v4191_v41, %v4370_v3  ;;  %v4643_v28 = vunpack.c.l.bf16 %v754_v22 }
  0xdb   : > { %3609 = vrcp.f32 %v4635_v39  ;;  %v2805_v29 = vand.u32 2147483648, %v4635_v39  ;;  %v4647_v15 = vunpack.c.l.bf16 %v1772_v36  ;;  %v2788_v26 = vand.u32 2147483647, %v4631_v0 }
  0xdc   : > { %v2803_v12 = vand.u32 2147483647, %v4635_v39  ;;  %v1644_v32 = vsel %vm1139_vm8, %v1642_v54, %v1643_v35  ;;  %v1646_v23 = vsel %vm1139_vm8, %v1643_v35, %v1645_v4  ;;  %v2791_v7 = vor.u32 1.1754944e-38, %v2790_v48 }
  0xdd   : > { %v4653_v56 = vor.u32 1.1754944e-38, %v2805_v29  ;;  %v1742_v3 = vadd.f32 %v1644_v32, %v1501_v1  ;;  %v1743_v44 = vadd.f32 %v1646_v23, %v1502_v40  ;;  %v1920_v53 = vrot.slane %v1815_v49, 2 }
  0xde   : > { %v1921_v6 = vrot.slane %v1816_v34, 2  ;;  %v1923_v10 = vrot.slane %v1817_v14, 2  ;;  %v2057_v33 = vmul.f32 %v4196_v58, %v4531_v30  ;;  %vm2784_vm4 = vweird.f32 %v4631_v0 }
  0xdf   : > { %v2058_v19 = vmul.f32 %v4196_v58, %v4393_v13  ;;  %v2059_v50 = vmul.f32 %v4196_v58, %v4465_v38  ;;  %v2298_v18 = vmul.f32 %v4199_v61, %v4647_v15  ;;  %v2299_v21 = vmul.f32 %v4525_v17, %v4199_v61 }
  0xe0   : > { %v3608_v20 = vpop.eup %3607  ;;  %vm2799_vm5 = vweird.f32 %v4635_v39  ;;  %v1922_v47 = vsel %vm1899_vm9, %v1920_v53, %v1921_v6  ;;  %v1924_v52 = vsel %vm1899_vm9, %v1921_v6, %v1923_v10  ;;  %v2161_v57 = vrot.slane %v2057_v33, 2  ;;  %v1013_v6 = vld [vmem:[#allocation2 + $0x5c] sm:$0x1] }
  0xe1   : > { %v2300_v2 = vmul.f32 %v4199_v61, %v4586_v60  ;;  %v3610_v43 = vpop.eup %3609  ;;  %v2780_v37 = vmul.f32 %v3608_v20, %v4631_v0  ;;  %vm2785_vm6 = vweird.f32 %v3608_v20  ;;  %vm4672_vm7 = vcmp.eq.f32.partialorder %v2788_v26, 8.507059e+37 }
  0xe2   : > { %v2020_v22 = vadd.f32 %v1922_v47, %v1742_v3  ;;  %v2021_v25 = vadd.f32 %v1924_v52, %v1743_v44  ;;  %v2795_v27 = vmul.f32 %v3610_v43, %v4635_v39  ;;  %vm2800_vm10 = vweird.f32 %v3610_v43  ;;  %vm2786_vm12 = vmor %vm2784_vm4, %vm2785_vm6 }
  0xe3   : > { %vm4677_vm11 = vcmp.eq.f32.partialorder %v2803_v12, 8.507059e+37  ;;  %v2162_v54 = vrot.slane %v2058_v19, 2  ;;  %v2164_v35 = vrot.slane %v2059_v50, 2  ;;  %v2781_v36 = vsub.f32 1.0, %v2780_v37  ;;  %vm2801_vm13 = vmor %vm2799_vm5, %vm2800_vm10 }
  0xe4   : > { %v2402_v49 = vrot.slane %v2298_v18, 2  ;;  %v2403_v1 = vrot.slane %v2299_v21, 2  ;;  %v2405_v40 = vrot.slane %v2300_v2, 2  ;;  %v2796_v4 = vsub.f32 1.0, %v2795_v27 }
  0xe5   : > { %v2163_v48 = vsel %vm1899_vm9, %v2161_v57, %v2162_v54  ;;  %v2165_v34 = vsel %vm1899_vm9, %v2162_v54, %v2164_v35  ;;  %v822_v14 = vmul.f32 %v4120_v46, %v4391_v51  ;;  %v2782_v29 = vmul.f32 %v3608_v20, %v2781_v36 }
  0xe6   : > { %v2261_v26 = vadd.f32 %v2163_v48, %v2020_v22  ;;  %v2262_v12 = vadd.f32 %v2165_v34, %v2021_v25  ;;  %v2404_v32 = vsel %vm1899_vm9, %v2402_v49, %v2403_v1  ;;  %v2797_v23 = vmul.f32 %v3610_v43, %v2796_v4 }
  0xe7   : > { %v2406_v3 = vsel %vm1899_vm9, %v2403_v1, %v2405_v40  ;;  %v823_v44 = vmul.f32 %v4120_v46, %v4393_v13  ;;  %v887_v53 = vmul.f32 %v4519_v11, %v4130_v55  ;;  %v2783_v10 = vadd.f32 %v3608_v20, %v2782_v29 }
  0xe8   : > { %v2502_v33 = vadd.f32 %v2404_v32, %v2261_v26  ;;  %v2503_v19 = vadd.f32 %v2406_v3, %v2262_v12  ;;  %v888_v50 = vmul.f32 %v4525_v17, %v4130_v55  ;;  %v2798_v18 = vadd.f32 %v3610_v43, %v2797_v23  ;;  %v3549_v26 = vld [vmem:[#allocation2 + $0x60] sm:$0xff]  }
  0xe9   : > { %v919_v21 = vadd.f32 %v887_v53, %v822_v14  ;;  %v952_v47 = vmul.f32 %v4139_v59, %v4627_v45  ;;  %v953_v52 = vmul.f32 %v4139_v59, %v4643_v28  ;;  %v2787_v57 = vsel %vm2786_vm12, %v3608_v20, %v2783_v10 }
  0xea   : > { %v4704_v2 = vadd.f32 %v4228_v31, %v2502_v33  ;;  %v4707_v37 = vadd.f32 %v4228_v31, %v2503_v19  ;;  %v920_v0 = vadd.f32 %v888_v50, %v823_v44  ;;  %v2792_v22 = vsel %vm4672_vm7, %v2791_v7, %v2787_v57  ;;  %v1773_v57 = vld [vmem:[#allocation2 + $0x54] sm:$0xe] }
  0xeb   : > { %v2802_v25 = vsel %vm2801_vm13, %v3610_v43, %v2798_v18  ;;  %v984_v27 = vadd.f32 %v952_v47, %v919_v21  ;;  %v4711_v54 = vunpack.c.l.bf16 %v1013_v6  ;;  %v3175_v39 = vmul.f32 %v2792_v22, %v4582_v24 }
  0xec   : > { %v2807_v20 = vsel %vm4677_vm11, %v4653_v56, %v2802_v25  ;;  %v3402_v35 = vmul.f32 -1.442695, %v4704_v2  ;;  %v3403_v36 = vmul.f32 -1.442695, %v4707_v37  ;;  %v985_v49 = vadd.f32 %v953_v52, %v920_v0 }
  0xed   : > { %v3176_v31 = vmul.f32 %v2807_v20, %v4592_v42  ;;  %v1058_v7 = vmul.f32 %v4157_v5, %v4391_v51  ;;  %v1059_v43 = vmul.f32 %v4157_v5, %v4393_v13  ;;  %v3270_v63 = vadd.f32 %v4616_v16, %v3175_v39 }
  0xee   : > { %3611 = vpow2.f32 %v3402_v35  ;;  %v1060_v24 = vmul.f32 %v4157_v5, %v4465_v38  ;;  %v1300_v56 = vmul.f32 %v4519_v11, %v4160_v8  ;;  %v1301_v51 = vmul.f32 %v4525_v17, %v4160_v8 }
  0xef   : > { %v3484_v62 = vpack.c.bf16 %v3176_v31, %v3175_v39  ;;  %3613 = vpow2.f32 %v3403_v36  ;;  %v1165_v42 = vrot.slane %v1058_v7, 1  ;;  %v1166_v1 = vrot.slane %v1059_v43, 1 }
  0xf0   : > { %v4729_v40 = vadd.f32 %v3270_v63, %v3176_v31  ;;  %v1168_v4 = vrot.slane %v1060_v24, 1  ;;  %v1302_v16 = vmul.f32 %v4160_v8, %v4586_v60  ;;  %v1406_v34 = vrot.slane %v1300_v56, 1 }
  0xf1   : > { %3556 = vst [vmem:[%s4379_s5 + $0x18] sm:$0xff] %v3484_v62   ;;  %v1167_v48 = vsel %vm1139_vm8, %v1165_v42, %v1166_v1  ;;  %v1541_v14 = vmul.f32 %v4163_v9, %v4627_v45  ;;  %v1542_v29 = vmul.f32 %v4163_v9, %v4643_v28  ;;  %v1407_v23 = vrot.slane %v1301_v51, 1 }
  0xf2   : > { %v1169_v12 = vsel %vm1139_vm8, %v1166_v1, %v1168_v4  ;;  %v1262_v32 = vadd.f32 %v1167_v48, %v984_v27  ;;  %v1409_v3 = vrot.slane %v1302_v16, 1  ;;  %v1543_v53 = vmul.f32 %v4163_v9, %v4711_v54 }
  0xf3   : > { %v1263_v44 = vadd.f32 %v1169_v12, %v985_v49  ;;  %v1647_v6 = vrot.slane %v1541_v14, 1  ;;  %v1648_v10 = vrot.slane %v1542_v29, 1  ;;  %v1408_v19 = vsel %vm1139_vm8, %v1406_v34, %v1407_v23 }
  0xf4   : > { %v3612_v33 = vpop.eup %3611  ;;  %v1410_v50 = vsel %vm1139_vm8, %v1407_v23, %v1409_v3  ;;  %v4746_v21 = vunpack.c.l.bf16 %v3549_v26  ;;  %v1503_v52 = vadd.f32 %v1408_v19, %v1262_v32  ;;  %v1818_v0 = vmul.f32 %v4191_v41, %v4531_v30 }
  0xf5   : > { %v3614_v18 = vpop.eup %3613  ;;  %v4748_v47 = vadd.f32 1.0, %v3612_v33  ;;  %v1504_v25 = vadd.f32 %v1410_v50, %v1263_v44  ;;  %v1649_v27 = vsel %vm1139_vm8, %v1647_v6, %v1648_v10  ;;  %v1650_v20 = vrot.slane %v1543_v53, 1 }
  0xf6   : > { %v4752_v22 = vadd.f32 1.0, %v3614_v18  ;;  %v1819_v35 = vmul.f32 %v4191_v41, %v4393_v13  ;;  %v1820_v36 = vmul.f32 %v4191_v41, %v4465_v38  ;;  %v4761_v31 = vunpack.c.h.bf16 %v3549_v26 }
  0xf7   : > { %3615 = vrcp.f32 %v4748_v47  ;;  %v2820_v39 = vand.u32 2147483648, %v4748_v47  ;;  %v4765_v49 = vunpack.c.l.bf16 %v1773_v57  ;;  %v2818_v7 = vand.u32 2147483647, %v4748_v47 }
  0xf8   : > { %3617 = vrcp.f32 %v4752_v22  ;;  %v2835_v30 = vand.u32 2147483648, %v4752_v22  ;;  %v2833_v63 = vand.u32 2147483647, %v4752_v22  ;;  %v1651_v24 = vsel %vm1139_vm8, %v1648_v10, %v1650_v20 }
  0xf9   : > { %v4768_v43 = vor.u32 1.1754944e-38, %v2820_v39  ;;  %v1744_v56 = vadd.f32 %v1649_v27, %v1503_v52  ;;  %v1745_v38 = vadd.f32 %v1651_v24, %v1504_v25  ;;  %v1925_v62 = vrot.slane %v1818_v0, 2  ;;  %v1014_v24 = vld [vmem:[#allocation2 + $0x68] sm:$0x1] }
  0xfa   : > { %v4772_v13 = vor.u32 1.1754944e-38, %v2835_v30  ;;  %v1926_v42 = vrot.slane %v1819_v35, 2  ;;  %v1928_v1 = vrot.slane %v1820_v36, 2  ;;  %v2060_v4 = vmul.f32 %v4196_v58, %v4647_v15 }
  0xfb   : > { %v2061_v51 = vmul.f32 %v4525_v17, %v4196_v58  ;;  %vm2814_vm14 = vweird.f32 %v4748_v47  ;;  %v2062_v16 = vmul.f32 %v4196_v58, %v4586_v60  ;;  %v2301_v48 = vmul.f32 %v4199_v61, %v4765_v49 }
  0xfc   : > { %v2302_v34 = vmul.f32 %v4199_v61, %v4643_v28  ;;  %v2303_v14 = vmul.f32 %v4199_v61, %v4711_v54  ;;  %vm2829_vm15 = vweird.f32 %v4752_v22  ;;  %v1927_v26 = vsel %vm1899_vm9, %v1925_v62, %v1926_v42 }
  0xfd   : > { %v3616_v29 = vpop.eup %3615  ;;  %v1929_v12 = vsel %vm1899_vm9, %v1926_v42, %v1928_v1  ;;  %v2166_v32 = vrot.slane %v2060_v4, 2  ;;  %v2167_v23 = vrot.slane %v2061_v51, 2  ;;  %vm4791_vm1 = vcmp.eq.f32.partialorder %v2818_v7, 8.507059e+37 }
  0xfe   : > { %v3618_v3 = vpop.eup %3617  ;;  %v2810_v44 = vmul.f32 %v3616_v29, %v4748_v47  ;;  %vm2815_vm0 = vweird.f32 %v3616_v29  ;;  %v2022_v6 = vadd.f32 %v1927_v26, %v1744_v56  ;;  %v2023_v10 = vadd.f32 %v1929_v12, %v1745_v38 }
  0xff   : > { %v2825_v33 = vmul.f32 %v3618_v3, %v4752_v22  ;;  %vm2830_vm2 = vweird.f32 %v3618_v3  ;;  %vm4796_vm3 = vcmp.eq.f32.partialorder %v2833_v63, 8.507059e+37  ;;  %v2168_v50 = vsel %vm1899_vm9, %v2166_v32, %v2167_v23  ;;  %vm2816_vm4 = vmor %vm2814_vm14, %vm2815_vm0 }
 0x100   : > { %v2169_v18 = vrot.slane %v2062_v16, 2  ;;  %v2811_v52 = vsub.f32 1.0, %v2810_v44  ;;  %v2263_v57 = vadd.f32 %v2168_v50, %v2022_v6  ;;  %v2407_v0 = vrot.slane %v2301_v48, 2  ;;  %vm2831_vm5 = vmor %vm2829_vm15, %vm2830_vm2 }
 0x101   : > { %v2408_v25 = vrot.slane %v2302_v34, 2  ;;  %v2826_v27 = vsub.f32 1.0, %v2825_v33  ;;  %v2410_v39 = vrot.slane %v2303_v14, 2  ;;  %v824_v35 = vmul.f32 %v4519_v11, %v4120_v46  ;;  %v4820_v34 = vld [vmem:[%s6012_s2] ss:$0 sm:$0xff] }
 0x102   : > { %v2170_v20 = vsel %vm1899_vm9, %v2167_v23, %v2169_v18  ;;  %v2812_v36 = vmul.f32 %v3616_v29, %v2811_v52  ;;  %v825_v63 = vmul.f32 %v4525_v17, %v4120_v46  ;;  %v889_v42 = vmul.f32 %v4130_v55, %v4627_v45 }
 0x103   : > { %v2264_v30 = vadd.f32 %v2170_v20, %v2023_v10  ;;  %v2409_v7 = vsel %vm1899_vm9, %v2407_v0, %v2408_v25  ;;  %v2827_v56 = vmul.f32 %v3618_v3, %v2826_v27  ;;  %v2411_v38 = vsel %vm1899_vm9, %v2408_v25, %v2410_v39 }
 0x104   : > { %v2504_v62 = vadd.f32 %v2409_v7, %v2263_v57  ;;  %v2813_v1 = vadd.f32 %v3616_v29, %v2812_v36  ;;  %v890_v51 = vmul.f32 %v4130_v55, %v4643_v28  ;;  %v954_v16 = vmul.f32 %v4746_v21, %v4139_v59 }
 0x105   : > { %v2505_v4 = vadd.f32 %v2411_v38, %v2264_v30  ;;  %v2828_v48 = vadd.f32 %v3618_v3, %v2827_v56  ;;  %v921_v26 = vadd.f32 %v889_v42, %v824_v35  ;;  %v955_v12 = vmul.f32 %v4761_v31, %v4139_v59 }
 0x106   : > { %v4823_v14 = vadd.f32 %v4820_v34, %v2504_v62  ;;  %v2817_v32 = vsel %vm2816_vm4, %v3616_v29, %v2813_v1  ;;  %v922_v23 = vadd.f32 %v890_v51, %v825_v63  ;;  %v4833_v44 = vunpack.c.l.bf16 %v1014_v24  ;;  %v757_v62 = vld [vmem:[#allocation2 + $0x6c] sm:$0xf] }
 0x107   : > { %v4831_v47 = vadd.f32 %v4820_v34, %v2505_v4  ;;  %v2822_v6 = vsel %vm4791_vm1, %v4768_v43, %v2817_v32  ;;  %v2832_v10 = vsel %vm2831_vm5, %v3618_v3, %v2828_v48  ;;  %v986_v50 = vadd.f32 %v954_v16, %v921_v26  ;;  %v758_v48 = vld [vmem:[#allocation2 + $0x70] sm:$0xf] }
 0x108   : > { %v3404_v33 = vmul.f32 -1.442695, %v4823_v14  ;;  %v2837_v29 = vsel %vm4796_vm3, %v4772_v13, %v2832_v10  ;;  %v3177_v22 = vmul.f32 %v2822_v6, %v4704_v2  ;;  %v987_v52 = vadd.f32 %v955_v12, %v922_v23  ;;  %v1774_v23 = vld [vmem:[#allocation2 + $0x60] sm:$0xe] }
 0x109   : > { %v3405_v18 = vmul.f32 -1.442695, %v4831_v47  ;;  %v3178_v57 = vmul.f32 %v2837_v29, %v4707_v37  ;;  %v1061_v43 = vmul.f32 %v4519_v11, %v4157_v5  ;;  %v1062_v3 = vmul.f32 %v4525_v17, %v4157_v5 }
 0x10a   : > { %3619 = vpow2.f32 %v3404_v33  ;;  %v3272_v53 = vadd.f32 %v4729_v40, %v3177_v22  ;;  %v1063_v13 = vmul.f32 %v4157_v5, %v4586_v60  ;;  %v1303_v2 = vmul.f32 %v4160_v8, %v4627_v45 }
 0x10b   : > { %3621 = vpow2.f32 %v3405_v18  ;;  %v3489_v19 = vpack.c.bf16 %v3178_v57, %v3177_v22  ;;  %v1170_v0 = vrot.slane %v1061_v43, 1  ;;  %v1171_v37 = vrot.slane %v1062_v3, 1 }
 0x10c   : > { %v1304_v25 = vmul.f32 %v4160_v8, %v4643_v28  ;;  %v4856_v27 = vadd.f32 %v3272_v53, %v3178_v57  ;;  %v1173_v11 = vrot.slane %v1063_v13, 1  ;;  %v1305_v20 = vmul.f32 %v4160_v8, %v4711_v54 }
 0x10d   : > { %v1411_v40 = vrot.slane %v1303_v2, 1  ;;  %3557 = vst [vmem:[%s4379_s5 + $0x20] sm:$0xff] %v3489_v19   ;;  %v1172_v39 = vsel %vm1139_vm8, %v1170_v0, %v1171_v37  ;;  %v1544_v36 = vmul.f32 %v4746_v21, %v4163_v9  ;;  %v1545_v30 = vmul.f32 %v4761_v31, %v4163_v9 }
 0x10e   : > { %v1412_v35 = vrot.slane %v1304_v25, 1  ;;  %v1174_v7 = vsel %vm1139_vm8, %v1171_v37, %v1173_v11  ;;  %v1264_v63 = vadd.f32 %v1172_v39, %v986_v50  ;;  %v1414_v24 = vrot.slane %v1305_v20, 1 }
 0x10f   : > { %v1546_v56 = vmul.f32 %v4163_v9, %v4833_v44  ;;  %v1265_v42 = vadd.f32 %v1174_v7, %v987_v52  ;;  %v1652_v4 = vrot.slane %v1544_v36, 1  ;;  %v1653_v51 = vrot.slane %v1545_v30, 1 }
 0x110   : > { %v3620_v38 = vpop.eup %3619  ;;  %v1413_v1 = vsel %vm1139_vm8, %v1411_v40, %v1412_v35  ;;  %v1415_v12 = vsel %vm1139_vm8, %v1412_v35, %v1414_v24  ;;  %v4875_v50 = vunpack.c.l.bf16 %v757_v62  ;;  %v4880_v18 = vunpack.c.l.bf16 %v758_v48 }
 0x111   : > { %v3622_v16 = vpop.eup %3621  ;;  %v4870_v26 = vadd.f32 1.0, %v3620_v38  ;;  %v1655_v32 = vrot.slane %v1546_v56, 1  ;;  %v1505_v10 = vadd.f32 %v1413_v1, %v1264_v63  ;;  %v1506_v33 = vadd.f32 %v1415_v12, %v1265_v42 }
 0x112   : > { %v4873_v6 = vadd.f32 1.0, %v3622_v16  ;;  %v1654_v22 = vsel %vm1139_vm8, %v1652_v4, %v1653_v51  ;;  %v4884_v57 = vunpack.c.l.bf16 %v1774_v23  ;;  %v1821_v37 = vmul.f32 %v4191_v41, %v4647_v15 }
 0x113   : > { %3623 = vrcp.f32 %v4870_v26  ;;  %v2850_v29 = vand.u32 2147483648, %v4870_v26  ;;  %v2848_v43 = vand.u32 2147483647, %v4870_v26  ;;  %v1656_v13 = vsel %vm1139_vm8, %v1653_v51, %v1655_v32 }
 0x114   : > { %3625 = vrcp.f32 %v4873_v6  ;;  %v2865_v52 = vand.u32 2147483648, %v4873_v6  ;;  %v2863_v53 = vand.u32 2147483647, %v4873_v6  ;;  %v1746_v19 = vadd.f32 %v1654_v22, %v1505_v10 }
 0x115   : > { %v4887_v3 = vor.u32 1.1754944e-38, %v2850_v29  ;;  %v1747_v0 = vadd.f32 %v1656_v13, %v1506_v33  ;;  %vm2859_vm6 = vweird.f32 %v4873_v6  ;;  %v1822_v25 = vmul.f32 %v4525_v17, %v4191_v41 }
 0x116   : > { %v4891_v2 = vor.u32 1.1754944e-38, %v2865_v52  ;;  %v1823_v11 = vmul.f32 %v4191_v41, %v4586_v60  ;;  %v2063_v20 = vmul.f32 %v4196_v58, %v4765_v49  ;;  %v2064_v40 = vmul.f32 %v4196_v58, %v4643_v28 }
 0x117   : > { %vm2844_vm7 = vweird.f32 %v4870_v26  ;;  %v1930_v39 = vrot.slane %v1821_v37, 2  ;;  %v2065_v15 = vmul.f32 %v4196_v58, %v4711_v54  ;;  %v2304_v35 = vmul.f32 %v4199_v61, %v4884_v57 }
 0x118   : > { %v2305_v17 = vmul.f32 %v4761_v31, %v4199_v61  ;;  %v1931_v60 = vrot.slane %v1822_v25, 2  ;;  %v1933_v30 = vrot.slane %v1823_v11, 2  ;;  %v2171_v7 = vrot.slane %v2063_v20, 2 }
 0x119   : > { %v3624_v36 = vpop.eup %3623  ;;  %v2172_v63 = vrot.slane %v2064_v40, 2  ;;  %vm4912_vm11 = vcmp.eq.f32.partialorder %v2848_v43, 8.507059e+37  ;;  %v2174_v62 = vrot.slane %v2065_v15, 2  ;;  %v2306_v42 = vmul.f32 %v4199_v61, %v4833_v44 }
 0x11a   : > { %v3626_v24 = vpop.eup %3625  ;;  %v2840_v56 = vmul.f32 %v3624_v36, %v4870_v26  ;;  %vm2845_vm10 = vweird.f32 %v3624_v36  ;;  %vm4919_vm13 = vcmp.eq.f32.partialorder %v2863_v53, 8.507059e+37  ;;  %v1932_v51 = vsel %vm1899_vm9, %v1930_v39, %v1931_v60 }
 0x11b   : > { %v2855_v1 = vmul.f32 %v3626_v24, %v4873_v6  ;;  %vm2860_vm12 = vweird.f32 %v3626_v24  ;;  %v1934_v16 = vsel %vm1899_vm9, %v1931_v60, %v1933_v30  ;;  %v2024_v12 = vadd.f32 %v1932_v51, %v1746_v19  ;;  %vm2846_vm14 = vmor %vm2844_vm7, %vm2845_vm10  ;;  %v1015_v30 = vld [vmem:[#allocation2 + $0x74] sm:$0x1] }
 0x11c   : > { %v2841_v48 = vsub.f32 1.0, %v2840_v56  ;;  %v2025_v32 = vadd.f32 %v1934_v16, %v1747_v0  ;;  %v2173_v23 = vsel %vm1899_vm9, %v2171_v7, %v2172_v63  ;;  %v2175_v33 = vsel %vm1899_vm9, %v2172_v63, %v2174_v62  ;;  %vm2861_vm15 = vmor %vm2859_vm6, %vm2860_vm12 }
 0x11d   : > { %v2856_v10 = vsub.f32 1.0, %v2855_v1  ;;  %v2412_v29 = vrot.slane %v2304_v35, 2  ;;  %v2413_v22 = vrot.slane %v2305_v17, 2  ;;  %v2265_v43 = vadd.f32 %v2173_v23, %v2024_v12 }
 0x11e   : > { %v2842_v52 = vmul.f32 %v3624_v36, %v2841_v48  ;;  %v2266_v53 = vadd.f32 %v2175_v33, %v2025_v32  ;;  %v2415_v13 = vrot.slane %v2306_v42, 2  ;;  %v826_v11 = vmul.f32 %v4120_v46, %v4627_v45 }
 0x11f   : > { %v2857_v37 = vmul.f32 %v3626_v24, %v2856_v10  ;;  %v2414_v25 = vsel %vm1899_vm9, %v2412_v29, %v2413_v22  ;;  %v827_v19 = vmul.f32 %v4120_v46, %v4643_v28  ;;  %v891_v39 = vmul.f32 %v4746_v21, %v4130_v55 }
 0x120   : > { %v2843_v0 = vadd.f32 %v3624_v36, %v2842_v52  ;;  %v2416_v20 = vsel %vm1899_vm9, %v2413_v22, %v2415_v13  ;;  %v2506_v40 = vadd.f32 %v2414_v25, %v2265_v43  ;;  %v892_v17 = vmul.f32 %v4761_v31, %v4130_v55 }
 0x121   : > { %v2858_v15 = vadd.f32 %v3626_v24, %v2857_v37  ;;  %v2507_v35 = vadd.f32 %v2416_v20, %v2266_v53  ;;  %v956_v60 = vmul.f32 %v4139_v59, %v4875_v50  ;;  %v923_v56 = vadd.f32 %v891_v39, %v826_v11  ;;  %v3550_v39 = vld [vmem:[#allocation2 + $0x78] sm:$0xff]  }
 0x122   : > { %v2847_v7 = vsel %vm2846_vm14, %v3624_v36, %v2843_v0  ;;  %v4946_v63 = vadd.f32 %v4820_v34, %v2506_v40  ;;  %v957_v26 = vmul.f32 %v4139_v59, %v4880_v18  ;;  %v924_v36 = vadd.f32 %v892_v17, %v827_v19 }
 0x123   : > { %v2852_v62 = vsel %vm4912_vm11, %v4887_v3, %v2847_v7  ;;  %v2862_v42 = vsel %vm2861_vm15, %v3626_v24, %v2858_v15  ;;  %v4954_v1 = vadd.f32 %v4820_v34, %v2507_v35  ;;  %v988_v48 = vadd.f32 %v956_v60, %v923_v56 }
 0x124   : > { %v2867_v6 = vsel %vm4919_vm13, %v4891_v2, %v2862_v42  ;;  %v3179_v51 = vmul.f32 %v2852_v62, %v4823_v14  ;;  %v3406_v16 = vmul.f32 -1.442695, %v4946_v63  ;;  %v989_v3 = vadd.f32 %v957_v26, %v924_v36  ;;  %v1775_v62 = vld [vmem:[#allocation2 + $0x6c] sm:$0xe] }
 0x125   : > { %v3180_v12 = vmul.f32 %v2867_v6, %v4831_v47  ;;  %v3407_v38 = vmul.f32 -1.442695, %v4954_v1  ;;  %v4963_v24 = vunpack.c.l.bf16 %v1015_v30  ;;  %v1064_v4 = vmul.f32 %v4157_v5, %v4627_v45 }
 0x126   : > { %v3274_v32 = vadd.f32 %v4856_v27, %v3179_v51  ;;  %3627 = vpow2.f32 %v3406_v16  ;;  %v1065_v14 = vmul.f32 %v4157_v5, %v4643_v28  ;;  %v1066_v47 = vmul.f32 %v4157_v5, %v4711_v54 }
 0x127   : > { %v3494_v2 = vpack.c.bf16 %v3180_v12, %v3179_v51  ;;  %3629 = vpow2.f32 %v3407_v38  ;;  %v1306_v23 = vmul.f32 %v4746_v21, %v4160_v8  ;;  %v1175_v33 = vrot.slane %v1064_v4, 1 }
 0x128   : > { %v4974_v10 = vadd.f32 %v3274_v32, %v3180_v12  ;;  %v1176_v29 = vrot.slane %v1065_v14, 1  ;;  %v1307_v27 = vmul.f32 %v4761_v31, %v4160_v8  ;;  %v1178_v45 = vrot.slane %v1066_v47, 1 }
 0x129   : > { %3558 = vst [vmem:[%s4379_s5 + $0x28] sm:$0xff] %v3494_v2   ;;  %v1308_v22 = vmul.f32 %v4160_v8, %v4833_v44  ;;  %v1416_v52 = vrot.slane %v1306_v23, 1  ;;  %v1547_v43 = vmul.f32 %v4163_v9, %v4875_v50  ;;  %v1548_v37 = vmul.f32 %v4163_v9, %v4880_v18 }
 0x12a   : > { %v1177_v53 = vsel %vm1139_vm8, %v1175_v33, %v1176_v29  ;;  %v1417_v13 = vrot.slane %v1307_v27, 1  ;;  %v1549_v25 = vmul.f32 %v4163_v9, %v4963_v24  ;;  %v1179_v11 = vsel %vm1139_vm8, %v1176_v29, %v1178_v45 }
 0x12b   : > { %v1266_v19 = vadd.f32 %v1177_v53, %v988_v48  ;;  %v1419_v0 = vrot.slane %v1308_v22, 1  ;;  %v1657_v20 = vrot.slane %v1547_v43, 1  ;;  %v1267_v15 = vadd.f32 %v1179_v11, %v989_v3 }
 0x12c   : > { %v3628_v40 = vpop.eup %3627  ;;  %v1418_v35 = vsel %vm1139_vm8, %v1416_v52, %v1417_v13  ;;  %v1658_v17 = vrot.slane %v1548_v37, 1  ;;  %v1660_v60 = vrot.slane %v1549_v25, 1  ;;  %v4996_v51 = vunpack.c.l.bf16 %v3550_v39 }
 0x12d   : > { %v3630_v30 = vpop.eup %3629  ;;  %v4990_v7 = vadd.f32 1.0, %v3628_v40  ;;  %v1420_v56 = vsel %vm1139_vm8, %v1417_v13, %v1419_v0  ;;  %v1507_v26 = vadd.f32 %v1418_v35, %v1266_v19  ;;  %v5001_v12 = vunpack.c.h.bf16 %v3550_v39 }
 0x12e   : > { %v4993_v42 = vadd.f32 1.0, %v3630_v30  ;;  %v1508_v36 = vadd.f32 %v1420_v56, %v1267_v15  ;;  %v1659_v6 = vsel %vm1139_vm8, %v1657_v20, %v1658_v17  ;;  %v1661_v48 = vsel %vm1139_vm8, %v1658_v17, %v1660_v60 }
 0x12f   : > { %3631 = vrcp.f32 %v4990_v7  ;;  %v2880_v16 = vand.u32 2147483648, %v4990_v7  ;;  %v5005_v3 = vunpack.c.l.bf16 %v1775_v62  ;;  %v2878_v32 = vand.u32 2147483647, %v4990_v7 }
 0x130   : > { %3633 = vrcp.f32 %v4993_v42  ;;  %v2895_v38 = vand.u32 2147483648, %v4993_v42  ;;  %v2893_v14 = vand.u32 2147483647, %v4993_v42  ;;  %v1748_v2 = vadd.f32 %v1659_v6, %v1507_v26 }
 0x131   : > { %v5008_v4 = vor.u32 1.1754944e-38, %v2880_v16  ;;  %vm2874_vm0 = vweird.f32 %v4990_v7  ;;  %v1749_v23 = vadd.f32 %v1661_v48, %v1508_v36  ;;  %v1824_v33 = vmul.f32 %v4191_v41, %v4765_v49 }
 0x132   : > { %v5012_v47 = vor.u32 1.1754944e-38, %v2895_v38  ;;  %v1825_v29 = vmul.f32 %v4191_v41, %v4643_v28  ;;  %vm2889_vm1 = vweird.f32 %v4993_v42  ;;  %v1826_v27 = vmul.f32 %v4191_v41, %v4711_v54 }
 0x133   : > { %v2066_v45 = vmul.f32 %v4196_v58, %v4884_v57  ;;  %v2067_v22 = vmul.f32 %v4761_v31, %v4196_v58  ;;  %v2068_v52 = vmul.f32 %v4196_v58, %v4833_v44  ;;  %v1935_v43 = vrot.slane %v1824_v33, 2 }
 0x134   : > { %v1936_v53 = vrot.slane %v1825_v29, 2  ;;  %v2307_v49 = vmul.f32 %v4199_v61, %v5005_v3  ;;  %v2308_v28 = vmul.f32 %v4199_v61, %v4880_v18  ;;  %v1938_v37 = vrot.slane %v1826_v27, 2 }
 0x135   : > { %v3632_v13 = vpop.eup %3631  ;;  %v2176_v54 = vrot.slane %v2066_v45, 2  ;;  %v2177_v25 = vrot.slane %v2067_v22, 2  ;;  %v2179_v11 = vrot.slane %v2068_v52, 2  ;;  %vm5032_vm3 = vcmp.eq.f32.partialorder %v2878_v32, 8.507059e+37 }
 0x136   : > { %v3634_v19 = vpop.eup %3633  ;;  %v2870_v0 = vmul.f32 %v3632_v13, %v4990_v7  ;;  %vm2875_vm2 = vweird.f32 %v3632_v13  ;;  %v1937_v40 = vsel %vm1899_vm9, %v1935_v43, %v1936_v53  ;;  %v2309_v39 = vmul.f32 %v4199_v61, %v4963_v24 }
 0x137   : > { %v2885_v15 = vmul.f32 %v3634_v19, %v4993_v42  ;;  %vm2890_vm4 = vweird.f32 %v3634_v19  ;;  %vm5040_vm5 = vcmp.eq.f32.partialorder %v2893_v14, 8.507059e+37  ;;  %v1939_v17 = vsel %vm1899_vm9, %v1936_v53, %v1938_v37  ;;  %vm2876_vm6 = vmor %vm2874_vm0, %vm2875_vm2 }
 0x138   : > { %v2026_v60 = vadd.f32 %v1937_v40, %v1748_v2  ;;  %v2871_v30 = vsub.f32 1.0, %v2870_v0  ;;  %v2027_v56 = vadd.f32 %v1939_v17, %v1749_v23  ;;  %v2178_v26 = vsel %vm1899_vm9, %v2176_v54, %v2177_v25  ;;  %v1016_v54 = vld [vmem:[#allocation2 + $0x80] sm:$0x1]  ;;  %vm2891_vm7 = vmor %vm2889_vm1, %vm2890_vm4 }
 0x139   : > { %v2180_v62 = vsel %vm1899_vm9, %v2177_v25, %v2179_v11  ;;  %v2886_v36 = vsub.f32 1.0, %v2885_v15  ;;  %v2417_v16 = vrot.slane %v2307_v49, 2  ;;  %v2418_v48 = vrot.slane %v2308_v28, 2 }
 0x13a   : > { %v2267_v6 = vadd.f32 %v2178_v26, %v2026_v60  ;;  %v2872_v38 = vmul.f32 %v3632_v13, %v2871_v30  ;;  %v2268_v32 = vadd.f32 %v2180_v62, %v2027_v56  ;;  %v2420_v33 = vrot.slane %v2309_v39, 2 }
 0x13b   : > { %v828_v14 = vmul.f32 %v4746_v21, %v4120_v46  ;;  %v2887_v29 = vmul.f32 %v3634_v19, %v2886_v36  ;;  %v2419_v27 = vsel %vm1899_vm9, %v2417_v16, %v2418_v48  ;;  %v829_v2 = vmul.f32 %v4761_v31, %v4120_v46 }
 0x13c   : > { %v893_v23 = vmul.f32 %v4130_v55, %v4875_v50  ;;  %v2873_v45 = vadd.f32 %v3632_v13, %v2872_v38  ;;  %v2421_v22 = vsel %vm1899_vm9, %v2418_v48, %v2420_v33  ;;  %v2508_v52 = vadd.f32 %v2419_v27, %v2267_v6 }
 0x13d   : > { %v894_v43 = vmul.f32 %v4130_v55, %v4880_v18  ;;  %v2888_v53 = vadd.f32 %v3634_v19, %v2887_v29  ;;  %v2509_v49 = vadd.f32 %v2421_v22, %v2268_v32  ;;  %v958_v37 = vmul.f32 %v4996_v51, %v4139_v59 }
 0x13e   : > { %v925_v28 = vadd.f32 %v893_v23, %v828_v14  ;;  %v2877_v25 = vsel %vm2876_vm6, %v3632_v13, %v2873_v45  ;;  %v5066_v11 = vadd.f32 %v4820_v34, %v2508_v52  ;;  %v959_v7 = vmul.f32 %v5001_v12, %v4139_v59  ;;  %v762_v14 = vld [vmem:[#allocation2 + $0x88] sm:$0xf] }
 0x13f   : > { %v926_v0 = vadd.f32 %v894_v43, %v829_v2  ;;  %v2882_v40 = vsel %vm5032_vm3, %v5008_v4, %v2877_v25  ;;  %v2892_v39 = vsel %vm2891_vm7, %v3634_v19, %v2888_v53  ;;  %v5074_v15 = vadd.f32 %v4820_v34, %v2509_v49  ;;  %v1776_v53 = vld [vmem:[#allocation2 + $0x78] sm:$0xe] }
 0x140   : > { %v990_v13 = vadd.f32 %v958_v37, %v925_v28  ;;  %v2897_v42 = vsel %vm5040_vm5, %v5012_v47, %v2892_v39  ;;  %v3181_v17 = vmul.f32 %v2882_v40, %v4946_v63  ;;  %v3408_v60 = vmul.f32 -1.442695, %v5066_v11 }
 0x141   : > { %v991_v30 = vadd.f32 %v959_v7, %v926_v0  ;;  %v3182_v56 = vmul.f32 %v2897_v42, %v4954_v1  ;;  %v3409_v26 = vmul.f32 -1.442695, %v5074_v15  ;;  %v5083_v4 = vunpack.c.l.bf16 %v1016_v54 }
 0x142   : > { %v1067_v19 = vmul.f32 %v4746_v21, %v4157_v5  ;;  %v3276_v20 = vadd.f32 %v4974_v10, %v3181_v17  ;;  %3635 = vpow2.f32 %v3408_v60  ;;  %v1068_v47 = vmul.f32 %v4761_v31, %v4157_v5  ;;  %v761_v10 = vld [vmem:[#allocation2 + $0x84] sm:$0xf] }
 0x143   : > { %v1069_v63 = vmul.f32 %v4157_v5, %v4833_v44  ;;  %v3499_v35 = vpack.c.bf16 %v3182_v56, %v3181_v17  ;;  %3637 = vpow2.f32 %v3409_v26  ;;  %v1309_v62 = vmul.f32 %v4160_v8, %v4875_v50 }
 0x144   : > { %v1180_v1 = vrot.slane %v1067_v19, 1  ;;  %v5094_v36 = vadd.f32 %v3276_v20, %v3182_v56  ;;  %v1181_v6 = vrot.slane %v1068_v47, 1  ;;  %v1310_v21 = vmul.f32 %v4160_v8, %v4880_v18 }
 0x145   : > { %v1183_v16 = vrot.slane %v1069_v63, 1  ;;  %3559 = vst [vmem:[%s4379_s5 + $0x30] sm:$0xff] %v3499_v35   ;;  %v1311_v48 = vmul.f32 %v4160_v8, %v4963_v24  ;;  %v1421_v38 = vrot.slane %v1309_v62, 1  ;;  %v1550_v32 = vmul.f32 %v4996_v51, %v4163_v9 }
 0x146   : > { %v1551_v33 = vmul.f32 %v5001_v12, %v4163_v9  ;;  %v1182_v29 = vsel %vm1139_vm8, %v1180_v1, %v1181_v6  ;;  %v1422_v2 = vrot.slane %v1310_v21, 1  ;;  %v1552_v23 = vmul.f32 %v4163_v9, %v5083_v4 }
 0x147   : > { %v1184_v27 = vsel %vm1139_vm8, %v1181_v6, %v1183_v16  ;;  %v1268_v45 = vadd.f32 %v1182_v29, %v990_v13  ;;  %v1424_v52 = vrot.slane %v1311_v48, 1  ;;  %v1662_v43 = vrot.slane %v1550_v32, 1 }
 0x148   : > { %v1269_v22 = vadd.f32 %v1184_v27, %v991_v30  ;;  %v3636_v49 = vpop.eup %3635  ;;  %v5109_v28 = vunpack.c.l.bf16 %v761_v10  ;;  %v1423_v37 = vsel %vm1139_vm8, %v1421_v38, %v1422_v2  ;;  %v1663_v54 = vrot.slane %v1551_v33, 1 }
 0x149   : > { %v1665_v25 = vrot.slane %v1552_v23, 1  ;;  %v3638_v0 = vpop.eup %3637  ;;  %v5112_v7 = vunpack.c.l.bf16 %v762_v14  ;;  %v2671_v40 = vadd.f32 1.0, %v3636_v49  ;;  %v1425_v39 = vsel %vm1139_vm8, %v1422_v2, %v1424_v52 }
 0x14a   : > { %v1509_v42 = vadd.f32 %v1423_v37, %v1268_v45  ;;  %v5115_v17 = vadd.f32 1.0, %v3638_v0  ;;  %v1510_v13 = vadd.f32 %v1425_v39, %v1269_v22  ;;  %v1664_v60 = vsel %vm1139_vm8, %v1662_v43, %v1663_v54 }
 0x14b   : > { %v5118_v30 = vunpack.c.l.bf16 %v1776_v53  ;;  %3639 = vrcp.f32 %v2671_v40  ;;  %v2910_v56 = vand.u32 2147483648, %v2671_v40  ;;  %v1666_v26 = vsel %vm1139_vm8, %v1663_v54, %v1665_v25 }
 0x14c   : > { %v1827_v19 = vmul.f32 %v4191_v41, %v4884_v57  ;;  %vm2904_vm10 = vweird.f32 %v2671_v40  ;;  %v2908_v20 = vand.u32 2147483647, %v2671_v40  ;;  %3641 = vrcp.f32 %v5115_v17 }
 0x14d   : > { %v2925_v47 = vand.u32 2147483648, %v5115_v17  ;;  %v5125_v63 = vor.u32 1.1754944e-38, %v2910_v56  ;;  %vm2919_vm11 = vweird.f32 %v5115_v17  ;;  %v2923_v35 = vand.u32 2147483647, %v5115_v17 }
 0x14e   : > { %v1750_v1 = vadd.f32 %v1664_v60, %v1509_v42  ;;  %v1751_v6 = vadd.f32 %v1666_v26, %v1510_v13  ;;  %v1828_v16 = vmul.f32 %v4761_v31, %v4191_v41  ;;  %v1829_v57 = vmul.f32 %v4191_v41, %v4833_v44 }
 0x14f   : > { %v5129_v62 = vor.u32 1.1754944e-38, %v2925_v47  ;;  %v1940_v21 = vrot.slane %v1827_v19, 2  ;;  %v2069_v10 = vmul.f32 %v4196_v58, %v5005_v3  ;;  %v2070_v48 = vmul.f32 %v4196_v58, %v4880_v18 }
 0x150   : > { %v2071_v38 = vmul.f32 %v4196_v58, %v4963_v24  ;;  %vm5141_vm12 = vcmp.eq.f32.partialorder %v2908_v20, 8.507059e+37  ;;  %v1941_v33 = vrot.slane %v1828_v16, 2  ;;  %v1943_v14 = vrot.slane %v1829_v57, 2 }
 0x151   : > { %v2310_v31 = vmul.f32 %v4199_v61, %v5118_v30  ;;  %v2311_v44 = vmul.f32 %v5001_v12, %v4199_v61  ;;  %v3640_v29 = vpop.eup %3639  ;;  %vm5149_vm13 = vcmp.eq.f32.partialorder %v2923_v35, 8.507059e+37  ;;  %v2181_v2 = vrot.slane %v2069_v10, 2 }
 0x152   : > { %v2182_v23 = vrot.slane %v2070_v48, 2  ;;  %v2184_v45 = vrot.slane %v2071_v38, 2  ;;  %v2312_v22 = vmul.f32 %v4199_v61, %v5083_v4  ;;  %v3642_v52 = vpop.eup %3641  ;;  %v2900_v43 = vmul.f32 %v3640_v29, %v2671_v40 }
 0x153   : > { %vm2905_vm14 = vweird.f32 %v3640_v29  ;;  %v1942_v53 = vsel %vm1899_vm9, %v1940_v21, %v1941_v33  ;;  %v1944_v49 = vsel %vm1899_vm9, %v1941_v33, %v1943_v14  ;;  %v2915_v37 = vmul.f32 %v3642_v52, %v5115_v17 }
 0x154   : > { %vm2920_vm15 = vweird.f32 %v3642_v52  ;;  %v2028_v54 = vadd.f32 %v1942_v53, %v1750_v1  ;;  %v2029_v25 = vadd.f32 %v1944_v49, %v1751_v6  ;;  %v2901_v0 = vsub.f32 1.0, %v2900_v43  ;;  %v1017_v1 = vld [vmem:[#allocation2 + $0x8c] sm:$0x1]  ;;  %vm5166_vm0 = vmor %vm2904_vm10, %vm2905_vm14 }
 0x155   : > { %v2183_v39 = vsel %vm1899_vm9, %v2181_v2, %v2182_v23  ;;  %v2185_v42 = vsel %vm1899_vm9, %v2182_v23, %v2184_v45  ;;  %v2422_v13 = vrot.slane %v2310_v31, 2  ;;  %v2916_v60 = vsub.f32 1.0, %v2915_v37  ;;  %vm5178_vm1 = vmor %vm2919_vm11, %vm2920_vm15 }
 0x156   : > { %v2269_v56 = vadd.f32 %v2183_v39, %v2028_v54  ;;  %v2270_v26 = vadd.f32 %v2185_v42, %v2029_v25  ;;  %v2423_v19 = vrot.slane %v2311_v44, 2  ;;  %v2902_v20 = vmul.f32 %v3640_v29, %v2901_v0 }
 0x157   : > { %v2425_v47 = vrot.slane %v2312_v22, 2  ;;  %v830_v35 = vmul.f32 %v4120_v46, %v4875_v50  ;;  %v831_v16 = vmul.f32 %v4120_v46, %v4880_v18  ;;  %v2917_v57 = vmul.f32 %v3642_v52, %v2916_v60 }
 0x158   : > { %v2424_v21 = vsel %vm1899_vm9, %v2422_v13, %v2423_v19  ;;  %v895_v10 = vmul.f32 %v4996_v51, %v4130_v55  ;;  %v896_v48 = vmul.f32 %v5001_v12, %v4130_v55  ;;  %v2903_v38 = vadd.f32 %v3640_v29, %v2902_v20  ;;  %v3551_v20 = vld [vmem:[#allocation2 + $0x90] sm:$0xff]  }
 0x159   : > { %v2426_v40 = vsel %vm1899_vm9, %v2423_v19, %v2425_v47  ;;  %v2510_v14 = vadd.f32 %v2424_v21, %v2269_v56  ;;  %v960_v31 = vmul.f32 %v4139_v59, %v5109_v28  ;;  %v2918_v44 = vadd.f32 %v3642_v52, %v2917_v57 }
 0x15a   : > { %v2511_v2 = vadd.f32 %v2426_v40, %v2270_v26  ;;  %v927_v23 = vadd.f32 %v895_v10, %v830_v35  ;;  %v928_v45 = vadd.f32 %v896_v48, %v831_v16  ;;  %v2907_v22 = vsel %vm5166_vm0, %v3640_v29, %v2903_v38  ;;  %v1777_v48 = vld [vmem:[#allocation2 + $0x84] sm:$0xe] }
 0x15b   : > { %v5188_v43 = vadd.f32 %v4820_v34, %v2510_v14  ;;  %v961_v17 = vmul.f32 %v4139_v59, %v5112_v7  ;;  %v5192_v53 = vunpack.c.l.bf16 %v1017_v1  ;;  %v2912_v49 = vsel %vm5141_vm12, %v5125_v63, %v2907_v22 }
 0x15c   : > { %v2922_v37 = vsel %vm5178_vm1, %v3642_v52, %v2918_v44  ;;  %v5200_v54 = vadd.f32 %v4820_v34, %v2511_v2  ;;  %v992_v25 = vadd.f32 %v960_v31, %v927_v23  ;;  %v3183_v0 = vmul.f32 %v2912_v49, %v5066_v11 }
 0x15d   : > { %v2927_v29 = vsel %vm5149_vm13, %v5129_v62, %v2922_v37  ;;  %v3410_v39 = vmul.f32 -1.442695, %v5188_v43  ;;  %v993_v42 = vadd.f32 %v961_v17, %v928_v45  ;;  %v1070_v32 = vmul.f32 %v4157_v5, %v4875_v50 }
 0x15e   : > { %v3184_v13 = vmul.f32 %v2927_v29, %v5074_v15  ;;  %v3411_v63 = vmul.f32 -1.442695, %v5200_v54  ;;  %v1071_v52 = vmul.f32 %v4157_v5, %v4880_v18  ;;  %v3278_v60 = vadd.f32 %v5094_v36, %v3183_v0 }
 0x15f   : > { %3643 = vpow2.f32 %v3410_v39  ;;  %v1072_v11 = vmul.f32 %v4157_v5, %v4963_v24  ;;  %v1312_v62 = vmul.f32 %v4996_v51, %v4160_v8  ;;  %v1185_v15 = vrot.slane %v1070_v32, 1 }
 0x160   : > { %v3504_v27 = vpack.c.bf16 %v3184_v13, %v3183_v0  ;;  %3645 = vpow2.f32 %v3411_v63  ;;  %v1186_v56 = vrot.slane %v1071_v52, 1  ;;  %v5218_v26 = vadd.f32 %v3278_v60, %v3184_v13 }
 0x161   : > { %v1188_v19 = vrot.slane %v1072_v11, 1  ;;  %v1313_v50 = vmul.f32 %v5001_v12, %v4160_v8  ;;  %v1314_v36 = vmul.f32 %v4160_v8, %v5083_v4  ;;  %v1426_v35 = vrot.slane %v1312_v62, 1 }
 0x162   : > { %3560 = vst [vmem:[%s4379_s5 + $0x38] sm:$0xff] %v3504_v27   ;;  %v1187_v47 = vsel %vm1139_vm8, %v1185_v15, %v1186_v56  ;;  %v1553_v16 = vmul.f32 %v4163_v9, %v5109_v28  ;;  %v1554_v1 = vmul.f32 %v4163_v9, %v5112_v7  ;;  %v1555_v33 = vmul.f32 %v4163_v9, %v5192_v53 }
 0x163   : > { %v1189_v6 = vsel %vm1139_vm8, %v1186_v56, %v1188_v19  ;;  %v1270_v57 = vadd.f32 %v1187_v47, %v992_v25  ;;  %v1427_v21 = vrot.slane %v1313_v50, 1  ;;  %v1429_v10 = vrot.slane %v1314_v36, 1 }
 0x164   : > { %v1271_v38 = vadd.f32 %v1189_v6, %v993_v42  ;;  %v1667_v40 = vrot.slane %v1553_v16, 1  ;;  %v1668_v14 = vrot.slane %v1554_v1, 1  ;;  %v5233_v44 = vunpack.c.l.bf16 %v3551_v20 }
 0x165   : > { %v3644_v31 = vpop.eup %3643  ;;  %v5235_v2 = vunpack.c.h.bf16 %v3551_v20  ;;  %v1428_v23 = vsel %vm1139_vm8, %v1426_v35, %v1427_v21  ;;  %v1430_v45 = vsel %vm1139_vm8, %v1427_v21, %v1429_v10  ;;  %v5239_v37 = vunpack.c.l.bf16 %v1777_v48 }
 0x166   : > { %v3646_v22 = vpop.eup %3645  ;;  %v2673_v17 = vadd.f32 1.0, %v3644_v31  ;;  %v1511_v49 = vadd.f32 %v1428_v23, %v1270_v57  ;;  %v1830_v25 = vmul.f32 %v4191_v41, %v5005_v3  ;;  %v1512_v0 = vadd.f32 %v1430_v45, %v1271_v38 }
 0x167   : > { %v5243_v29 = vadd.f32 1.0, %v3646_v22  ;;  %v1669_v39 = vsel %vm1139_vm8, %v1667_v40, %v1668_v14  ;;  %v1670_v42 = vrot.slane %v1555_v33, 1  ;;  %v1831_v63 = vmul.f32 %v4191_v41, %v4880_v18 }
 0x168   : > { %3647 = vrcp.f32 %v2673_v17  ;;  %v2940_v13 = vand.u32 2147483648, %v2673_v17  ;;  %v1832_v32 = vmul.f32 %v4191_v41, %v4963_v24  ;;  %vm2934_vm2 = vweird.f32 %v2673_v17 }
 0x169   : > { %v2938_v52 = vand.u32 2147483647, %v2673_v17  ;;  %3649 = vrcp.f32 %v5243_v29  ;;  %v2955_v3 = vand.u32 2147483648, %v5243_v29  ;;  %vm2949_vm3 = vweird.f32 %v5243_v29 }
 0x16a   : > { %v5252_v60 = vor.u32 1.1754944e-38, %v2940_v13  ;;  %v2953_v11 = vand.u32 2147483647, %v5243_v29  ;;  %v1671_v62 = vsel %vm1139_vm8, %v1668_v14, %v1670_v42  ;;  %v1752_v18 = vadd.f32 %v1669_v39, %v1511_v49 }
 0x16b   : > { %v5257_v27 = vor.u32 1.1754944e-38, %v2955_v3  ;;  %v1753_v15 = vadd.f32 %v1671_v62, %v1512_v0  ;;  %v1945_v56 = vrot.slane %v1830_v25, 2  ;;  %v1946_v24 = vrot.slane %v1831_v63, 2 }
 0x16c   : > { %v1948_v19 = vrot.slane %v1832_v32, 2  ;;  %v2072_v50 = vmul.f32 %v4196_v58, %v5118_v30  ;;  %v2073_v36 = vmul.f32 %v5001_v12, %v4196_v58  ;;  %vm5263_vm4 = vcmp.eq.f32.partialorder %v2938_v52, 8.507059e+37 }
 0x16d   : > { %v2074_v47 = vmul.f32 %v4196_v58, %v5083_v4  ;;  %v2313_v35 = vmul.f32 %v4199_v61, %v5239_v37  ;;  %v2314_v16 = vmul.f32 %v4199_v61, %v5112_v7  ;;  %v2315_v1 = vmul.f32 %v4199_v61, %v5192_v53 }
 0x16e   : > { %v3648_v6 = vpop.eup %3647  ;;  %vm5275_vm5 = vcmp.eq.f32.partialorder %v2953_v11, 8.507059e+37  ;;  %v1947_v21 = vsel %vm1899_vm9, %v1945_v56, %v1946_v24  ;;  %v1949_v10 = vsel %vm1899_vm9, %v1946_v24, %v1948_v19  ;;  %v2186_v48 = vrot.slane %v2072_v50, 2 }
 0x16f   : > { %v2187_v38 = vrot.slane %v2073_v36, 2  ;;  %v3650_v33 = vpop.eup %3649  ;;  %v2930_v40 = vmul.f32 %v3648_v6, %v2673_v17  ;;  %vm2935_vm6 = vweird.f32 %v3648_v6  ;;  %v2030_v14 = vadd.f32 %v1947_v21, %v1752_v18  ;;  %v1018_v18 = vld [vmem:[#allocation2 + $0x98] sm:$0x1] }
 0x170   : > { %v2031_v31 = vadd.f32 %v1949_v10, %v1753_v15  ;;  %v2945_v23 = vmul.f32 %v3650_v33, %v5243_v29  ;;  %vm2950_vm7 = vweird.f32 %v3650_v33  ;;  %v2189_v22 = vrot.slane %v2074_v47, 2  ;;  %vm5291_vm10 = vmor %vm2934_vm2, %vm2935_vm6 }
 0x171   : > { %v2188_v45 = vsel %vm1899_vm9, %v2186_v48, %v2187_v38  ;;  %v2931_v49 = vsub.f32 1.0, %v2930_v40  ;;  %v2427_v0 = vrot.slane %v2313_v35, 2  ;;  %v2428_v39 = vrot.slane %v2314_v16, 2  ;;  %vm5301_vm11 = vmor %vm2949_vm3, %vm2950_vm7 }
 0x172   : > { %v2271_v25 = vadd.f32 %v2188_v45, %v2030_v14  ;;  %v2946_v42 = vsub.f32 1.0, %v2945_v23  ;;  %v2190_v13 = vsel %vm1899_vm9, %v2187_v38, %v2189_v22  ;;  %v2430_v63 = vrot.slane %v2315_v1, 2 }
 0x173   : > { %v832_v32 = vmul.f32 %v4996_v51, %v4120_v46  ;;  %v2932_v52 = vmul.f32 %v3648_v6, %v2931_v49  ;;  %v2272_v3 = vadd.f32 %v2190_v13, %v2031_v31  ;;  %v2429_v11 = vsel %vm1899_vm9, %v2427_v0, %v2428_v39 }
 0x174   : > { %v833_v62 = vmul.f32 %v5001_v12, %v4120_v46  ;;  %v2947_v56 = vmul.f32 %v3650_v33, %v2946_v42  ;;  %v2431_v24 = vsel %vm1899_vm9, %v2428_v39, %v2430_v63  ;;  %v2512_v19 = vadd.f32 %v2429_v11, %v2271_v25 }
 0x175   : > { %v897_v50 = vmul.f32 %v4130_v55, %v5109_v28  ;;  %v2933_v36 = vadd.f32 %v3648_v6, %v2932_v52  ;;  %v2513_v17 = vadd.f32 %v2431_v24, %v2272_v3  ;;  %v898_v35 = vmul.f32 %v4130_v55, %v5112_v7 }
 0x176   : > { %v962_v16 = vmul.f32 %v5233_v44, %v4139_v59  ;;  %v2948_v1 = vadd.f32 %v3650_v33, %v2947_v56  ;;  %v5310_v21 = vadd.f32 %v4820_v34, %v2512_v19  ;;  %v963_v48 = vmul.f32 %v5235_v2, %v4139_v59 }
 0x177   : > { %v929_v10 = vadd.f32 %v897_v50, %v832_v32  ;;  %v2937_v29 = vsel %vm5291_vm10, %v3648_v6, %v2933_v36  ;;  %v5317_v38 = vadd.f32 %v4820_v34, %v2513_v17  ;;  %v930_v40 = vadd.f32 %v898_v35, %v833_v62  ;;  %v765_v32 = vld [vmem:[#allocation2 + $0x9c] sm:$0xf] }
 0x178   : > { %v5319_v14 = vunpack.c.l.bf16 %v1018_v18  ;;  %v2942_v31 = vsel %vm5263_vm4, %v5252_v60, %v2937_v29  ;;  %v2952_v23 = vsel %vm5301_vm11, %v3650_v33, %v2948_v1  ;;  %v3412_v45 = vmul.f32 -1.442695, %v5310_v21  ;;  %v766_v18 = vld [vmem:[#allocation2 + $0xa0] sm:$0xf] }
 0x179   : > { %v994_v22 = vadd.f32 %v962_v16, %v929_v10  ;;  %v2957_v6 = vsel %vm5275_vm5, %v5257_v27, %v2952_v23  ;;  %v3185_v34 = vmul.f32 %v2942_v31, %v5188_v43  ;;  %v3413_v49 = vmul.f32 -1.442695, %v5317_v38  ;;  %v1778_v16 = vld [vmem:[#allocation2 + $0x90] sm:$0xe] }
 0x17a   : > { %v995_v25 = vadd.f32 %v963_v48, %v930_v40  ;;  %v3186_v0 = vmul.f32 %v2957_v6, %v5200_v54  ;;  %3651 = vpow2.f32 %v3412_v45  ;;  %v1073_v60 = vmul.f32 %v4996_v51, %v4157_v5 }
 0x17b   : > { %v1074_v20 = vmul.f32 %v5001_v12, %v4157_v5  ;;  %v3280_v33 = vadd.f32 %v5218_v26, %v3185_v34  ;;  %3653 = vpow2.f32 %v3413_v49  ;;  %v1075_v27 = vmul.f32 %v4157_v5, %v5083_v4 }
 0x17c   : > { %v1315_v43 = vmul.f32 %v4160_v8, %v5109_v28  ;;  %v3509_v57 = vpack.c.bf16 %v3186_v0, %v3185_v34  ;;  %v1190_v39 = vrot.slane %v1073_v60, 1  ;;  %v1316_v42 = vmul.f32 %v4160_v8, %v5112_v7 }
 0x17d   : > { %v1191_v54 = vrot.slane %v1074_v20, 1  ;;  %v5344_v13 = vadd.f32 %v3280_v33, %v3186_v0  ;;  %v1193_v51 = vrot.slane %v1075_v27, 1  ;;  %v1317_v63 = vmul.f32 %v4160_v8, %v5192_v53 }
 0x17e   : > { %v1431_v26 = vrot.slane %v1315_v43, 1  ;;  %3561 = vst [vmem:[%s4379_s5 + $0x40] sm:$0xff] %v3509_v57   ;;  %v1432_v3 = vrot.slane %v1316_v42, 1  ;;  %v1556_v11 = vmul.f32 %v5233_v44, %v4163_v9  ;;  %v1557_v62 = vmul.f32 %v5235_v2, %v4163_v9 }
 0x17f   : > { %v1192_v52 = vsel %vm1139_vm8, %v1190_v39, %v1191_v54  ;;  %v1194_v15 = vsel %vm1139_vm8, %v1191_v54, %v1193_v51  ;;  %v1434_v24 = vrot.slane %v1317_v63, 1  ;;  %v1558_v19 = vmul.f32 %v4163_v9, %v5319_v14 }
 0x180   : > { %v1272_v56 = vadd.f32 %v1192_v52, %v994_v22  ;;  %v3652_v50 = vpop.eup %3651  ;;  %v1273_v36 = vadd.f32 %v1194_v15, %v995_v25  ;;  %v1433_v47 = vsel %vm1139_vm8, %v1431_v26, %v1432_v3  ;;  %v1672_v17 = vrot.slane %v1556_v11, 1 }
 0x181   : > { %v1673_v35 = vrot.slane %v1557_v62, 1  ;;  %v3654_v1 = vpop.eup %3653  ;;  %v5358_v10 = vunpack.c.l.bf16 %v765_v32  ;;  %v2675_v48 = vadd.f32 1.0, %v3652_v50  ;;  %v1435_v29 = vsel %vm1139_vm8, %v1432_v3, %v1434_v24 }
 0x182   : > { %v1675_v40 = vrot.slane %v1558_v19, 1  ;;  %v5361_v31 = vunpack.c.l.bf16 %v766_v18  ;;  %v2676_v23 = vadd.f32 1.0, %v3654_v1  ;;  %v1513_v45 = vadd.f32 %v1433_v47, %v1272_v56 }
 0x183   : > { %v1514_v22 = vadd.f32 %v1435_v29, %v1273_v36  ;;  %3655 = vrcp.f32 %v2675_v48  ;;  %v2970_v6 = vand.u32 2147483648, %v2675_v48  ;;  %v1674_v34 = vsel %vm1139_vm8, %v1672_v17, %v1673_v35 }
 0x184   : > { %v5364_v49 = vunpack.c.l.bf16 %v1778_v16  ;;  %vm2964_vm12 = vweird.f32 %v2675_v48  ;;  %v2968_v25 = vand.u32 2147483647, %v2675_v48  ;;  %3657 = vrcp.f32 %v2676_v23 }
 0x185   : > { %v2985_v0 = vand.u32 2147483648, %v2676_v23  ;;  %v5366_v60 = vor.u32 1.1754944e-38, %v2970_v6  ;;  %vm2979_vm13 = vweird.f32 %v2676_v23  ;;  %v2983_v20 = vand.u32 2147483647, %v2676_v23 }
 0x186   : > { %v1676_v33 = vsel %vm1139_vm8, %v1673_v35, %v1675_v40  ;;  %v1754_v43 = vadd.f32 %v1674_v34, %v1513_v45  ;;  %v1833_v39 = vmul.f32 %v4191_v41, %v5118_v30  ;;  %v1834_v54 = vmul.f32 %v5001_v12, %v4191_v41 }
 0x187   : > { %v5369_v27 = vor.u32 1.1754944e-38, %v2985_v0  ;;  %v1755_v57 = vadd.f32 %v1676_v33, %v1514_v22  ;;  %v1835_v42 = vmul.f32 %v4191_v41, %v5083_v4  ;;  %v2075_v51 = vmul.f32 %v4196_v58, %v5239_v37  ;;  %v3552_v33 = vld [vmem:[#allocation2 + $0xa8] sm:$0xff]  }
 0x188   : > { %v2076_v63 = vmul.f32 %v4196_v58, %v5112_v7  ;;  %vm5381_vm14 = vcmp.eq.f32.partialorder %v2968_v25, 8.507059e+37  ;;  %v1950_v32 = vrot.slane %v1833_v39, 2  ;;  %v2077_v30 = vmul.f32 %v4196_v58, %v5192_v53 }
 0x189   : > { %v2316_v12 = vmul.f32 %v4199_v61, %v5364_v49  ;;  %v2317_v4 = vmul.f32 %v5235_v2, %v4199_v61  ;;  %v3656_v52 = vpop.eup %3655  ;;  %vm5391_vm15 = vcmp.eq.f32.partialorder %v2983_v20, 8.507059e+37  ;;  %v1951_v11 = vrot.slane %v1834_v54, 2 }
 0x18a   : > { %v1953_v62 = vrot.slane %v1835_v42, 2  ;;  %v2191_v18 = vrot.slane %v2075_v51, 2  ;;  %v2192_v15 = vrot.slane %v2076_v63, 2  ;;  %v3658_v56 = vpop.eup %3657  ;;  %v2960_v24 = vmul.f32 %v3656_v52, %v2675_v48 }
 0x18b   : > { %vm2965_vm0 = vweird.f32 %v3656_v52  ;;  %v2194_v19 = vrot.slane %v2077_v30, 2  ;;  %v2318_v50 = vmul.f32 %v4199_v61, %v5319_v14  ;;  %v2975_v36 = vmul.f32 %v3658_v56, %v2676_v23 }
 0x18c   : > { %vm2980_vm1 = vweird.f32 %v3658_v56  ;;  %v1952_v47 = vsel %vm1899_vm9, %v1950_v32, %v1951_v11  ;;  %v1954_v17 = vsel %vm1899_vm9, %v1951_v11, %v1953_v62  ;;  %v2961_v35 = vsub.f32 1.0, %v2960_v24  ;;  %vm5403_vm2 = vmor %vm2964_vm12, %vm2965_vm0  ;;  %v1019_v62 = vld [vmem:[#allocation2 + $0xa4] sm:$0x1] }
 0x18d   : > { %v2032_v16 = vadd.f32 %v1952_v47, %v1754_v43  ;;  %v2033_v1 = vadd.f32 %v1954_v17, %v1755_v57  ;;  %v2193_v29 = vsel %vm1899_vm9, %v2191_v18, %v2192_v15  ;;  %v2976_v40 = vsub.f32 1.0, %v2975_v36  ;;  %vm5414_vm3 = vmor %vm2979_vm13, %vm2980_vm1  ;;  %v5430_v18 = vld [vmem:[%s6012_s2] ss:$0 sm:$0xff] }
 0x18e   : > { %v2195_v45 = vsel %vm1899_vm9, %v2192_v15, %v2194_v19  ;;  %v2432_v22 = vrot.slane %v2316_v12, 2  ;;  %v2433_v6 = vrot.slane %v2317_v4, 2  ;;  %v2962_v34 = vmul.f32 %v3656_v52, %v2961_v35 }
 0x18f   : > { %v2273_v25 = vadd.f32 %v2193_v29, %v2032_v16  ;;  %v2274_v0 = vadd.f32 %v2195_v45, %v2033_v1  ;;  %v2435_v20 = vrot.slane %v2318_v50, 2  ;;  %v2977_v39 = vmul.f32 %v3658_v56, %v2976_v40 }
 0x190   : > { %v2434_v43 = vsel %vm1899_vm9, %v2432_v22, %v2433_v6  ;;  %v834_v57 = vmul.f32 %v4120_v46, %v5109_v28  ;;  %v835_v54 = vmul.f32 %v4120_v46, %v5112_v7  ;;  %v2963_v42 = vadd.f32 %v3656_v52, %v2962_v34 }
 0x191   : > { %v2436_v48 = vsel %vm1899_vm9, %v2433_v6, %v2435_v20  ;;  %v2514_v63 = vadd.f32 %v2434_v43, %v2273_v25  ;;  %v899_v32 = vmul.f32 %v5233_v44, %v4130_v55  ;;  %v2978_v30 = vadd.f32 %v3658_v56, %v2977_v39 }
 0x192   : > { %v2515_v12 = vadd.f32 %v2436_v48, %v2274_v0  ;;  %v900_v4 = vmul.f32 %v5235_v2, %v4130_v55  ;;  %v964_v11 = vmul.f32 %v4139_v59, %v5358_v10  ;;  %v2967_v23 = vsel %vm5403_vm2, %v3656_v52, %v2963_v42 }
 0x193   : > { %v5433_v15 = vadd.f32 %v5430_v18, %v2514_v63  ;;  %v931_v24 = vadd.f32 %v899_v32, %v834_v57  ;;  %v965_v19 = vmul.f32 %v4139_v59, %v5361_v31  ;;  %v2972_v50 = vsel %vm5381_vm14, %v5366_v60, %v2967_v23 }
 0x194   : > { %v2982_v36 = vsel %vm5414_vm3, %v3658_v56, %v2978_v30  ;;  %v5443_v52 = vadd.f32 %v5430_v18, %v2515_v12  ;;  %v932_v47 = vadd.f32 %v900_v4, %v835_v54  ;;  %v3187_v35 = vmul.f32 %v2972_v50, %v5310_v21 }
 0x195   : > { %v2987_v17 = vsel %vm5391_vm15, %v5369_v27, %v2982_v36  ;;  %v3414_v16 = vmul.f32 -1.442695, %v5433_v15  ;;  %v996_v1 = vadd.f32 %v964_v11, %v931_v24  ;;  %v5452_v56 = vunpack.c.l.bf16 %v1019_v62  ;;  %v1779_v62 = vld [vmem:[#allocation2 + $0x9c] sm:$0xe] }
 0x196   : > { %v3188_v29 = vmul.f32 %v2987_v17, %v5317_v38  ;;  %v3415_v60 = vmul.f32 -1.442695, %v5443_v52  ;;  %v997_v26 = vadd.f32 %v965_v19, %v932_v47  ;;  %v3282_v40 = vadd.f32 %v5344_v13, %v3187_v35 }
 0x197   : > { %3659 = vpow2.f32 %v3414_v16  ;;  %v1076_v3 = vmul.f32 %v4157_v5, %v5109_v28  ;;  %v1077_v21 = vmul.f32 %v4157_v5, %v5112_v7  ;;  %v1078_v38 = vmul.f32 %v4157_v5, %v5192_v53 }
 0x198   : > { %v3514_v27 = vpack.c.bf16 %v3188_v29, %v3187_v35  ;;  %3661 = vpow2.f32 %v3415_v60  ;;  %v1318_v45 = vmul.f32 %v5233_v44, %v4160_v8  ;;  %v5463_v22 = vadd.f32 %v3282_v40, %v3188_v29 }
 0x199   : > { %v1195_v6 = vrot.slane %v1076_v3, 1  ;;  %v1196_v34 = vrot.slane %v1077_v21, 1  ;;  %v1319_v13 = vmul.f32 %v5235_v2, %v4160_v8  ;;  %v1198_v28 = vrot.slane %v1078_v38, 1 }
 0x19a   : > { %3562 = vst [vmem:[%s4379_s5 + $0x48] sm:$0xff] %v3514_v27   ;;  %v1320_v25 = vmul.f32 %v4160_v8, %v5319_v14  ;;  %v1436_v0 = vrot.slane %v1318_v45, 1  ;;  %v1559_v20 = vmul.f32 %v4163_v9, %v5358_v10  ;;  %v1560_v57 = vmul.f32 %v4163_v9, %v5361_v31 }
 0x19b   : > { %v1197_v39 = vsel %vm1139_vm8, %v1195_v6, %v1196_v34  ;;  %v1437_v43 = vrot.slane %v1319_v13, 1  ;;  %v1561_v54 = vmul.f32 %v4163_v9, %v5452_v56  ;;  %v1199_v42 = vsel %vm1139_vm8, %v1196_v34, %v1198_v28 }
 0x19c   : > { %v1274_v51 = vadd.f32 %v1197_v39, %v996_v1  ;;  %v1439_v48 = vrot.slane %v1320_v25, 1  ;;  %v1677_v63 = vrot.slane %v1559_v20, 1  ;;  %v1275_v30 = vadd.f32 %v1199_v42, %v997_v26 }
 0x19d   : > { %v3660_v32 = vpop.eup %3659  ;;  %v1438_v12 = vsel %vm1139_vm8, %v1436_v0, %v1437_v43  ;;  %v1678_v4 = vrot.slane %v1560_v57, 1  ;;  %v1680_v11 = vrot.slane %v1561_v54, 1  ;;  %v5479_v24 = vunpack.c.l.bf16 %v3552_v33 }
 0x19e   : > { %v3662_v23 = vpop.eup %3661  ;;  %v2677_v19 = vadd.f32 1.0, %v3660_v32  ;;  %v1440_v50 = vsel %vm1139_vm8, %v1437_v43, %v1439_v48  ;;  %v1515_v36 = vadd.f32 %v1438_v12, %v1274_v51  ;;  %v5482_v47 = vunpack.c.h.bf16 %v3552_v33 }
 0x19f   : > { %v2678_v17 = vadd.f32 1.0, %v3662_v23  ;;  %v1516_v35 = vadd.f32 %v1440_v50, %v1275_v30  ;;  %v1679_v16 = vsel %vm1139_vm8, %v1677_v63, %v1678_v4  ;;  %v1681_v29 = vsel %vm1139_vm8, %v1678_v4, %v1680_v11 }
 0x1a0   : > { %3663 = vrcp.f32 %v2677_v19  ;;  %v3000_v1 = vand.u32 2147483648, %v2677_v19  ;;  %v5486_v60 = vunpack.c.l.bf16 %v1779_v62  ;;  %vm2994_vm4 = vweird.f32 %v2677_v19 }
 0x1a1   : > { %v2998_v26 = vand.u32 2147483647, %v2677_v19  ;;  %3665 = vrcp.f32 %v2678_v17  ;;  %v3015_v40 = vand.u32 2147483648, %v2678_v17  ;;  %vm3009_vm5 = vweird.f32 %v2678_v17 }
 0x1a2   : > { %v5488_v3 = vor.u32 1.1754944e-38, %v3000_v1  ;;  %v3013_v21 = vand.u32 2147483647, %v2678_v17  ;;  %v1756_v27 = vadd.f32 %v1679_v16, %v1515_v36  ;;  %v1757_v45 = vadd.f32 %v1681_v29, %v1516_v35 }
 0x1a3   : > { %v5490_v38 = vor.u32 1.1754944e-38, %v3015_v40  ;;  %v1836_v6 = vmul.f32 %v4191_v41, %v5239_v37  ;;  %v1837_v34 = vmul.f32 %v4191_v41, %v5112_v7  ;;  %v1838_v13 = vmul.f32 %v4191_v41, %v5192_v53 }
 0x1a4   : > { %v2078_v28 = vmul.f32 %v4196_v58, %v5364_v49  ;;  %v2079_v25 = vmul.f32 %v5235_v2, %v4196_v58  ;;  %v2080_v0 = vmul.f32 %v4196_v58, %v5319_v14  ;;  %vm5504_vm6 = vcmp.eq.f32.partialorder %v2998_v26, 8.507059e+37 }
 0x1a5   : > { %v1955_v37 = vrot.slane %v1836_v6, 2  ;;  %v1956_v33 = vrot.slane %v1837_v34, 2  ;;  %v2319_v7 = vmul.f32 %v4199_v61, %v5486_v60  ;;  %v2320_v53 = vmul.f32 %v4199_v61, %v5361_v31 }
 0x1a6   : > { %v3664_v39 = vpop.eup %3663  ;;  %vm5512_vm7 = vcmp.eq.f32.partialorder %v3013_v21, 8.507059e+37  ;;  %v1958_v57 = vrot.slane %v1838_v13, 2  ;;  %v2196_v54 = vrot.slane %v2078_v28, 2  ;;  %v2197_v42 = vrot.slane %v2079_v25, 2 }
 0x1a7   : > { %v2199_v51 = vrot.slane %v2080_v0, 2  ;;  %v3666_v48 = vpop.eup %3665  ;;  %v2990_v63 = vmul.f32 %v3664_v39, %v2677_v19  ;;  %vm2995_vm10 = vweird.f32 %v3664_v39  ;;  %v1957_v32 = vsel %vm1899_vm9, %v1955_v37, %v1956_v33 }
 0x1a8   : > { %v2321_v30 = vmul.f32 %v4199_v61, %v5452_v56  ;;  %v3005_v12 = vmul.f32 %v3666_v48, %v2678_v17  ;;  %vm3010_vm11 = vweird.f32 %v3666_v48  ;;  %v1959_v4 = vsel %vm1899_vm9, %v1956_v33, %v1958_v57  ;;  %vm5526_vm12 = vmor %vm2994_vm4, %vm2995_vm10 }
 0x1a9   : > { %v2034_v11 = vadd.f32 %v1957_v32, %v1756_v27  ;;  %v2991_v62 = vsub.f32 1.0, %v2990_v63  ;;  %v2035_v23 = vadd.f32 %v1959_v4, %v1757_v45  ;;  %v2198_v50 = vsel %vm1899_vm9, %v2196_v54, %v2197_v42  ;;  %vm5537_vm13 = vmor %vm3009_vm5, %vm3010_vm11 }
 0x1aa   : > { %v2200_v36 = vsel %vm1899_vm9, %v2197_v42, %v2199_v51  ;;  %v3006_v35 = vsub.f32 1.0, %v3005_v12  ;;  %v2437_v1 = vrot.slane %v2319_v7, 2  ;;  %v2438_v29 = vrot.slane %v2320_v53, 2  ;;  %v1020_v42 = vld [vmem:[#allocation2 + $0xb0] sm:$0x1] }
 0x1ab   : > { %v2275_v16 = vadd.f32 %v2198_v50, %v2034_v11  ;;  %v2992_v26 = vmul.f32 %v3664_v39, %v2991_v62  ;;  %v2276_v40 = vadd.f32 %v2200_v36, %v2035_v23  ;;  %v2440_v21 = vrot.slane %v2321_v30, 2 }
 0x1ac   : > { %v836_v6 = vmul.f32 %v5233_v44, %v4120_v46  ;;  %v3007_v45 = vmul.f32 %v3666_v48, %v3006_v35  ;;  %v2439_v34 = vsel %vm1899_vm9, %v2437_v1, %v2438_v29  ;;  %v837_v13 = vmul.f32 %v5235_v2, %v4120_v46 }
 0x1ad   : > { %v901_v28 = vmul.f32 %v4130_v55, %v5358_v10  ;;  %v2993_v25 = vadd.f32 %v3664_v39, %v2992_v26  ;;  %v2441_v19 = vsel %vm1899_vm9, %v2438_v29, %v2440_v21  ;;  %v2516_v37 = vadd.f32 %v2439_v34, %v2275_v16 }
 0x1ae   : > { %v902_v33 = vmul.f32 %v4130_v55, %v5361_v31  ;;  %v3008_v7 = vadd.f32 %v3666_v48, %v3007_v45  ;;  %v2517_v53 = vadd.f32 %v2441_v19, %v2276_v40  ;;  %v966_v54 = vmul.f32 %v5479_v24, %v4139_v59  ;;  %v770_v45 = vld [vmem:[#allocation2 + $0xb8] sm:$0xf] }
 0x1af   : > { %v933_v57 = vadd.f32 %v901_v28, %v836_v6  ;;  %v2997_v17 = vsel %vm5526_vm12, %v3664_v39, %v2993_v25  ;;  %v5549_v51 = vadd.f32 %v5430_v18, %v2516_v37  ;;  %v967_v32 = vmul.f32 %v5482_v47, %v4139_v59 }
 0x1b0   : > { %v934_v63 = vadd.f32 %v902_v33, %v837_v13  ;;  %v3002_v30 = vsel %vm5504_vm6, %v5488_v3, %v2997_v17  ;;  %v3012_v12 = vsel %vm5537_vm13, %v3666_v48, %v3008_v7  ;;  %v5559_v4 = vadd.f32 %v5430_v18, %v2517_v53  ;;  %v1780_v7 = vld [vmem:[#allocation2 + $0xa8] sm:$0xe] }
 0x1b1   : > { %v998_v11 = vadd.f32 %v966_v54, %v933_v57  ;;  %v3017_v39 = vsel %vm5512_vm7, %v5490_v38, %v3012_v12  ;;  %v3189_v62 = vmul.f32 %v3002_v30, %v5433_v15  ;;  %v3416_v23 = vmul.f32 -1.442695, %v5549_v51 }
 0x1b2   : > { %v999_v50 = vadd.f32 %v967_v32, %v934_v63  ;;  %v3190_v36 = vmul.f32 %v3017_v39, %v5443_v52  ;;  %v3417_v3 = vmul.f32 -1.442695, %v5559_v4  ;;  %v5568_v20 = vunpack.c.l.bf16 %v1020_v42 }
 0x1b3   : > { %v1079_v48 = vmul.f32 %v5233_v44, %v4157_v5  ;;  %v3284_v35 = vadd.f32 %v5463_v22, %v3189_v62  ;;  %3667 = vpow2.f32 %v3416_v23  ;;  %v1080_v38 = vmul.f32 %v5235_v2, %v4157_v5  ;;  %v769_v22 = vld [vmem:[#allocation2 + $0xb4] sm:$0xf] }
 0x1b4   : > { %v1081_v15 = vmul.f32 %v4157_v5, %v5319_v14  ;;  %v3519_v43 = vpack.c.bf16 %v3190_v36, %v3189_v62  ;;  %3669 = vpow2.f32 %v3417_v3  ;;  %v1321_v16 = vmul.f32 %v4160_v8, %v5358_v10 }
 0x1b5   : > { %v1200_v52 = vrot.slane %v1079_v48, 1  ;;  %v5579_v1 = vadd.f32 %v3284_v35, %v3190_v36  ;;  %v1201_v29 = vrot.slane %v1080_v38, 1  ;;  %v1322_v44 = vmul.f32 %v4160_v8, %v5361_v31 }
 0x1b6   : > { %v1203_v26 = vrot.slane %v1081_v15, 1  ;;  %3563 = vst [vmem:[%s4379_s5 + $0x50] sm:$0xff] %v3519_v43   ;;  %v1323_v40 = vmul.f32 %v4160_v8, %v5452_v56  ;;  %v1441_v21 = vrot.slane %v1321_v16, 1  ;;  %v1562_v6 = vmul.f32 %v5479_v24, %v4163_v9 }
 0x1b7   : > { %v1563_v27 = vmul.f32 %v5482_v47, %v4163_v9  ;;  %v1202_v34 = vsel %vm1139_vm8, %v1200_v52, %v1201_v29  ;;  %v1442_v28 = vrot.slane %v1322_v44, 1  ;;  %v1564_v25 = vmul.f32 %v4163_v9, %v5568_v20 }
 0x1b8   : > { %v1204_v13 = vsel %vm1139_vm8, %v1201_v29, %v1203_v26  ;;  %v1276_v0 = vadd.f32 %v1202_v34, %v998_v11  ;;  %v1444_v37 = vrot.slane %v1323_v40, 1  ;;  %v1682_v33 = vrot.slane %v1562_v6, 1 }
 0x1b9   : > { %v1277_v19 = vadd.f32 %v1204_v13, %v999_v50  ;;  %v3668_v53 = vpop.eup %3667  ;;  %v5594_v57 = vunpack.c.l.bf16 %v769_v22  ;;  %v1443_v54 = vsel %vm1139_vm8, %v1441_v21, %v1442_v28  ;;  %v1683_v42 = vrot.slane %v1563_v27, 1 }
 0x1ba   : > { %v1685_v17 = vrot.slane %v1564_v25, 1  ;;  %v3670_v63 = vpop.eup %3669  ;;  %v5597_v32 = vunpack.c.l.bf16 %v770_v45  ;;  %v2679_v30 = vadd.f32 1.0, %v3668_v53  ;;  %v1445_v12 = vsel %vm1139_vm8, %v1442_v28, %v1444_v37 }
 0x1bb   : > { %v1517_v39 = vadd.f32 %v1443_v54, %v1276_v0  ;;  %v5600_v62 = vadd.f32 1.0, %v3670_v63  ;;  %v1518_v11 = vadd.f32 %v1445_v12, %v1277_v19  ;;  %v1684_v23 = vsel %vm1139_vm8, %v1682_v33, %v1683_v42 }
 0x1bc   : > { %v5603_v50 = vunpack.c.l.bf16 %v1780_v7  ;;  %3671 = vrcp.f32 %v2679_v30  ;;  %v3030_v36 = vand.u32 2147483648, %v2679_v30  ;;  %v1686_v3 = vsel %vm1139_vm8, %v1683_v42, %v1685_v17 }
 0x1bd   : > { %v1839_v48 = vmul.f32 %v4191_v41, %v5364_v49  ;;  %vm3024_vm14 = vweird.f32 %v2679_v30  ;;  %v3028_v35 = vand.u32 2147483647, %v2679_v30  ;;  %3673 = vrcp.f32 %v5600_v62 }
 0x1be   : > { %v3045_v38 = vand.u32 2147483648, %v5600_v62  ;;  %v5610_v15 = vor.u32 1.1754944e-38, %v3030_v36  ;;  %vm3039_vm15 = vweird.f32 %v5600_v62  ;;  %v3043_v43 = vand.u32 2147483647, %v5600_v62 }
 0x1bf   : > { %v1758_v52 = vadd.f32 %v1684_v23, %v1517_v39  ;;  %v1759_v29 = vadd.f32 %v1686_v3, %v1518_v11  ;;  %v1840_v26 = vmul.f32 %v5235_v2, %v4191_v41  ;;  %v1841_v49 = vmul.f32 %v4191_v41, %v5319_v14 }
 0x1c0   : > { %v5614_v16 = vor.u32 1.1754944e-38, %v3045_v38  ;;  %v1960_v44 = vrot.slane %v1839_v48, 2  ;;  %v2081_v22 = vmul.f32 %v4196_v58, %v5486_v60  ;;  %v2082_v40 = vmul.f32 %v4196_v58, %v5361_v31 }
 0x1c1   : > { %v2083_v21 = vmul.f32 %v4196_v58, %v5452_v56  ;;  %vm5626_vm0 = vcmp.eq.f32.partialorder %v3028_v35, 8.507059e+37  ;;  %v1961_v27 = vrot.slane %v1840_v26, 2  ;;  %v1963_v45 = vrot.slane %v1841_v49, 2 }
 0x1c2   : > { %v2322_v2 = vmul.f32 %v4199_v61, %v5603_v50  ;;  %v2323_v14 = vmul.f32 %v5482_v47, %v4199_v61  ;;  %v3672_v34 = vpop.eup %3671  ;;  %vm5634_vm1 = vcmp.eq.f32.partialorder %v3043_v43, 8.507059e+37  ;;  %v2201_v28 = vrot.slane %v2081_v22, 2 }
 0x1c3   : > { %v2202_v25 = vrot.slane %v2082_v40, 2  ;;  %v2204_v0 = vrot.slane %v2083_v21, 2  ;;  %v2324_v19 = vmul.f32 %v4199_v61, %v5568_v20  ;;  %v3674_v37 = vpop.eup %3673  ;;  %v3020_v33 = vmul.f32 %v3672_v34, %v2679_v30 }
 0x1c4   : > { %vm3025_vm2 = vweird.f32 %v3672_v34  ;;  %v1962_v7 = vsel %vm1899_vm9, %v1960_v44, %v1961_v27  ;;  %v1964_v53 = vsel %vm1899_vm9, %v1961_v27, %v1963_v45  ;;  %v3035_v54 = vmul.f32 %v3674_v37, %v5600_v62 }
 0x1c5   : > { %vm3040_vm3 = vweird.f32 %v3674_v37  ;;  %v2036_v42 = vadd.f32 %v1962_v7, %v1758_v52  ;;  %v2037_v17 = vadd.f32 %v1964_v53, %v1759_v29  ;;  %v3021_v63 = vsub.f32 1.0, %v3020_v33  ;;  %v1021_v52 = vld [vmem:[#allocation2 + $0xbc] sm:$0x1]  ;;  %vm5651_vm4 = vmor %vm3024_vm14, %vm3025_vm2 }
 0x1c6   : > { %v2203_v12 = vsel %vm1899_vm9, %v2201_v28, %v2202_v25  ;;  %v2205_v39 = vsel %vm1899_vm9, %v2202_v25, %v2204_v0  ;;  %v2442_v11 = vrot.slane %v2322_v2, 2  ;;  %v3036_v23 = vsub.f32 1.0, %v3035_v54  ;;  %vm5663_vm5 = vmor %vm3039_vm15, %vm3040_vm3 }
 0x1c7   : > { %v2277_v36 = vadd.f32 %v2203_v12, %v2036_v42  ;;  %v2278_v3 = vadd.f32 %v2205_v39, %v2037_v17  ;;  %v2443_v48 = vrot.slane %v2323_v14, 2  ;;  %v3022_v35 = vmul.f32 %v3672_v34, %v3021_v63 }
 0x1c8   : > { %v2445_v38 = vrot.slane %v2324_v19, 2  ;;  %v838_v43 = vmul.f32 %v4120_v46, %v5358_v10  ;;  %v839_v26 = vmul.f32 %v4120_v46, %v5361_v31  ;;  %v3037_v49 = vmul.f32 %v3674_v37, %v3036_v23 }
 0x1c9   : > { %v2444_v44 = vsel %vm1899_vm9, %v2442_v11, %v2443_v48  ;;  %v903_v22 = vmul.f32 %v5479_v24, %v4130_v55  ;;  %v904_v40 = vmul.f32 %v5482_v47, %v4130_v55  ;;  %v3023_v21 = vadd.f32 %v3672_v34, %v3022_v35 }
 0x1ca   : > { %v2446_v30 = vsel %vm1899_vm9, %v2443_v48, %v2445_v38  ;;  %v2518_v45 = vadd.f32 %v2444_v44, %v2277_v36  ;;  %v968_v2 = vmul.f32 %v4139_v59, %v5594_v57  ;;  %v3038_v14 = vadd.f32 %v3674_v37, %v3037_v49 }
 0x1cb   : > { %v2519_v28 = vadd.f32 %v2446_v30, %v2278_v3  ;;  %v935_v25 = vadd.f32 %v903_v22, %v838_v43  ;;  %v936_v0 = vadd.f32 %v904_v40, %v839_v26  ;;  %v3027_v19 = vsel %vm5651_vm4, %v3672_v34, %v3023_v21  ;;  %v1781_v22 = vld [vmem:[#allocation2 + $0xb4] sm:$0xe] }
 0x1cc   : > { %v5673_v33 = vadd.f32 %v5430_v18, %v2518_v45  ;;  %v969_v62 = vmul.f32 %v4139_v59, %v5597_v32  ;;  %v5677_v7 = vunpack.c.l.bf16 %v1021_v52  ;;  %v3032_v53 = vsel %vm5626_vm0, %v5610_v15, %v3027_v19 }
 0x1cd   : > { %v3042_v54 = vsel %vm5663_vm5, %v3674_v37, %v3038_v14  ;;  %v5685_v42 = vadd.f32 %v5430_v18, %v2519_v28  ;;  %v1000_v17 = vadd.f32 %v968_v2, %v935_v25  ;;  %v3191_v63 = vmul.f32 %v3032_v53, %v5549_v51 }
 0x1ce   : > { %v3047_v34 = vsel %vm5634_vm1, %v5614_v16, %v3042_v54  ;;  %v3418_v12 = vmul.f32 -1.442695, %v5673_v33  ;;  %v1001_v39 = vadd.f32 %v969_v62, %v936_v0  ;;  %v1082_v6 = vmul.f32 %v4157_v5, %v5358_v10 }
 0x1cf   : > { %v3192_v11 = vmul.f32 %v3047_v34, %v5559_v4  ;;  %v3419_v15 = vmul.f32 -1.442695, %v5685_v42  ;;  %v1083_v37 = vmul.f32 %v4157_v5, %v5361_v31  ;;  %v3286_v23 = vadd.f32 %v5579_v1, %v3191_v63 }
 0x1d0   : > { %3675 = vpow2.f32 %v3418_v12  ;;  %v1084_v51 = vmul.f32 %v4157_v5, %v5452_v56  ;;  %v1324_v16 = vmul.f32 %v5479_v24, %v4160_v8  ;;  %v1205_v4 = vrot.slane %v1082_v6, 1 }
 0x1d1   : > { %v3524_v13 = vpack.c.bf16 %v3192_v11, %v3191_v63  ;;  %3677 = vpow2.f32 %v3419_v15  ;;  %v1206_v36 = vrot.slane %v1083_v37, 1  ;;  %v5703_v3 = vadd.f32 %v3286_v23, %v3192_v11 }
 0x1d2   : > { %v1208_v48 = vrot.slane %v1084_v51, 1  ;;  %v1325_v10 = vmul.f32 %v5482_v47, %v4160_v8  ;;  %v1326_v1 = vmul.f32 %v4160_v8, %v5568_v20  ;;  %v1446_v38 = vrot.slane %v1324_v16, 1 }
 0x1d3   : > { %3564 = vst [vmem:[%s4379_s5 + $0x58] sm:$0xff] %v3524_v13   ;;  %v1207_v35 = vsel %vm1139_vm8, %v1205_v4, %v1206_v36  ;;  %v1565_v43 = vmul.f32 %v4163_v9, %v5594_v57  ;;  %v1566_v26 = vmul.f32 %v4163_v9, %v5597_v32  ;;  %v1567_v21 = vmul.f32 %v4163_v9, %v5677_v7 }
 0x1d4   : > { %v1209_v52 = vsel %vm1139_vm8, %v1206_v36, %v1208_v48  ;;  %v1278_v29 = vadd.f32 %v1207_v35, %v1000_v17  ;;  %v1447_v49 = vrot.slane %v1325_v10, 1  ;;  %v1449_v44 = vrot.slane %v1326_v1, 1 }
 0x1d5   : > { %v1279_v40 = vadd.f32 %v1209_v52, %v1001_v39  ;;  %v1687_v27 = vrot.slane %v1565_v43, 1  ;;  %v1688_v30 = vrot.slane %v1566_v26, 1  ;;  %v5720_v19 = vunpack.c.l.bf16 %v1781_v22 }
 0x1d6   : > { %v3676_v45 = vpop.eup %3675  ;;  %v1448_v2 = vsel %vm1139_vm8, %v1446_v38, %v1447_v49  ;;  %v1450_v14 = vsel %vm1139_vm8, %v1447_v49, %v1449_v44  ;;  %v1842_v62 = vmul.f32 %v4191_v41, %v5486_v60  ;;  %v1690_v34 = vrot.slane %v1567_v21, 1 }
 0x1d7   : > { %v3678_v28 = vpop.eup %3677  ;;  %v2681_v25 = vadd.f32 1.0, %v3676_v45  ;;  %v1519_v0 = vadd.f32 %v1448_v2, %v1278_v29  ;;  %v1520_v54 = vadd.f32 %v1450_v14, %v1279_v40  ;;  %v1689_v17 = vsel %vm1139_vm8, %v1687_v27, %v1688_v30 }
 0x1d8   : > { %v5724_v53 = vadd.f32 1.0, %v3678_v28  ;;  %v1843_v12 = vmul.f32 %v4191_v41, %v5361_v31  ;;  %v1844_v39 = vmul.f32 %v4191_v41, %v5452_v56  ;;  %v1691_v37 = vsel %vm1139_vm8, %v1688_v30, %v1690_v34  ;;  %v3553_v30 = vld [vmem:[#allocation2 + $0xc0] sm:$0xff]  }
 0x1d9   : > { %3679 = vrcp.f32 %v2681_v25  ;;  %v3060_v63 = vand.u32 2147483648, %v2681_v25  ;;  %vm3054_vm6 = vweird.f32 %v2681_v25  ;;  %v3058_v11 = vand.u32 2147483647, %v2681_v25 }
 0x1da   : > { %3681 = vrcp.f32 %v5724_v53  ;;  %v3075_v60 = vand.u32 2147483648, %v5724_v53  ;;  %vm3069_vm7 = vweird.f32 %v5724_v53  ;;  %v3073_v6 = vand.u32 2147483647, %v5724_v53 }
 0x1db   : > { %v5733_v15 = vor.u32 1.1754944e-38, %v3060_v63  ;;  %v1760_v31 = vadd.f32 %v1689_v17, %v1519_v0  ;;  %v1761_v51 = vadd.f32 %v1691_v37, %v1520_v54  ;;  %v1965_v16 = vrot.slane %v1842_v62, 2 }
 0x1dc   : > { %v5738_v23 = vor.u32 1.1754944e-38, %v3075_v60  ;;  %v1966_v56 = vrot.slane %v1843_v12, 2  ;;  %v1968_v13 = vrot.slane %v1844_v39, 2  ;;  %v2084_v4 = vmul.f32 %v4196_v58, %v5603_v50 }
 0x1dd   : > { %v2085_v36 = vmul.f32 %v5482_v47, %v4196_v58  ;;  %vm5744_vm10 = vcmp.eq.f32.partialorder %v3058_v11, 8.507059e+37  ;;  %v2086_v10 = vmul.f32 %v4196_v58, %v5568_v20  ;;  %v2325_v1 = vmul.f32 %v4199_v61, %v5720_v19 }
 0x1de   : > { %v2326_v35 = vmul.f32 %v4199_v61, %v5597_v32  ;;  %v2327_v38 = vmul.f32 %v4199_v61, %v5677_v7  ;;  %vm5756_vm11 = vcmp.eq.f32.partialorder %v3073_v6, 8.507059e+37  ;;  %v1967_v52 = vsel %vm1899_vm9, %v1965_v16, %v1966_v56 }
 0x1df   : > { %v3680_v43 = vpop.eup %3679  ;;  %v1969_v29 = vsel %vm1899_vm9, %v1966_v56, %v1968_v13  ;;  %v2206_v49 = vrot.slane %v2084_v4, 2  ;;  %v2207_v44 = vrot.slane %v2085_v36, 2  ;;  %v2038_v21 = vadd.f32 %v1967_v52, %v1760_v31 }
 0x1e0   : > { %v3682_v22 = vpop.eup %3681  ;;  %v3050_v40 = vmul.f32 %v3680_v43, %v2681_v25  ;;  %vm3055_vm12 = vweird.f32 %v3680_v43  ;;  %v2039_v27 = vadd.f32 %v1969_v29, %v1761_v51  ;;  %v2209_v14 = vrot.slane %v2086_v10, 2 }
 0x1e1   : > { %v3065_v45 = vmul.f32 %v3682_v22, %v5724_v53  ;;  %vm3070_vm13 = vweird.f32 %v3682_v22  ;;  %v2208_v2 = vsel %vm1899_vm9, %v2206_v49, %v2207_v44  ;;  %v2447_v62 = vrot.slane %v2325_v1, 2  ;;  %vm5772_vm14 = vmor %vm3054_vm6, %vm3055_vm12 }
 0x1e2   : > { %v3051_v28 = vsub.f32 1.0, %v3050_v40  ;;  %v2279_v0 = vadd.f32 %v2208_v2, %v2038_v21  ;;  %v2448_v54 = vrot.slane %v2326_v35, 2  ;;  %v2210_v34 = vsel %vm1899_vm9, %v2207_v44, %v2209_v14  ;;  %vm5782_vm15 = vmor %vm3069_vm7, %vm3070_vm13  ;;  %v1022_v40 = vld [vmem:[#allocation2 + $0xc8] sm:$0x1] }
 0x1e3   : > { %v3066_v17 = vsub.f32 1.0, %v3065_v45  ;;  %v2450_v63 = vrot.slane %v2327_v38, 2  ;;  %v5765_v12 = vunpack.c.l.bf16 %v3553_v30  ;;  %v2280_v11 = vadd.f32 %v2210_v34, %v2039_v27 }
 0x1e4   : > { %v3052_v39 = vmul.f32 %v3680_v43, %v3051_v28  ;;  %v2449_v60 = vsel %vm1899_vm9, %v2447_v62, %v2448_v54  ;;  %v5768_v6 = vunpack.c.h.bf16 %v3553_v30  ;;  %v840_v56 = vmul.f32 %v5479_v24, %v4120_v46 }
 0x1e5   : > { %v3067_v31 = vmul.f32 %v3682_v22, %v3066_v17  ;;  %v2451_v51 = vsel %vm1899_vm9, %v2448_v54, %v2450_v63  ;;  %v2520_v16 = vadd.f32 %v2449_v60, %v2279_v0  ;;  %v841_v36 = vmul.f32 %v5482_v47, %v4120_v46 }
 0x1e6   : > { %v3053_v13 = vadd.f32 %v3680_v43, %v3052_v39  ;;  %v2521_v25 = vadd.f32 %v2451_v51, %v2280_v11  ;;  %v905_v10 = vmul.f32 %v4130_v55, %v5594_v57  ;;  %v906_v38 = vmul.f32 %v4130_v55, %v5597_v32 }
 0x1e7   : > { %v3068_v1 = vadd.f32 %v3682_v22, %v3067_v31  ;;  %v5791_v35 = vadd.f32 %v5430_v18, %v2520_v16  ;;  %v970_v53 = vmul.f32 %v5765_v12, %v4139_v59  ;;  %v971_v44 = vmul.f32 %v5768_v6, %v4139_v59 }
 0x1e8   : > { %v3057_v52 = vsel %vm5772_vm14, %v3680_v43, %v3053_v13  ;;  %v5800_v29 = vadd.f32 %v5430_v18, %v2521_v25  ;;  %v937_v49 = vadd.f32 %v905_v10, %v840_v56  ;;  %v938_v45 = vadd.f32 %v906_v38, %v841_v36  ;;  %v5843_v36 = vld [vmem:[#allocation2 + $0xc0] sm:$0xe] }
 0x1e9   : > { %v3062_v21 = vsel %vm5744_vm10, %v5733_v15, %v3057_v52  ;;  %v3072_v27 = vsel %vm5782_vm15, %v3682_v22, %v3068_v1  ;;  %v3420_v30 = vmul.f32 -1.442695, %v5791_v35  ;;  %v5816_v48 = vunpack.c.l.bf16 %v1022_v40 }
 0x1ea   : > { %v3077_v43 = vsel %vm5756_vm11, %v5738_v23, %v3072_v27  ;;  %v3193_v2 = vmul.f32 %v3062_v21, %v5673_v33  ;;  %v3421_v14 = vmul.f32 -1.442695, %v5800_v29  ;;  %v1002_v28 = vadd.f32 %v970_v53, %v937_v49 }
 0x1eb   : > { %v3194_v0 = vmul.f32 %v3077_v43, %v5685_v42  ;;  %3683 = vpow2.f32 %v3420_v30  ;;  %v1003_v15 = vadd.f32 %v971_v44, %v938_v45  ;;  %v1085_v62 = vmul.f32 %v5479_v24, %v4157_v5 }
 0x1ec   : > { %v3288_v22 = vadd.f32 %v5703_v3, %v3193_v2  ;;  %3685 = vpow2.f32 %v3421_v14  ;;  %v1086_v23 = vmul.f32 %v5482_v47, %v4157_v5  ;;  %v1087_v26 = vmul.f32 %v4157_v5, %v5568_v20 }
 0x1ed   : > { %v3529_v33 = vpack.c.bf16 %v3194_v0, %v3193_v2  ;;  %v1327_v42 = vmul.f32 %v4160_v8, %v5594_v57  ;;  %v1328_v54 = vmul.f32 %v4160_v8, %v5597_v32  ;;  %v1210_v3 = vrot.slane %v1085_v62, 1 }
 0x1ee   : > { %v5829_v17 = vadd.f32 %v3288_v22, %v3194_v0  ;;  %v1211_v34 = vrot.slane %v1086_v23, 1  ;;  %v1329_v24 = vmul.f32 %v4160_v8, %v5677_v7  ;;  %v1213_v63 = vrot.slane %v1087_v26, 1 }
 0x1ef   : > { %3565 = vst [vmem:[%s4379_s5 + $0x60] sm:$0xff] %v3529_v33   ;;  %v1451_v39 = vrot.slane %v1327_v42, 1  ;;  %v1452_v11 = vrot.slane %v1328_v54, 1  ;;  %v1568_v60 = vmul.f32 %v5765_v12, %v4163_v9  ;;  %v1569_v51 = vmul.f32 %v5768_v6, %v4163_v9 }
 0x1f0   : > { %v1212_v37 = vsel %vm1139_vm8, %v1210_v3, %v1211_v34  ;;  %v1454_v31 = vrot.slane %v1329_v24, 1  ;;  %v1570_v16 = vmul.f32 %v4163_v9, %v5816_v48  ;;  %v1214_v13 = vsel %vm1139_vm8, %v1211_v34, %v1213_v63 }
 0x1f1   : > { %v3684_v56 = vpop.eup %3683  ;;  %v1280_v4 = vadd.f32 %v1212_v37, %v1002_v28  ;;  %v1453_v25 = vsel %vm1139_vm8, %v1451_v39, %v1452_v11  ;;  %v1281_v38 = vadd.f32 %v1214_v13, %v1003_v15  ;;  %v1692_v53 = vrot.slane %v1568_v60, 1 }
 0x1f2   : > { %v3686_v10 = vpop.eup %3685  ;;  %v2683_v1 = vadd.f32 1.0, %v3684_v56  ;;  %v1693_v52 = vrot.slane %v1569_v51, 1  ;;  %v1455_v44 = vsel %vm1139_vm8, %v1452_v11, %v1454_v31  ;;  %v1695_v21 = vrot.slane %v1570_v16, 1 }
 0x1f3   : > { %v2684_v49 = vadd.f32 1.0, %v3686_v10  ;;  %v1521_v40 = vadd.f32 %v1453_v25, %v1280_v4  ;;  %v1800_v30 = vunpack.c.l.bf16 %v5843_v36  ;;  %v1522_v14 = vadd.f32 %v1455_v44, %v1281_v38  ;;  %v773_v25 = vld [vmem:[#allocation2 + $0xcc] sm:$0xff]  }
 0x1f4   : > { %3687 = vrcp.f32 %v2683_v1  ;;  %v3090_v27 = vand.u32 2147483648, %v2683_v1  ;;  %vm3084_vm0 = vweird.f32 %v2683_v1  ;;  %v3088_v45 = vand.u32 2147483647, %v2683_v1 }
 0x1f5   : > { %3689 = vrcp.f32 %v2684_v49  ;;  %v3105_v43 = vand.u32 2147483648, %v2684_v49  ;;  %vm3099_vm1 = vweird.f32 %v2684_v49  ;;  %v3103_v2 = vand.u32 2147483647, %v2684_v49 }
 0x1f6   : > { %v1694_v28 = vsel %vm1139_vm8, %v1692_v53, %v1693_v52  ;;  %v3091_v0 = vor.u32 1.1754944e-38, %v3090_v27  ;;  %v1696_v22 = vsel %vm1139_vm8, %v1693_v52, %v1695_v21  ;;  %v1845_v33 = vmul.f32 %v4191_v41, %v5603_v50 }
 0x1f7   : > { %v5848_v15 = vor.u32 1.1754944e-38, %v3105_v43  ;;  %v1762_v62 = vadd.f32 %v1694_v28, %v1521_v40  ;;  %v1763_v23 = vadd.f32 %v1696_v22, %v1522_v14  ;;  %v1846_v26 = vmul.f32 %v5482_v47, %v4191_v41 }
 0x1f8   : > { %v1847_v42 = vmul.f32 %v4191_v41, %v5568_v20  ;;  %vm5857_vm2 = vcmp.eq.f32.partialorder %v3088_v45, 8.507059e+37  ;;  %v2087_v3 = vmul.f32 %v4196_v58, %v5720_v19  ;;  %v2088_v34 = vmul.f32 %v4196_v58, %v5597_v32 }
 0x1f9   : > { %v2089_v24 = vmul.f32 %v4196_v58, %v5677_v7  ;;  %v2328_v47 = vmul.f32 %v4199_v61, %v1800_v30  ;;  %vm5870_vm3 = vcmp.eq.f32.partialorder %v3103_v2, 8.507059e+37  ;;  %v1970_v63 = vrot.slane %v1845_v33, 2 }
 0x1fa   : > { %v3688_v50 = vpop.eup %3687  ;;  %v1971_v39 = vrot.slane %v1846_v26, 2  ;;  %v1973_v11 = vrot.slane %v1847_v42, 2  ;;  %v2329_v60 = vmul.f32 %v5768_v6, %v4199_v61  ;;  %v2211_v51 = vrot.slane %v2087_v3, 2 }
 0x1fb   : > { %v3690_v37 = vpop.eup %3689  ;;  %v3080_v31 = vmul.f32 %v3688_v50, %v2683_v1  ;;  %vm3085_vm4 = vweird.f32 %v3688_v50  ;;  %v2212_v16 = vrot.slane %v2088_v34, 2  ;;  %v2214_v40 = vrot.slane %v2089_v24, 2 }
 0x1fc   : > { %v3095_v56 = vmul.f32 %v3690_v37, %v2684_v49  ;;  %vm3100_vm5 = vweird.f32 %v3690_v37  ;;  %v1972_v13 = vsel %vm1899_vm9, %v1970_v63, %v1971_v39  ;;  %v1974_v4 = vsel %vm1899_vm9, %v1971_v39, %v1973_v11  ;;  %vm5883_vm6 = vmor %vm3084_vm0, %vm3085_vm4 }
 0x1fd   : > { %v3081_v10 = vsub.f32 1.0, %v3080_v31  ;;  %v2040_v38 = vadd.f32 %v1972_v13, %v1762_v62  ;;  %v2041_v53 = vadd.f32 %v1974_v4, %v1763_v23  ;;  %v2213_v52 = vsel %vm1899_vm9, %v2211_v51, %v2212_v16  ;;  %vm5892_vm7 = vmor %vm3099_vm1, %vm3100_vm5 }
 0x1fe   : > { %v3096_v44 = vsub.f32 1.0, %v3095_v56  ;;  %v2330_v21 = vmul.f32 %v4199_v61, %v5816_v48  ;;  %v2452_v27 = vrot.slane %v2328_v47, 2  ;;  %v2453_v2 = vrot.slane %v2329_v60, 2 }
 0x1ff   : > { %v3082_v45 = vmul.f32 %v3688_v50, %v3081_v10  ;;  %v2281_v43 = vadd.f32 %v2213_v52, %v2040_v38  ;;  %v809_v14 = vunpack.c.l.bf16 %v773_v25  ;;  %v2215_v62 = vsel %vm1899_vm9, %v2212_v16, %v2214_v40 }
 0x200   : > { %v3097_v22 = vmul.f32 %v3690_v37, %v3096_v44  ;;  %v2455_v23 = vrot.slane %v2330_v21, 2  ;;  %v5888_v33 = vunpack.c.h.bf16 %v773_v25  ;;  %v2282_v3 = vadd.f32 %v2215_v62, %v2041_v53 }
 0x201   : > { %v3083_v26 = vadd.f32 %v3688_v50, %v3082_v45  ;;  %v2454_v1 = vsel %vm1899_vm9, %v2452_v27, %v2453_v2  ;;  %v842_v34 = vmul.f32 %v4120_v46, %v5594_v57  ;;  %v843_v39 = vmul.f32 %v4120_v46, %v5597_v32 }
 0x202   : > { %v3098_v24 = vadd.f32 %v3690_v37, %v3097_v22  ;;  %v2456_v47 = vsel %vm1899_vm9, %v2453_v2, %v2455_v23  ;;  %v2522_v63 = vadd.f32 %v2454_v1, %v2281_v43  ;;  %v907_v60 = vmul.f32 %v5765_v12, %v4130_v55 }
 0x203   : > { %v3087_v49 = vsel %vm5883_vm6, %v3688_v50, %v3083_v26  ;;  %v2523_v11 = vadd.f32 %v2456_v47, %v2282_v3  ;;  %v908_v31 = vmul.f32 %v5768_v6, %v4130_v55  ;;  %v972_v46 = vmul.f32 %v4139_v59, %v809_v14 }
 0x204   : > { %v3092_v51 = vsel %vm5857_vm2, %v3091_v0, %v3087_v49  ;;  %v3102_v16 = vsel %vm5892_vm7, %v3690_v37, %v3098_v24  ;;  %v5913_v56 = vadd.f32 %v5430_v18, %v2522_v63  ;;  %v939_v54 = vadd.f32 %v907_v60, %v842_v34  ;;  %v5925_v0 = vld [vmem:[#allocation2 + $0xd4] sm:$0x1]  ;;  %v1783_v63 = vld [vmem:[#allocation2 + $0xcc] sm:$0xe] }
 0x205   : > { %v3107_v50 = vsel %vm5870_vm3, %v5848_v15, %v3102_v16  ;;  %v5920_v13 = vmul.f32 %v3092_v51, %v5791_v35  ;;  %v5923_v55 = vadd.f32 %v5430_v18, %v2523_v11  ;;  %v940_v25 = vadd.f32 %v908_v31, %v843_v39 }
 0x206   : > { %v5928_v37 = vmul.f32 %v3107_v50, %v5800_v29  ;;  %v3422_v4 = vmul.f32 -1.442695, %v5913_v56  ;;  %v973_v20 = vmul.f32 %v4139_v59, %v5888_v33  ;;  %v1004_v35 = vadd.f32 %v972_v46, %v939_v54 }
 0x207   : > { %v3423_v15 = vmul.f32 -1.442695, %v5923_v55  ;;  %v1041_v10 = vunpack.c.l.bf16 %v5925_v0  ;;  %v1088_v38 = vmul.f32 %v4157_v5, %v5594_v57  ;;  %v1089_v53 = vmul.f32 %v4157_v5, %v5597_v32 }
 0x208   : > { %v3534_v18 = vpack.c.bf16 %v5928_v37, %v5920_v13  ;;  %3691 = vpow2.f32 %v3422_v4  ;;  %v1005_v29 = vadd.f32 %v973_v20, %v940_v25  ;;  %v1090_v59 = vmul.f32 %v4157_v5, %v5677_v7 }
 0x209   : > { %3693 = vpow2.f32 %v3423_v15  ;;  %v1215_v52 = vrot.slane %v1088_v38, 1  ;;  %v1330_v44 = vmul.f32 %v5765_v12, %v4160_v8  ;;  %v1331_v40 = vmul.f32 %v5768_v6, %v4160_v8 }
 0x20a   : > { %3566 = vst [vmem:[%s4379_s5 + $0x68] sm:$0xff] %v3534_v18   ;;  %v1332_v21 = vmul.f32 %v4160_v8, %v5816_v48  ;;  %v1216_v57 = vrot.slane %v1089_v53, 1  ;;  %v1218_v27 = vrot.slane %v1090_v59, 1  ;;  %v1571_v45 = vmul.f32 %v4163_v9, %v809_v14 }
 0x20b   : > { %v1572_v43 = vmul.f32 %v4163_v9, %v5888_v33  ;;  %v1456_v2 = vrot.slane %v1330_v44, 1  ;;  %v1457_v5 = vrot.slane %v1331_v40, 1  ;;  %v1573_v22 = vmul.f32 %v4163_v9, %v1041_v10 }
 0x20c   : > { %v1459_v28 = vrot.slane %v1332_v21, 1  ;;  %v1217_v12 = vsel %vm1139_vm8, %v1215_v52, %v1216_v57  ;;  %v1219_v62 = vsel %vm1139_vm8, %v1216_v57, %v1218_v27  ;;  %v1697_v23 = vrot.slane %v1571_v45, 1 }
 0x20d   : > { %v1698_v26 = vrot.slane %v1572_v43, 1  ;;  %v1282_v8 = vadd.f32 %v1217_v12, %v1004_v35  ;;  %v1283_v3 = vadd.f32 %v1219_v62, %v1005_v29  ;;  %v1458_v1 = vsel %vm1139_vm8, %v1456_v2, %v1457_v5 }
 0x20e   : > { %v3692_v42 = vpop.eup %3691  ;;  %v1460_v14 = vsel %vm1139_vm8, %v1457_v5, %v1459_v28  ;;  %v1700_v47 = vrot.slane %v1573_v22, 1  ;;  %v1848_v60 = vmul.f32 %v4191_v41, %v5720_v19  ;;  %v1801_v51 = vunpack.c.l.bf16 %v1783_v63 }
 0x20f   : > { %v3694_v34 = vpop.eup %3693  ;;  %v2685_v24 = vadd.f32 1.0, %v3692_v42  ;;  %v1523_v49 = vadd.f32 %v1458_v1, %v1282_v8  ;;  %v1524_v9 = vadd.f32 %v1460_v14, %v1283_v3  ;;  %v1699_v11 = vsel %vm1139_vm8, %v1697_v23, %v1698_v26 }
 0x210   : > { %v2686_v39 = vadd.f32 1.0, %v3694_v34  ;;  %v1701_v50 = vsel %vm1139_vm8, %v1698_v26, %v1700_v47  ;;  %v1849_v25 = vmul.f32 %v4191_v41, %v5597_v32  ;;  %v1850_v20 = vmul.f32 %v4191_v41, %v5677_v7 }
 0x211   : > { %3695 = vrcp.f32 %v2685_v24  ;;  %vm3114_vm10 = vweird.f32 %v2685_v24  ;;  %v3118_v31 = vand.u32 2147483647, %v2685_v24  ;;  %v3120_v16 = vand.u32 2147483648, %v2685_v24 }
 0x212   : > { %3697 = vrcp.f32 %v2686_v39  ;;  %vm3129_vm11 = vweird.f32 %v2686_v39  ;;  %v3133_v46 = vand.u32 2147483647, %v2686_v39  ;;  %v3135_v54 = vand.u32 2147483648, %v2686_v39 }
 0x213   : > { %v1764_v0 = vadd.f32 %v1699_v11, %v1523_v49  ;;  %v1765_v4 = vadd.f32 %v1701_v50, %v1524_v9  ;;  %v1975_v15 = vrot.slane %v1848_v60, 2  ;;  %v2090_v19 = vmul.f32 %v4196_v58, %v1800_v30 }
 0x214   : > { %v2091_v35 = vmul.f32 %v5768_v6, %v4196_v58  ;;  %v1976_v18 = vrot.slane %v1849_v25, 2  ;;  %v2092_v38 = vmul.f32 %v4196_v58, %v5816_v48  ;;  %v2331_v29 = vmul.f32 %v4199_v61, %v1801_v51 }
 0x215   : > { %v2332_v32 = vmul.f32 %v4199_v61, %v5888_v33  ;;  %v1978_v59 = vrot.slane %v1850_v20, 2  ;;  %v2216_v41 = vrot.slane %v2090_v19, 2  ;;  %v2333_v36 = vmul.f32 %v4199_v61, %v1041_v10 }
 0x216   : > { %v2217_v7 = vrot.slane %v2091_v35, 2  ;;  %v1977_v6 = vsel %vm1899_vm9, %v1975_v15, %v1976_v18  ;;  %v2219_v44 = vrot.slane %v2092_v38, 2  ;;  %v2457_v61 = vrot.slane %v2331_v29, 2 }
 0x217   : > { %v3696_v53 = vpop.eup %3695  ;;  %v1979_v58 = vsel %vm1899_vm9, %v1976_v18, %v1978_v59  ;;  %v2042_v48 = vadd.f32 %v1977_v6, %v1764_v0  ;;  %v2458_v10 = vrot.slane %v2332_v32, 2  ;;  %v2460_v28 = vrot.slane %v2333_v36, 2 }
 0x218   : > { %v3698_v52 = vpop.eup %3697  ;;  %v3110_v30 = vmul.f32 %v3696_v53, %v2685_v24  ;;  %vm3115_vm8 = vweird.f32 %v3696_v53  ;;  %v2043_v57 = vadd.f32 %v1979_v58, %v1765_v4  ;;  %v2218_v33 = vsel %vm1899_vm9, %v2216_v41, %v2217_v7  ;;  %v3709_v24 = vld [vmem:[%s6012_s2] ss:$0 sm:$0xff] }
 0x219   : > { %v3125_v40 = vmul.f32 %v3698_v52, %v2686_v39  ;;  %vm3130_vm12 = vweird.f32 %v3698_v52  ;;  %v2220_v27 = vsel %vm1899_vm9, %v2217_v7, %v2219_v44  ;;  %v2283_v43 = vadd.f32 %v2218_v33, %v2042_v48  ;;  %vm5983_vm13 = vmor %vm3114_vm10, %vm3115_vm8 }
 0x21a   : > { %v3111_v21 = vsub.f32 1.0, %v3110_v30  ;;  %v2284_v5 = vadd.f32 %v2220_v27, %v2043_v57  ;;  %vm3119_vm14 = vcmp.eq.f32.partialorder %v3118_v31, 8.507059e+37  ;;  %v3121_v12 = vor.u32 1.1754944e-38, %v3120_v16  ;;  %vm3131_vm15 = vmor %vm3129_vm11, %vm3130_vm12 }
 0x21b   : > { %v3126_v45 = vsub.f32 1.0, %v3125_v40  ;;  %v2459_v23 = vsel %vm1899_vm9, %v2457_v61, %v2458_v10  ;;  %v3136_v42 = vor.u32 1.1754944e-38, %v3135_v54  ;;  %v2461_v8 = vsel %vm1899_vm9, %v2458_v10, %v2460_v28 }
 0x21c   : > { %v3112_v2 = vmul.f32 %v3696_v53, %v3111_v21  ;;  %v2524_v3 = vadd.f32 %v2459_v23, %v2283_v43  ;;  %vm3134_vm0 = vcmp.eq.f32.partialorder %v3133_v46, 8.507059e+37  ;;  %v2525_v14 = vadd.f32 %v2461_v8, %v2284_v5 }
 0x21d   : > { %v3127_v62 = vmul.f32 %v3698_v52, %v3126_v45  ;;  %v3290_v4 = vadd.f32 %v5829_v17, %v5920_v13 }
 0x21e   : > { %v3113_v26 = vadd.f32 %v3696_v53, %v3112_v2  ;;  %v2559_v47 = vadd.f32 %v3709_v24, %v2524_v3  ;;  %v2560_v39 = vadd.f32 %v3709_v24, %v2525_v14 }
 0x21f   : > { %v3128_v1 = vadd.f32 %v3698_v52, %v3127_v62 }
 0x220   : > { %v3117_v34 = vsel %vm5983_vm13, %v3696_v53, %v3113_v26  ;;  %v3424_v60 = vmul.f32 -1.442695, %v2559_v47  ;;  %v3425_v51 = vmul.f32 -1.442695, %v2560_v39 }
 0x221   : > { %v3122_v63 = vsel %vm3119_vm14, %v3121_v12, %v3117_v34  ;;  %v3132_v49 = vsel %vm3131_vm15, %v3698_v52, %v3128_v1 }
 0x222   : > { %v3137_v9 = vsel %vm3134_vm0, %v3136_v42, %v3132_v49  ;;  %v3197_v11 = vmul.f32 %v3122_v63, %v5913_v56  ;;  %3699 = vpow2.f32 %v3424_v60  ;;  %v3291_v56 = vadd.f32 %v3290_v4, %v5928_v37 }
 0x223   : > { %v3198_v31 = vmul.f32 %v3137_v9, %v5923_v55  ;;  %3701 = vpow2.f32 %v3425_v51 }
 0x224   : > { %v3292_v53 = vadd.f32 %v3291_v56, %v3197_v11 }
 0x225   : > { %v3539_v16 = vpack.c.bf16 %v3198_v31, %v3197_v11 }
 0x226   : > { %v3293_v36 = vadd.f32 %v3292_v53, %v3198_v31 }
 0x227   : > { %3567 = vst [vmem:[%s4379_s5 + $0x70] sm:$0xff] %v3539_v16  }
 0x228   : > { %v3700_v46 = vpop.eup %3699 }
 0x229   : > { %v3702_v50 = vpop.eup %3701  ;;  %v2687_v54 = vadd.f32 1.0, %v3700_v46 }
 0x22a   : > { %v2688_v0 = vadd.f32 1.0, %v3702_v50 }
 0x22b   : > { %3703 = vrcp.f32 %v2687_v54  ;;  %vm3144_vm9 = vweird.f32 %v2687_v54  ;;  %v3150_v55 = vand.u32 2147483648, %v2687_v54  ;;  %v3148_v18 = vand.u32 2147483647, %v2687_v54 }
 0x22c   : > { %3705 = vrcp.f32 %v2688_v0  ;;  %v3165_v38 = vand.u32 2147483648, %v2688_v0  ;;  %vm3159_vm2 = vweird.f32 %v2688_v0  ;;  %v3163_v32 = vand.u32 2147483647, %v2688_v0 }
 0x22d   : > { %v3151_v17 = vor.u32 1.1754944e-38, %v3150_v55  ;;  %vm3149_vm5 = vcmp.eq.f32.partialorder %v3148_v18, 8.507059e+37 }
 0x22e   : > { %v3166_v37 = vor.u32 1.1754944e-38, %v3165_v38  ;;  %vm3164_vm7 = vcmp.eq.f32.partialorder %v3163_v32, 8.507059e+37 }
 0x231   : > { %v3704_v25 = vpop.eup %3703 }
 0x232   : > { %v3706_v20 = vpop.eup %3705  ;;  %v3140_v15 = vmul.f32 %v3704_v25, %v2687_v54  ;;  %vm3145_vm1 = vweird.f32 %v3704_v25 }
 0x233   : > { %v3155_v19 = vmul.f32 %v3706_v20, %v2688_v0  ;;  %vm3160_vm3 = vweird.f32 %v3706_v20  ;;  %vm3146_vm4 = vmor %vm3144_vm9, %vm3145_vm1 }
 0x234   : > { %v3141_v35 = vsub.f32 1.0, %v3140_v15  ;;  %vm3161_vm6 = vmor %vm3159_vm2, %vm3160_vm3 }
 0x235   : > { %v3156_v29 = vsub.f32 1.0, %v3155_v19 }
 0x236   : > { %v3142_v59 = vmul.f32 %v3704_v25, %v3141_v35 }
 0x237   : > { %v3157_v13 = vmul.f32 %v3706_v20, %v3156_v29 }
 0x238   : > { %v3143_v41 = vadd.f32 %v3704_v25, %v3142_v59 }
 0x239   : > { %v3158_v7 = vadd.f32 %v3706_v20, %v3157_v13 }
 0x23a   : > { %v3147_v52 = vsel %vm3146_vm4, %v3704_v25, %v3143_v41 }
 0x23b   : > { %v3152_v30 = vsel %vm3149_vm5, %v3151_v17, %v3147_v52  ;;  %v3162_v6 = vsel %vm3161_vm6, %v3706_v20, %v3158_v7 }
 0x23c   : > { %v3167_v44 = vsel %vm3164_vm7, %v3166_v37, %v3162_v6  ;;  %v3199_v40 = vmul.f32 %v3152_v30, %v2559_v47 }
 0x23d   : > { %v3200_v58 = vmul.f32 %v3167_v44, %v2560_v39 }
 0x23e   : > { %v3294_v48 = vadd.f32 %v3293_v36, %v3199_v40 }
 0x23f   : > { %v3544_v21 = vpack.c.bf16 %v3200_v58, %v3199_v40 }
 0x240   : > { %v3295_v57 = vadd.f32 %v3294_v48, %v3200_v58 }
 0x241   : > { %3568 = vst [vmem:[%s4379_s5 + $0x78] sm:$0xff] %v3544_v21  }
 0x242   : > { %v3296_v33 = vrot.slane %v3295_v57, 4 }
 0x244   : > { %v3297_v27 = vadd.f32 %v3296_v33, %v3295_v57 }
 0x246   : > { %v3298_v45 = vrot.slane %v3297_v27, 2 }
 0x248   : > { %v3299_v43 = vadd.f32 %v3298_v45, %v3297_v27 }
 0x24a   : > { %v3300_v61 = vrot.slane %v3299_v43, 1 }
 0x24c   : > { %v3301_v10 = vadd.f32 %v3300_v61, %v3299_v43 }
 0x24e   : > { %v3303_v2 = vmul.f32 0.00390625, %v3301_v10 }
 0x250   : > { %3304 = vst [vmem:[%s206_s14] sm:$0x1] %v3303_v2 }
 0x251 PF: > { %s15_s15 = sadd.s32 1, %s3716_s15  }
 0x252   : > { %p12_p4 = scmp.ge.s32.totalorder %s15_s15, 4  }
 0x254   :  { %14 = sbr.rel (!%p12_p4) target bundleno = 1 (0x1), region = 75 }

// kernel: forward.15
= control target key start
LH: loop header
LB: loop body
LE: loop exit
PB: predicated region body
PF: predicated region fallthrough
CT: control target
= control target key end

     0   :  { %s686_s15 = smov 0   ;;  %s688_s16 = smov 0   ;;  %s757_s0 = inlined_call_operand.vmem [shape: bf16[2,64,128], index: 0, kind: input, shape index: {}]   ;;  %s758_s1 = inlined_call_operand.vmem [shape: f32[2,1,128], index: 1, kind: input, shape index: {}]   ;;  %s759_s2 = inlined_call_operand.vmem [shape: bf16[128,128], index: 2, kind: input, shape index: {}]   ;;  %s760_s3 = inlined_call_operand.vmem [shape: f32[1,128], index: 3, kind: input, shape index: {}]   ;;  %s761_s4 = inlined_call_operand.vmem [shape: bf16[2,64,128], index: 4, kind: output, shape index: {}]  }
   0x1   :  { %s690_s17 = smov 0  }
   0x2 LB: > { %s26_s18 = sadd.s32 1, %s655_s16  ;;  %p496_p0 = scmp.ge.s32.totalorder %s659_s17, 1  ;;  %s659_s17 = sphi %s690_s17, %s14_s17   ;;  %s655_s16 = sphi %s688_s16, %s763_s16   ;;  %s651_s15 = sphi %s686_s15, %s762_s15  }
   0x3   : > { %p28_p1 = scmp.ge.s32.totalorder %s26_s18, 2  ;;  %p191_p2 = scmp.lt.s32.totalorder %s659_s17, 3 }
   0x5   : > { %s765_s18 = smov (%p28_p1, %s26_s18), 0  ;;  %p192_p3 = pnand %p496_p0, %p191_p2 }
   0x6   : > { %p229_p4 = scmp.lt.s32.totalorder (!%p192_p3), %s651_s15, 1 }
   0x7   : > { %195 = sbr.rel (%p192_p3) target bundleno = 191 (0xbf), region = 36 }
   0xc   : > { %v544_v0 = vld [vmem:[%s759_s2 + $0x38] sm:$0xff]  ;;  %v543_v1 = vld [vmem:[%s759_s2 + $0x30] sm:$0xff]  ;;  %s767_s15 = smov (!%p229_p4, %s651_s15), 1  ;;  %v542_v2 = vld [vmem:[%s759_s2 + $0x28] sm:$0xff] }
   0xd   : > { %351 = vmatpush.bf16.msra.mxu0 %v544_v0  ;;  %587 = vmatpush.bf16.msra.mxu1 %v544_v0  ;;  %s240_s25 = scalar_lea.vmem %s758_s1, %s767_s15  ;;  %v541_v3 = vld [vmem:[%s759_s2 + $0x20] sm:$0xff]  ;;  %s535_s30 = sshll.u32 %s767_s15, 5  ;;  %v540_v4 = vld [vmem:[%s759_s2 + $0x18] sm:$0xff]  ;;  %v539_v6 = vld [vmem:[%s759_s2 + $0x10] sm:$0xff] }
   0xe   : > { %588 = vmatpush.bf16.msra.mxu2 %v544_v0  ;;  %589 = vmatpush.bf16.msra.mxu3 %v544_v0  ;;  %s236_s9 = scalar_lea.vmem %s757_s0, %s535_s30  ;;  %v635_v11 = vld [vmem:[%s240_s25] ss:$0 sm:$0xff]  ;;  %v538_v16 = vld [vmem:[%s759_s2 + $0x8] sm:$0xff]  ;;  %s249_s24 = scalar_lea.vmem %s761_s4, %s535_s30 }
   0xf   : > { %v546_v5 = vld [vmem:[%s236_s9] sm:$0xff]   ;;  %v581_v7 = vld [vmem:[%s236_s9 + $0x8] sm:$0xff]   ;;  %v582_v8 = vld [vmem:[%s236_s9 + $0x10] sm:$0xff]  }
  0x10   : > { %v583_v9 = vld [vmem:[%s236_s9 + $0x18] sm:$0xff]   ;;  %v547_v10 = vunpack.c.l.bf16 %v546_v5  ;;  %v548_v12 = vunpack.c.h.bf16 %v546_v5  ;;  %v551_v13 = vunpack.c.l.bf16 %v581_v7  ;;  %v552_v14 = vunpack.c.h.bf16 %v581_v7  ;;  %v537_v25 = vld [vmem:[%s759_s2] sm:$0xff] }
  0x11   : > { %352 = vmatpush.bf16.msra.mxu0 %v543_v1  ;;  %590 = vmatpush.bf16.msra.mxu1 %v543_v1  ;;  %v555_v15 = vunpack.c.l.bf16 %v582_v8  ;;  %v556_v17 = vunpack.c.h.bf16 %v582_v8  ;;  %v559_v18 = vunpack.c.l.bf16 %v583_v9  ;;  %v560_v19 = vunpack.c.h.bf16 %v583_v9  ;;  %v636_v35 = vld [vmem:[%s760_s3] ss:$0 sm:$0xff] }
  0x12   : > { %591 = vmatpush.bf16.msra.mxu2 %v543_v1  ;;  %592 = vmatpush.bf16.msra.mxu3 %v543_v1  ;;  %v271_v20 = vmul.f32 %v635_v11, %v547_v10  ;;  %v272_v21 = vmul.f32 %v635_v11, %v548_v12  ;;  %v273_v22 = vmul.f32 %v635_v11, %v551_v13 }
  0x13   : > { %v274_v23 = vmul.f32 %v635_v11, %v552_v14  ;;  %v275_v24 = vmul.f32 %v635_v11, %v555_v15  ;;  %v276_v26 = vmul.f32 %v635_v11, %v556_v17  ;;  %v277_v27 = vmul.f32 %v635_v11, %v559_v18 }
  0x14   : > { %v278_v28 = vmul.f32 %v635_v11, %v560_v19  ;;  %v279_v29 = vpack.c.bf16 %v272_v21, %v271_v20 }
  0x15   : > { %353 = vmatpush.bf16.msra.mxu0 %v542_v2  ;;  %593 = vmatpush.bf16.msra.mxu1 %v542_v2  ;;  %v280_v30 = vpack.c.bf16 %v274_v23, %v273_v22  ;;  %v281_v31 = vpack.c.bf16 %v276_v26, %v275_v24 }
  0x16   : > { %594 = vmatpush.bf16.msra.mxu2 %v542_v2  ;;  %595 = vmatpush.bf16.msra.mxu3 %v542_v2  ;;  %v282_v32 = vpack.c.bf16 %v278_v28, %v277_v27 }
  0x19   : > { %354 = vmatpush.bf16.msra.mxu0 %v541_v3  ;;  %596 = vmatpush.bf16.msra.mxu1 %v541_v3 }
  0x1a   : > { %597 = vmatpush.bf16.msra.mxu2 %v541_v3  ;;  %598 = vmatpush.bf16.msra.mxu3 %v541_v3 }
  0x1d   : > { %355 = vmatpush.bf16.msra.mxu0 %v540_v4  ;;  %599 = vmatpush.bf16.msra.mxu1 %v540_v4 }
  0x1e   : > { %600 = vmatpush.bf16.msra.mxu2 %v540_v4  ;;  %601 = vmatpush.bf16.msra.mxu3 %v540_v4 }
  0x21   : > { %356 = vmatpush.bf16.msra.mxu0 %v539_v6  ;;  %602 = vmatpush.bf16.msra.mxu1 %v539_v6 }
  0x22   : > { %603 = vmatpush.bf16.msra.mxu2 %v539_v6  ;;  %604 = vmatpush.bf16.msra.mxu3 %v539_v6 }
  0x25   : > { %357 = vmatpush.bf16.msra.mxu0 %v538_v16  ;;  %605 = vmatpush.bf16.msra.mxu1 %v538_v16 }
  0x26   : > { %606 = vmatpush.bf16.msra.mxu2 %v538_v16  ;;  %607 = vmatpush.bf16.msra.mxu3 %v538_v16 }
  0x29   : > { %358 = vmatpush.bf16.msra.mxu0 %v537_v25  ;;  %608 = vmatpush.bf16.msra.mxu1 %v537_v25 }
  0x2a   : > { %609 = vmatpush.bf16.msra.mxu2 %v537_v25  ;;  %610 = vmatpush.bf16.msra.mxu3 %v537_v25 }
  0x2c   : > { %359 = vmatmul.bf16.vlgmr.msra.gmra.mxu0 %v279_v29  ;;  %364 = vmatmul.bf16.vlgmr.msra.gmra.mxu1 %v280_v30 }
  0x2d   : > { %369 = vmatmul.bf16.vlgmr.msra.gmra.mxu2 %v281_v31  ;;  %374 = vmatmul.bf16.vlgmr.msra.gmra.mxu3 %v282_v32 }
  0xa9   : > { %v360_v33 = vpop.f32.mrf.mxu0  ;;  %v365_v34 = vpop.f32.mrf.mxu1 }
  0xaa   : > { %v361_v40 = vadd.f32 %v636_v35, %v360_v33  ;;  %v366_v41 = vadd.f32 %v636_v35, %v365_v34 }
  0xb0   : > { %v370_v36 = vpop.f32.mrf.mxu2  ;;  %v375_v37 = vpop.f32.mrf.mxu3 }
  0xb1   : > { %v362_v38 = vpop.f32.mrf.mxu0  ;;  %v367_v39 = vpop.f32.mrf.mxu1  ;;  %v371_v48 = vadd.f32 %v636_v35, %v370_v36  ;;  %v376_v49 = vadd.f32 %v636_v35, %v375_v37 }
  0xb2   : > { %v363_v42 = vadd.f32 %v636_v35, %v362_v38  ;;  %v368_v43 = vadd.f32 %v636_v35, %v367_v39 }
  0xb4   : > { %v564_v44 = vpack.c.bf16 %v363_v42, %v361_v40  ;;  %v569_v45 = vpack.c.bf16 %v368_v43, %v366_v41 }
  0xb6   : > { %565 = vst [vmem:[%s249_s24] sm:$0xff] %v564_v44  }
  0xb7   : > { %584 = vst [vmem:[%s249_s24 + $0x8] sm:$0xff] %v569_v45  }
  0xb8   : > { %v372_v46 = vpop.f32.mrf.mxu2  ;;  %v377_v47 = vpop.f32.mrf.mxu3 }
  0xb9   : > { %v373_v50 = vadd.f32 %v636_v35, %v372_v46  ;;  %v378_v51 = vadd.f32 %v636_v35, %v377_v47 }
  0xbb   : > { %v574_v52 = vpack.c.bf16 %v373_v50, %v371_v48  ;;  %v579_v53 = vpack.c.bf16 %v378_v51, %v376_v49 }
  0xbd   : > { %585 = vst [vmem:[%s249_s24 + $0x10] sm:$0xff] %v574_v52  }
  0xbe   : > { %586 = vst [vmem:[%s249_s24 + $0x18] sm:$0xff] %v579_v53  }
  0xbf PF: > { %s14_s17 = sadd.s32 1, %s659_s17   ;;  %s762_s15 = smov %s655_s16 }
  0xc0   : > { %p11_p5 = scmp.ge.s32.totalorder %s14_s17, 4   ;;  %s763_s16 = smov %s765_s18 }
  0xc2   :  { %13 = sbr.rel (!%p11_p5) target bundleno = 2 (0x2), region = 69 }

// kernel: forward.13
= control target key start
LH: loop header
LB: loop body
LE: loop exit
PB: predicated region body
PF: predicated region fallthrough
CT: control target
= control target key end

     0   :  { %s2542_s15 = smov 0   ;;  %s2544_s16 = smov 0   ;;  %s4061_s0 = inlined_call_operand.vmem [shape: bf16[4,2,10,10,128], index: 0, kind: input, shape index: {}]   ;;  %s4062_s1 = inlined_call_operand.vmem [shape: f32[5,5,128], index: 1, kind: input, shape index: {}]   ;;  %s4063_s2 = inlined_call_operand.vmem [shape: f32[1,1,128], index: 2, kind: input, shape index: {}]   ;;  %s4064_s3 = inlined_call_operand.vmem [shape: bf16[2,8,8,128], index: 3, kind: output, shape index: {0}]   ;;  %s4065_s4 = inlined_call_operand.vmem [shape: f32[2,1,128], index: 4, kind: output, shape index: {1}]  }
   0x1   :  { %s2546_s17 = smov 0  }
   0x2 LB: > { %s2321_s18 = sadd.s32 4294967295, %s2515_s17   ;;  %s2559_s19 = sadd.s32 1, %s2515_s17   ;;  %s2515_s17 = sphi %s2546_s17, %s4301_s17   ;;  %s2511_s16 = sphi %s2544_s16, %s4300_s16   ;;  %s2507_s15 = sphi %s2542_s15, %s4299_s15  }
   0x3   : > { %s19_s20 = ssub.s32 %s2515_s17, %s2559_s19  ;;  %s22_s21 = sadd.s32 1, %s2511_s16 }
   0x4   : > { %p20_p0 = scmp.eq.s32.totalorder %s19_s20, 0  ;;  %p29_p1 = scmp.ne.s32.totalorder %s2511_s16, %s2507_s15 }
   0x5   : > { %p30_p2 = scmp.eq.s32.totalorder %s2515_s17, 0  ;;  %p2324_p4 = scmp.ge.s32.totalorder %s2515_s17, 2 }
   0x6   : > { %s2568_s22 = scalar_select %p20_p0, %s2511_s16, %s22_s21  }
   0x7   : > { %p31_p3 = por %p30_p2, %p29_p1  ;;  %155 = sbr.rel (%p2324_p4) target bundleno = 57 (0x39), region = 24 }
   0xc   : > { %158 = sbr.rel (!%p31_p3) target bundleno = 57 (0x39), region = 28  ;;  %s160_s23 = sand.u32 (%p31_p3), 1, %s2511_s16  }
   0xd   : > { %s2429_s24 = smul.u32 (%p31_p3), 80, %s2515_s17 }
   0xe   : > { %s2428_s25 = smul.u32 (%p31_p3), 320, %s160_s23 }
   0xf   : > { %s2576_s28 = scalar_lea.vmem (%p31_p3), %s4061_s0, %s2429_s24 }
  0x10   : > { %v182_v0 = vld [vmem:[%s2576_s28] sm:$0xff] (%p31_p3)   ;;  %v186_v1 = vld [vmem:[%s2576_s28 + $0x8] sm:$0xff] (%p31_p3)   ;;  %v190_v2 = vld [vmem:[%s2576_s28 + $0x10] sm:$0xff] (%p31_p3)   ;;  %s2581_s29 = scalar_lea.vmem (%p31_p3), [#allocation2], %s2428_s25 }
  0x11   : > { %183 = vst [vmem:[%s2581_s29] sm:$0xff] %v182_v0   ;;  %v194_v3 = vld [vmem:[%s2576_s28 + $0x18] sm:$0xff]   ;;  %v198_v4 = vld [vmem:[%s2576_s28 + $0x20] sm:$0xff]   ;;  %v202_v5 = vld [vmem:[%s2576_s28 + $0x28] sm:$0xff]  }
  0x12   : > { %187 = vst [vmem:[%s2581_s29 + $0x8] sm:$0xff] %v186_v1   ;;  %v206_v6 = vld [vmem:[%s2576_s28 + $0x30] sm:$0xff]   ;;  %v210_v7 = vld [vmem:[%s2576_s28 + $0x38] sm:$0xff]   ;;  %v214_v8 = vld [vmem:[%s2576_s28 + $0x40] sm:$0xff]  }
  0x13   : > { %191 = vst [vmem:[%s2581_s29 + $0x10] sm:$0xff] %v190_v2   ;;  %v218_v9 = vld [vmem:[%s2576_s28 + $0x48] sm:$0xff]   ;;  %v222_v10 = vld [vmem:[%s2576_s28 + $0xa0] sm:$0xff]   ;;  %v230_v12 = vld [vmem:[%s2576_s28 + $0xb0] sm:$0xff]  }
  0x14   : > { %195 = vst [vmem:[%s2581_s29 + $0x18] sm:$0xff] %v194_v3   ;;  %v226_v11 = vld [vmem:[%s2576_s28 + $0xa8] sm:$0xff]   ;;  %v234_v13 = vld [vmem:[%s2576_s28 + $0xb8] sm:$0xff]   ;;  %v238_v14 = vld [vmem:[%s2576_s28 + $0xc0] sm:$0xff]  }
  0x15   : > { %199 = vst [vmem:[%s2581_s29 + $0x20] sm:$0xff] %v198_v4   ;;  %v242_v15 = vld [vmem:[%s2576_s28 + $0xc8] sm:$0xff]   ;;  %v246_v16 = vld [vmem:[%s2576_s28 + $0xd0] sm:$0xff]   ;;  %v250_v17 = vld [vmem:[%s2576_s28 + $0xd8] sm:$0xff]  }
  0x16   : > { %203 = vst [vmem:[%s2581_s29 + $0x28] sm:$0xff] %v202_v5   ;;  %v254_v18 = vld [vmem:[%s2576_s28 + $0xe0] sm:$0xff]   ;;  %v258_v19 = vld [vmem:[%s2576_s28 + $0xe8] sm:$0xff]   ;;  %v270_v22 = vld [vmem:[%s2576_s28 + $0x150] sm:$0xff]  }
  0x17   : > { %207 = vst [vmem:[%s2581_s29 + $0x30] sm:$0xff] %v206_v6   ;;  %v262_v20 = vld [vmem:[%s2576_s28 + $0x140] sm:$0xff]   ;;  %v266_v21 = vld [vmem:[%s2576_s28 + $0x148] sm:$0xff]   ;;  %v274_v23 = vld [vmem:[%s2576_s28 + $0x158] sm:$0xff]  }
  0x18   : > { %211 = vst [vmem:[%s2581_s29 + $0x38] sm:$0xff] %v210_v7   ;;  %v278_v24 = vld [vmem:[%s2576_s28 + $0x160] sm:$0xff]   ;;  %v282_v25 = vld [vmem:[%s2576_s28 + $0x168] sm:$0xff]   ;;  %v286_v26 = vld [vmem:[%s2576_s28 + $0x170] sm:$0xff]  }
  0x19   : > { %215 = vst [vmem:[%s2581_s29 + $0x40] sm:$0xff] %v214_v8   ;;  %v290_v27 = vld [vmem:[%s2576_s28 + $0x178] sm:$0xff]   ;;  %v294_v28 = vld [vmem:[%s2576_s28 + $0x180] sm:$0xff]   ;;  %v298_v29 = vld [vmem:[%s2576_s28 + $0x188] sm:$0xff]  }
  0x1a   : > { %219 = vst [vmem:[%s2581_s29 + $0x48] sm:$0xff] %v218_v9   ;;  %v302_v30 = vld [vmem:[%s2576_s28 + $0x1e0] sm:$0xff]   ;;  %v306_v31 = vld [vmem:[%s2576_s28 + $0x1e8] sm:$0xff]   ;;  %v310_v32 = vld [vmem:[%s2576_s28 + $0x1f0] sm:$0xff]  }
  0x1b   : > { %223 = vst [vmem:[%s2581_s29 + $0x50] sm:$0xff] %v222_v10   ;;  %v314_v33 = vld [vmem:[%s2576_s28 + $0x1f8] sm:$0xff]   ;;  %v318_v34 = vld [vmem:[%s2576_s28 + $0x200] sm:$0xff]   ;;  %v322_v35 = vld [vmem:[%s2576_s28 + $0x208] sm:$0xff]  }
  0x1c   : > { %227 = vst [vmem:[%s2581_s29 + $0x58] sm:$0xff] %v226_v11   ;;  %v326_v36 = vld [vmem:[%s2576_s28 + $0x210] sm:$0xff]   ;;  %v330_v37 = vld [vmem:[%s2576_s28 + $0x218] sm:$0xff]   ;;  %v334_v38 = vld [vmem:[%s2576_s28 + $0x220] sm:$0xff]  }
  0x1d   : > { %231 = vst [vmem:[%s2581_s29 + $0x60] sm:$0xff] %v230_v12   ;;  %v338_v39 = vld [vmem:[%s2576_s28 + $0x228] sm:$0xff]  }
  0x1e   : > { %235 = vst [vmem:[%s2581_s29 + $0x68] sm:$0xff] %v234_v13  }
  0x1f   : > { %239 = vst [vmem:[%s2581_s29 + $0x70] sm:$0xff] %v238_v14  }
  0x20   : > { %243 = vst [vmem:[%s2581_s29 + $0x78] sm:$0xff] %v242_v15  }
  0x21   : > { %247 = vst [vmem:[%s2581_s29 + $0x80] sm:$0xff] %v246_v16  }
  0x22   : > { %251 = vst [vmem:[%s2581_s29 + $0x88] sm:$0xff] %v250_v17  }
  0x23   : > { %255 = vst [vmem:[%s2581_s29 + $0x90] sm:$0xff] %v254_v18  }
  0x24   : > { %259 = vst [vmem:[%s2581_s29 + $0x98] sm:$0xff] %v258_v19  }
  0x25   : > { %263 = vst [vmem:[%s2581_s29 + $0xa0] sm:$0xff] %v262_v20  }
  0x26   : > { %267 = vst [vmem:[%s2581_s29 + $0xa8] sm:$0xff] %v266_v21  }
  0x27   : > { %271 = vst [vmem:[%s2581_s29 + $0xb0] sm:$0xff] %v270_v22  }
  0x28   : > { %275 = vst [vmem:[%s2581_s29 + $0xb8] sm:$0xff] %v274_v23  }
  0x29   : > { %279 = vst [vmem:[%s2581_s29 + $0xc0] sm:$0xff] %v278_v24  }
  0x2a   : > { %283 = vst [vmem:[%s2581_s29 + $0xc8] sm:$0xff] %v282_v25  }
  0x2b   : > { %287 = vst [vmem:[%s2581_s29 + $0xd0] sm:$0xff] %v286_v26  }
  0x2c   : > { %291 = vst [vmem:[%s2581_s29 + $0xd8] sm:$0xff] %v290_v27  }
  0x2d   : > { %295 = vst [vmem:[%s2581_s29 + $0xe0] sm:$0xff] %v294_v28  }
  0x2e   : > { %299 = vst [vmem:[%s2581_s29 + $0xe8] sm:$0xff] %v298_v29  }
  0x2f   : > { %303 = vst [vmem:[%s2581_s29 + $0xf0] sm:$0xff] %v302_v30  }
  0x30   : > { %307 = vst [vmem:[%s2581_s29 + $0xf8] sm:$0xff] %v306_v31  }
  0x31   : > { %311 = vst [vmem:[%s2581_s29 + $0x100] sm:$0xff] %v310_v32  }
  0x32   : > { %315 = vst [vmem:[%s2581_s29 + $0x108] sm:$0xff] %v314_v33  }
  0x33   : > { %319 = vst [vmem:[%s2581_s29 + $0x110] sm:$0xff] %v318_v34  }
  0x34   : > { %323 = vst [vmem:[%s2581_s29 + $0x118] sm:$0xff] %v322_v35  }
  0x35   : > { %327 = vst [vmem:[%s2581_s29 + $0x120] sm:$0xff] %v326_v36  }
  0x36   : > { %331 = vst [vmem:[%s2581_s29 + $0x128] sm:$0xff] %v330_v37  }
  0x37   : > { %335 = vst [vmem:[%s2581_s29 + $0x130] sm:$0xff] %v334_v38  }
  0x38   : > { %339 = vst [vmem:[%s2581_s29 + $0x138] sm:$0xff] %v338_v39  }
  0x39 PF: > { %p2326_p5 = scmp.ge.s32.totalorder %s2515_s17, 1  ;;  %p524_p6 = scmp.lt.s32.totalorder %s2515_s17, 3 }
  0x3b   : > { %p525_p7 = pnand %p2326_p5, %p524_p6 }
  0x3d   : > { %528 = sbr.rel (%p525_p7) target bundleno = 391 (0x187), region = 69 }
  0x42   : > { %s531_s30 = sand.u32 1, %s2507_s15   ;;  %v2666_v40 = vld [vmem:[%s4062_s1] sm:$0x1f]  ;;  %v2671_v41 = vld [vmem:[%s4062_s1 + $0x8] sm:$0x1f]  ;;  %vm875_vm0 = vcmask 1046528  }
  0x43   : > { %s2430_s9 = smul.u32 320, %s531_s30  ;;  %v2676_v42 = vld [vmem:[%s4062_s1 + $0x10] sm:$0x1f]  ;;  %v2681_v43 = vld [vmem:[%s4062_s1 + $0x18] sm:$0x1f]  ;;  %v593_v45 = vperm.slane %v2666_v40, 0 }
  0x44   : > { %v2686_v44 = vld [vmem:[%s4062_s1 + $0x20] sm:$0x1f]  ;;  %v610_v46 = vperm.slane %v2676_v42, 0  ;;  %v2692_v48 = vperm.slane %v2671_v41, 0  ;;  %v2695_v49 = vperm.slane %v2681_v43, 0  ;;  %v2704_v52 = vperm.slane %v2666_v40, 1 }
  0x45   : > { %v627_v47 = vperm.slane %v2686_v44, 0  ;;  %s2697_s20 = scalar_lea.vmem [#allocation2], %s2430_s9  ;;  %v2707_v53 = vperm.slane %v2676_v42, 1  ;;  %vm1682_vm1 = vcmask 1045504   ;;  %p3909_p8 = scmp.lt.s32.totalorder %s2321_s18, 1 }
  0x46   : > { %v2700_v50 = vld [vmem:[%s2697_s20] sm:$0xf]  ;;  %v574_v51 = vld [vmem:[%s2697_s20 + $0x8] sm:$0xf]  ;;  %v575_v54 = vld [vmem:[%s2697_s20 + $0x10] sm:$0xf] }
  0x47   : > { %v576_v55 = vld [vmem:[%s2697_s20 + $0x18] sm:$0xf]  ;;  %v577_v56 = vld [vmem:[%s2697_s20 + $0x20] sm:$0xf]  ;;  %v4070_v57 = vunpack.c.l.bf16 %v2700_v50  ;;  %v2713_v58 = vunpack.c.l.bf16 %v574_v51  ;;  %v578_v59 = vld [vmem:[%s2697_s20 + $0x28] sm:$0xf]  ;;  %v2718_v62 = vunpack.c.l.bf16 %v575_v54 }
  0x48   : > { %v579_v60 = vld [vmem:[%s2697_s20 + $0x30] sm:$0xf]  ;;  %v580_v61 = vld [vmem:[%s2697_s20 + $0x38] sm:$0xf]  ;;  %v2720_v63 = vunpack.c.l.bf16 %v576_v55  ;;  %v581_v0 = vld [vmem:[%s2697_s20 + $0x40] sm:$0xf]  ;;  %v2726_v2 = vunpack.c.l.bf16 %v577_v56  ;;  %v2728_v3 = vunpack.c.l.bf16 %v578_v59 }
  0x49   : > { %v2724_v1 = vld [vmem:[%s2697_s20 + $0x48] sm:$0xf]  ;;  %v2730_v4 = vunpack.c.l.bf16 %v579_v60  ;;  %v2732_v5 = vunpack.c.l.bf16 %v580_v61  ;;  %v2734_v6 = vunpack.c.l.bf16 %v581_v0  ;;  %v594_v8 = vmul.f32 %v593_v45, %v4070_v57  ;;  %v2758_v34 = vld [vmem:[%s2697_s20 + $0xa0] sm:$0xf]  ;;  %v2335_v61 = vld [vmem:[%s2697_s20 + $0xd0] sm:$0xf] }
  0x4a   : > { %v4067_v7 = vunpack.c.l.bf16 %v2724_v1  ;;  %v595_v9 = vmul.f32 %v593_v45, %v2713_v58  ;;  %v596_v10 = vmul.f32 %v593_v45, %v2718_v62  ;;  %v597_v11 = vmul.f32 %v593_v45, %v2720_v63  ;;  %v2330_v39 = vld [vmem:[%s2697_s20 + $0xa8] sm:$0xf]  ;;  %v2333_v59 = vld [vmem:[%s2697_s20 + $0xc0] sm:$0xf]  ;;  %s4303_s18 = smov (!%p3909_p8, %s2321_s18), 1 }
  0x4b   : > { %v598_v12 = vmul.f32 %v593_v45, %v2726_v2  ;;  %v599_v13 = vmul.f32 %v593_v45, %v2728_v3  ;;  %v600_v14 = vmul.f32 %v593_v45, %v2730_v4  ;;  %v611_v15 = vmul.f32 %v610_v46, %v2713_v58  ;;  %v2334_v60 = vld [vmem:[%s2697_s20 + $0xc8] sm:$0xf]  ;;  %s2404_s17 = sshll.u32 %s4303_s18, 5  ;;  %s566_s14 = scalar_lea.vmem %s4065_s4, %s4303_s18 }
  0x4c   : > { %v612_v16 = vmul.f32 %v610_v46, %v2718_v62  ;;  %v613_v17 = vmul.f32 %v610_v46, %v2720_v63  ;;  %v614_v18 = vmul.f32 %v610_v46, %v2726_v2  ;;  %v615_v19 = vmul.f32 %v610_v46, %v2728_v3  ;;  %v2351_v57 = vld [vmem:[%s2697_s20 + $0x108] sm:$0xf]  ;;  %s4013_s11 = scalar_lea.vmem %s4064_s3, %s2404_s17 }
  0x4d   : > { %v616_v20 = vmul.f32 %v610_v46, %v2730_v4  ;;  %v617_v21 = vmul.f32 %v610_v46, %v2732_v5  ;;  %v601_v22 = vmul.f32 %v593_v45, %v2732_v5  ;;  %v618_v23 = vmul.f32 %v610_v46, %v2734_v6  ;;  %v2331_v45 = vld [vmem:[%s2697_s20 + $0xb0] sm:$0xf]  ;;  %v2332_v46 = vld [vmem:[%s2697_s20 + $0xb8] sm:$0xf] }
  0x4e   : > { %v619_v24 = vadd.f32 %v611_v15, %v594_v8  ;;  %v620_v25 = vadd.f32 %v612_v16, %v595_v9  ;;  %v621_v26 = vadd.f32 %v613_v17, %v596_v10  ;;  %v622_v27 = vadd.f32 %v614_v18, %v597_v11  ;;  %v2336_v11 = vld [vmem:[%s2697_s20 + $0xd8] sm:$0xf]  ;;  %v2779_v16 = vld [vmem:[%s2697_s20 + $0xe0] sm:$0xf] }
  0x4f   : > { %v623_v28 = vadd.f32 %v615_v19, %v598_v12  ;;  %v624_v29 = vadd.f32 %v616_v20, %v599_v13  ;;  %v625_v30 = vadd.f32 %v617_v21, %v600_v14  ;;  %v628_v31 = vmul.f32 %v627_v47, %v2718_v62  ;;  %4156 = vst [vmem:[#allocation4_spill] sm:$0xff] %v2779_v16 }
  0x50   : > { %v629_v32 = vmul.f32 %v627_v47, %v2720_v63  ;;  %v630_v33 = vmul.f32 %v627_v47, %v2726_v2  ;;  %v631_v35 = vmul.f32 %v627_v47, %v2728_v3  ;;  %v632_v36 = vmul.f32 %v627_v47, %v2730_v4 }
  0x51   : > { %v633_v37 = vmul.f32 %v627_v47, %v2732_v5  ;;  %v634_v38 = vmul.f32 %v627_v47, %v2734_v6  ;;  %v626_v51 = vadd.f32 %v618_v23, %v601_v22  ;;  %v635_v54 = vmul.f32 %v627_v47, %v4067_v7 }
  0x52   : > { %v636_v55 = vadd.f32 %v628_v31, %v619_v24  ;;  %v637_v56 = vadd.f32 %v629_v32, %v620_v25  ;;  %v638_v0 = vadd.f32 %v630_v33, %v621_v26  ;;  %v639_v8 = vadd.f32 %v631_v35, %v622_v27 }
  0x53   : > { %v640_v9 = vadd.f32 %v632_v36, %v623_v28  ;;  %v641_v10 = vadd.f32 %v633_v37, %v624_v29  ;;  %v642_v12 = vadd.f32 %v634_v38, %v625_v30  ;;  %v4066_v13 = vunpack.c.l.bf16 %v2758_v34 }
  0x54   : > { %v2774_v14 = vunpack.c.l.bf16 %v2330_v39  ;;  %v2776_v15 = vunpack.c.l.bf16 %v2331_v45  ;;  %v2781_v47 = vunpack.c.l.bf16 %v2332_v46  ;;  %v2783_v17 = vunpack.c.l.bf16 %v2333_v59  ;;  %v2340_v59 = vld [vmem:[%s2697_s20 + $0x60] sm:$0xf] }
  0x55   : > { %v2785_v18 = vunpack.c.l.bf16 %v2334_v60  ;;  %v2787_v19 = vunpack.c.l.bf16 %v2335_v61  ;;  %v643_v20 = vadd.f32 %v635_v54, %v626_v51  ;;  %v2789_v21 = vunpack.c.l.bf16 %v2336_v11  ;;  %v2343_v11 = vld [vmem:[%s2697_s20 + $0x78] sm:$0xf] }
  0x56   : > { %4155 = vst [vmem:[#allocation3_spill] sm:$0xff] %v2776_v15  ;;  %v664_v22 = vmul.f32 %v2692_v48, %v4066_v13  ;;  %v665_v23 = vmul.f32 %v2692_v48, %v2774_v14  ;;  %v666_v24 = vmul.f32 %v2692_v48, %v2776_v15  ;;  %v667_v25 = vmul.f32 %v2692_v48, %v2781_v47 }
  0x57   : > { %4157 = vst [vmem:[#allocation5_spill] sm:$0xff] %v2781_v47  ;;  %v668_v26 = vmul.f32 %v2692_v48, %v2783_v17  ;;  %v669_v27 = vmul.f32 %v2692_v48, %v2785_v18  ;;  %v4069_v28 = vunpack.c.l.bf16 %v2779_v16  ;;  %v670_v29 = vmul.f32 %v2692_v48, %v2787_v19 }
  0x58   : > { %4158 = vst [vmem:[#allocation6_spill] sm:$0xff] %v2783_v17  ;;  %v671_v30 = vmul.f32 %v2692_v48, %v2789_v21  ;;  %v672_v31 = vadd.f32 %v664_v22, %v636_v55  ;;  %v673_v32 = vadd.f32 %v665_v23, %v637_v56  ;;  %v674_v33 = vadd.f32 %v666_v24, %v638_v0  ;;  %v2822_v55 = vld [vmem:[%s2697_s20 + $0x50] sm:$0xf]  ;;  %v2339_v56 = vld [vmem:[%s2697_s20 + $0x58] sm:$0xf] }
  0x59   : > { %4159 = vst [vmem:[#allocation7_spill] sm:$0xff] %v2785_v18  ;;  %v675_v35 = vadd.f32 %v667_v25, %v639_v8  ;;  %v676_v36 = vadd.f32 %v668_v26, %v640_v9  ;;  %v677_v37 = vadd.f32 %v669_v27, %v641_v10  ;;  %v678_v38 = vadd.f32 %v670_v29, %v642_v12  ;;  %v2341_v9 = vld [vmem:[%s2697_s20 + $0x68] sm:$0xf]  ;;  %v2342_v10 = vld [vmem:[%s2697_s20 + $0x70] sm:$0xf] }
  0x5a   : > { %4160 = vst [vmem:[#allocation8_spill] sm:$0xff] %v2787_v19  ;;  %v681_v39 = vmul.f32 %v2695_v49, %v2774_v14  ;;  %v682_v45 = vmul.f32 %v2695_v49, %v2776_v15  ;;  %v683_v48 = vmul.f32 %v2695_v49, %v2781_v47  ;;  %v684_v46 = vmul.f32 %v2695_v49, %v2783_v17  ;;  %v2344_v25 = vld [vmem:[%s2697_s20 + $0x80] sm:$0xf]  ;;  %v2345_v26 = vld [vmem:[%s2697_s20 + $0x88] sm:$0xf] }
  0x5b   : > { %4161 = vst [vmem:[#allocation9_spill] sm:$0xff] %v2789_v21  ;;  %v685_v51 = vmul.f32 %v2695_v49, %v2785_v18  ;;  %v686_v54 = vmul.f32 %v2695_v49, %v2787_v19  ;;  %v679_v60 = vadd.f32 %v671_v30, %v643_v20  ;;  %v687_v61 = vmul.f32 %v2695_v49, %v2789_v21  ;;  %v2346_v27 = vld [vmem:[%s2697_s20 + $0x90] sm:$0xf]  ;;  %v3017_v18 = vld [vmem:[%s2697_s20 + $0xa4] sm:$0x1] }
  0x5c   : > { %4162 = vst [vmem:[#allocation10_spill] sm:$0xff] %v2822_v55  ;;  %v688_v0 = vmul.f32 %v2695_v49, %v4069_v28  ;;  %v689_v8 = vadd.f32 %v681_v39, %v672_v31  ;;  %v690_v12 = vadd.f32 %v682_v45, %v673_v32  ;;  %v691_v22 = vadd.f32 %v683_v48, %v674_v33 }
  0x5d   : > { %v692_v23 = vadd.f32 %v684_v46, %v675_v35  ;;  %v693_v24 = vadd.f32 %v685_v51, %v676_v36  ;;  %v694_v29 = vadd.f32 %v686_v54, %v677_v37  ;;  %v695_v20 = vadd.f32 %v687_v61, %v678_v38  ;;  %4193 = vst [vmem:[#allocation36_spill] sm:$0xff] %v3017_v18 }
  0x5e   : > { %v4068_v30 = vunpack.c.l.bf16 %v2822_v55  ;;  %v2838_v13 = vunpack.c.l.bf16 %v2339_v56  ;;  %v2840_v7 = vunpack.c.l.bf16 %v2340_v59  ;;  %v2842_v49 = vunpack.c.l.bf16 %v2341_v9  ;;  %v2872_v9 = vld [vmem:[%s2697_s20 + $0x98] sm:$0xf]  ;;  %v2354_v55 = vld [vmem:[%s2697_s20 + $0x120] sm:$0xf] }
  0x5f   : > { %v2844_v31 = vunpack.c.l.bf16 %v2342_v10  ;;  %v2846_v39 = vunpack.c.l.bf16 %v2343_v11  ;;  %v696_v32 = vadd.f32 %v688_v0, %v679_v60  ;;  %v2848_v33 = vunpack.c.l.bf16 %v2344_v25  ;;  %4171 = vst [vmem:[#allocation19_spill] sm:$0xff] %v2872_v9 }
  0x60   : > { %4163 = vst [vmem:[#allocation11_spill] sm:$0xff] %v2838_v13  ;;  %v2850_v35 = vunpack.c.l.bf16 %v2345_v26  ;;  %v2852_v36 = vunpack.c.l.bf16 %v2346_v27  ;;  %v719_v37 = vmul.f32 %v2704_v52, %v4068_v30  ;;  %v720_v38 = vmul.f32 %v2704_v52, %v2838_v13 }
  0x61   : > { %4164 = vst [vmem:[#allocation12_spill] sm:$0xff] %v2840_v7  ;;  %v721_v45 = vmul.f32 %v2704_v52, %v2840_v7  ;;  %v722_v48 = vmul.f32 %v2704_v52, %v2842_v49  ;;  %v723_v46 = vmul.f32 %v2704_v52, %v2844_v31  ;;  %v724_v51 = vmul.f32 %v2704_v52, %v2846_v39 }
  0x62   : > { %4165 = vst [vmem:[#allocation13_spill] sm:$0xff] %v2842_v49  ;;  %v725_v54 = vmul.f32 %v2704_v52, %v2848_v33  ;;  %v726_v56 = vmul.f32 %v2704_v52, %v2850_v35  ;;  %v727_v59 = vadd.f32 %v719_v37, %v689_v8  ;;  %v728_v60 = vadd.f32 %v720_v38, %v690_v12  ;;  %v2350_v37 = vld [vmem:[%s2697_s20 + $0x100] sm:$0xf] }
  0x63   : > { %4166 = vst [vmem:[#allocation14_spill] sm:$0xff] %v2844_v31  ;;  %v729_v61 = vadd.f32 %v721_v45, %v691_v22  ;;  %v730_v0 = vadd.f32 %v722_v48, %v692_v23  ;;  %v731_v10 = vadd.f32 %v723_v46, %v693_v24  ;;  %v732_v11 = vadd.f32 %v724_v51, %v694_v29  ;;  %v2353_v29 = vld [vmem:[%s2697_s20 + $0x118] sm:$0xf] }
  0x64   : > { %4167 = vst [vmem:[#allocation15_spill] sm:$0xff] %v2846_v39  ;;  %v733_v25 = vadd.f32 %v725_v54, %v695_v20  ;;  %v734_v26 = vadd.f32 %v726_v56, %v696_v32  ;;  %v736_v27 = vmul.f32 %v2707_v53, %v2838_v13  ;;  %v737_v30 = vmul.f32 %v2707_v53, %v2840_v7  ;;  %v2892_v20 = vld [vmem:[%s2697_s20 + $0xf0] sm:$0xf]  ;;  %v2349_v32 = vld [vmem:[%s2697_s20 + $0xf8] sm:$0xf] }
  0x65   : > { %4168 = vst [vmem:[#allocation16_spill] sm:$0xff] %v2848_v33  ;;  %v738_v52 = vmul.f32 %v2707_v53, %v2842_v49  ;;  %v739_v8 = vmul.f32 %v2707_v53, %v2844_v31  ;;  %v740_v12 = vmul.f32 %v2707_v53, %v2846_v39  ;;  %v741_v22 = vmul.f32 %v2707_v53, %v2848_v33  ;;  %v2352_v13 = vld [vmem:[%s2697_s20 + $0x110] sm:$0xf] }
  0x66   : > { %4169 = vst [vmem:[#allocation17_spill] sm:$0xff] %v2850_v35  ;;  %v742_v23 = vmul.f32 %v2707_v53, %v2850_v35  ;;  %v743_v24 = vmul.f32 %v2707_v53, %v2852_v36  ;;  %v744_v38 = vadd.f32 %v736_v27, %v727_v59  ;;  %v745_v45 = vadd.f32 %v737_v30, %v728_v60 }
  0x67   : > { %4170 = vst [vmem:[#allocation18_spill] sm:$0xff] %v2852_v36  ;;  %v746_v48 = vadd.f32 %v738_v52, %v729_v61  ;;  %v747_v46 = vadd.f32 %v739_v8, %v730_v0  ;;  %v748_v51 = vadd.f32 %v740_v12, %v731_v10  ;;  %v749_v54 = vadd.f32 %v741_v22, %v732_v11  ;;  %v2355_v52 = vld [vmem:[%s2697_s20 + $0x128] sm:$0xf]  ;;  %v2917_v8 = vld [vmem:[%s2697_s20 + $0x130] sm:$0xf] }
  0x68   : > { %4172 = vst [vmem:[#allocation20_spill] sm:$0xff] %v2892_v20  ;;  %v750_v56 = vadd.f32 %v742_v23, %v733_v25  ;;  %v752_v28 = vperm.slane %v2686_v44, 1  ;;  %v751_v53 = vadd.f32 %v743_v24, %v734_v26  ;;  %v2902_v21 = vunpack.c.l.bf16 %v2349_v32 }
  0x69   : > { %v2904_v59 = vunpack.c.l.bf16 %v2350_v37  ;;  %v4175_v26 = vunpack.c.l.bf16 %v2872_v9  ;;  %4176 = vst [vmem:[#allocation23_spill] sm:$0xff] %v2917_v8  ;;  %v2919_v12 = vunpack.c.l.bf16 %v2351_v57  ;;  %v2921_v22 = vunpack.c.l.bf16 %v2352_v13 }
  0x6a   : > { %4173 = vst [vmem:[#allocation21_spill] sm:$0xff] %v2902_v21  ;;  %v753_v30 = vmul.f32 %v752_v28, %v2840_v7  ;;  %v754_v60 = vmul.f32 %v752_v28, %v2842_v49  ;;  %v755_v61 = vmul.f32 %v752_v28, %v2844_v31  ;;  %v756_v0 = vmul.f32 %v752_v28, %v2846_v39  ;;  %v3012_v31 = vld [vmem:[%s2697_s20 + $0x4c] sm:$0x1] }
  0x6b   : > { %4174 = vst [vmem:[#allocation22_spill] sm:$0xff] %v2904_v59  ;;  %v757_v10 = vmul.f32 %v752_v28, %v2848_v33  ;;  %v758_v11 = vmul.f32 %v752_v28, %v2850_v35  ;;  %v759_v25 = vmul.f32 %v752_v28, %v2852_v36  ;;  %v760_v27 = vmul.f32 %v752_v28, %v4175_v26 }
  0x6c   : > { %4177 = vst [vmem:[#allocation24_spill] sm:$0xff] %v2919_v12  ;;  %v2923_v23 = vunpack.c.l.bf16 %v2353_v29  ;;  %v2925_v24 = vunpack.c.l.bf16 %v2354_v55  ;;  %v761_v32 = vadd.f32 %v753_v30, %v744_v38  ;;  %v762_v37 = vadd.f32 %v754_v60, %v745_v45 }
  0x6d   : > { %4178 = vst [vmem:[#allocation25_spill] sm:$0xff] %v2921_v22  ;;  %v763_v16 = vadd.f32 %v755_v61, %v746_v48  ;;  %v764_v35 = vadd.f32 %v756_v0, %v747_v46  ;;  %v765_v33 = vadd.f32 %v757_v10, %v748_v51  ;;  %v766_v36 = vadd.f32 %v758_v11, %v749_v54 }
  0x6e   : > { %4179 = vst [vmem:[#allocation26_spill] sm:$0xff] %v2923_v23  ;;  %v2927_v39 = vunpack.c.l.bf16 %v2355_v52  ;;  %v788_v28 = vperm.slane %v2671_v41, 1  ;;  %v767_v26 = vadd.f32 %v759_v25, %v750_v56  ;;  %v768_v9 = vadd.f32 %v760_v27, %v751_v53  ;;  %v2942_v27 = vld [vmem:[%s2697_s20 + $0x4] sm:$0x1]  ;;  %v823_v52 = vld [vmem:[%s2697_s20 + $0xc] sm:$0x1] }
  0x6f   : > { %4180 = vst [vmem:[#allocation27_spill] sm:$0xff] %v2925_v24  ;;  %v805_v13 = vperm.slane %v2681_v43, 1  ;;  %v4182_v29 = vunpack.c.l.bf16 %v2892_v20 }
  0x70   : > { %4181 = vst [vmem:[#allocation28_spill] sm:$0xff] %v2927_v39  ;;  %v790_v38 = vmul.f32 %v788_v28, %v2902_v21  ;;  %v791_v45 = vmul.f32 %v788_v28, %v2904_v59  ;;  %v792_v48 = vmul.f32 %v788_v28, %v2919_v12  ;;  %v793_v46 = vmul.f32 %v788_v28, %v2921_v22 }
  0x71   : > { %v789_v55 = vmul.f32 %v788_v28, %v4182_v29  ;;  %v794_v51 = vmul.f32 %v788_v28, %v2923_v23  ;;  %v795_v54 = vmul.f32 %v788_v28, %v2925_v24  ;;  %v796_v56 = vmul.f32 %v788_v28, %v2927_v39  ;;  %4183 = vst [vmem:[#allocation29_spill] sm:$0xff] %v2942_v27  ;;  %v824_v29 = vld [vmem:[%s2697_s20 + $0x14] sm:$0x1] }
  0x72   : > { %v798_v30 = vadd.f32 %v790_v38, %v762_v37  ;;  %v799_v60 = vadd.f32 %v791_v45, %v763_v16  ;;  %v800_v61 = vadd.f32 %v792_v48, %v764_v35  ;;  %v801_v0 = vadd.f32 %v793_v46, %v765_v33  ;;  %v825_v33 = vld [vmem:[%s2697_s20 + $0x1c] sm:$0x1]  ;;  %4192 = vst [vmem:[#allocation35_spill] sm:$0xff] %v3012_v31 }
  0x73   : > { %v797_v53 = vadd.f32 %v789_v55, %v761_v32  ;;  %v802_v10 = vadd.f32 %v794_v51, %v766_v36  ;;  %v803_v11 = vadd.f32 %v795_v54, %v767_v26  ;;  %v804_v25 = vadd.f32 %v796_v56, %v768_v9  ;;  %v826_v26 = vld [vmem:[%s2697_s20 + $0x24] sm:$0x1]  ;;  %v827_v55 = vld [vmem:[%s2697_s20 + $0x2c] sm:$0x1]  ;;  %v828_v56 = vld [vmem:[%s2697_s20 + $0x34] sm:$0x1] }
  0x74   : > { %v806_v57 = vmul.f32 %v805_v13, %v2902_v21  ;;  %v807_v20 = vmul.f32 %v805_v13, %v2904_v59  ;;  %v808_v32 = vmul.f32 %v805_v13, %v2919_v12  ;;  %v809_v16 = vmul.f32 %v805_v13, %v2921_v22 }
  0x75   : > { %v810_v35 = vmul.f32 %v805_v13, %v2923_v23  ;;  %v811_v36 = vmul.f32 %v805_v13, %v2925_v24  ;;  %v812_v9 = vmul.f32 %v805_v13, %v2927_v39  ;;  %v4184_v37 = vunpack.c.l.bf16 %v2917_v8  ;;  %v829_v24 = vld [vmem:[%s2697_s20 + $0x3c] sm:$0x1]  ;;  %v830_v39 = vld [vmem:[%s2697_s20 + $0x44] sm:$0x1] }
  0x76   : > { %v2959_v45 = vunpack.c.l.bf16 %v823_v52  ;;  %v2961_v48 = vunpack.c.l.bf16 %v824_v29  ;;  %v2963_v46 = vadd.f32 %v806_v57, %v797_v53  ;;  %v2965_v51 = vadd.f32 %v807_v20, %v798_v30 }
  0x77   : > { %v813_v28 = vmul.f32 %v805_v13, %v4184_v37  ;;  %v2967_v54 = vadd.f32 %v808_v32, %v799_v60  ;;  %v2972_v23 = vunpack.c.l.bf16 %v825_v33  ;;  %v817_v13 = vadd.f32 %v809_v16, %v800_v61 }
  0x78   : > { %4185 = vst [vmem:[#allocation30_spill] sm:$0xff] %v2959_v45  ;;  %v818_v37 = vadd.f32 %v810_v35, %v801_v0  ;;  %v2974_v8 = vadd.f32 %v811_v36, %v802_v10  ;;  %v2976_v38 = vadd.f32 %v812_v9, %v803_v11  ;;  %v2980_v29 = vunpack.c.l.bf16 %v826_v26 }
  0x79   : > { %v2978_v52 = vadd.f32 %v813_v28, %v804_v25  ;;  %v2982_v57 = vunpack.c.l.bf16 %v827_v55  ;;  %v842_v20 = vperm.slane %v2666_v40, 2  ;;  %v2985_v53 = vunpack.c.l.bf16 %v828_v56 }
  0x7a   : > { %v2987_v30 = vunpack.c.l.bf16 %v829_v24  ;;  %v2989_v60 = vunpack.c.l.bf16 %v830_v39  ;;  %v4190_v61 = vunpack.c.l.bf16 %v2700_v50  ;;  %v4191_v10 = vunpack.c.l.bf16 %v2942_v27 }
  0x7b   : > { %4186 = vst [vmem:[#allocation31_spill] sm:$0xff] %v2982_v57  ;;  %v845_v25 = vmul.f32 %v842_v20, %v2713_v58  ;;  %v846_v32 = vmul.f32 %v842_v20, %v2959_v45  ;;  %v847_v16 = vmul.f32 %v842_v20, %v2718_v62  ;;  %v848_v40 = vmul.f32 %v842_v20, %v2961_v48 }
  0x7c   : > { %4187 = vst [vmem:[#allocation32_spill] sm:$0xff] %v2985_v53  ;;  %v843_v0 = vmul.f32 %v842_v20, %v4190_v61  ;;  %v844_v11 = vmul.f32 %v842_v20, %v4191_v10  ;;  %v849_v24 = vmul.f32 %v842_v20, %v2720_v63  ;;  %v850_v39 = vmul.f32 %v842_v20, %v2972_v23 }
  0x7d   : > { %4188 = vst [vmem:[#allocation33_spill] sm:$0xff] %v2987_v30  ;;  %v851_v33 = vmul.f32 %v842_v20, %v2726_v2  ;;  %v852_v50 = vmul.f32 %v842_v20, %v2980_v29  ;;  %v853_v35 = vmul.f32 %v842_v20, %v2728_v3  ;;  %v3005_v36 = vperm.slane %v2676_v42, 2 }
  0x7e   : > { %4189 = vst [vmem:[#allocation34_spill] sm:$0xff] %v2989_v60  ;;  %v854_v9 = vmul.f32 %v842_v20, %v2982_v57  ;;  %v855_v28 = vmul.f32 %v842_v20, %v2730_v4  ;;  %v856_v26 = vmul.f32 %v842_v20, %v2985_v53  ;;  %v857_v55 = vmul.f32 %v842_v20, %v2732_v5 }
  0x7f   : > { %v876_v56 = vrot.slane %v843_v0, 1  ;;  %v877_v61 = vrot.slane %v844_v11, 1  ;;  %v879_v10 = vrot.slane %v845_v25, 1  ;;  %v880_v27 = vrot.slane %v846_v32, 1 }
  0x80   : > { %v882_v22 = vrot.slane %v847_v16, 1  ;;  %v883_v12 = vrot.slane %v848_v40, 1  ;;  %v885_v59 = vrot.slane %v849_v24, 1  ;;  %v886_v21 = vrot.slane %v850_v39, 1 }
  0x81   : > { %v858_v42 = vmul.f32 %v842_v20, %v2987_v30  ;;  %v878_v49 = vsel %vm875_vm0, %v876_v56, %v877_v61  ;;  %v888_v7 = vrot.slane %v851_v33, 1  ;;  %v889_v19 = vrot.slane %v852_v50, 1 }
  0x82   : > { %v881_v17 = vsel %vm875_vm0, %v879_v10, %v880_v27  ;;  %v884_v0 = vsel %vm875_vm0, %v882_v22, %v883_v12  ;;  %v891_v11 = vrot.slane %v853_v35, 1  ;;  %v892_v25 = vrot.slane %v854_v9, 1 }
  0x83   : > { %v887_v32 = vsel %vm875_vm0, %v885_v59, %v886_v21  ;;  %v890_v16 = vsel %vm875_vm0, %v888_v7, %v889_v19  ;;  %v894_v40 = vrot.slane %v855_v28, 1  ;;  %v895_v24 = vrot.slane %v856_v26, 1 }
  0x84   : > { %v897_v39 = vrot.slane %v857_v55, 1  ;;  %v3025_v33 = vperm.slane %v2686_v44, 2  ;;  %v893_v27 = vsel %vm875_vm0, %v891_v11, %v892_v25  ;;  %v898_v56 = vrot.slane %v858_v42, 1 }
  0x85   : > { %v908_v12 = vadd.f32 %v878_v49, %v2963_v46  ;;  %v909_v22 = vadd.f32 %v881_v17, %v2965_v51  ;;  %v896_v21 = vsel %vm875_vm0, %v894_v40, %v895_v24  ;;  %v910_v7 = vadd.f32 %v884_v0, %v2967_v54 }
  0x86   : > { %v911_v19 = vadd.f32 %v887_v32, %v817_v13  ;;  %v912_v59 = vadd.f32 %v890_v16, %v818_v37  ;;  %v917_v35 = vmul.f32 %v3005_v36, %v2713_v58  ;;  %v918_v44 = vmul.f32 %v3005_v36, %v2959_v45 }
  0x87   : > { %v919_v9 = vmul.f32 %v3005_v36, %v2718_v62  ;;  %v920_v49 = vmul.f32 %v3005_v36, %v2961_v48  ;;  %v921_v17 = vmul.f32 %v3005_v36, %v2720_v63  ;;  %v922_v46 = vmul.f32 %v3005_v36, %v2972_v23 }
  0x88   : > { %v923_v51 = vmul.f32 %v3005_v36, %v2726_v2  ;;  %v924_v58 = vmul.f32 %v3005_v36, %v2980_v29  ;;  %v899_v54 = vsel %vm875_vm0, %v897_v39, %v898_v56  ;;  %v925_v13 = vmul.f32 %v3005_v36, %v2728_v3 }
  0x89   : > { %v926_v37 = vmul.f32 %v3005_v36, %v2982_v57  ;;  %v927_v28 = vmul.f32 %v3005_v36, %v2730_v4  ;;  %v928_v26 = vmul.f32 %v3005_v36, %v2985_v53  ;;  %v929_v55 = vmul.f32 %v3005_v36, %v2732_v5 }
  0x8a   : > { %v930_v61 = vmul.f32 %v3005_v36, %v2987_v30  ;;  %v931_v10 = vmul.f32 %v3005_v36, %v2734_v6  ;;  %v949_v42 = vrot.slane %v917_v35, 1  ;;  %v950_v0 = vrot.slane %v918_v44, 1 }
  0x8b   : > { %v952_v11 = vrot.slane %v919_v9, 1  ;;  %v953_v25 = vrot.slane %v920_v49, 1  ;;  %v955_v32 = vrot.slane %v921_v17, 1  ;;  %v956_v16 = vrot.slane %v922_v46, 1 }
  0x8c   : > { %v958_v40 = vrot.slane %v923_v51, 1  ;;  %v959_v24 = vrot.slane %v924_v58, 1  ;;  %v932_v39 = vmul.f32 %v3005_v36, %v2989_v60  ;;  %v951_v56 = vsel %vm875_vm0, %v949_v42, %v950_v0 }
  0x8d   : > { %v961_v50 = vrot.slane %v925_v13, 1  ;;  %v962_v20 = vrot.slane %v926_v37, 1  ;;  %v954_v45 = vsel %vm875_vm0, %v952_v11, %v953_v25  ;;  %v957_v47 = vsel %vm875_vm0, %v955_v32, %v956_v16 }
  0x8e   : > { %v964_v15 = vrot.slane %v927_v28, 1  ;;  %v965_v35 = vrot.slane %v928_v26, 1  ;;  %v960_v44 = vsel %vm875_vm0, %v958_v40, %v959_v24  ;;  %v967_v49 = vrot.slane %v929_v55, 1  ;;  %v2358_v24 = vld [vmem:[%s2697_s20 + $0xac] sm:$0x1] }
  0x8f   : > { %v963_v9 = vsel %vm875_vm0, %v961_v50, %v962_v20  ;;  %v968_v17 = vrot.slane %v930_v61, 1  ;;  %v913_v46 = vadd.f32 %v893_v27, %v2974_v8  ;;  %v914_v36 = vadd.f32 %v896_v21, %v2976_v38 }
  0x90   : > { %v915_v51 = vadd.f32 %v899_v54, %v2978_v52  ;;  %v970_v58 = vrot.slane %v931_v10, 1  ;;  %v966_v13 = vsel %vm875_vm0, %v964_v15, %v965_v35  ;;  %v971_v37 = vrot.slane %v932_v39, 1 }
  0x91   : > { %v981_v42 = vadd.f32 %v951_v56, %v908_v12  ;;  %v982_v0 = vadd.f32 %v954_v45, %v909_v22  ;;  %v969_v28 = vsel %vm875_vm0, %v967_v49, %v968_v17  ;;  %v983_v26 = vadd.f32 %v957_v47, %v910_v7 }
  0x92   : > { %v984_v11 = vadd.f32 %v960_v44, %v911_v19  ;;  %v985_v25 = vadd.f32 %v963_v9, %v912_v59  ;;  %v990_v20 = vmul.f32 %v3025_v33, %v2718_v62  ;;  %v991_v8 = vmul.f32 %v3025_v33, %v2961_v48 }
  0x93   : > { %v992_v38 = vmul.f32 %v3025_v33, %v2720_v63  ;;  %v993_v15 = vmul.f32 %v3025_v33, %v2972_v23  ;;  %v994_v45 = vmul.f32 %v3025_v33, %v2726_v2  ;;  %v995_v47 = vmul.f32 %v3025_v33, %v2980_v29 }
  0x94   : > { %v996_v52 = vmul.f32 %v3025_v33, %v2728_v3  ;;  %v997_v62 = vmul.f32 %v3025_v33, %v2982_v57  ;;  %v998_v50 = vmul.f32 %v3025_v33, %v2730_v4  ;;  %v999_v63 = vmul.f32 %v3025_v33, %v2985_v53 }
  0x95   : > { %v1000_v27 = vmul.f32 %v3025_v33, %v2732_v5  ;;  %v1001_v2 = vmul.f32 %v3025_v33, %v2987_v30  ;;  %v1002_v12 = vmul.f32 %v3025_v33, %v2734_v6  ;;  %v1003_v3 = vmul.f32 %v3025_v33, %v2989_v60 }
  0x96   : > { %v4194_v22 = vunpack.c.l.bf16 %v2724_v1  ;;  %v4195_v21 = vunpack.c.l.bf16 %v3012_v31  ;;  %v1022_v19 = vrot.slane %v990_v20, 1  ;;  %v1023_v5 = vrot.slane %v991_v8, 1  ;;  %v2359_v8 = vld [vmem:[%s2697_s20 + $0xb4] sm:$0x1] }
  0x97   : > { %v1025_v59 = vrot.slane %v992_v38, 1  ;;  %v1026_v54 = vrot.slane %v993_v15, 1  ;;  %v1028_v55 = vrot.slane %v994_v45, 1  ;;  %v1029_v61 = vrot.slane %v995_v47, 1  ;;  %v2360_v38 = vld [vmem:[%s2697_s20 + $0xbc] sm:$0x1] }
  0x98   : > { %v1004_v4 = vmul.f32 %v3025_v33, %v4194_v22  ;;  %v1005_v7 = vmul.f32 %v3025_v33, %v4195_v21  ;;  %v1031_v10 = vrot.slane %v996_v52, 1  ;;  %v1032_v6 = vrot.slane %v997_v62, 1 }
  0x99   : > { %v972_v32 = vsel %vm875_vm0, %v970_v58, %v971_v37  ;;  %v1024_v16 = vsel %vm875_vm0, %v1022_v19, %v1023_v5  ;;  %v1034_v1 = vrot.slane %v998_v50, 1  ;;  %v1035_v40 = vrot.slane %v999_v63, 1  ;;  %v2361_v50 = vld [vmem:[%s2697_s20 + $0xc4] sm:$0x1]  ;;  %v2362_v63 = vld [vmem:[%s2697_s20 + $0xcc] sm:$0x1] }
  0x9a   : > { %v1027_v39 = vsel %vm875_vm0, %v1025_v59, %v1026_v54  ;;  %v1030_v33 = vsel %vm875_vm0, %v1028_v55, %v1029_v61  ;;  %v1037_v56 = vrot.slane %v1000_v27, 1  ;;  %v1038_v35 = vrot.slane %v1001_v2, 1 }
  0x9b   : > { %v1033_v44 = vsel %vm875_vm0, %v1031_v10, %v1032_v6  ;;  %v1040_v9 = vrot.slane %v1002_v12, 1  ;;  %v1041_v49 = vrot.slane %v1003_v3, 1  ;;  %v1043_v17 = vrot.slane %v1004_v4, 1  ;;  %v2363_v12 = vld [vmem:[%s2697_s20 + $0xd4] sm:$0x1] }
  0x9c   : > { %v986_v58 = vadd.f32 %v966_v13, %v913_v46  ;;  %v1036_v37 = vsel %vm875_vm0, %v1034_v1, %v1035_v40  ;;  %v1044_v20 = vrot.slane %v1005_v7, 1  ;;  %v3119_v15 = vunpack.c.l.bf16 %v2358_v24  ;;  %v2364_v3 = vld [vmem:[%s2697_s20 + $0xdc] sm:$0x1]  ;;  %v4208_v24 = vld [vmem:[#allocation7_spill] sm:$0xff] }
  0x9d   : > { %v987_v45 = vadd.f32 %v969_v28, %v914_v36  ;;  %v988_v47 = vadd.f32 %v972_v32, %v915_v51  ;;  %v1039_v52 = vsel %vm875_vm0, %v1037_v56, %v1038_v35  ;;  %v3122_v62 = vadd.f32 %v1024_v16, %v981_v42  ;;  %v4206_v32 = vld [vmem:[#allocation5_spill] sm:$0xff]  ;;  %v4209_v56 = vld [vmem:[#allocation8_spill] sm:$0xff] }
  0x9e   : > { %4196 = vst [vmem:[#allocation37_spill] sm:$0xff] %v3119_v15  ;;  %v1042_v27 = vsel %vm875_vm0, %v1040_v9, %v1041_v49  ;;  %v1055_v46 = vadd.f32 %v1027_v39, %v982_v0  ;;  %v1056_v13 = vadd.f32 %v1030_v33, %v983_v26  ;;  %v1057_v2 = vadd.f32 %v1033_v44, %v984_v11  ;;  %v4210_v9 = vld [vmem:[#allocation9_spill] sm:$0xff] }
  0x9f   : > { %v1045_v22 = vsel %vm875_vm0, %v1043_v17, %v1044_v20  ;;  %v1058_v4 = vadd.f32 %v1036_v37, %v985_v25  ;;  %v3130_v21 = vunpack.c.l.bf16 %v2359_v8  ;;  %v3132_v36 = vunpack.c.l.bf16 %v2360_v38 }
  0xa0   : > { %v1059_v51 = vadd.f32 %v1039_v52, %v986_v58  ;;  %v3134_v28 = vunpack.c.l.bf16 %v2361_v50  ;;  %v3136_v42 = vunpack.c.l.bf16 %v2362_v63  ;;  %v1080_v7 = vperm.slane %v2671_v41, 2  ;;  %v4205_v41 = vld [vmem:[#allocation3_spill] sm:$0xff] }
  0xa1   : > { %4197 = vst [vmem:[#allocation38_spill] sm:$0xff] %v3130_v21  ;;  %v3139_v19 = vadd.f32 %v1042_v27, %v987_v45  ;;  %v3141_v0 = vunpack.c.l.bf16 %v2363_v12  ;;  %v3143_v26 = vunpack.c.l.bf16 %v2364_v3  ;;  %v3146_v11 = vperm.slane %v2681_v43, 2  ;;  %v4207_v43 = vld [vmem:[#allocation6_spill] sm:$0xff]  ;;  %v3167_v63 = vld [vmem:[%s2697_s20 + $0xe4] sm:$0x1] }
  0xa2   : > { %4198 = vst [vmem:[#allocation39_spill] sm:$0xff] %v3132_v36  ;;  %v4203_v25 = vunpack.c.l.bf16 %v2758_v34  ;;  %v4204_v59 = vunpack.c.l.bf16 %v3017_v18  ;;  %v1083_v55 = vmul.f32 %v1080_v7, %v2774_v14  ;;  %v1084_v61 = vmul.f32 %v1080_v7, %v3119_v15  ;;  %v3301_v18 = vld [vmem:[%s2697_s20 + $0xf4] sm:$0x1] }
  0xa3   : > { %4199 = vst [vmem:[#allocation40_spill] sm:$0xff] %v3134_v28  ;;  %v1085_v10 = vmul.f32 %v1080_v7, %v4205_v41  ;;  %v1086_v6 = vmul.f32 %v1080_v7, %v3130_v21  ;;  %v1087_v16 = vmul.f32 %v1080_v7, %v4206_v32  ;;  %v1088_v1 = vmul.f32 %v1080_v7, %v3132_v36 }
  0xa4   : > { %4200 = vst [vmem:[#allocation41_spill] sm:$0xff] %v3136_v42  ;;  %v1081_v5 = vmul.f32 %v1080_v7, %v4203_v25  ;;  %v1082_v54 = vmul.f32 %v1080_v7, %v4204_v59  ;;  %v1089_v40 = vmul.f32 %v1080_v7, %v4207_v43  ;;  %v1090_v34 = vmul.f32 %v1080_v7, %v3134_v28 }
  0xa5   : > { %4201 = vst [vmem:[#allocation42_spill] sm:$0xff] %v3141_v0  ;;  %v1091_v39 = vmul.f32 %v1080_v7, %v4208_v24  ;;  %v1092_v33 = vmul.f32 %v1080_v7, %v3136_v42  ;;  %v1093_v35 = vmul.f32 %v1080_v7, %v4209_v56  ;;  %v1094_v44 = vmul.f32 %v1080_v7, %v3141_v0 }
  0xa6   : > { %4202 = vst [vmem:[#allocation43_spill] sm:$0xff] %v3143_v26  ;;  %v1095_v49 = vmul.f32 %v1080_v7, %v4210_v9  ;;  %v1096_v17 = vmul.f32 %v1080_v7, %v3143_v26  ;;  %v1113_v58 = vrot.slane %v1081_v5, 1  ;;  %v1114_v37 = vrot.slane %v1082_v54, 1 }
  0xa7   : > { %v1116_v20 = vrot.slane %v1083_v55, 1  ;;  %v1117_v8 = vrot.slane %v1084_v61, 1  ;;  %v1119_v38 = vrot.slane %v1085_v10, 1  ;;  %v1120_v45 = vrot.slane %v1086_v6, 1  ;;  %4211 = vst [vmem:[#allocation3_spill] sm:$0xff] %v3167_v63 }
  0xa8   : > { %v1122_v52 = vrot.slane %v1087_v16, 1  ;;  %v1123_v50 = vrot.slane %v1088_v1, 1  ;;  %v1115_v27 = vsel %vm875_vm0, %v1113_v58, %v1114_v37  ;;  %v1125_v3 = vrot.slane %v1089_v40, 1 }
  0xa9   : > { %v1118_v12 = vsel %vm875_vm0, %v1116_v20, %v1117_v8  ;;  %v1126_v25 = vrot.slane %v1090_v34, 1  ;;  %v1121_v59 = vsel %vm875_vm0, %v1119_v38, %v1120_v45  ;;  %v1128_v5 = vrot.slane %v1091_v39, 1 }
  0xaa   : > { %v1124_v7 = vsel %vm875_vm0, %v1122_v52, %v1123_v50  ;;  %v1129_v54 = vrot.slane %v1092_v33, 1  ;;  %v1131_v61 = vrot.slane %v1093_v35, 1  ;;  %v1132_v10 = vrot.slane %v1094_v44, 1 }
  0xab   : > { %v1127_v55 = vsel %vm875_vm0, %v1125_v3, %v1126_v25  ;;  %v1134_v6 = vrot.slane %v1095_v49, 1  ;;  %v1061_v16 = vadd.f32 %v1045_v22, %v988_v47  ;;  %v4121_v1 = vunpack.c.l.bf16 %v3167_v63  ;;  %v4212_v49 = vld [vmem:[#allocation4_spill] sm:$0xff] }
  0xac   : > { %v1130_v58 = vsel %vm875_vm0, %v1128_v5, %v1129_v54  ;;  %v1135_v37 = vrot.slane %v1096_v17, 1  ;;  %v1133_v40 = vsel %vm875_vm0, %v1131_v61, %v1132_v10  ;;  %v1145_v34 = vadd.f32 %v1115_v27, %v3122_v62  ;;  %v2366_v61 = vld [vmem:[%s2697_s20 + $0x54] sm:$0x1] }
  0xad   : > { %v1146_v20 = vadd.f32 %v1118_v12, %v1055_v46  ;;  %v1147_v8 = vadd.f32 %v1121_v59, %v1056_v13  ;;  %v1148_v33 = vadd.f32 %v1124_v7, %v1057_v2  ;;  %v1149_v38 = vadd.f32 %v1127_v55, %v1058_v4 }
  0xae   : > { %v1136_v39 = vsel %vm875_vm0, %v1134_v6, %v1135_v37  ;;  %v1150_v45 = vadd.f32 %v1130_v58, %v1059_v51  ;;  %v1154_v35 = vmul.f32 %v3146_v11, %v2774_v14  ;;  %v1155_v47 = vmul.f32 %v3146_v11, %v3119_v15  ;;  %v3218_v37 = vld [vmem:[%s2697_s20 + $0x5c] sm:$0x1] }
  0xaf   : > { %v1156_v22 = vmul.f32 %v3146_v11, %v4205_v41  ;;  %v1157_v44 = vmul.f32 %v3146_v11, %v3130_v21  ;;  %v1158_v62 = vmul.f32 %v3146_v11, %v4206_v32  ;;  %v1159_v46 = vmul.f32 %v3146_v11, %v3132_v36 }
  0xb0   : > { %v1160_v13 = vmul.f32 %v3146_v11, %v4207_v43  ;;  %v1161_v14 = vmul.f32 %v3146_v11, %v3134_v28  ;;  %v1162_v2 = vmul.f32 %v3146_v11, %v4208_v24  ;;  %v1163_v4 = vmul.f32 %v3146_v11, %v3136_v42  ;;  %v3296_v42 = vld [vmem:[%s2697_s20 + $0x9c] sm:$0x1] }
  0xb1   : > { %v1164_v51 = vmul.f32 %v3146_v11, %v4209_v56  ;;  %v1165_v41 = vmul.f32 %v3146_v11, %v3141_v0  ;;  %v1166_v32 = vmul.f32 %v3146_v11, %v4210_v9  ;;  %v1167_v43 = vmul.f32 %v3146_v11, %v3143_v26 }
  0xb2   : > { %v4213_v17 = vunpack.c.l.bf16 %v4212_v49  ;;  %v1169_v52 = vmul.f32 %v3146_v11, %v4121_v1  ;;  %v1186_v50 = vrot.slane %v1154_v35, 1  ;;  %v1187_v56 = vrot.slane %v1155_v47, 1  ;;  %v2368_v35 = vld [vmem:[%s2697_s20 + $0x64] sm:$0x1] }
  0xb3   : > { %v1189_v27 = vrot.slane %v1156_v22, 1  ;;  %v1190_v12 = vrot.slane %v1157_v44, 1  ;;  %v1192_v3 = vrot.slane %v1158_v62, 1  ;;  %v1193_v9 = vrot.slane %v1159_v46, 1  ;;  %v2369_v46 = vld [vmem:[%s2697_s20 + $0x6c] sm:$0x1] }
  0xb4   : > { %v1168_v24 = vmul.f32 %v3146_v11, %v4213_v17  ;;  %v1195_v25 = vrot.slane %v1160_v13, 1  ;;  %v1196_v59 = vrot.slane %v1161_v14, 1  ;;  %v1151_v7 = vadd.f32 %v1133_v40, %v3139_v19  ;;  %v2370_v14 = vld [vmem:[%s2697_s20 + $0x74] sm:$0x1] }
  0xb5   : > { %v1152_v5 = vadd.f32 %v1136_v39, %v1061_v16  ;;  %v1198_v54 = vrot.slane %v1162_v2, 1  ;;  %v1199_v55 = vrot.slane %v1163_v4, 1  ;;  %v1188_v10 = vsel %vm875_vm0, %v1186_v50, %v1187_v56  ;;  %v2371_v2 = vld [vmem:[%s2697_s20 + $0x7c] sm:$0x1]  ;;  %v3242_v50 = vld [vmem:[%s2697_s20 + $0x94] sm:$0x1] }
  0xb6   : > { %v1191_v11 = vsel %vm875_vm0, %v1189_v27, %v1190_v12  ;;  %v1201_v6 = vrot.slane %v1164_v51, 1  ;;  %v1202_v58 = vrot.slane %v1165_v41, 1  ;;  %v1194_v47 = vsel %vm875_vm0, %v1192_v3, %v1193_v9 }
  0xb7   : > { %v1204_v22 = vrot.slane %v1166_v32, 1  ;;  %v1205_v19 = vrot.slane %v1167_v43, 1  ;;  %v1207_v16 = vrot.slane %v1168_v24, 1  ;;  %v1197_v40 = vsel %vm875_vm0, %v1195_v25, %v1196_v59  ;;  %v2372_v24 = vld [vmem:[%s2697_s20 + $0x84] sm:$0x1] }
  0xb8   : > { %v1200_v39 = vsel %vm875_vm0, %v1198_v54, %v1199_v55  ;;  %v1203_v44 = vsel %vm875_vm0, %v1201_v6, %v1202_v58  ;;  %v1208_v62 = vrot.slane %v1169_v52, 1  ;;  %v1236_v4 = vunpack.c.l.bf16 %v2366_v61  ;;  %v2373_v52 = vld [vmem:[%s2697_s20 + $0x8c] sm:$0x1]  ;;  %v4216_v61 = vld [vmem:[#allocation11_spill] sm:$0xff] }
  0xb9   : > { %v1206_v13 = vsel %vm875_vm0, %v1204_v22, %v1205_v19  ;;  %v4122_v51 = vunpack.c.l.bf16 %v3218_v37  ;;  %v3230_v41 = vunpack.c.l.bf16 %v2368_v35  ;;  %v3233_v43 = vadd.f32 %v1188_v10, %v1145_v34  ;;  %v4217_v6 = vld [vmem:[#allocation12_spill] sm:$0xff] }
  0xba   : > { %v1209_v32 = vsel %vm875_vm0, %v1207_v16, %v1208_v62  ;;  %v3235_v49 = vadd.f32 %v1191_v11, %v1146_v20  ;;  %v3237_v17 = vadd.f32 %v1194_v47, %v1147_v8  ;;  %v3244_v56 = vadd.f32 %v1197_v40, %v1148_v33  ;;  %v3261_v8 = vld [vmem:[%s4062_s1] sm:$0x1f]  ;;  %v4218_v47 = vld [vmem:[#allocation13_spill] sm:$0xff]  ;;  %v4219_v16 = vld [vmem:[#allocation14_spill] sm:$0xff] }
  0xbb   : > { %v3246_v27 = vadd.f32 %v1200_v39, %v1149_v38  ;;  %v3248_v12 = vadd.f32 %v1203_v44, %v1150_v45  ;;  %v3250_v3 = vunpack.c.l.bf16 %v2369_v46  ;;  %v3252_v9 = vadd.f32 %v1206_v13, %v1151_v7  ;;  %v4214_v7 = vld [vmem:[#allocation10_spill] sm:$0xff]  ;;  %v4220_v44 = vld [vmem:[#allocation15_spill] sm:$0xff]  ;;  %v3286_v46 = vld [vmem:[%s4062_s1 + $0x10] sm:$0x1f] }
  0xbc   : > { %v3254_v34 = vadd.f32 %v1209_v32, %v1152_v5  ;;  %v3256_v20 = vunpack.c.l.bf16 %v2370_v14  ;;  %v1246_v33 = vperm.slane %v3261_v8, 3  ;;  %v3264_v25 = vunpack.c.l.bf16 %v2371_v2  ;;  %v4221_v2 = vld [vmem:[#allocation16_spill] sm:$0xff] }
  0xbd   : > { %v3266_v38 = vunpack.c.l.bf16 %v2372_v24  ;;  %v3268_v45 = vunpack.c.l.bf16 %v2373_v52  ;;  %v4215_v5 = vunpack.c.l.bf16 %v4214_v7  ;;  %v3289_v13 = vperm.slane %v3286_v46, 3  ;;  %v4222_v24 = vld [vmem:[#allocation17_spill] sm:$0xff] }
  0xbe   : > { %v1248_v55 = vmul.f32 %v1246_v33, %v1236_v4  ;;  %v1249_v10 = vmul.f32 %v1246_v33, %v4216_v61  ;;  %v1250_v11 = vmul.f32 %v1246_v33, %v4122_v51  ;;  %v1251_v58 = vmul.f32 %v1246_v33, %v4217_v6 }
  0xbf   : > { %v1247_v54 = vmul.f32 %v1246_v33, %v4215_v5  ;;  %v1252_v35 = vmul.f32 %v1246_v33, %v3230_v41  ;;  %v1253_v22 = vmul.f32 %v1246_v33, %v4218_v47  ;;  %v1254_v19 = vmul.f32 %v1246_v33, %v3250_v3 }
  0xc0   : > { %v1255_v40 = vmul.f32 %v1246_v33, %v4219_v16  ;;  %v1256_v39 = vmul.f32 %v1246_v33, %v3256_v20  ;;  %v1257_v62 = vmul.f32 %v1246_v33, %v4220_v44  ;;  %v1258_v14 = vmul.f32 %v1246_v33, %v3264_v25 }
  0xc1   : > { %v1259_v4 = vmul.f32 %v1246_v33, %v4221_v2  ;;  %v1260_v32 = vmul.f32 %v1246_v33, %v3266_v38  ;;  %v1261_v52 = vmul.f32 %v1246_v33, %v4222_v24  ;;  %v1279_v7 = vrot.slane %v1247_v54, 1 }
  0xc2   : > { %v1280_v5 = vrot.slane %v1248_v55, 1  ;;  %v1282_v1 = vrot.slane %v1249_v10, 1  ;;  %v1283_v59 = vrot.slane %v1250_v11, 1  ;;  %v1285_v51 = vrot.slane %v1251_v58, 1 }
  0xc3   : > { %v1286_v63 = vrot.slane %v1252_v35, 1  ;;  %v1288_v26 = vrot.slane %v1253_v22, 1  ;;  %v1289_v0 = vrot.slane %v1254_v19, 1  ;;  %v1262_v28 = vmul.f32 %v1246_v33, %v3268_v45 }
  0xc4   : > { %v1281_v36 = vsel %vm875_vm0, %v1279_v7, %v1280_v5  ;;  %v1291_v21 = vrot.slane %v1255_v40, 1  ;;  %v1292_v15 = vrot.slane %v1256_v39, 1  ;;  %v1284_v31 = vsel %vm875_vm0, %v1282_v1, %v1283_v59  ;;  %v3311_v40 = vld [vmem:[%s4062_s1 + $0x20] sm:$0x1f] }
  0xc5   : > { %v1287_v54 = vsel %vm875_vm0, %v1285_v51, %v1286_v63  ;;  %v1294_v55 = vrot.slane %v1257_v62, 1  ;;  %v1295_v10 = vrot.slane %v1258_v14, 1  ;;  %v1290_v11 = vsel %vm875_vm0, %v1288_v26, %v1289_v0  ;;  %4223 = vst [vmem:[#allocation5_spill] sm:$0xff] %v3311_v40 }
  0xc6   : > { %v1293_v58 = vsel %vm875_vm0, %v1291_v21, %v1292_v15  ;;  %v1297_v35 = vrot.slane %v1259_v4, 1  ;;  %v1298_v22 = vrot.slane %v1260_v32, 1  ;;  %v1300_v19 = vrot.slane %v1261_v52, 1 }
  0xc7   : > { %v3314_v1 = vperm.slane %v3311_v40, 3  ;;  %v1296_v51 = vsel %vm875_vm0, %v1294_v55, %v1295_v10  ;;  %v1301_v0 = vrot.slane %v1262_v28, 1  ;;  %v1311_v15 = vadd.f32 %v1281_v36, %v3233_v43 }
  0xc8   : > { %v1312_v21 = vadd.f32 %v1284_v31, %v3235_v49  ;;  %v1299_v26 = vsel %vm875_vm0, %v1297_v35, %v1298_v22  ;;  %v1313_v59 = vadd.f32 %v1287_v54, %v3237_v17  ;;  %v1314_v39 = vadd.f32 %v1290_v11, %v3244_v56  ;;  %v4225_v54 = vld [vmem:[#allocation18_spill] sm:$0xff] }
  0xc9   : > { %v1315_v62 = vadd.f32 %v1293_v58, %v3246_v27  ;;  %v1320_v14 = vmul.f32 %v3289_v13, %v4216_v61  ;;  %v4224_v4 = vunpack.c.l.bf16 %v3218_v37  ;;  %v1322_v36 = vmul.f32 %v3289_v13, %v4217_v6 }
  0xca   : > { %v1323_v31 = vmul.f32 %v3289_v13, %v3230_v41  ;;  %v1324_v28 = vmul.f32 %v3289_v13, %v4218_v47  ;;  %v1325_v43 = vmul.f32 %v3289_v13, %v3250_v3  ;;  %v1326_v49 = vmul.f32 %v3289_v13, %v4219_v16 }
  0xcb   : > { %v1321_v32 = vmul.f32 %v3289_v13, %v4224_v4  ;;  %v1327_v37 = vmul.f32 %v3289_v13, %v3256_v20  ;;  %v1302_v17 = vsel %vm875_vm0, %v1300_v19, %v1301_v0  ;;  %v1328_v56 = vmul.f32 %v3289_v13, %v4220_v44 }
  0xcc   : > { %v1329_v27 = vmul.f32 %v3289_v13, %v3264_v25  ;;  %v1330_v61 = vmul.f32 %v3289_v13, %v4221_v2  ;;  %v1331_v52 = vmul.f32 %v3289_v13, %v3266_v38  ;;  %v1332_v7 = vmul.f32 %v3289_v13, %v4222_v24 }
  0xcd   : > { %v1333_v5 = vmul.f32 %v3289_v13, %v3268_v45  ;;  %v1334_v55 = vmul.f32 %v3289_v13, %v4225_v54  ;;  %v1352_v10 = vrot.slane %v1320_v14, 1  ;;  %v1353_v11 = vrot.slane %v1321_v32, 1 }
  0xce   : > { %v1355_v58 = vrot.slane %v1322_v36, 1  ;;  %v1356_v35 = vrot.slane %v1323_v31, 1  ;;  %v1358_v22 = vrot.slane %v1324_v28, 1  ;;  %v1359_v19 = vrot.slane %v1325_v43, 1 }
  0xcf   : > { %v1361_v0 = vrot.slane %v1326_v49, 1  ;;  %v1362_v4 = vrot.slane %v1327_v37, 1  ;;  %v4226_v63 = vunpack.c.l.bf16 %v3242_v50  ;;  %v1354_v60 = vsel %vm875_vm0, %v1352_v10, %v1353_v11 }
  0xd0   : > { %v1364_v40 = vrot.slane %v1328_v56, 1  ;;  %v1365_v30 = vrot.slane %v1329_v27, 1  ;;  %v1357_v53 = vsel %vm875_vm0, %v1355_v58, %v1356_v35  ;;  %v1360_v57 = vsel %vm875_vm0, %v1358_v22, %v1359_v19 }
  0xd1   : > { %v1335_v33 = vmul.f32 %v3289_v13, %v4226_v63  ;;  %v1367_v14 = vrot.slane %v1330_v61, 1  ;;  %v1368_v32 = vrot.slane %v1331_v52, 1  ;;  %v1363_v36 = vsel %vm875_vm0, %v1361_v0, %v1362_v4 }
  0xd2   : > { %v1366_v31 = vsel %vm875_vm0, %v1364_v40, %v1365_v30  ;;  %v1370_v28 = vrot.slane %v1332_v7, 1  ;;  %v1371_v43 = vrot.slane %v1333_v5, 1  ;;  %v1316_v49 = vadd.f32 %v1296_v51, %v3248_v12 }
  0xd3   : > { %v1317_v13 = vadd.f32 %v1299_v26, %v3252_v9  ;;  %v1318_v63 = vadd.f32 %v1302_v17, %v3254_v34  ;;  %v1373_v37 = vrot.slane %v1334_v55, 1  ;;  %v1369_v56 = vsel %vm875_vm0, %v1367_v14, %v1368_v32 }
  0xd4   : > { %v1374_v27 = vrot.slane %v1335_v33, 1  ;;  %v1384_v10 = vadd.f32 %v1354_v60, %v1311_v15  ;;  %v1385_v11 = vadd.f32 %v1357_v53, %v1312_v21  ;;  %v1372_v61 = vsel %vm875_vm0, %v1370_v28, %v1371_v43  ;;  %v4228_v33 = vld [vmem:[#allocation19_spill] sm:$0xff]  ;;  %v3417_v43 = vld [vmem:[%s2697_s20 + $0x10c] sm:$0x1] }
  0xd5   : > { %v1386_v52 = vadd.f32 %v1360_v57, %v1313_v59  ;;  %v1387_v58 = vadd.f32 %v1363_v36, %v1314_v39  ;;  %v1388_v35 = vadd.f32 %v1366_v31, %v1315_v62  ;;  %v1393_v30 = vmul.f32 %v3314_v1, %v4217_v6  ;;  %v3414_v28 = vld [vmem:[%s2697_s20 + $0x104] sm:$0x1] }
  0xd6   : > { %v1394_v12 = vmul.f32 %v3314_v1, %v3230_v41  ;;  %v1395_v9 = vmul.f32 %v3314_v1, %v4218_v47  ;;  %v1396_v34 = vmul.f32 %v3314_v1, %v3250_v3  ;;  %v1397_v53 = vmul.f32 %v3314_v1, %v4219_v16 }
  0xd7   : > { %v1398_v57 = vmul.f32 %v3314_v1, %v3256_v20  ;;  %v1399_v60 = vmul.f32 %v3314_v1, %v4220_v44  ;;  %v1400_v6 = vmul.f32 %v3314_v1, %v3264_v25  ;;  %v1401_v41 = vmul.f32 %v3314_v1, %v4221_v2 }
  0xd8   : > { %v1402_v47 = vmul.f32 %v3314_v1, %v3266_v38  ;;  %v1403_v3 = vmul.f32 %v3314_v1, %v4222_v24  ;;  %v1404_v16 = vmul.f32 %v3314_v1, %v3268_v45  ;;  %v1405_v20 = vmul.f32 %v3314_v1, %v4225_v54  ;;  %v3407_v54 = vld [vmem:[%s2697_s20 + $0xfc] sm:$0x1] }
  0xd9   : > { %v4227_v44 = vunpack.c.l.bf16 %v3242_v50  ;;  %v4229_v40 = vunpack.c.l.bf16 %v4228_v33  ;;  %v4230_v38 = vunpack.c.l.bf16 %v3296_v42  ;;  %v1425_v24 = vrot.slane %v1393_v30, 1  ;;  %v4231_v33 = vld [vmem:[#allocation20_spill] sm:$0xff] }
  0xda   : > { %v1426_v15 = vrot.slane %v1394_v12, 1  ;;  %v1428_v21 = vrot.slane %v1395_v9, 1  ;;  %v1429_v45 = vrot.slane %v1396_v34, 1  ;;  %v1431_v26 = vrot.slane %v1397_v53, 1  ;;  %v3426_v34 = vld [vmem:[%s2697_s20 + $0x114] sm:$0x1] }
  0xdb   : > { %v1406_v25 = vmul.f32 %v3314_v1, %v4227_v44  ;;  %v1407_v2 = vmul.f32 %v3314_v1, %v4229_v40  ;;  %v1408_v51 = vmul.f32 %v3314_v1, %v4230_v38  ;;  %v1432_v59 = vrot.slane %v1398_v57, 1  ;;  %v3464_v44 = vld [vmem:[%s4062_s1 + $0x18] sm:$0x1f] }
  0xdc   : > { %v1434_v39 = vrot.slane %v1399_v60, 1  ;;  %v1435_v62 = vrot.slane %v1400_v6, 1  ;;  %v1375_v50 = vsel %vm875_vm0, %v1373_v37, %v1374_v27  ;;  %v1427_v17 = vsel %vm875_vm0, %v1425_v24, %v1426_v15  ;;  %v3439_v6 = vld [vmem:[%s2697_s20 + $0x124] sm:$0x1]  ;;  %v4234_v24 = vld [vmem:[#allocation21_spill] sm:$0xff] }
  0xdd   : > { %v1437_v7 = vrot.slane %v1401_v41, 1  ;;  %v1438_v5 = vrot.slane %v1402_v47, 1  ;;  %v1430_v42 = vsel %vm875_vm0, %v1428_v21, %v1429_v45  ;;  %v1433_v1 = vsel %vm875_vm0, %v1431_v26, %v1432_v59  ;;  %v4235_v45 = vld [vmem:[#allocation22_spill] sm:$0xff] }
  0xde   : > { %v1440_v55 = vrot.slane %v1403_v3, 1  ;;  %v1441_v22 = vrot.slane %v1404_v16, 1  ;;  %v1436_v19 = vsel %vm875_vm0, %v1434_v39, %v1435_v62  ;;  %v1443_v0 = vrot.slane %v1405_v20, 1  ;;  %v4236_v39 = vld [vmem:[#allocation24_spill] sm:$0xff] }
  0xdf   : > { %v1444_v4 = vrot.slane %v1406_v25, 1  ;;  %v1446_v14 = vrot.slane %v1407_v2, 1  ;;  %v1389_v32 = vadd.f32 %v1369_v56, %v1316_v49  ;;  %v1439_v36 = vsel %vm875_vm0, %v1437_v7, %v1438_v5  ;;  %v3429_v49 = vld [vmem:[%s2697_s20 + $0x11c] sm:$0x1] }
  0xe0   : > { %v1447_v31 = vrot.slane %v1408_v51, 1  ;;  %v4154_v37 = vunpack.c.l.bf16 %v3407_v54  ;;  %v1390_v27 = vadd.f32 %v1372_v61, %v1317_v13  ;;  %v3420_v30 = vadd.f32 %v1375_v50, %v1318_v63  ;;  %v3442_v13 = vld [vmem:[%s2697_s20 + $0x12c] sm:$0x1]  ;;  %v4238_v5 = vld [vmem:[#allocation26_spill] sm:$0xff] }
  0xe1   : > { %v1442_v12 = vsel %vm875_vm0, %v1440_v55, %v1441_v22  ;;  %v3423_v9 = vadd.f32 %v1427_v17, %v1384_v10  ;;  %v1445_v56 = vsel %vm875_vm0, %v1443_v0, %v1444_v4  ;;  %v3432_v53 = vadd.f32 %v1430_v42, %v1385_v11  ;;  %v4237_v17 = vld [vmem:[#allocation25_spill] sm:$0xff]  ;;  %v4239_v55 = vld [vmem:[#allocation27_spill] sm:$0xff]  ;;  %v4240_v0 = vld [vmem:[#allocation28_spill] sm:$0xff] }
  0xe2   : > { %v3434_v57 = vadd.f32 %v1433_v1, %v1386_v52  ;;  %v3436_v60 = vadd.f32 %v1436_v19, %v1387_v58  ;;  %v1448_v63 = vsel %vm875_vm0, %v1446_v14, %v1447_v31  ;;  %v1461_v10 = vadd.f32 %v1439_v36, %v1388_v35  ;;  %v3454_v58 = vld [vmem:[%s4062_s1 + $0x8] sm:$0x1f] }
  0xe3   : > { %v4153_v61 = vunpack.c.l.bf16 %v3414_v28  ;;  %v4152_v41 = vunpack.c.l.bf16 %v3417_v43  ;;  %v3447_v47 = vadd.f32 %v1442_v12, %v1389_v32  ;;  %v4150_v11 = vunpack.c.l.bf16 %v3426_v34 }
  0xe4   : > { %v4149_v52 = vunpack.c.l.bf16 %v3429_v49  ;;  %v1483_v3 = vperm.slane %v3454_v58, 3  ;;  %v3457_v16 = vadd.f32 %v1445_v56, %v1390_v27  ;;  %v4151_v35 = vunpack.c.l.bf16 %v3439_v6 }
  0xe5   : > { %v1481_v20 = vunpack.c.l.bf16 %v3442_v13  ;;  %v3467_v25 = vperm.slane %v3464_v44, 3  ;;  %v4232_v40 = vunpack.c.l.bf16 %v4231_v33  ;;  %v4233_v38 = vunpack.c.l.bf16 %v3301_v18 }
  0xe6   : > { %v1486_v15 = vmul.f32 %v1483_v3, %v4234_v24  ;;  %v1487_v21 = vmul.f32 %v1483_v3, %v4154_v37  ;;  %v1488_v26 = vmul.f32 %v1483_v3, %v4235_v45  ;;  %v1489_v59 = vmul.f32 %v1483_v3, %v4153_v61  ;;  %v3498_v61 = vld [vmem:[%s2697_s20] sm:$0xe] }
  0xe7   : > { %v1484_v2 = vmul.f32 %v1483_v3, %v4232_v40  ;;  %v1485_v51 = vmul.f32 %v1483_v3, %v4233_v38  ;;  %v1490_v62 = vmul.f32 %v1483_v3, %v4236_v39  ;;  %v1491_v50 = vmul.f32 %v1483_v3, %v4152_v41  ;;  %v2384_v38 = vld [vmem:[%s2697_s20 + $0x134] sm:$0x1] }
  0xe8   : > { %v1492_v7 = vmul.f32 %v1483_v3, %v4237_v17  ;;  %v1493_v18 = vmul.f32 %v1483_v3, %v4150_v11  ;;  %v1494_v42 = vmul.f32 %v1483_v3, %v4238_v5  ;;  %v1495_v1 = vmul.f32 %v1483_v3, %v4149_v52 }
  0xe9   : > { %v1496_v22 = vmul.f32 %v1483_v3, %v4239_v55  ;;  %v1497_v19 = vmul.f32 %v1483_v3, %v4151_v35  ;;  %v1498_v4 = vmul.f32 %v1483_v3, %v4240_v0  ;;  %v1499_v14 = vmul.f32 %v1483_v3, %v1481_v20 }
  0xea   : > { %v1516_v32 = vrot.slane %v1484_v2, 1  ;;  %v1517_v36 = vrot.slane %v1485_v51, 1  ;;  %v1519_v31 = vrot.slane %v1486_v15, 1  ;;  %v1520_v27 = vrot.slane %v1487_v21, 1 }
  0xeb   : > { %v1522_v12 = vrot.slane %v1488_v26, 1  ;;  %v1523_v56 = vrot.slane %v1489_v59, 1  ;;  %v1525_v33 = vrot.slane %v1490_v62, 1  ;;  %v1526_v40 = vrot.slane %v1491_v50, 1 }
  0xec   : > { %v1518_v52 = vsel %vm875_vm0, %v1516_v32, %v1517_v36  ;;  %v1521_v11 = vsel %vm875_vm0, %v1519_v31, %v1520_v27  ;;  %v1528_v35 = vrot.slane %v1492_v7, 1  ;;  %v1529_v41 = vrot.slane %v1493_v18, 1 }
  0xed   : > { %v1524_v37 = vsel %vm875_vm0, %v1522_v12, %v1523_v56  ;;  %v1527_v3 = vsel %vm875_vm0, %v1525_v33, %v1526_v40  ;;  %v1531_v2 = vrot.slane %v1494_v42, 1  ;;  %v1532_v51 = vrot.slane %v1495_v1, 1 }
  0xee   : > { %v1530_v15 = vsel %vm875_vm0, %v1528_v35, %v1529_v41  ;;  %v1534_v21 = vrot.slane %v1496_v22, 1  ;;  %v1535_v26 = vrot.slane %v1497_v19, 1  ;;  %v1537_v59 = vrot.slane %v1498_v4, 1 }
  0xef   : > { %v1464_v62 = vadd.f32 %v1448_v63, %v3420_v30  ;;  %v1482_v50 = vunpack.c.l.bf16 %v2384_v38  ;;  %v1538_v32 = vrot.slane %v1499_v14, 1  ;;  %v1639_v7 = vunpack.c.l.bf16 %v3498_v61  ;;  %v4247_v14 = vld [vmem:[#allocation23_spill] sm:$0xff] }
  0xf0   : > { %v1533_v18 = vsel %vm875_vm0, %v1531_v2, %v1532_v51  ;;  %v1536_v36 = vsel %vm875_vm0, %v1534_v21, %v1535_v26  ;;  %v1548_v31 = vadd.f32 %v1518_v52, %v3423_v9  ;;  %v1549_v42 = vadd.f32 %v1521_v11, %v3432_v53  ;;  %v3556_v26 = vld [vmem:[%s2697_s20 + $0x8] sm:$0xe] }
  0xf1   : > { %v1539_v1 = vsel %vm875_vm0, %v1537_v59, %v1538_v32  ;;  %v1550_v41 = vadd.f32 %v1524_v37, %v3434_v57  ;;  %v1551_v35 = vadd.f32 %v1527_v3, %v3436_v60  ;;  %v1552_v22 = vadd.f32 %v1530_v15, %v1461_v10  ;;  %v1631_v59 = vld [vmem:[%s2697_s20 + $0x10] sm:$0xe] }
  0xf2   : > { %v1557_v30 = vmul.f32 %v3467_v25, %v4234_v24  ;;  %v4241_v63 = vunpack.c.l.bf16 %v3407_v54  ;;  %v1559_v4 = vmul.f32 %v3467_v25, %v4235_v45  ;;  %v4242_v9 = vunpack.c.l.bf16 %v3414_v28 }
  0xf3   : > { %v1561_v37 = vmul.f32 %v3467_v25, %v4236_v39  ;;  %v4243_v57 = vunpack.c.l.bf16 %v3417_v43  ;;  %v1563_v10 = vmul.f32 %v3467_v25, %v4237_v17  ;;  %v4244_v54 = vunpack.c.l.bf16 %v3426_v34 }
  0xf4   : > { %v1558_v19 = vmul.f32 %v3467_v25, %v4241_v63  ;;  %v1560_v53 = vmul.f32 %v3467_v25, %v4242_v9  ;;  %v1565_v52 = vmul.f32 %v3467_v25, %v4238_v5  ;;  %v4245_v28 = vunpack.c.l.bf16 %v3429_v49 }
  0xf5   : > { %v1562_v60 = vmul.f32 %v3467_v25, %v4243_v57  ;;  %v1564_v11 = vmul.f32 %v3467_v25, %v4244_v54  ;;  %v1567_v45 = vmul.f32 %v3467_v25, %v4239_v55  ;;  %v4246_v43 = vunpack.c.l.bf16 %v3439_v6 }
  0xf6   : > { %v1566_v24 = vmul.f32 %v3467_v25, %v4245_v28  ;;  %v1569_v17 = vmul.f32 %v3467_v25, %v4240_v0  ;;  %v1570_v34 = vmul.f32 %v3467_v25, %v1481_v20  ;;  %v4248_v5 = vunpack.c.l.bf16 %v4247_v14  ;;  %v1635_v28 = vld [vmem:[%s2697_s20 + $0x30] sm:$0xe] }
  0xf7   : > { %v1568_v39 = vmul.f32 %v3467_v25, %v4246_v43  ;;  %v1572_v27 = vmul.f32 %v3467_v25, %v1482_v50  ;;  %v1589_v12 = vrot.slane %v1557_v30, 1  ;;  %v1590_v55 = vrot.slane %v1558_v19, 1  ;;  %v1632_v19 = vld [vmem:[%s2697_s20 + $0x18] sm:$0xe] }
  0xf8   : > { %v1571_v49 = vmul.f32 %v3467_v25, %v4248_v5  ;;  %v1592_v6 = vrot.slane %v1559_v4, 1  ;;  %v1593_v56 = vrot.slane %v1560_v53, 1  ;;  %v1595_v33 = vrot.slane %v1561_v37, 1  ;;  %v1633_v53 = vld [vmem:[%s2697_s20 + $0x20] sm:$0xe] }
  0xf9   : > { %v1596_v40 = vrot.slane %v1562_v60, 1  ;;  %v1598_v38 = vrot.slane %v1563_v10, 1  ;;  %v1599_v0 = vrot.slane %v1564_v11, 1  ;;  %v1553_v13 = vadd.f32 %v1533_v18, %v3447_v47  ;;  %v1634_v37 = vld [vmem:[%s2697_s20 + $0x28] sm:$0xe] }
  0xfa   : > { %v1554_v20 = vadd.f32 %v1536_v36, %v3457_v16  ;;  %v1601_v3 = vrot.slane %v1565_v52, 1  ;;  %v1602_v2 = vrot.slane %v1566_v24, 1  ;;  %v1591_v51 = vsel %vm875_vm0, %v1589_v12, %v1590_v55  ;;  %v1636_v24 = vld [vmem:[%s2697_s20 + $0x38] sm:$0xe] }
  0xfb   : > { %v1594_v25 = vsel %vm875_vm0, %v1592_v6, %v1593_v56  ;;  %v1604_v15 = vrot.slane %v1567_v45, 1  ;;  %v1605_v21 = vrot.slane %v1568_v39, 1  ;;  %v1597_v50 = vsel %vm875_vm0, %v1595_v33, %v1596_v40  ;;  %v4251_v12 = vld [vmem:[#allocation30_spill] sm:$0xff] }
  0xfc   : > { %v1607_v32 = vrot.slane %v1569_v17, 1  ;;  %v1608_v47 = vrot.slane %v1570_v34, 1  ;;  %v1610_v18 = vrot.slane %v1571_v49, 1  ;;  %v1600_v16 = vsel %vm875_vm0, %v1598_v38, %v1599_v0  ;;  %v4252_v0 = vld [vmem:[#allocation31_spill] sm:$0xff] }
  0xfd   : > { %v1603_v36 = vsel %vm875_vm0, %v1601_v3, %v1602_v2  ;;  %v1606_v30 = vsel %vm875_vm0, %v1604_v15, %v1605_v21  ;;  %v1611_v63 = vrot.slane %v1572_v27, 1  ;;  %v1555_v4 = vadd.f32 %v1539_v1, %v1464_v62  ;;  %v4253_v3 = vld [vmem:[#allocation32_spill] sm:$0xff] }
  0xfe   : > { %v1609_v9 = vsel %vm875_vm0, %v1607_v32, %v1608_v47  ;;  %v1640_v57 = vunpack.c.l.bf16 %v3556_v26  ;;  %v3568_v60 = vunpack.c.l.bf16 %v1631_v59  ;;  %v1621_v54 = vadd.f32 %v1591_v51, %v1548_v31 }
  0xff   : > { %v1612_v10 = vsel %vm875_vm0, %v1610_v18, %v1611_v63  ;;  %v1622_v11 = vadd.f32 %v1594_v25, %v1549_v42  ;;  %v3571_v52 = vadd.f32 %v1597_v50, %v1550_v41  ;;  %v1624_v45 = vadd.f32 %v1600_v16, %v1551_v35  ;;  %v3614_v16 = vld [vmem:[%s2697_s20 + $0x40] sm:$0xe] }
 0x100   : > { %v1625_v43 = vadd.f32 %v1603_v36, %v1552_v22  ;;  %v3575_v39 = vadd.f32 %v1606_v30, %v1553_v13  ;;  %v3577_v62 = vunpack.c.l.bf16 %v1632_v19  ;;  %v3579_v1 = vadd.f32 %v1609_v9, %v1554_v20  ;;  %v4249_v22 = vld [vmem:[#allocation29_spill] sm:$0xff] }
 0x101   : > { %v3581_v17 = vunpack.c.l.bf16 %v1633_v53  ;;  %v3583_v34 = vunpack.c.l.bf16 %v1634_v37  ;;  %v1649_v14 = vperm.slane %v3261_v8, 4  ;;  %v3586_v31 = vadd.f32 %v1612_v10, %v1555_v4  ;;  %v4254_v36 = vld [vmem:[#allocation33_spill] sm:$0xff] }
 0x102   : > { %v3588_v42 = vunpack.c.l.bf16 %v1635_v28  ;;  %v3590_v41 = vunpack.c.l.bf16 %v1636_v24  ;;  %v4250_v5 = vunpack.c.l.bf16 %v4249_v22  ;;  %v3607_v38 = vperm.slane %v3286_v46, 4  ;;  %v3617_v46 = vld [vmem:[%s2697_s20 + $0x48] sm:$0xe] }
 0x103   : > { %v1650_v35 = vmul.f32 %v1649_v14, %v1639_v7  ;;  %v1652_v27 = vmul.f32 %v1649_v14, %v1640_v57  ;;  %v1653_v55 = vmul.f32 %v1649_v14, %v4251_v12  ;;  %v1654_v8 = vmul.f32 %v1649_v14, %v3568_v60 }
 0x104   : > { %v1651_v49 = vmul.f32 %v1649_v14, %v4250_v5  ;;  %v1655_v6 = vmul.f32 %v1649_v14, %v2961_v48  ;;  %v1656_v56 = vmul.f32 %v1649_v14, %v3577_v62  ;;  %v1657_v33 = vmul.f32 %v1649_v14, %v2972_v23 }
 0x105   : > { %v1658_v40 = vmul.f32 %v1649_v14, %v3581_v17  ;;  %v1659_v61 = vmul.f32 %v1649_v14, %v2980_v29  ;;  %v1660_v7 = vmul.f32 %v1649_v14, %v3583_v34  ;;  %v1661_v13 = vmul.f32 %v1649_v14, %v4252_v0 }
 0x106   : > { %v1662_v20 = vmul.f32 %v1649_v14, %v3588_v42  ;;  %v1663_v2 = vmul.f32 %v1649_v14, %v4253_v3  ;;  %v1664_v51 = vmul.f32 %v1649_v14, %v3590_v41  ;;  %v1683_v25 = vrot.slane %v1650_v35, 2 }
 0x107   : > { %v1684_v15 = vrot.slane %v1651_v49, 2  ;;  %v1686_v21 = vrot.slane %v1652_v27, 2  ;;  %v1687_v59 = vrot.slane %v1653_v55, 2  ;;  %v1689_v50 = vrot.slane %v1654_v8, 2  ;;  %v4255_v27 = vld [vmem:[#allocation5_spill] sm:$0xff] }
 0x108   : > { %v1690_v32 = vrot.slane %v1655_v6, 2  ;;  %v1692_v47 = vrot.slane %v1656_v56, 2  ;;  %v1693_v18 = vrot.slane %v1657_v33, 2  ;;  %v1665_v30 = vmul.f32 %v1649_v14, %v4254_v36 }
 0x109   : > { %v1685_v63 = vsel %vm1682_vm1, %v1683_v25, %v1684_v15  ;;  %v1695_v19 = vrot.slane %v1658_v40, 2  ;;  %v1696_v4 = vrot.slane %v1659_v61, 2  ;;  %v1688_v9 = vsel %vm1682_vm1, %v1686_v21, %v1687_v59 }
 0x10a   : > { %v1691_v53 = vsel %vm1682_vm1, %v1689_v50, %v1690_v32  ;;  %v1698_v37 = vrot.slane %v1660_v7, 2  ;;  %v1699_v10 = vrot.slane %v1661_v13, 2  ;;  %v1694_v28 = vsel %vm1682_vm1, %v1692_v47, %v1693_v18 }
 0x10b   : > { %v1697_v24 = vsel %vm1682_vm1, %v1695_v19, %v1696_v4  ;;  %v1701_v35 = vrot.slane %v1662_v20, 2  ;;  %v1702_v22 = vrot.slane %v1663_v2, 2  ;;  %v1647_v5 = vunpack.c.l.bf16 %v3614_v16 }
 0x10c   : > { %v1648_v14 = vunpack.c.l.bf16 %v3617_v46  ;;  %v1704_v49 = vrot.slane %v1664_v51, 2  ;;  %v3628_v55 = vperm.slane %v4255_v27, 4  ;;  %v1700_v8 = vsel %vm1682_vm1, %v1698_v37, %v1699_v10 }
 0x10d   : > { %v1705_v6 = vrot.slane %v1665_v30, 2  ;;  %v1715_v56 = vadd.f32 %v1685_v63, %v1621_v54  ;;  %v1716_v33 = vadd.f32 %v1688_v9, %v1622_v11  ;;  %v1703_v40 = vsel %vm1682_vm1, %v1701_v35, %v1702_v22 }
 0x10e   : > { %v1717_v61 = vadd.f32 %v1691_v53, %v3571_v52  ;;  %v1718_v7 = vadd.f32 %v1694_v28, %v1624_v45  ;;  %v1719_v13 = vadd.f32 %v1697_v24, %v1625_v43  ;;  %v1724_v20 = vmul.f32 %v3607_v38, %v1640_v57  ;;  %v4256_v53 = vld [vmem:[#allocation34_spill] sm:$0xff] }
 0x10f   : > { %v1725_v2 = vmul.f32 %v3607_v38, %v4251_v12  ;;  %v1726_v51 = vmul.f32 %v3607_v38, %v3568_v60  ;;  %v1727_v54 = vmul.f32 %v3607_v38, %v2961_v48  ;;  %v1728_v11 = vmul.f32 %v3607_v38, %v3577_v62 }
 0x110   : > { %v1729_v52 = vmul.f32 %v3607_v38, %v2972_v23  ;;  %v1730_v26 = vmul.f32 %v3607_v38, %v3581_v17  ;;  %v1731_v57 = vmul.f32 %v3607_v38, %v2980_v29  ;;  %v1706_v45 = vsel %vm1682_vm1, %v1704_v49, %v1705_v6 }
 0x111   : > { %v1732_v43 = vmul.f32 %v3607_v38, %v3583_v34  ;;  %v1733_v12 = vmul.f32 %v3607_v38, %v4252_v0  ;;  %v1734_v25 = vmul.f32 %v3607_v38, %v3588_v42  ;;  %v1735_v15 = vmul.f32 %v3607_v38, %v4253_v3 }
 0x112   : > { %v1736_v21 = vmul.f32 %v3607_v38, %v3590_v41  ;;  %v1737_v59 = vmul.f32 %v3607_v38, %v4254_v36  ;;  %v1738_v50 = vmul.f32 %v3607_v38, %v1647_v5  ;;  %v1756_v32 = vrot.slane %v1724_v20, 2 }
 0x113   : > { %v1757_v47 = vrot.slane %v1725_v2, 2  ;;  %v1759_v18 = vrot.slane %v1726_v51, 2  ;;  %v1760_v30 = vrot.slane %v1727_v54, 2  ;;  %v1762_v63 = vrot.slane %v1728_v11, 2 }
 0x114   : > { %v1763_v19 = vrot.slane %v1729_v52, 2  ;;  %v1765_v4 = vrot.slane %v1730_v26, 2  ;;  %v1766_v9 = vrot.slane %v1731_v57, 2  ;;  %v1739_v37 = vmul.f32 %v3607_v38, %v4256_v53 }
 0x115   : > { %v1758_v10 = vsel %vm1682_vm1, %v1756_v32, %v1757_v47  ;;  %v1768_v28 = vrot.slane %v1732_v43, 2  ;;  %v1769_v24 = vrot.slane %v1733_v12, 2  ;;  %v1761_v35 = vsel %vm1682_vm1, %v1759_v18, %v1760_v30 }
 0x116   : > { %v1764_v22 = vsel %vm1682_vm1, %v1762_v63, %v1763_v19  ;;  %v1771_v49 = vrot.slane %v1734_v25, 2  ;;  %v1772_v27 = vrot.slane %v1735_v15, 2  ;;  %v1767_v6 = vsel %vm1682_vm1, %v1765_v4, %v1766_v9 }
 0x117   : > { %v1770_v20 = vsel %vm1682_vm1, %v1768_v28, %v1769_v24  ;;  %v1774_v2 = vrot.slane %v1736_v21, 2  ;;  %v1775_v51 = vrot.slane %v1737_v59, 2  ;;  %v1720_v54 = vadd.f32 %v1700_v8, %v3575_v39 }
 0x118   : > { %v1721_v38 = vadd.f32 %v1703_v40, %v3579_v1  ;;  %v1722_v11 = vadd.f32 %v1706_v45, %v3586_v31  ;;  %v1777_v52 = vrot.slane %v1738_v50, 2  ;;  %v1773_v26 = vsel %vm1682_vm1, %v1771_v49, %v1772_v27 }
 0x119   : > { %v1778_v57 = vrot.slane %v1739_v37, 2  ;;  %v1788_v43 = vadd.f32 %v1758_v10, %v1715_v56  ;;  %v1789_v12 = vadd.f32 %v1761_v35, %v1716_v33  ;;  %v1776_v25 = vsel %vm1682_vm1, %v1774_v2, %v1775_v51  ;;  %v2385_v37 = vld [vmem:[%s2697_s20 + $0xa0] sm:$0xe]  ;;  %v3729_v2 = vld [vmem:[%s2697_s20 + $0xb8] sm:$0xe] }
 0x11a   : > { %v1790_v15 = vadd.f32 %v1764_v22, %v1717_v61  ;;  %v1791_v32 = vadd.f32 %v1767_v6, %v1718_v7  ;;  %v1792_v47 = vadd.f32 %v1770_v20, %v1719_v13  ;;  %v1797_v21 = vmul.f32 %v3628_v55, %v3568_v60  ;;  %v3721_v22 = vld [vmem:[%s2697_s20 + $0xa8] sm:$0xe]  ;;  %v3726_v20 = vld [vmem:[%s2697_s20 + $0xb0] sm:$0xe] }
 0x11b   : > { %v1798_v39 = vmul.f32 %v3628_v55, %v2961_v48  ;;  %v1799_v1 = vmul.f32 %v3628_v55, %v3577_v62  ;;  %v1800_v31 = vmul.f32 %v3628_v55, %v2972_v23  ;;  %v1801_v8 = vmul.f32 %v3628_v55, %v3581_v17 }
 0x11c   : > { %v1802_v56 = vmul.f32 %v3628_v55, %v2980_v29  ;;  %v1803_v33 = vmul.f32 %v3628_v55, %v3583_v34  ;;  %v1804_v60 = vmul.f32 %v3628_v55, %v4252_v0  ;;  %v1805_v48 = vmul.f32 %v3628_v55, %v3588_v42  ;;  %v4257_v0 = vld [vmem:[#allocation35_spill] sm:$0xff] }
 0x11d   : > { %v1806_v62 = vmul.f32 %v3628_v55, %v4253_v3  ;;  %v1807_v23 = vmul.f32 %v3628_v55, %v3590_v41  ;;  %v1808_v17 = vmul.f32 %v3628_v55, %v4254_v36  ;;  %v1809_v29 = vmul.f32 %v3628_v55, %v1647_v5 }
 0x11e   : > { %v1810_v34 = vmul.f32 %v3628_v55, %v4256_v53  ;;  %v1811_v42 = vmul.f32 %v3628_v55, %v1648_v14  ;;  %v4258_v40 = vunpack.c.l.bf16 %v4257_v0  ;;  %v1829_v61 = vrot.slane %v1797_v21, 2 }
 0x11f   : > { %v1830_v41 = vrot.slane %v1798_v39, 2  ;;  %v1832_v7 = vrot.slane %v1799_v1, 2  ;;  %v1833_v13 = vrot.slane %v1800_v31, 2  ;;  %v1835_v36 = vrot.slane %v1801_v8, 2  ;;  %v3739_v39 = vld [vmem:[%s2697_s20 + $0xd0] sm:$0xe] }
 0x120   : > { %v1812_v3 = vmul.f32 %v3628_v55, %v4258_v40  ;;  %v1836_v16 = vrot.slane %v1802_v56, 2  ;;  %v1838_v45 = vrot.slane %v1803_v33, 2  ;;  %v1839_v5 = vrot.slane %v1804_v60, 2  ;;  %v3742_v1 = vld [vmem:[%s2697_s20 + $0xd8] sm:$0xe] }
 0x121   : > { %v1779_v59 = vsel %vm1682_vm1, %v1777_v52, %v1778_v57  ;;  %v1793_v50 = vadd.f32 %v1773_v26, %v1720_v54  ;;  %v1841_v46 = vrot.slane %v1805_v48, 2  ;;  %v1842_v18 = vrot.slane %v1806_v62, 2  ;;  %v3733_v52 = vld [vmem:[%s2697_s20 + $0xc0] sm:$0xe]  ;;  %v3736_v26 = vld [vmem:[%s2697_s20 + $0xc8] sm:$0xe] }
 0x122   : > { %v1794_v14 = vadd.f32 %v1776_v25, %v1721_v38  ;;  %v1831_v30 = vsel %vm1682_vm1, %v1829_v61, %v1830_v41  ;;  %v1844_v55 = vrot.slane %v1807_v23, 2  ;;  %v1845_v63 = vrot.slane %v1808_v17, 2  ;;  %v3745_v31 = vld [vmem:[%s2697_s20 + $0xe0] sm:$0xe] }
 0x123   : > { %v1834_v19 = vsel %vm1682_vm1, %v1832_v7, %v1833_v13  ;;  %v1847_v4 = vrot.slane %v1809_v29, 2  ;;  %v1848_v9 = vrot.slane %v1810_v34, 2  ;;  %v1850_v53 = vrot.slane %v1811_v42, 2  ;;  %v4259_v34 = vld [vmem:[#allocation36_spill] sm:$0xff]  ;;  %v4262_v7 = vld [vmem:[#allocation38_spill] sm:$0xff] }
 0x124   : > { %v1837_v10 = vsel %vm1682_vm1, %v1835_v36, %v1836_v16  ;;  %v1840_v28 = vsel %vm1682_vm1, %v1838_v45, %v1839_v5  ;;  %v1843_v24 = vsel %vm1682_vm1, %v1841_v46, %v1842_v18  ;;  %v1851_v35 = vrot.slane %v1812_v3, 2  ;;  %v4261_v3 = vld [vmem:[#allocation37_spill] sm:$0xff]  ;;  %v4263_v36 = vld [vmem:[#allocation39_spill] sm:$0xff]  ;;  %v4264_v5 = vld [vmem:[#allocation40_spill] sm:$0xff] }
 0x125   : > { %v1795_v49 = vadd.f32 %v1779_v59, %v1722_v11  ;;  %v1846_v27 = vsel %vm1682_vm1, %v1844_v55, %v1845_v63  ;;  %v1849_v6 = vsel %vm1682_vm1, %v1847_v4, %v1848_v9  ;;  %v1861_v54 = vadd.f32 %v1831_v30, %v1788_v43  ;;  %v4265_v46 = vld [vmem:[#allocation41_spill] sm:$0xff]  ;;  %v4267_v63 = vld [vmem:[#allocation43_spill] sm:$0xff] }
 0x126   : > { %v1852_v51 = vsel %vm1682_vm1, %v1850_v53, %v1851_v35  ;;  %v1862_v38 = vadd.f32 %v1834_v19, %v1789_v12  ;;  %v1878_v57 = vunpack.c.l.bf16 %v2385_v37  ;;  %v1863_v25 = vadd.f32 %v1837_v10, %v1790_v15 }
 0x127   : > { %v1864_v11 = vadd.f32 %v1840_v28, %v1791_v32  ;;  %v1865_v21 = vadd.f32 %v1843_v24, %v1792_v47  ;;  %v1879_v8 = vunpack.c.l.bf16 %v3721_v22  ;;  %v1866_v56 = vadd.f32 %v1846_v27, %v1793_v50 }
 0x128   : > { %v1867_v33 = vadd.f32 %v1849_v6, %v1794_v14  ;;  %v1880_v43 = vunpack.c.l.bf16 %v3726_v20  ;;  %v1881_v12 = vunpack.c.l.bf16 %v3729_v2  ;;  %v1868_v60 = vadd.f32 %v1852_v51, %v1795_v49  ;;  %v4266_v14 = vld [vmem:[#allocation42_spill] sm:$0xff] }
 0x129   : > { %v1882_v48 = vunpack.c.l.bf16 %v3733_v52  ;;  %v1883_v15 = vunpack.c.l.bf16 %v3736_v26  ;;  %v1887_v32 = vperm.slane %v3454_v58, 4  ;;  %v1884_v47 = vunpack.c.l.bf16 %v3739_v39 }
 0x12a   : > { %v1885_v62 = vunpack.c.l.bf16 %v3742_v1  ;;  %v1886_v23 = vunpack.c.l.bf16 %v3745_v31  ;;  %v3757_v17 = vperm.slane %v3464_v44, 4  ;;  %v4260_v42 = vunpack.c.l.bf16 %v4259_v34 }
 0x12b   : > { %v1888_v29 = vmul.f32 %v1887_v32, %v1878_v57  ;;  %v1890_v40 = vmul.f32 %v1887_v32, %v1879_v8  ;;  %v1891_v61 = vmul.f32 %v1887_v32, %v4261_v3  ;;  %v1892_v41 = vmul.f32 %v1887_v32, %v1880_v43 }
 0x12c   : > { %v1889_v0 = vmul.f32 %v1887_v32, %v4260_v42  ;;  %v1893_v13 = vmul.f32 %v1887_v32, %v4262_v7  ;;  %v1894_v58 = vmul.f32 %v1887_v32, %v1881_v12  ;;  %v1895_v16 = vmul.f32 %v1887_v32, %v4263_v36 }
 0x12d   : > { %v1896_v45 = vmul.f32 %v1887_v32, %v1882_v48  ;;  %v1897_v59 = vmul.f32 %v1887_v32, %v4264_v5  ;;  %v1898_v50 = vmul.f32 %v1887_v32, %v1883_v15  ;;  %v1899_v44 = vmul.f32 %v1887_v32, %v4265_v46 }
 0x12e   : > { %v1900_v18 = vmul.f32 %v1887_v32, %v1884_v47  ;;  %v1901_v30 = vmul.f32 %v1887_v32, %v4266_v14  ;;  %v1902_v55 = vmul.f32 %v1887_v32, %v1885_v62  ;;  %v1903_v19 = vmul.f32 %v1887_v32, %v4267_v63 }
 0x12f   : > { %v1920_v4 = vrot.slane %v1888_v29, 2  ;;  %v1921_v9 = vrot.slane %v1889_v0, 2  ;;  %v1923_v53 = vrot.slane %v1890_v40, 2  ;;  %v1924_v37 = vrot.slane %v1891_v61, 2 }
 0x130   : > { %v1926_v10 = vrot.slane %v1892_v41, 2  ;;  %v1927_v28 = vrot.slane %v1893_v13, 2  ;;  %v1929_v24 = vrot.slane %v1894_v58, 2  ;;  %v1930_v35 = vrot.slane %v1895_v16, 2 }
 0x131   : > { %v1922_v22 = vsel %vm1682_vm1, %v1920_v4, %v1921_v9  ;;  %v1925_v49 = vsel %vm1682_vm1, %v1923_v53, %v1924_v37  ;;  %v1932_v27 = vrot.slane %v1896_v45, 2  ;;  %v1933_v6 = vrot.slane %v1897_v59, 2  ;;  %v2455_v53 = vld [vmem:[%s4063_s2] ss:$0 sm:$0xff] }
 0x132   : > { %v1928_v20 = vsel %vm1682_vm1, %v1926_v10, %v1927_v28  ;;  %v1931_v2 = vsel %vm1682_vm1, %v1929_v24, %v1930_v35  ;;  %v1935_v51 = vrot.slane %v1898_v50, 2  ;;  %v1936_v52 = vrot.slane %v1899_v44, 2 }
 0x133   : > { %v1934_v26 = vsel %vm1682_vm1, %v1932_v27, %v1933_v6  ;;  %v1938_v57 = vrot.slane %v1900_v18, 2  ;;  %v1939_v39 = vrot.slane %v1901_v30, 2  ;;  %v1941_v32 = vrot.slane %v1902_v55, 2 }
 0x134   : > { %v1937_v29 = vsel %vm1682_vm1, %v1935_v51, %v1936_v52  ;;  %v1942_v34 = vrot.slane %v1903_v19, 2  ;;  %v1952_v42 = vadd.f32 %v1922_v22, %v1861_v54  ;;  %v1953_v0 = vadd.f32 %v1925_v49, %v1862_v38 }
 0x135   : > { %v1940_v40 = vsel %vm1682_vm1, %v1938_v57, %v1939_v39  ;;  %v1954_v61 = vadd.f32 %v1928_v20, %v1863_v25  ;;  %v1955_v41 = vadd.f32 %v1931_v2, %v1864_v11  ;;  %v1956_v13 = vadd.f32 %v1934_v26, %v1865_v21 }
 0x136   : > { %v1943_v58 = vsel %vm1682_vm1, %v1941_v32, %v1942_v34  ;;  %v1957_v16 = vadd.f32 %v1937_v29, %v1866_v56  ;;  %v1958_v45 = vadd.f32 %v1940_v40, %v1867_v33  ;;  %v1961_v59 = vmul.f32 %v3757_v17, %v1879_v8 }
 0x137   : > { %v1959_v50 = vadd.f32 %v1943_v58, %v1868_v60  ;;  %v1962_v44 = vmul.f32 %v3757_v17, %v4261_v3  ;;  %v1963_v18 = vmul.f32 %v3757_v17, %v1880_v43  ;;  %v1964_v54 = vmul.f32 %v3757_v17, %v4262_v7 }
 0x138   : > { %v1965_v38 = vmul.f32 %v3757_v17, %v1881_v12  ;;  %v1966_v25 = vmul.f32 %v3757_v17, %v4263_v36  ;;  %v1967_v11 = vmul.f32 %v3757_v17, %v1882_v48  ;;  %v1968_v21 = vmul.f32 %v3757_v17, %v4264_v5 }
 0x139   : > { %v1969_v8 = vmul.f32 %v3757_v17, %v1883_v15  ;;  %v1970_v56 = vmul.f32 %v3757_v17, %v4265_v46  ;;  %v1971_v33 = vmul.f32 %v3757_v17, %v1884_v47  ;;  %v1972_v43 = vmul.f32 %v3757_v17, %v4266_v14  ;;  %v4268_v15 = vld [vmem:[#allocation3_spill] sm:$0xff] }
 0x13a   : > { %v1973_v12 = vmul.f32 %v3757_v17, %v1885_v62  ;;  %v1974_v60 = vmul.f32 %v3757_v17, %v4267_v63  ;;  %v1975_v48 = vmul.f32 %v3757_v17, %v1886_v23  ;;  %v4269_v3 = vunpack.c.l.bf16 %v4268_v15 }
 0x13b   : > { %v1993_v36 = vrot.slane %v1961_v59, 2  ;;  %v1994_v47 = vrot.slane %v1962_v44, 2  ;;  %v1996_v5 = vrot.slane %v1963_v18, 2  ;;  %v1997_v46 = vrot.slane %v1964_v54, 2 }
 0x13c   : > { %v1976_v7 = vmul.f32 %v3757_v17, %v4269_v3  ;;  %v1999_v14 = vrot.slane %v1965_v38, 2  ;;  %v2000_v30 = vrot.slane %v1966_v25, 2  ;;  %v2002_v1 = vrot.slane %v1967_v11, 2 }
 0x13d   : > { %v2003_v55 = vrot.slane %v1968_v21, 2  ;;  %v1995_v62 = vsel %vm1682_vm1, %v1993_v36, %v1994_v47  ;;  %v1998_v63 = vsel %vm1682_vm1, %v1996_v5, %v1997_v46  ;;  %v2005_v19 = vrot.slane %v1969_v8, 2 }
 0x13e   : > { %v2006_v31 = vrot.slane %v1970_v56, 2  ;;  %v2001_v23 = vsel %vm1682_vm1, %v1999_v14, %v2000_v30  ;;  %v2008_v9 = vrot.slane %v1971_v33, 2  ;;  %v2009_v17 = vrot.slane %v1972_v43, 2 }
 0x13f   : > { %v2004_v4 = vsel %vm1682_vm1, %v2002_v1, %v2003_v55  ;;  %v2011_v10 = vrot.slane %v1973_v12, 2  ;;  %v2012_v28 = vrot.slane %v1974_v60, 2  ;;  %v2014_v24 = vrot.slane %v1975_v48, 2 }
 0x140   : > { %v2007_v37 = vsel %vm1682_vm1, %v2005_v19, %v2006_v31  ;;  %v2010_v35 = vsel %vm1682_vm1, %v2008_v9, %v2009_v17  ;;  %v2015_v22 = vrot.slane %v1976_v7, 2  ;;  %v2025_v49 = vadd.f32 %v1995_v62, %v1952_v42 }
 0x141   : > { %v2026_v27 = vadd.f32 %v1998_v63, %v1953_v0  ;;  %v2013_v6 = vsel %vm1682_vm1, %v2011_v10, %v2012_v28  ;;  %v2027_v20 = vadd.f32 %v2001_v23, %v1954_v61  ;;  %v2028_v2 = vadd.f32 %v2004_v4, %v1955_v41 }
 0x142   : > { %v2029_v51 = vadd.f32 %v2007_v37, %v1956_v13  ;;  %v2016_v52 = vsel %vm1682_vm1, %v2014_v24, %v2015_v22  ;;  %v2030_v26 = vadd.f32 %v2010_v35, %v1957_v16  ;;  %v2031_v57 = vadd.f32 %v2013_v6, %v1958_v45 }
 0x143   : > { %v3818_v39 = vadd.f32 %v2455_v53, %v2025_v49  ;;  %v2032_v32 = vadd.f32 %v2016_v52, %v1959_v50  ;;  %v3820_v29 = vadd.f32 %v2455_v53, %v2026_v27  ;;  %v3822_v34 = vadd.f32 %v2455_v53, %v2027_v20 }
 0x144   : > { %v3824_v40 = vadd.f32 %v2455_v53, %v2028_v2  ;;  %v3826_v42 = vadd.f32 %v2455_v53, %v2029_v51  ;;  %v3828_v0 = vadd.f32 %v2455_v53, %v2030_v26  ;;  %v3831_v41 = vadd.f32 %v2455_v53, %v2031_v57 }
 0x145   : > { %v2394_v61 = vmul.f32 -1.442695, %v3818_v39  ;;  %v2395_v13 = vmul.f32 -1.442695, %v3820_v29  ;;  %v2396_v58 = vmul.f32 -1.442695, %v3822_v34  ;;  %v3836_v45 = vadd.f32 %v2455_v53, %v2032_v32 }
 0x146   : > { %v2397_v16 = vmul.f32 -1.442695, %v3824_v40  ;;  %v2398_v59 = vmul.f32 -1.442695, %v3826_v42  ;;  %v2399_v50 = vmul.f32 -1.442695, %v3828_v0 }
 0x147   : > { %2456 = vpow2.f32 %v2394_v61  ;;  %v2400_v44 = vmul.f32 -1.442695, %v3831_v41  ;;  %v2401_v18 = vmul.f32 -1.442695, %v3836_v45 }
 0x148   : > { %2458 = vpow2.f32 %v2395_v13 }
 0x149   : > { %2460 = vpow2.f32 %v2396_v58 }
 0x14a   : > { %2462 = vpow2.f32 %v2397_v16 }
 0x14b   : > { %2464 = vpow2.f32 %v2398_v59 }
 0x14c   : > { %2466 = vpow2.f32 %v2399_v50 }
 0x14d   : > { %v2457_v54 = vpop.eup %2456  ;;  %2468 = vpow2.f32 %v2400_v44 }
 0x14e   : > { %v2459_v38 = vpop.eup %2458  ;;  %v2068_v25 = vadd.f32 1.0, %v2457_v54  ;;  %2470 = vpow2.f32 %v2401_v18 }
 0x14f   : > { %v2461_v11 = vpop.eup %2460  ;;  %v3842_v21 = vadd.f32 1.0, %v2459_v38 }
 0x150   : > { %v2463_v8 = vpop.eup %2462  ;;  %v3844_v56 = vadd.f32 1.0, %v2461_v11  ;;  %2472 = vrcp.f32 %v2068_v25  ;;  %v2087_v48 = vand.u32 2147483648, %v2068_v25  ;;  %vm2081_vm2 = vweird.f32 %v2068_v25 }
 0x151   : > { %v2465_v33 = vpop.eup %2464  ;;  %v3846_v43 = vadd.f32 1.0, %v2463_v8  ;;  %2474 = vrcp.f32 %v3842_v21  ;;  %v2085_v3 = vand.u32 2147483647, %v2068_v25  ;;  %vm2096_vm3 = vweird.f32 %v3842_v21 }
 0x152   : > { %v2467_v12 = vpop.eup %2466  ;;  %v3849_v60 = vadd.f32 1.0, %v2465_v33  ;;  %2476 = vrcp.f32 %v3844_v56  ;;  %v2102_v7 = vand.u32 2147483648, %v3842_v21  ;;  %v2100_v5 = vand.u32 2147483647, %v3842_v21 }
 0x153   : > { %v2469_v15 = vpop.eup %2468  ;;  %v3854_v47 = vadd.f32 1.0, %v2467_v12  ;;  %v2117_v46 = vand.u32 2147483648, %v3844_v56  ;;  %2478 = vrcp.f32 %v3846_v43  ;;  %v3861_v30 = vor.u32 1.1754944e-38, %v2087_v48 }
 0x154   : > { %v2471_v36 = vpop.eup %2470  ;;  %vm2111_vm4 = vweird.f32 %v3844_v56  ;;  %v2115_v1 = vand.u32 2147483647, %v3844_v56  ;;  %2480 = vrcp.f32 %v3849_v60  ;;  %v3868_v62 = vadd.f32 1.0, %v2469_v15 }
 0x155   : > { %v2130_v19 = vand.u32 2147483647, %v3846_v43  ;;  %v2132_v31 = vand.u32 2147483648, %v3846_v43  ;;  %v3873_v23 = vadd.f32 1.0, %v2471_v36  ;;  %vm3875_vm5 = vcmp.eq.f32.partialorder %v2085_v3, 8.507059e+37 }
 0x156   : > { %v3859_v14 = vpop.eup %2472  ;;  %v2103_v17 = vor.u32 1.1754944e-38, %v2102_v7  ;;  %vm2126_vm6 = vweird.f32 %v3846_v43  ;;  %vm3885_vm8 = vcmp.eq.f32.partialorder %v2100_v5, 8.507059e+37  ;;  %v2118_v28 = vor.u32 1.1754944e-38, %v2117_v46 }
 0x157   : > { %v3866_v55 = vpop.eup %2474  ;;  %v2077_v63 = vmul.f32 %v3859_v14, %v2068_v25  ;;  %vm2082_vm7 = vweird.f32 %v3859_v14  ;;  %2482 = vrcp.f32 %v3854_v47  ;;  %vm3893_vm10 = vcmp.eq.f32.partialorder %v2115_v1, 8.507059e+37 }
 0x158   : > { %v2092_v9 = vmul.f32 %v3866_v55, %v3842_v21  ;;  %v3882_v53 = vpop.eup %2476  ;;  %vm2097_vm9 = vweird.f32 %v3866_v55  ;;  %vm2141_vm11 = vweird.f32 %v3849_v60  ;;  %vm3899_vm12 = vcmp.eq.f32.partialorder %v2130_v19, 8.507059e+37  ;;  %vm3917_vm14 = vmor %vm2081_vm2, %vm2082_vm7 }
 0x159   : > { %v2078_v37 = vsub.f32 1.0, %v2077_v63  ;;  %v2107_v35 = vmul.f32 %v3882_v53, %v3844_v56  ;;  %v2479_v49 = vpop.eup %2478  ;;  %v2133_v20 = vor.u32 1.1754944e-38, %v2132_v31  ;;  %v2145_v2 = vand.u32 2147483647, %v3849_v60  ;;  %vm3929_vm15 = vmor %vm2096_vm3, %vm2097_vm9 }
 0x15a   : > { %v2093_v24 = vsub.f32 1.0, %v2092_v9  ;;  %v2481_v51 = vpop.eup %2480  ;;  %vm2112_vm13 = vweird.f32 %v3882_v53  ;;  %v2122_v57 = vmul.f32 %v2479_v49, %v3846_v43  ;;  %v2147_v58 = vand.u32 2147483648, %v3849_v60 }
 0x15b   : > { %v2079_v27 = vmul.f32 %v3859_v14, %v2078_v37  ;;  %v2108_v26 = vsub.f32 1.0, %v2107_v35  ;;  %v2137_v13 = vmul.f32 %v2481_v51, %v3849_v60  ;;  %v2160_v16 = vand.u32 2147483647, %v3854_v47  ;;  %vm3936_vm1 = vmor %vm2111_vm4, %vm2112_vm13 }
 0x15c   : > { %v2094_v52 = vmul.f32 %v3866_v55, %v2093_v24  ;;  %v2123_v18 = vsub.f32 1.0, %v2122_v57  ;;  %vm2127_vm0 = vweird.f32 %v2479_v49  ;;  %vm2142_vm2 = vweird.f32 %v2481_v51 }
 0x15d   : > { %v2080_v32 = vadd.f32 %v3859_v14, %v2079_v27  ;;  %v2109_v44 = vmul.f32 %v3882_v53, %v2108_v26  ;;  %v2483_v54 = vpop.eup %2482  ;;  %v2138_v25 = vsub.f32 1.0, %v2137_v13  ;;  %vm2156_vm7 = vweird.f32 %v3854_v47  ;;  %vm3961_vm4 = vmor %vm2126_vm6, %vm2127_vm0 }
 0x15e   : > { %v2095_v59 = vadd.f32 %v3866_v55, %v2094_v52  ;;  %2484 = vrcp.f32 %v3868_v62  ;;  %v2124_v8 = vmul.f32 %v2479_v49, %v2123_v18  ;;  %vm3946_vm3 = vcmp.eq.f32.partialorder %v2145_v2, 8.507059e+37  ;;  %vm3972_vm9 = vmor %vm2141_vm11, %vm2142_vm2 }
 0x15f   : > { %v2084_v11 = vsel %vm3917_vm14, %v3859_v14, %v2080_v32  ;;  %v2110_v21 = vadd.f32 %v3882_v53, %v2109_v44  ;;  %v2139_v48 = vmul.f32 %v2481_v51, %v2138_v25  ;;  %v2148_v15 = vor.u32 1.1754944e-38, %v2147_v58 }
 0x160   : > { %v2099_v56 = vsel %vm3929_vm15, %v3866_v55, %v2095_v59  ;;  %v2152_v3 = vmul.f32 %v2483_v54, %v3854_v47  ;;  %v2125_v36 = vadd.f32 %v2479_v49, %v2124_v8  ;;  %vm3976_vm6 = vcmp.eq.f32.partialorder %v2160_v16, 8.507059e+37 }
 0x161   : > { %v2114_v7 = vsel %vm3936_vm1, %v3882_v53, %v2110_v21  ;;  %v2162_v46 = vand.u32 2147483648, %v3854_v47  ;;  %v2089_v14 = vsel %vm3875_vm5, %v3861_v30, %v2084_v11  ;;  %v2140_v1 = vadd.f32 %v2481_v51, %v2139_v48 }
 0x162   : > { %v2153_v55 = vsub.f32 1.0, %v2152_v3  ;;  %vm2157_vm13 = vweird.f32 %v2483_v54  ;;  %v2104_v60 = vsel %vm3885_vm8, %v2103_v17, %v2099_v56  ;;  %v2129_v63 = vsel %vm3961_vm4, %v2479_v49, %v2125_v36 }
 0x163   : > { %v2175_v19 = vand.u32 2147483647, %v3868_v62  ;;  %2486 = vrcp.f32 %v3873_v23  ;;  %v2119_v9 = vsel %vm3893_vm10, %v2118_v28, %v2114_v7  ;;  %v2134_v30 = vsel %vm3899_vm12, %v2133_v20, %v2129_v63  ;;  %vm3999_vm5 = vmor %vm2156_vm7, %vm2157_vm13 }
 0x164   : > { %v2485_v31 = vpop.eup %2484  ;;  %v2144_v4 = vsel %vm3972_vm9, %v2481_v51, %v2140_v1  ;;  %v2154_v53 = vmul.f32 %v2483_v54, %v2153_v55  ;;  %v2163_v37 = vor.u32 1.1754944e-38, %v2162_v46  ;;  %vm2171_vm8 = vweird.f32 %v3868_v62 }
 0x165   : > { %v2167_v10 = vmul.f32 %v2485_v31, %v3868_v62  ;;  %v2177_v28 = vand.u32 2147483648, %v3868_v62  ;;  %v2149_v24 = vsel %vm3946_vm3, %v2148_v15, %v2144_v4  ;;  %v2196_v22 = vmul.f32 %v2089_v14, %v3818_v39 }
 0x166   : > { %v2155_v35 = vadd.f32 %v2483_v54, %v2154_v53  ;;  %v2197_v49 = vmul.f32 %v2104_v60, %v3820_v29  ;;  %vm2172_vm10 = vweird.f32 %v2485_v31  ;;  %v2198_v27 = vmul.f32 %v2119_v9, %v3822_v34 }
 0x167   : > { %v2168_v47 = vsub.f32 1.0, %v2167_v10  ;;  %v2199_v6 = vmul.f32 %v2134_v30, %v3824_v40  ;;  %vm4019_vm11 = vcmp.eq.f32.partialorder %v2175_v19, 8.507059e+37  ;;  %vm4027_vm12 = vmor %vm2171_vm8, %vm2172_vm10  ;;  %v2178_v40 = vor.u32 1.1754944e-38, %v2177_v28 }
 0x168   : > { %v2159_v20 = vsel %vm3999_vm5, %v2483_v54, %v2155_v35  ;;  %v2408_v39 = vpack.c.bf16 %v2197_v49, %v2196_v22  ;;  %v2220_v57 = vadd.f32 %v2197_v49, %v2196_v22  ;;  %v2200_v61 = vmul.f32 %v2149_v24, %v3826_v42 }
 0x169   : > { %v2487_v29 = vpop.eup %2486  ;;  %v2164_v51 = vsel %vm3976_vm6, %v2163_v37, %v2159_v20  ;;  %v2169_v52 = vmul.f32 %v2485_v31, %v2168_v47  ;;  %v2413_v26 = vpack.c.bf16 %v2199_v6, %v2198_v27  ;;  %vm2186_vm14 = vweird.f32 %v3873_v23 }
 0x16a   : > { %v2182_v32 = vmul.f32 %v2487_v29, %v3873_v23  ;;  %v2201_v13 = vmul.f32 %v2164_v51, %v3828_v0  ;;  %2409 = vst [vmem:[%s4013_s11] sm:$0xff] %v2408_v39   ;;  %v2192_v16 = vand.u32 2147483648, %v3873_v23  ;;  %v2221_v62 = vadd.f32 %v2220_v57, %v2198_v27 }
 0x16b   : > { %v2170_v58 = vadd.f32 %v2485_v31, %v2169_v52  ;;  %2425 = vst [vmem:[%s4013_s11 + $0x8] sm:$0xff] %v2413_v26   ;;  %vm2187_vm15 = vweird.f32 %v2487_v29  ;;  %v2190_v50 = vand.u32 2147483647, %v3873_v23 }
 0x16c   : > { %v2183_v59 = vsub.f32 1.0, %v2182_v32  ;;  %v2418_v44 = vpack.c.bf16 %v2201_v13, %v2200_v61  ;;  %v2222_v42 = vadd.f32 %v2221_v62, %v2199_v6  ;;  %vm2188_vm0 = vmor %vm2186_vm14, %vm2187_vm15  ;;  %v2193_v38 = vor.u32 1.1754944e-38, %v2192_v16 }
 0x16d   : > { %v2174_v18 = vsel %vm4027_vm12, %v2485_v31, %v2170_v58  ;;  %vm2191_vm1 = vcmp.eq.f32.partialorder %v2190_v50, 8.507059e+37 }
 0x16e   : > { %v2179_v0 = vsel %vm4019_vm11, %v2178_v40, %v2174_v18  ;;  %v2184_v54 = vmul.f32 %v2487_v29, %v2183_v59  ;;  %2426 = vst [vmem:[%s4013_s11 + $0x10] sm:$0xff] %v2418_v44   ;;  %v2223_v11 = vadd.f32 %v2222_v42, %v2200_v61 }
 0x16f   : > { %v2202_v25 = vmul.f32 %v2179_v0, %v3831_v41 }
 0x170   : > { %v2185_v21 = vadd.f32 %v2487_v29, %v2184_v54  ;;  %v2224_v23 = vadd.f32 %v2223_v11, %v2201_v13 }
 0x172   : > { %v2189_v8 = vsel %vm2188_vm0, %v2487_v29, %v2185_v21  ;;  %v2225_v56 = vadd.f32 %v2224_v23, %v2202_v25 }
 0x173   : > { %v2194_v33 = vsel %vm2191_vm1, %v2193_v38, %v2189_v8 }
 0x174   : > { %v2203_v12 = vmul.f32 %v2194_v33, %v3836_v45 }
 0x176   : > { %v2423_v48 = vpack.c.bf16 %v2203_v12, %v2202_v25  ;;  %v2226_v15 = vadd.f32 %v2225_v56, %v2203_v12 }
 0x178   : > { %2427 = vst [vmem:[%s4013_s11 + $0x18] sm:$0xff] %v2423_v48   ;;  %v2227_v3 = vrot.slane %v2226_v15, 4 }
 0x17a   : > { %v2228_v7 = vadd.f32 %v2227_v3, %v2226_v15 }
 0x17c   : > { %v2229_v36 = vrot.slane %v2228_v7, 2 }
 0x17e   : > { %v2230_v5 = vadd.f32 %v2229_v36, %v2228_v7 }
 0x180   : > { %v2231_v43 = vrot.slane %v2230_v5, 1 }
 0x182   : > { %v2232_v46 = vadd.f32 %v2231_v43, %v2230_v5 }
 0x184   : > { %v2233_v41 = vmul.f32 0.015625, %v2232_v46 }
 0x186   : > { %2234 = vst [vmem:[%s566_s14] sm:$0x1] %v2233_v41 }
 0x187 PF: > { %p12_p9 = scmp.ge.s32.totalorder %s2559_s19, 4   ;;  %s4299_s15 = smov %s2511_s16 }
 0x188   : > { %s4300_s16 = smov %s2568_s22  ;;  %s4301_s17 = smov %s2559_s19 }
 0x189   :  { %14 = sbr.rel (!%p12_p9) target bundleno = 2 (0x2), region = 123 }

</bundles_post_ra>
